<compile_context>
chip_gen: v7x
topology: tpu7x:2x2x1
jax: 0.10.0
libtpu: 0.0.40
codegen_flags: <defaults>
</compile_context>

<pallas_src>
import functools

import jax
import jax.numpy as jnp
from jax.experimental import pallas as pl
from jax.experimental.pallas import tpu as pltpu


# ----------------------- static geometry (from the module) ----------------- #
H_IN, W_IN = 23, 84
H1, W1 = 4, 84             # after conv1 (20,3), padding (0,1)
W2 = 12                    # after conv2 (1,9), dilation (1,9)
W3 = 4                     # after conv3 (1,9)
W1P, W2P, W3P = 88, 16, 8  # sublane-padded widths (multiples of 8)
C1, C2, C3 = 128, 256, 128
KW = 9                     # taps of the 1x9 convs
K1_RAW = 1 * 20 * 3        # conv1 contraction dim
K1 = 64                    # zero-padded to 64
FC_IN = H1 * W3 * C3       # 2048
FC_H1, FC_H2, FC_OUT = 256, 64, 2
FC_OUT_PAD = 128           # lane-dense final store


# ------------------------------- fused kernel ------------------------------ #

def _affine_prelu(z, aff_ref):
    """aff_ref rows: [BN scale; BN shift (conv bias folded); PReLU alpha]."""
    scale = aff_ref[0:1, :]
    shift = aff_ref[1:2, :]
    alpha = aff_ref[2:3, :]
    y = z * scale + shift
    return jnp.where(y > 0, y, alpha * y)


def _cnn_branch_kernel(p1_ref, w1_ref, aff1_ref, w2_ref, aff2_ref,
                       w3_ref, aff3_ref,
                       fcw1_ref, fcb1_ref, fcw2_ref, fcb2_ref,
                       fcw3_ref, fcb3_ref,
                       out_ref,
                       a1_ref, x2_ref, a2_ref, x3_ref, *, batch):
    g = batch * H1                        # activation slab count; slab = h*B + b

    # ---- conv1: one bf16 matmul over the shared im2col patches ------------- #
    z1 = jnp.dot(p1_ref[...], w1_ref[...], preferred_element_type=jnp.float32)
    a1_ref[...] = _affine_prelu(z1, aff1_ref).reshape(g, W1P, C1)

    # ---- conv2 (1,9), dilation (1,9): in-VMEM im2col + ONE K=1152 matmul --- #
    # 9 whole-tensor tap copies (padding rows of a1 are never touched).
    for j in range(KW):
        x2_ref[:, 0:W2, j * C1:(j + 1) * C1] = a1_ref[:, 9 * j:9 * j + W2, :]
    x2 = x2_ref[...].reshape(g * W2P, KW * C1).astype(jnp.bfloat16)
    z2 = jnp.dot(x2, w2_ref[...], preferred_element_type=jnp.float32)
    a2_ref[...] = _affine_prelu(z2, aff2_ref).reshape(g, W2P, C2)

    # ---- conv3 (1,9): in-VMEM im2col + ONE K=2304 matmul ------------------- #
    for j in range(KW):
        x3_ref[:, 0:W3, j * C2:(j + 1) * C2] = a2_ref[:, j:j + W3, :]
    x3 = x3_ref[...].reshape(g * W3P, KW * C2).astype(jnp.bfloat16)
    z3 = jnp.dot(x3, w3_ref[...], preferred_element_type=jnp.float32)
    a3 = _affine_prelu(z3, aff3_ref).reshape(g, W3P, C3)      # value, ~8 vregs

    # ---- FC head (FC_pos applied to every branch, as in the reference) ----- #
    # (B,16,128)->(B,2048) flatten realised as 16 accumulating tap matmuls
    # against fc_w1 reshaped to (16,128,256); no sublane->lane retile.
    acc = jnp.zeros((batch, FC_H1), jnp.float32)
    for h in range(H1):
        for w in range(W3):
            xs = a3[h * batch:(h + 1) * batch, w, :]           # (B, 128) f32
            acc = acc + jnp.dot(xs.astype(jnp.bfloat16),
                                fcw1_ref[h * W3 + w],
                                preferred_element_type=jnp.float32)
    h1 = jnp.tanh(acc + fcb1_ref[...])
    h2 = jnp.tanh(jnp.dot(h1.astype(jnp.bfloat16), fcw2_ref[...],
                          preferred_element_type=jnp.float32) + fcb2_ref[...])
    out_ref[...] = (jnp.dot(h2.astype(jnp.bfloat16), fcw3_ref[...],
                            preferred_element_type=jnp.float32)
                    + fcb3_ref[...])


def _cost_estimate(batch):
    g = batch * H1
    flops_branch = (2 * g * W1P * K1 * C1
                    + 2 * g * W2P * KW * C1 * C2
                    + 2 * g * W3P * KW * C2 * C3
                    + 2 * batch * FC_IN * FC_H1
                    + 2 * batch * FC_H1 * FC_H2
                    + 2 * batch * FC_H2 * FC_OUT_PAD)
    flops = 3 * flops_branch
    transcendentals = 3 * batch * (FC_H1 + FC_H2)
    bytes_in = (g * W1P * K1 * 2
                + 3 * (K1 * C1 + KW * C1 * C2 + KW * C2 * C3) * 2
                + 3 * 3 * (C1 + C2 + C3) * 4
                + (H1 * W3 * C3 * FC_H1 + FC_H1 * FC_H2 + FC_H2 * FC_OUT_PAD) * 2
                + (FC_H1 + FC_H2 + FC_OUT_PAD) * 4)
    bytes_out = 3 * batch * FC_OUT_PAD * 4
    return pl.CostEstimate(flops=flops, transcendentals=transcendentals,
                           bytes_accessed=bytes_in + bytes_out)


def cnn_fused(p1, prep, batch):
    g = batch * H1
    m1 = g * W1P
    kernel = functools.partial(_cnn_branch_kernel, batch=batch)
    return pl.pallas_call(
        kernel,
        out_shape=jax.ShapeDtypeStruct((3, batch, FC_OUT_PAD), jnp.float32),
        grid=(3,),
        in_specs=[
            pl.BlockSpec((m1, K1), lambda i: (0, 0)),                 # shared patches
            pl.BlockSpec((None, K1, C1), lambda i: (i, 0, 0)),        # conv1 w
            pl.BlockSpec((None, 3, C1), lambda i: (i, 0, 0)),         # conv1 affine
            pl.BlockSpec((None, KW * C1, C2), lambda i: (i, 0, 0)),   # conv2 w (tap-flat)
            pl.BlockSpec((None, 3, C2), lambda i: (i, 0, 0)),         # conv2 affine
            pl.BlockSpec((None, KW * C2, C3), lambda i: (i, 0, 0)),   # conv3 w (tap-flat)
            pl.BlockSpec((None, 3, C3), lambda i: (i, 0, 0)),         # conv3 affine
            pl.BlockSpec((H1 * W3, C3, FC_H1), lambda i: (0, 0, 0)),  # fc w1 (16,128,256)
            pl.BlockSpec((1, FC_H1), lambda i: (0, 0)),               # fc b1
            pl.BlockSpec((FC_H1, FC_H2), lambda i: (0, 0)),           # fc w2
            pl.BlockSpec((1, FC_H2), lambda i: (0, 0)),               # fc b2
            pl.BlockSpec((FC_H2, FC_OUT_PAD), lambda i: (0, 0)),      # fc w3 (lane-pad)
            pl.BlockSpec((1, FC_OUT_PAD), lambda i: (0, 0)),          # fc b3
        ],
        out_specs=pl.BlockSpec((None, batch, FC_OUT_PAD), lambda i: (i, 0, 0)),
        scratch_shapes=[
            pltpu.VMEM((g, W1P, C1), jnp.float32),        # conv1 activation
            pltpu.VMEM((g, W2P, KW * C1), jnp.float32),   # conv2 im2col (X2)
            pltpu.VMEM((g, W2P, C2), jnp.float32),        # conv2 activation
            pltpu.VMEM((g, W3P, KW * C2), jnp.float32),   # conv3 im2col (X3)
        ],
        compiler_params=pltpu.CompilerParams(
            dimension_semantics=("parallel",)),           # v7x: branches across 2 TCs
        cost_estimate=_cost_estimate(batch),
    )(p1, prep["w1s"], prep["aff1s"], prep["w2s"], prep["aff2s"],
      prep["w3s"], prep["aff3s"],
      prep["fc_w1"], prep["fc_b1"], prep["fc_w2"], prep["fc_b2"],
      prep["fc_w3"], prep["fc_b3"])


# ------------------------- host-side conv1 im2col -------------------------- #

def conv1_patches(x):
    """x: (B, 23, 84) single-channel -> (B*4*88, 64) bf16 patches.

    Rows ordered (h, b, w) with w padded 84->88 (zeros); K padded 60->64.
    """
    b = x.shape[0]
    xp = jnp.pad(x, ((0, 0), (0, 0), (1, 1)))               # W pad 1 -> (B,23,86)
    cols = [xp[:, kh:kh + H1, kw:kw + W1]                    # (B, 4, 84)
            for kh in range(20) for kw in range(3)]
    p = jnp.stack(cols, axis=-1)                             # (B, 4, 84, 60)
    p = jnp.transpose(p, (1, 0, 2, 3))                       # (4, B, 84, 60)
    p = jnp.pad(p, ((0, 0), (0, 0), (0, W1P - W1), (0, K1 - K1_RAW)))
    return p.reshape(b * H1 * W1P, K1).astype(jnp.bfloat16)


# --------------------------- parameters (PyTorch layout) ------------------- #

def init_conv_block(key, c_in, c_out, kh, kw):
    k = jax.random.split(key, 6)
    return dict(
        w=jax.random.normal(k[0], (c_out, c_in, kh, kw), jnp.float32) * 0.05,
        b=jax.random.normal(k[1], (c_out,), jnp.float32) * 0.05,
        gamma=1.0 + 0.1 * jax.random.normal(k[2], (c_out,), jnp.float32),
        beta=0.05 * jax.random.normal(k[3], (c_out,), jnp.float32),
        mean=0.05 * jax.random.normal(k[4], (c_out,), jnp.float32),
        var=0.9 + 0.1 * jnp.abs(jax.random.normal(k[5], (c_out,), jnp.float32)),
        alpha=jnp.float32(0.25),            # PReLU default (num_parameters=1)
    )


def init_fc(key):
    k = jax.random.split(key, 6)
    return dict(
        w1=jax.random.normal(k[0], (FC_H1, FC_IN), jnp.float32) * 0.02,
        b1=jax.random.normal(k[1], (FC_H1,), jnp.float32) * 0.02,
        w2=jax.random.normal(k[2], (FC_H2, FC_H1), jnp.float32) * 0.05,
        b2=jax.random.normal(k[3], (FC_H2,), jnp.float32) * 0.05,
        w3=jax.random.normal(k[4], (FC_OUT, FC_H2), jnp.float32) * 0.1,
        b3=jax.random.normal(k[5], (FC_OUT,), jnp.float32) * 0.1,
    )


def init_params(key):
    ks = jax.random.split(key, 6)

    def branch(k):
        k1, k2, k3 = jax.random.split(k, 3)
        return dict(c1=init_conv_block(k1, 1, C1, 20, 3),
                    c2=init_conv_block(k2, C1, C2, 1, KW),
                    c3=init_conv_block(k3, C2, C3, 1, KW))

    return dict(conv_pos=branch(ks[0]), conv_vel=branch(ks[1]),
                conv_acc=branch(ks[2]),
                fc_pos=init_fc(ks[3]),
                fc_vel=init_fc(ks[4]),   # unused in forward (reference bug)
                fc_acc=init_fc(ks[5]))   # unused in forward (reference bug)


def _affine(blk):
    """Fold conv bias + BatchNorm(eval) into (scale, shift); carry PReLU alpha."""
    inv = blk["gamma"] / jnp.sqrt(blk["var"] + 1e-5)
    scale = inv
    shift = (blk["b"] - blk["mean"]) * inv + blk["beta"]
    alpha = jnp.full_like(scale, blk["alpha"])
    return jnp.stack([scale, shift, alpha], axis=0)          # (3, C) f32


def prepare_params(params):
    """Repack PyTorch-layout weights into kernel layout (done once).

    Matmul weights are stored bf16 (halves weight DMA bytes, native MXU rate);
    folded BN/PReLU affines and FC biases stay f32.
    """
    branches = [params["conv_pos"], params["conv_vel"], params["conv_acc"]]

    # conv1: (C1, 1, 20, 3) -> (60, C1), zero-pad K to 64; stack branches.
    w1s = jnp.stack([
        jnp.pad(br["c1"]["w"].reshape(C1, K1_RAW).T, ((0, K1 - K1_RAW), (0, 0)))
        for br in branches]).astype(jnp.bfloat16)             # (3, 64, 128)
    aff1s = jnp.stack([_affine(br["c1"]) for br in branches])  # (3, 3, 128)
    # conv2: (C2, C1, 1, 9) -> tap-major (9, C1, C2) -> flat (1152, 256)
    w2s = jnp.stack([
        jnp.transpose(br["c2"]["w"][:, :, 0, :], (2, 1, 0)).reshape(KW * C1, C2)
        for br in branches]).astype(jnp.bfloat16)             # (3, 1152, 256)
    aff2s = jnp.stack([_affine(br["c2"]) for br in branches])
    # conv3: (C3, C2, 1, 9) -> tap-major (9, C2, C3) -> flat (2304, 128)
    w3s = jnp.stack([
        jnp.transpose(br["c3"]["w"][:, :, 0, :], (2, 1, 0)).reshape(KW * C2, C3)
        for br in branches]).astype(jnp.bfloat16)             # (3, 2304, 128)
    aff3s = jnp.stack([_affine(br["c3"]) for br in branches])

    # FC_pos: w1 input dim is PyTorch flatten order (c, h, w); reshape to
    # per-position slabs (p = h*4+w, c, out) for the in-kernel tap matmuls.
    fc = params["fc_pos"]
    w1r = jnp.transpose(fc["w1"].reshape(FC_H1, C3, H1, W3), (2, 3, 1, 0))
    w1r = w1r.reshape(H1 * W3, C3, FC_H1).astype(jnp.bfloat16)   # (16, 128, 256)
    w2p = fc["w2"].T.astype(jnp.bfloat16)                         # (256, 64)
    w3p = jnp.pad(fc["w3"].T,
                  ((0, 0), (0, FC_OUT_PAD - FC_OUT))).astype(jnp.bfloat16)
    b3p = jnp.pad(fc["b3"], (0, FC_OUT_PAD - FC_OUT)).reshape(1, -1)
    return dict(w1s=w1s, aff1s=aff1s, w2s=w2s, aff2s=aff2s, w3s=w3s, aff3s=aff3s,
                fc_w1=w1r, fc_b1=fc["b1"].reshape(1, -1),
                fc_w2=w2p, fc_b2=fc["b2"].reshape(1, -1),
                fc_w3=w3p, fc_b3=b3p)


# ----------------------------------- forward ------------------------------- #

def cnn_forward(x, prep):
    b = x.shape[0]
    p1 = conv1_patches(x)                    # shared by all three branches
    out = cnn_fused(p1, prep, b)             # (3, B, 128) lane-padded
    preds = out[:, :, :FC_OUT]               # drop lane padding -> (3, B, 2)
    return preds[0], preds[1], preds[2]


if __name__ == "__main__":
    key = jax.random.PRNGKey(0)
    k_param, k_x = jax.random.split(key)
    params = init_params(k_param)
    prep = prepare_params(params)            # one-time weight repack (host-side)
    # (B=2, H=23, W=84): shapes implied by the 128*4*4 flatten in the module.
    x = jax.random.normal(k_x, (2, H_IN, W_IN), jnp.float32)

    fwd = jax.jit(cnn_forward)
    pred_pos, pred_vel, pred_acc = fwd(x, prep)
    jax.block_until_ready((pred_pos, pred_vel, pred_acc))

    assert pred_pos.shape == (2, 2)
    assert pred_vel.shape == (2, 2)
    assert pred_acc.shape == (2, 2)
    assert all(bool(jnp.all(jnp.isfinite(p))) for p in (pred_pos, pred_vel, pred_acc))
    print("KERNEL_OK")
</pallas_src>

<mosaic_0001>
module attributes {stable_mosaic.version = 11 : i64} {
  func.func @_cnn_branch_kernel(%arg0: i32, %arg1: memref<704x64xbf16, #tpu.memory_space<vmem>>, %arg2: memref<1x64x128xbf16, #tpu.memory_space<vmem>>, %arg3: memref<1x3x128xf32, #tpu.memory_space<vmem>>, %arg4: memref<1x1152x256xbf16, #tpu.memory_space<vmem>>, %arg5: memref<1x3x256xf32, #tpu.memory_space<vmem>>, %arg6: memref<1x2304x128xbf16, #tpu.memory_space<vmem>>, %arg7: memref<1x3x128xf32, #tpu.memory_space<vmem>>, %arg8: memref<16x128x256xbf16, #tpu.memory_space<vmem>>, %arg9: memref<1x256xf32, #tpu.memory_space<vmem>>, %arg10: memref<256x64xbf16, #tpu.memory_space<vmem>>, %arg11: memref<1x64xf32, #tpu.memory_space<vmem>>, %arg12: memref<64x128xbf16, #tpu.memory_space<vmem>>, %arg13: memref<1x128xf32, #tpu.memory_space<vmem>>, %arg14: memref<1x2x128xf32, #tpu.memory_space<vmem>>, %arg15: memref<8x88x128xf32, #tpu.memory_space<vmem>>, %arg16: memref<8x16x1152xf32, #tpu.memory_space<vmem>>, %arg17: memref<8x16x256xf32, #tpu.memory_space<vmem>>, %arg18: memref<8x8x2304xf32, #tpu.memory_space<vmem>>) attributes {dimension_semantics = [#tpu.dimension_semantics<parallel>], iteration_bounds = array<i64: 3>, scalar_prefetch = 0 : i64, scratch_operands = 4 : i64, tpu.core_type = #tpu.core_type<tc>, window_params = [{pipeline_mode = #tpu.pipeline_mode<synchronous>, transform_indices = @transform_0, window_bounds = array<i64: 704, 64>}, {transform_indices = @transform_1, window_bounds = array<i64: 1, 64, 128>}, {transform_indices = @transform_2, window_bounds = array<i64: 1, 3, 128>}, {transform_indices = @transform_3, window_bounds = array<i64: 1, 1152, 256>}, {transform_indices = @transform_4, window_bounds = array<i64: 1, 3, 256>}, {transform_indices = @transform_5, window_bounds = array<i64: 1, 2304, 128>}, {transform_indices = @transform_6, window_bounds = array<i64: 1, 3, 128>}, {pipeline_mode = #tpu.pipeline_mode<synchronous>, transform_indices = @transform_7, window_bounds = array<i64: 16, 128, 256>}, {pipeline_mode = #tpu.pipeline_mode<synchronous>, transform_indices = @transform_8, window_bounds = array<i64: 1, 256>}, {pipeline_mode = #tpu.pipeline_mode<synchronous>, transform_indices = @transform_9, window_bounds = array<i64: 256, 64>}, {pipeline_mode = #tpu.pipeline_mode<synchronous>, transform_indices = @transform_10, window_bounds = array<i64: 1, 64>}, {pipeline_mode = #tpu.pipeline_mode<synchronous>, transform_indices = @transform_11, window_bounds = array<i64: 64, 128>}, {pipeline_mode = #tpu.pipeline_mode<synchronous>, transform_indices = @transform_12, window_bounds = array<i64: 1, 128>}, {transform_indices = @transform_13, window_bounds = array<i64: 1, 2, 128>}]} {
    %c0 = arith.constant 0 : index
    %c0_0 = arith.constant 0 : index
    %0 = vector.load %arg1[%c0, %c0_0] : memref<704x64xbf16, #tpu.memory_space<vmem>>, vector<704x64xbf16>
    %c0_1 = arith.constant 0 : index
    %c0_2 = arith.constant 0 : index
    %c0_3 = arith.constant 0 : index
    %1 = vector.load %arg2[%c0_1, %c0_2, %c0_3] : memref<1x64x128xbf16, #tpu.memory_space<vmem>>, vector<1x64x128xbf16>
    %2 = vector.shape_cast %1 : vector<1x64x128xbf16> to vector<64x128xbf16>
    %cst = arith.constant dense<0.000000e+00> : vector<704x128xf32>
    %3 = tpu.matmul %0, %2, %cst {dimension_numbers = #tpu.dot_dimension_numbers<[1], [0], [0], [1], [0, 0, 1, 1], [], []>} : vector<704x64xbf16>, vector<64x128xbf16>, vector<704x128xf32> -> vector<704x128xf32>
    %c0_4 = arith.constant 0 : index
    %c0_5 = arith.constant 0 : index
    %c0_6 = arith.constant 0 : index
    %4 = vector.load %arg3[%c0_4, %c0_5, %c0_6] : memref<1x3x128xf32, #tpu.memory_space<vmem>>, vector<1x1x128xf32>
    %5 = vector.shape_cast %4 : vector<1x1x128xf32> to vector<1x128xf32>
    %c0_7 = arith.constant 0 : index
    %c1 = arith.constant 1 : index
    %c0_8 = arith.constant 0 : index
    %6 = vector.load %arg3[%c0_7, %c1, %c0_8] : memref<1x3x128xf32, #tpu.memory_space<vmem>>, vector<1x1x128xf32>
    %7 = vector.shape_cast %6 : vector<1x1x128xf32> to vector<1x128xf32>
    %c0_9 = arith.constant 0 : index
    %c2 = arith.constant 2 : index
    %c0_10 = arith.constant 0 : index
    %8 = vector.load %arg3[%c0_9, %c2, %c0_10] : memref<1x3x128xf32, #tpu.memory_space<vmem>>, vector<1x1x128xf32>
    %9 = vector.shape_cast %8 : vector<1x1x128xf32> to vector<1x128xf32>
    %10 = vector.broadcast %5 : vector<1x128xf32> to vector<704x128xf32>
    %11 = arith.mulf %3, %10 : vector<704x128xf32>
    %12 = vector.broadcast %7 : vector<1x128xf32> to vector<704x128xf32>
    %13 = arith.addf %11, %12 : vector<704x128xf32>
    %cst_11 = arith.constant 0.000000e+00 : f32
    %14 = vector.broadcast %cst_11 : f32 to vector<704x128xf32>
    %15 = arith.cmpf ogt, %13, %14 : vector<704x128xf32>
    %16 = vector.broadcast %9 : vector<1x128xf32> to vector<704x128xf32>
    %17 = arith.mulf %16, %13 : vector<704x128xf32>
    %18 = arith.select %15, %13, %17 : vector<704x128xi1>, vector<704x128xf32>
    %19 = vector.shape_cast %18 : vector<704x128xf32> to vector<8x88x128xf32>
    %c0_12 = arith.constant 0 : index
    %c0_13 = arith.constant 0 : index
    %c0_14 = arith.constant 0 : index
    %20 = vector.load %arg15[%c0_12, %c0_13, %c0_14] : memref<8x88x128xf32, #tpu.memory_space<vmem>>, vector<8x88x128xf32>
    tpu.vector_store %arg15[%c0_12, %c0_13, %c0_14], %19 {strides = array<i32>} : memref<8x88x128xf32, #tpu.memory_space<vmem>>, vector<8x88x128xf32>,
    %c0_15 = arith.constant 0 : index
    %c0_16 = arith.constant 0 : index
    %c0_17 = arith.constant 0 : index
    %21 = vector.load %arg15[%c0_15, %c0_16, %c0_17] : memref<8x88x128xf32, #tpu.memory_space<vmem>>, vector<8x12x128xf32>
    %c0_18 = arith.constant 0 : index
    %c0_19 = arith.constant 0 : index
    %c0_20 = arith.constant 0 : index
    %22 = vector.load %arg16[%c0_18, %c0_19, %c0_20] : memref<8x16x1152xf32, #tpu.memory_space<vmem>>, vector<8x12x128xf32>
    tpu.vector_store %arg16[%c0_18, %c0_19, %c0_20], %21 {strides = array<i32>} : memref<8x16x1152xf32, #tpu.memory_space<vmem>>, vector<8x12x128xf32>,
    %c0_21 = arith.constant 0 : index
    %c9 = arith.constant 9 : index
    %c0_22 = arith.constant 0 : index
    %23 = vector.load %arg15[%c0_21, %c9, %c0_22] : memref<8x88x128xf32, #tpu.memory_space<vmem>>, vector<8x12x128xf32>
    %c0_23 = arith.constant 0 : index
    %c0_24 = arith.constant 0 : index
    %c128 = arith.constant 128 : index
    %24 = vector.load %arg16[%c0_23, %c0_24, %c128] : memref<8x16x1152xf32, #tpu.memory_space<vmem>>, vector<8x12x128xf32>
    tpu.vector_store %arg16[%c0_23, %c0_24, %c128], %23 {strides = array<i32>} : memref<8x16x1152xf32, #tpu.memory_space<vmem>>, vector<8x12x128xf32>,
    %c0_25 = arith.constant 0 : index
    %c18 = arith.constant 18 : index
    %c0_26 = arith.constant 0 : index
    %25 = vector.load %arg15[%c0_25, %c18, %c0_26] : memref<8x88x128xf32, #tpu.memory_space<vmem>>, vector<8x12x128xf32>
    %c0_27 = arith.constant 0 : index
    %c0_28 = arith.constant 0 : index
    %c256 = arith.constant 256 : index
    %26 = vector.load %arg16[%c0_27, %c0_28, %c256] : memref<8x16x1152xf32, #tpu.memory_space<vmem>>, vector<8x12x128xf32>
    tpu.vector_store %arg16[%c0_27, %c0_28, %c256], %25 {strides = array<i32>} : memref<8x16x1152xf32, #tpu.memory_space<vmem>>, vector<8x12x128xf32>,
    %c0_29 = arith.constant 0 : index
    %c27 = arith.constant 27 : index
    %c0_30 = arith.constant 0 : index
    %27 = vector.load %arg15[%c0_29, %c27, %c0_30] : memref<8x88x128xf32, #tpu.memory_space<vmem>>, vector<8x12x128xf32>
    %c0_31 = arith.constant 0 : index
    %c0_32 = arith.constant 0 : index
    %c384 = arith.constant 384 : index
    %28 = vector.load %arg16[%c0_31, %c0_32, %c384] : memref<8x16x1152xf32, #tpu.memory_space<vmem>>, vector<8x12x128xf32>
    tpu.vector_store %arg16[%c0_31, %c0_32, %c384], %27 {strides = array<i32>} : memref<8x16x1152xf32, #tpu.memory_space<vmem>>, vector<8x12x128xf32>,
    %c0_33 = arith.constant 0 : index
    %c36 = arith.constant 36 : index
    %c0_34 = arith.constant 0 : index
    %29 = vector.load %arg15[%c0_33, %c36, %c0_34] : memref<8x88x128xf32, #tpu.memory_space<vmem>>, vector<8x12x128xf32>
    %c0_35 = arith.constant 0 : index
    %c0_36 = arith.constant 0 : index
    %c512 = arith.constant 512 : index
    %30 = vector.load %arg16[%c0_35, %c0_36, %c512] : memref<8x16x1152xf32, #tpu.memory_space<vmem>>, vector<8x12x128xf32>
    tpu.vector_store %arg16[%c0_35, %c0_36, %c512], %29 {strides = array<i32>} : memref<8x16x1152xf32, #tpu.memory_space<vmem>>, vector<8x12x128xf32>,
    %c0_37 = arith.constant 0 : index
    %c45 = arith.constant 45 : index
    %c0_38 = arith.constant 0 : index
    %31 = vector.load %arg15[%c0_37, %c45, %c0_38] : memref<8x88x128xf32, #tpu.memory_space<vmem>>, vector<8x12x128xf32>
    %c0_39 = arith.constant 0 : index
    %c0_40 = arith.constant 0 : index
    %c640 = arith.constant 640 : index
    %32 = vector.load %arg16[%c0_39, %c0_40, %c640] : memref<8x16x1152xf32, #tpu.memory_space<vmem>>, vector<8x12x128xf32>
    tpu.vector_store %arg16[%c0_39, %c0_40, %c640], %31 {strides = array<i32>} : memref<8x16x1152xf32, #tpu.memory_space<vmem>>, vector<8x12x128xf32>,
    %c0_41 = arith.constant 0 : index
    %c54 = arith.constant 54 : index
    %c0_42 = arith.constant 0 : index
    %33 = vector.load %arg15[%c0_41, %c54, %c0_42] : memref<8x88x128xf32, #tpu.memory_space<vmem>>, vector<8x12x128xf32>
    %c0_43 = arith.constant 0 : index
    %c0_44 = arith.constant 0 : index
    %c768 = arith.constant 768 : index
    %34 = vector.load %arg16[%c0_43, %c0_44, %c768] : memref<8x16x1152xf32, #tpu.memory_space<vmem>>, vector<8x12x128xf32>
    tpu.vector_store %arg16[%c0_43, %c0_44, %c768], %33 {strides = array<i32>} : memref<8x16x1152xf32, #tpu.memory_space<vmem>>, vector<8x12x128xf32>,
    %c0_45 = arith.constant 0 : index
    %c63 = arith.constant 63 : index
    %c0_46 = arith.constant 0 : index
    %35 = vector.load %arg15[%c0_45, %c63, %c0_46] : memref<8x88x128xf32, #tpu.memory_space<vmem>>, vector<8x12x128xf32>
    %c0_47 = arith.constant 0 : index
    %c0_48 = arith.constant 0 : index
    %c896 = arith.constant 896 : index
    %36 = vector.load %arg16[%c0_47, %c0_48, %c896] : memref<8x16x1152xf32, #tpu.memory_space<vmem>>, vector<8x12x128xf32>
    tpu.vector_store %arg16[%c0_47, %c0_48, %c896], %35 {strides = array<i32>} : memref<8x16x1152xf32, #tpu.memory_space<vmem>>, vector<8x12x128xf32>,
    %c0_49 = arith.constant 0 : index
    %c72 = arith.constant 72 : index
    %c0_50 = arith.constant 0 : index
    %37 = vector.load %arg15[%c0_49, %c72, %c0_50] : memref<8x88x128xf32, #tpu.memory_space<vmem>>, vector<8x12x128xf32>
    %c0_51 = arith.constant 0 : index
    %c0_52 = arith.constant 0 : index
    %c1024 = arith.constant 1024 : index
    %38 = vector.load %arg16[%c0_51, %c0_52, %c1024] : memref<8x16x1152xf32, #tpu.memory_space<vmem>>, vector<8x12x128xf32>
    tpu.vector_store %arg16[%c0_51, %c0_52, %c1024], %37 {strides = array<i32>} : memref<8x16x1152xf32, #tpu.memory_space<vmem>>, vector<8x12x128xf32>,
    %c0_53 = arith.constant 0 : index
    %c0_54 = arith.constant 0 : index
    %c0_55 = arith.constant 0 : index
    %39 = vector.load %arg16[%c0_53, %c0_54, %c0_55] : memref<8x16x1152xf32, #tpu.memory_space<vmem>>, vector<8x16x1152xf32>
    %40 = vector.shape_cast %39 : vector<8x16x1152xf32> to vector<128x1152xf32>
    %41 = arith.truncf %40 : vector<128x1152xf32> to vector<128x1152xbf16>
    %c0_56 = arith.constant 0 : index
    %c0_57 = arith.constant 0 : index
    %c0_58 = arith.constant 0 : index
    %42 = vector.load %arg4[%c0_56, %c0_57, %c0_58] : memref<1x1152x256xbf16, #tpu.memory_space<vmem>>, vector<1x1152x256xbf16>
    %43 = vector.shape_cast %42 : vector<1x1152x256xbf16> to vector<1152x256xbf16>
    %cst_59 = arith.constant dense<0.000000e+00> : vector<128x256xf32>
    %44 = tpu.matmul %41, %43, %cst_59 {dimension_numbers = #tpu.dot_dimension_numbers<[1], [0], [0], [1], [0, 0, 1, 1], [], []>} : vector<128x1152xbf16>, vector<1152x256xbf16>, vector<128x256xf32> -> vector<128x256xf32>
    %c0_60 = arith.constant 0 : index
    %c0_61 = arith.constant 0 : index
    %c0_62 = arith.constant 0 : index
    %45 = vector.load %arg5[%c0_60, %c0_61, %c0_62] : memref<1x3x256xf32, #tpu.memory_space<vmem>>, vector<1x1x256xf32>
    %46 = vector.shape_cast %45 : vector<1x1x256xf32> to vector<1x256xf32>
    %c0_63 = arith.constant 0 : index
    %c1_64 = arith.constant 1 : index
    %c0_65 = arith.constant 0 : index
    %47 = vector.load %arg5[%c0_63, %c1_64, %c0_65] : memref<1x3x256xf32, #tpu.memory_space<vmem>>, vector<1x1x256xf32>
    %48 = vector.shape_cast %47 : vector<1x1x256xf32> to vector<1x256xf32>
    %c0_66 = arith.constant 0 : index
    %c2_67 = arith.constant 2 : index
    %c0_68 = arith.constant 0 : index
    %49 = vector.load %arg5[%c0_66, %c2_67, %c0_68] : memref<1x3x256xf32, #tpu.memory_space<vmem>>, vector<1x1x256xf32>
    %50 = vector.shape_cast %49 : vector<1x1x256xf32> to vector<1x256xf32>
    %51 = vector.broadcast %46 : vector<1x256xf32> to vector<128x256xf32>
    %52 = arith.mulf %44, %51 : vector<128x256xf32>
    %53 = vector.broadcast %48 : vector<1x256xf32> to vector<128x256xf32>
    %54 = arith.addf %52, %53 : vector<128x256xf32>
    %cst_69 = arith.constant 0.000000e+00 : f32
    %55 = vector.broadcast %cst_69 : f32 to vector<128x256xf32>
    %56 = arith.cmpf ogt, %54, %55 : vector<128x256xf32>
    %57 = vector.broadcast %50 : vector<1x256xf32> to vector<128x256xf32>
    %58 = arith.mulf %57, %54 : vector<128x256xf32>
    %59 = arith.select %56, %54, %58 : vector<128x256xi1>, vector<128x256xf32>
    %60 = vector.shape_cast %59 : vector<128x256xf32> to vector<8x16x256xf32>
    %c0_70 = arith.constant 0 : index
    %c0_71 = arith.constant 0 : index
    %c0_72 = arith.constant 0 : index
    %61 = vector.load %arg17[%c0_70, %c0_71, %c0_72] : memref<8x16x256xf32, #tpu.memory_space<vmem>>, vector<8x16x256xf32>
    tpu.vector_store %arg17[%c0_70, %c0_71, %c0_72], %60 {strides = array<i32>} : memref<8x16x256xf32, #tpu.memory_space<vmem>>, vector<8x16x256xf32>,
    %c0_73 = arith.constant 0 : index
    %c0_74 = arith.constant 0 : index
    %c0_75 = arith.constant 0 : index
    %62 = vector.load %arg17[%c0_73, %c0_74, %c0_75] : memref<8x16x256xf32, #tpu.memory_space<vmem>>, vector<8x4x256xf32>
    %c0_76 = arith.constant 0 : index
    %c0_77 = arith.constant 0 : index
    %c0_78 = arith.constant 0 : index
    %63 = vector.load %arg18[%c0_76, %c0_77, %c0_78] : memref<8x8x2304xf32, #tpu.memory_space<vmem>>, vector<8x4x256xf32>
    tpu.vector_store %arg18[%c0_76, %c0_77, %c0_78], %62 {strides = array<i32>} : memref<8x8x2304xf32, #tpu.memory_space<vmem>>, vector<8x4x256xf32>,
    %c0_79 = arith.constant 0 : index
    %c1_80 = arith.constant 1 : index
    %c0_81 = arith.constant 0 : index
    %64 = vector.load %arg17[%c0_79, %c1_80, %c0_81] : memref<8x16x256xf32, #tpu.memory_space<vmem>>, vector<8x4x256xf32>
    %c0_82 = arith.constant 0 : index
    %c0_83 = arith.constant 0 : index
    %c256_84 = arith.constant 256 : index
    %65 = vector.load %arg18[%c0_82, %c0_83, %c256_84] : memref<8x8x2304xf32, #tpu.memory_space<vmem>>, vector<8x4x256xf32>
    tpu.vector_store %arg18[%c0_82, %c0_83, %c256_84], %64 {strides = array<i32>} : memref<8x8x2304xf32, #tpu.memory_space<vmem>>, vector<8x4x256xf32>,
    %c0_85 = arith.constant 0 : index
    %c2_86 = arith.constant 2 : index
    %c0_87 = arith.constant 0 : index
    %66 = vector.load %arg17[%c0_85, %c2_86, %c0_87] : memref<8x16x256xf32, #tpu.memory_space<vmem>>, vector<8x4x256xf32>
    %c0_88 = arith.constant 0 : index
    %c0_89 = arith.constant 0 : index
    %c512_90 = arith.constant 512 : index
    %67 = vector.load %arg18[%c0_88, %c0_89, %c512_90] : memref<8x8x2304xf32, #tpu.memory_space<vmem>>, vector<8x4x256xf32>
    tpu.vector_store %arg18[%c0_88, %c0_89, %c512_90], %66 {strides = array<i32>} : memref<8x8x2304xf32, #tpu.memory_space<vmem>>, vector<8x4x256xf32>,
    %c0_91 = arith.constant 0 : index
    %c3 = arith.constant 3 : index
    %c0_92 = arith.constant 0 : index
    %68 = vector.load %arg17[%c0_91, %c3, %c0_92] : memref<8x16x256xf32, #tpu.memory_space<vmem>>, vector<8x4x256xf32>
    %c0_93 = arith.constant 0 : index
    %c0_94 = arith.constant 0 : index
    %c768_95 = arith.constant 768 : index
    %69 = vector.load %arg18[%c0_93, %c0_94, %c768_95] : memref<8x8x2304xf32, #tpu.memory_space<vmem>>, vector<8x4x256xf32>
    tpu.vector_store %arg18[%c0_93, %c0_94, %c768_95], %68 {strides = array<i32>} : memref<8x8x2304xf32, #tpu.memory_space<vmem>>, vector<8x4x256xf32>,
    %c0_96 = arith.constant 0 : index
    %c4 = arith.constant 4 : index
    %c0_97 = arith.constant 0 : index
    %70 = vector.load %arg17[%c0_96, %c4, %c0_97] : memref<8x16x256xf32, #tpu.memory_space<vmem>>, vector<8x4x256xf32>
    %c0_98 = arith.constant 0 : index
    %c0_99 = arith.constant 0 : index
    %c1024_100 = arith.constant 1024 : index
    %71 = vector.load %arg18[%c0_98, %c0_99, %c1024_100] : memref<8x8x2304xf32, #tpu.memory_space<vmem>>, vector<8x4x256xf32>
    tpu.vector_store %arg18[%c0_98, %c0_99, %c1024_100], %70 {strides = array<i32>} : memref<8x8x2304xf32, #tpu.memory_space<vmem>>, vector<8x4x256xf32>,
    %c0_101 = arith.constant 0 : index
    %c5 = arith.constant 5 : index
    %c0_102 = arith.constant 0 : index
    %72 = vector.load %arg17[%c0_101, %c5, %c0_102] : memref<8x16x256xf32, #tpu.memory_space<vmem>>, vector<8x4x256xf32>
    %c0_103 = arith.constant 0 : index
    %c0_104 = arith.constant 0 : index
    %c1280 = arith.constant 1280 : index
    %73 = vector.load %arg18[%c0_103, %c0_104, %c1280] : memref<8x8x2304xf32, #tpu.memory_space<vmem>>, vector<8x4x256xf32>
    tpu.vector_store %arg18[%c0_103, %c0_104, %c1280], %72 {strides = array<i32>} : memref<8x8x2304xf32, #tpu.memory_space<vmem>>, vector<8x4x256xf32>,
    %c0_105 = arith.constant 0 : index
    %c6 = arith.constant 6 : index
    %c0_106 = arith.constant 0 : index
    %74 = vector.load %arg17[%c0_105, %c6, %c0_106] : memref<8x16x256xf32, #tpu.memory_space<vmem>>, vector<8x4x256xf32>
    %c0_107 = arith.constant 0 : index
    %c0_108 = arith.constant 0 : index
    %c1536 = arith.constant 1536 : index
    %75 = vector.load %arg18[%c0_107, %c0_108, %c1536] : memref<8x8x2304xf32, #tpu.memory_space<vmem>>, vector<8x4x256xf32>
    tpu.vector_store %arg18[%c0_107, %c0_108, %c1536], %74 {strides = array<i32>} : memref<8x8x2304xf32, #tpu.memory_space<vmem>>, vector<8x4x256xf32>,
    %c0_109 = arith.constant 0 : index
    %c7 = arith.constant 7 : index
    %c0_110 = arith.constant 0 : index
    %76 = vector.load %arg17[%c0_109, %c7, %c0_110] : memref<8x16x256xf32, #tpu.memory_space<vmem>>, vector<8x4x256xf32>
    %c0_111 = arith.constant 0 : index
    %c0_112 = arith.constant 0 : index
    %c1792 = arith.constant 1792 : index
    %77 = vector.load %arg18[%c0_111, %c0_112, %c1792] : memref<8x8x2304xf32, #tpu.memory_space<vmem>>, vector<8x4x256xf32>
    tpu.vector_store %arg18[%c0_111, %c0_112, %c1792], %76 {strides = array<i32>} : memref<8x8x2304xf32, #tpu.memory_space<vmem>>, vector<8x4x256xf32>,
    %c0_113 = arith.constant 0 : index
    %c8 = arith.constant 8 : index
    %c0_114 = arith.constant 0 : index
    %78 = vector.load %arg17[%c0_113, %c8, %c0_114] : memref<8x16x256xf32, #tpu.memory_space<vmem>>, vector<8x4x256xf32>
    %c0_115 = arith.constant 0 : index
    %c0_116 = arith.constant 0 : index
    %c2048 = arith.constant 2048 : index
    %79 = vector.load %arg18[%c0_115, %c0_116, %c2048] : memref<8x8x2304xf32, #tpu.memory_space<vmem>>, vector<8x4x256xf32>
    tpu.vector_store %arg18[%c0_115, %c0_116, %c2048], %78 {strides = array<i32>} : memref<8x8x2304xf32, #tpu.memory_space<vmem>>, vector<8x4x256xf32>,
    %c0_117 = arith.constant 0 : index
    %c0_118 = arith.constant 0 : index
    %c0_119 = arith.constant 0 : index
    %80 = vector.load %arg18[%c0_117, %c0_118, %c0_119] : memref<8x8x2304xf32, #tpu.memory_space<vmem>>, vector<8x8x2304xf32>
    %81 = vector.shape_cast %80 : vector<8x8x2304xf32> to vector<64x2304xf32>
    %82 = arith.truncf %81 : vector<64x2304xf32> to vector<64x2304xbf16>
    %c0_120 = arith.constant 0 : index
    %c0_121 = arith.constant 0 : index
    %c0_122 = arith.constant 0 : index
    %83 = vector.load %arg6[%c0_120, %c0_121, %c0_122] : memref<1x2304x128xbf16, #tpu.memory_space<vmem>>, vector<1x2304x128xbf16>
    %84 = vector.shape_cast %83 : vector<1x2304x128xbf16> to vector<2304x128xbf16>
    %cst_123 = arith.constant dense<0.000000e+00> : vector<64x128xf32>
    %85 = tpu.matmul %82, %84, %cst_123 {dimension_numbers = #tpu.dot_dimension_numbers<[1], [0], [0], [1], [0, 0, 1, 1], [], []>} : vector<64x2304xbf16>, vector<2304x128xbf16>, vector<64x128xf32> -> vector<64x128xf32>
    %c0_124 = arith.constant 0 : index
    %c0_125 = arith.constant 0 : index
    %c0_126 = arith.constant 0 : index
    %86 = vector.load %arg7[%c0_124, %c0_125, %c0_126] : memref<1x3x128xf32, #tpu.memory_space<vmem>>, vector<1x1x128xf32>
    %87 = vector.shape_cast %86 : vector<1x1x128xf32> to vector<1x128xf32>
    %c0_127 = arith.constant 0 : index
    %c1_128 = arith.constant 1 : index
    %c0_129 = arith.constant 0 : index
    %88 = vector.load %arg7[%c0_127, %c1_128, %c0_129] : memref<1x3x128xf32, #tpu.memory_space<vmem>>, vector<1x1x128xf32>
    %89 = vector.shape_cast %88 : vector<1x1x128xf32> to vector<1x128xf32>
    %c0_130 = arith.constant 0 : index
    %c2_131 = arith.constant 2 : index
    %c0_132 = arith.constant 0 : index
    %90 = vector.load %arg7[%c0_130, %c2_131, %c0_132] : memref<1x3x128xf32, #tpu.memory_space<vmem>>, vector<1x1x128xf32>
    %91 = vector.shape_cast %90 : vector<1x1x128xf32> to vector<1x128xf32>
    %92 = vector.broadcast %87 : vector<1x128xf32> to vector<64x128xf32>
    %93 = arith.mulf %85, %92 : vector<64x128xf32>
    %94 = vector.broadcast %89 : vector<1x128xf32> to vector<64x128xf32>
    %95 = arith.addf %93, %94 : vector<64x128xf32>
    %cst_133 = arith.constant 0.000000e+00 : f32
    %96 = vector.broadcast %cst_133 : f32 to vector<64x128xf32>
    %97 = arith.cmpf ogt, %95, %96 : vector<64x128xf32>
    %98 = vector.broadcast %91 : vector<1x128xf32> to vector<64x128xf32>
    %99 = arith.mulf %98, %95 : vector<64x128xf32>
    %100 = arith.select %97, %95, %99 : vector<64x128xi1>, vector<64x128xf32>
    %101 = vector.shape_cast %100 : vector<64x128xf32> to vector<8x8x128xf32>
    %cst_134 = arith.constant 0.000000e+00 : f32
    %102 = vector.broadcast %cst_134 : f32 to vector<2x256xf32>
    %103 = vector.extract_strided_slice %101 {offsets = [0, 0, 0], sizes = [2, 1, 128], strides = [1, 1, 1]} : vector<8x8x128xf32> to vector<2x1x128xf32>
    %104 = vector.shape_cast %103 : vector<2x1x128xf32> to vector<2x128xf32>
    %105 = arith.truncf %104 : vector<2x128xf32> to vector<2x128xbf16>
    %c0_135 = arith.constant 0 : index
    %c0_136 = arith.constant 0 : index
    %c0_137 = arith.constant 0 : index
    %106 = vector.load %arg8[%c0_135, %c0_136, %c0_137] : memref<16x128x256xbf16, #tpu.memory_space<vmem>>, vector<1x128x256xbf16>
    %107 = vector.shape_cast %106 : vector<1x128x256xbf16> to vector<128x256xbf16>
    %cst_138 = arith.constant dense<0.000000e+00> : vector<2x256xf32>
    %108 = tpu.matmul %105, %107, %cst_138 {dimension_numbers = #tpu.dot_dimension_numbers<[1], [0], [0], [1], [0, 0, 1, 1], [], []>} : vector<2x128xbf16>, vector<128x256xbf16>, vector<2x256xf32> -> vector<2x256xf32>
    %109 = arith.addf %102, %108 : vector<2x256xf32>
    %110 = vector.extract_strided_slice %101 {offsets = [0, 1, 0], sizes = [2, 1, 128], strides = [1, 1, 1]} : vector<8x8x128xf32> to vector<2x1x128xf32>
    %111 = vector.shape_cast %110 : vector<2x1x128xf32> to vector<2x128xf32>
    %112 = arith.truncf %111 : vector<2x128xf32> to vector<2x128xbf16>
    %c1_139 = arith.constant 1 : index
    %c0_140 = arith.constant 0 : index
    %c0_141 = arith.constant 0 : index
    %113 = vector.load %arg8[%c1_139, %c0_140, %c0_141] : memref<16x128x256xbf16, #tpu.memory_space<vmem>>, vector<1x128x256xbf16>
    %114 = vector.shape_cast %113 : vector<1x128x256xbf16> to vector<128x256xbf16>
    %cst_142 = arith.constant dense<0.000000e+00> : vector<2x256xf32>
    %115 = tpu.matmul %112, %114, %cst_142 {dimension_numbers = #tpu.dot_dimension_numbers<[1], [0], [0], [1], [0, 0, 1, 1], [], []>} : vector<2x128xbf16>, vector<128x256xbf16>, vector<2x256xf32> -> vector<2x256xf32>
    %116 = arith.addf %109, %115 : vector<2x256xf32>
    %117 = vector.extract_strided_slice %101 {offsets = [0, 2, 0], sizes = [2, 1, 128], strides = [1, 1, 1]} : vector<8x8x128xf32> to vector<2x1x128xf32>
    %118 = vector.shape_cast %117 : vector<2x1x128xf32> to vector<2x128xf32>
    %119 = arith.truncf %118 : vector<2x128xf32> to vector<2x128xbf16>
    %c2_143 = arith.constant 2 : index
    %c0_144 = arith.constant 0 : index
    %c0_145 = arith.constant 0 : index
    %120 = vector.load %arg8[%c2_143, %c0_144, %c0_145] : memref<16x128x256xbf16, #tpu.memory_space<vmem>>, vector<1x128x256xbf16>
    %121 = vector.shape_cast %120 : vector<1x128x256xbf16> to vector<128x256xbf16>
    %cst_146 = arith.constant dense<0.000000e+00> : vector<2x256xf32>
    %122 = tpu.matmul %119, %121, %cst_146 {dimension_numbers = #tpu.dot_dimension_numbers<[1], [0], [0], [1], [0, 0, 1, 1], [], []>} : vector<2x128xbf16>, vector<128x256xbf16>, vector<2x256xf32> -> vector<2x256xf32>
    %123 = arith.addf %116, %122 : vector<2x256xf32>
    %124 = vector.extract_strided_slice %101 {offsets = [0, 3, 0], sizes = [2, 1, 128], strides = [1, 1, 1]} : vector<8x8x128xf32> to vector<2x1x128xf32>
    %125 = vector.shape_cast %124 : vector<2x1x128xf32> to vector<2x128xf32>
    %126 = arith.truncf %125 : vector<2x128xf32> to vector<2x128xbf16>
    %c3_147 = arith.constant 3 : index
    %c0_148 = arith.constant 0 : index
    %c0_149 = arith.constant 0 : index
    %127 = vector.load %arg8[%c3_147, %c0_148, %c0_149] : memref<16x128x256xbf16, #tpu.memory_space<vmem>>, vector<1x128x256xbf16>
    %128 = vector.shape_cast %127 : vector<1x128x256xbf16> to vector<128x256xbf16>
    %cst_150 = arith.constant dense<0.000000e+00> : vector<2x256xf32>
    %129 = tpu.matmul %126, %128, %cst_150 {dimension_numbers = #tpu.dot_dimension_numbers<[1], [0], [0], [1], [0, 0, 1, 1], [], []>} : vector<2x128xbf16>, vector<128x256xbf16>, vector<2x256xf32> -> vector<2x256xf32>
    %130 = arith.addf %123, %129 : vector<2x256xf32>
    %131 = vector.extract_strided_slice %101 {offsets = [2, 0, 0], sizes = [2, 1, 128], strides = [1, 1, 1]} : vector<8x8x128xf32> to vector<2x1x128xf32>
    %132 = vector.shape_cast %131 : vector<2x1x128xf32> to vector<2x128xf32>
    %133 = arith.truncf %132 : vector<2x128xf32> to vector<2x128xbf16>
    %c4_151 = arith.constant 4 : index
    %c0_152 = arith.constant 0 : index
    %c0_153 = arith.constant 0 : index
    %134 = vector.load %arg8[%c4_151, %c0_152, %c0_153] : memref<16x128x256xbf16, #tpu.memory_space<vmem>>, vector<1x128x256xbf16>
    %135 = vector.shape_cast %134 : vector<1x128x256xbf16> to vector<128x256xbf16>
    %cst_154 = arith.constant dense<0.000000e+00> : vector<2x256xf32>
    %136 = tpu.matmul %133, %135, %cst_154 {dimension_numbers = #tpu.dot_dimension_numbers<[1], [0], [0], [1], [0, 0, 1, 1], [], []>} : vector<2x128xbf16>, vector<128x256xbf16>, vector<2x256xf32> -> vector<2x256xf32>
    %137 = arith.addf %130, %136 : vector<2x256xf32>
    %138 = vector.extract_strided_slice %101 {offsets = [2, 1, 0], sizes = [2, 1, 128], strides = [1, 1, 1]} : vector<8x8x128xf32> to vector<2x1x128xf32>
    %139 = vector.shape_cast %138 : vector<2x1x128xf32> to vector<2x128xf32>
    %140 = arith.truncf %139 : vector<2x128xf32> to vector<2x128xbf16>
    %c5_155 = arith.constant 5 : index
    %c0_156 = arith.constant 0 : index
    %c0_157 = arith.constant 0 : index
    %141 = vector.load %arg8[%c5_155, %c0_156, %c0_157] : memref<16x128x256xbf16, #tpu.memory_space<vmem>>, vector<1x128x256xbf16>
    %142 = vector.shape_cast %141 : vector<1x128x256xbf16> to vector<128x256xbf16>
    %cst_158 = arith.constant dense<0.000000e+00> : vector<2x256xf32>
    %143 = tpu.matmul %140, %142, %cst_158 {dimension_numbers = #tpu.dot_dimension_numbers<[1], [0], [0], [1], [0, 0, 1, 1], [], []>} : vector<2x128xbf16>, vector<128x256xbf16>, vector<2x256xf32> -> vector<2x256xf32>
    %144 = arith.addf %137, %143 : vector<2x256xf32>
    %145 = vector.extract_strided_slice %101 {offsets = [2, 2, 0], sizes = [2, 1, 128], strides = [1, 1, 1]} : vector<8x8x128xf32> to vector<2x1x128xf32>
    %146 = vector.shape_cast %145 : vector<2x1x128xf32> to vector<2x128xf32>
    %147 = arith.truncf %146 : vector<2x128xf32> to vector<2x128xbf16>
    %c6_159 = arith.constant 6 : index
    %c0_160 = arith.constant 0 : index
    %c0_161 = arith.constant 0 : index
    %148 = vector.load %arg8[%c6_159, %c0_160, %c0_161] : memref<16x128x256xbf16, #tpu.memory_space<vmem>>, vector<1x128x256xbf16>
    %149 = vector.shape_cast %148 : vector<1x128x256xbf16> to vector<128x256xbf16>
    %cst_162 = arith.constant dense<0.000000e+00> : vector<2x256xf32>
    %150 = tpu.matmul %147, %149, %cst_162 {dimension_numbers = #tpu.dot_dimension_numbers<[1], [0], [0], [1], [0, 0, 1, 1], [], []>} : vector<2x128xbf16>, vector<128x256xbf16>, vector<2x256xf32> -> vector<2x256xf32>
    %151 = arith.addf %144, %150 : vector<2x256xf32>
    %152 = vector.extract_strided_slice %101 {offsets = [2, 3, 0], sizes = [2, 1, 128], strides = [1, 1, 1]} : vector<8x8x128xf32> to vector<2x1x128xf32>
    %153 = vector.shape_cast %152 : vector<2x1x128xf32> to vector<2x128xf32>
    %154 = arith.truncf %153 : vector<2x128xf32> to vector<2x128xbf16>
    %c7_163 = arith.constant 7 : index
    %c0_164 = arith.constant 0 : index
    %c0_165 = arith.constant 0 : index
    %155 = vector.load %arg8[%c7_163, %c0_164, %c0_165] : memref<16x128x256xbf16, #tpu.memory_space<vmem>>, vector<1x128x256xbf16>
    %156 = vector.shape_cast %155 : vector<1x128x256xbf16> to vector<128x256xbf16>
    %cst_166 = arith.constant dense<0.000000e+00> : vector<2x256xf32>
    %157 = tpu.matmul %154, %156, %cst_166 {dimension_numbers = #tpu.dot_dimension_numbers<[1], [0], [0], [1], [0, 0, 1, 1], [], []>} : vector<2x128xbf16>, vector<128x256xbf16>, vector<2x256xf32> -> vector<2x256xf32>
    %158 = arith.addf %151, %157 : vector<2x256xf32>
    %159 = vector.extract_strided_slice %101 {offsets = [4, 0, 0], sizes = [2, 1, 128], strides = [1, 1, 1]} : vector<8x8x128xf32> to vector<2x1x128xf32>
    %160 = vector.shape_cast %159 : vector<2x1x128xf32> to vector<2x128xf32>
    %161 = arith.truncf %160 : vector<2x128xf32> to vector<2x128xbf16>
    %c8_167 = arith.constant 8 : index
    %c0_168 = arith.constant 0 : index
    %c0_169 = arith.constant 0 : index
    %162 = vector.load %arg8[%c8_167, %c0_168, %c0_169] : memref<16x128x256xbf16, #tpu.memory_space<vmem>>, vector<1x128x256xbf16>
    %163 = vector.shape_cast %162 : vector<1x128x256xbf16> to vector<128x256xbf16>
    %cst_170 = arith.constant dense<0.000000e+00> : vector<2x256xf32>
    %164 = tpu.matmul %161, %163, %cst_170 {dimension_numbers = #tpu.dot_dimension_numbers<[1], [0], [0], [1], [0, 0, 1, 1], [], []>} : vector<2x128xbf16>, vector<128x256xbf16>, vector<2x256xf32> -> vector<2x256xf32>
    %165 = arith.addf %158, %164 : vector<2x256xf32>
    %166 = vector.extract_strided_slice %101 {offsets = [4, 1, 0], sizes = [2, 1, 128], strides = [1, 1, 1]} : vector<8x8x128xf32> to vector<2x1x128xf32>
    %167 = vector.shape_cast %166 : vector<2x1x128xf32> to vector<2x128xf32>
    %168 = arith.truncf %167 : vector<2x128xf32> to vector<2x128xbf16>
    %c9_171 = arith.constant 9 : index
    %c0_172 = arith.constant 0 : index
    %c0_173 = arith.constant 0 : index
    %169 = vector.load %arg8[%c9_171, %c0_172, %c0_173] : memref<16x128x256xbf16, #tpu.memory_space<vmem>>, vector<1x128x256xbf16>
    %170 = vector.shape_cast %169 : vector<1x128x256xbf16> to vector<128x256xbf16>
    %cst_174 = arith.constant dense<0.000000e+00> : vector<2x256xf32>
    %171 = tpu.matmul %168, %170, %cst_174 {dimension_numbers = #tpu.dot_dimension_numbers<[1], [0], [0], [1], [0, 0, 1, 1], [], []>} : vector<2x128xbf16>, vector<128x256xbf16>, vector<2x256xf32> -> vector<2x256xf32>
    %172 = arith.addf %165, %171 : vector<2x256xf32>
    %173 = vector.extract_strided_slice %101 {offsets = [4, 2, 0], sizes = [2, 1, 128], strides = [1, 1, 1]} : vector<8x8x128xf32> to vector<2x1x128xf32>
    %174 = vector.shape_cast %173 : vector<2x1x128xf32> to vector<2x128xf32>
    %175 = arith.truncf %174 : vector<2x128xf32> to vector<2x128xbf16>
    %c10 = arith.constant 10 : index
    %c0_175 = arith.constant 0 : index
    %c0_176 = arith.constant 0 : index
    %176 = vector.load %arg8[%c10, %c0_175, %c0_176] : memref<16x128x256xbf16, #tpu.memory_space<vmem>>, vector<1x128x256xbf16>
    %177 = vector.shape_cast %176 : vector<1x128x256xbf16> to vector<128x256xbf16>
    %cst_177 = arith.constant dense<0.000000e+00> : vector<2x256xf32>
    %178 = tpu.matmul %175, %177, %cst_177 {dimension_numbers = #tpu.dot_dimension_numbers<[1], [0], [0], [1], [0, 0, 1, 1], [], []>} : vector<2x128xbf16>, vector<128x256xbf16>, vector<2x256xf32> -> vector<2x256xf32>
    %179 = arith.addf %172, %178 : vector<2x256xf32>
    %180 = vector.extract_strided_slice %101 {offsets = [4, 3, 0], sizes = [2, 1, 128], strides = [1, 1, 1]} : vector<8x8x128xf32> to vector<2x1x128xf32>
    %181 = vector.shape_cast %180 : vector<2x1x128xf32> to vector<2x128xf32>
    %182 = arith.truncf %181 : vector<2x128xf32> to vector<2x128xbf16>
    %c11 = arith.constant 11 : index
    %c0_178 = arith.constant 0 : index
    %c0_179 = arith.constant 0 : index
    %183 = vector.load %arg8[%c11, %c0_178, %c0_179] : memref<16x128x256xbf16, #tpu.memory_space<vmem>>, vector<1x128x256xbf16>
    %184 = vector.shape_cast %183 : vector<1x128x256xbf16> to vector<128x256xbf16>
    %cst_180 = arith.constant dense<0.000000e+00> : vector<2x256xf32>
    %185 = tpu.matmul %182, %184, %cst_180 {dimension_numbers = #tpu.dot_dimension_numbers<[1], [0], [0], [1], [0, 0, 1, 1], [], []>} : vector<2x128xbf16>, vector<128x256xbf16>, vector<2x256xf32> -> vector<2x256xf32>
    %186 = arith.addf %179, %185 : vector<2x256xf32>
    %187 = vector.extract_strided_slice %101 {offsets = [6, 0, 0], sizes = [2, 1, 128], strides = [1, 1, 1]} : vector<8x8x128xf32> to vector<2x1x128xf32>
    %188 = vector.shape_cast %187 : vector<2x1x128xf32> to vector<2x128xf32>
    %189 = arith.truncf %188 : vector<2x128xf32> to vector<2x128xbf16>
    %c12 = arith.constant 12 : index
    %c0_181 = arith.constant 0 : index
    %c0_182 = arith.constant 0 : index
    %190 = vector.load %arg8[%c12, %c0_181, %c0_182] : memref<16x128x256xbf16, #tpu.memory_space<vmem>>, vector<1x128x256xbf16>
    %191 = vector.shape_cast %190 : vector<1x128x256xbf16> to vector<128x256xbf16>
    %cst_183 = arith.constant dense<0.000000e+00> : vector<2x256xf32>
    %192 = tpu.matmul %189, %191, %cst_183 {dimension_numbers = #tpu.dot_dimension_numbers<[1], [0], [0], [1], [0, 0, 1, 1], [], []>} : vector<2x128xbf16>, vector<128x256xbf16>, vector<2x256xf32> -> vector<2x256xf32>
    %193 = arith.addf %186, %192 : vector<2x256xf32>
    %194 = vector.extract_strided_slice %101 {offsets = [6, 1, 0], sizes = [2, 1, 128], strides = [1, 1, 1]} : vector<8x8x128xf32> to vector<2x1x128xf32>
    %195 = vector.shape_cast %194 : vector<2x1x128xf32> to vector<2x128xf32>
    %196 = arith.truncf %195 : vector<2x128xf32> to vector<2x128xbf16>
    %c13 = arith.constant 13 : index
    %c0_184 = arith.constant 0 : index
    %c0_185 = arith.constant 0 : index
    %197 = vector.load %arg8[%c13, %c0_184, %c0_185] : memref<16x128x256xbf16, #tpu.memory_space<vmem>>, vector<1x128x256xbf16>
    %198 = vector.shape_cast %197 : vector<1x128x256xbf16> to vector<128x256xbf16>
    %cst_186 = arith.constant dense<0.000000e+00> : vector<2x256xf32>
    %199 = tpu.matmul %196, %198, %cst_186 {dimension_numbers = #tpu.dot_dimension_numbers<[1], [0], [0], [1], [0, 0, 1, 1], [], []>} : vector<2x128xbf16>, vector<128x256xbf16>, vector<2x256xf32> -> vector<2x256xf32>
    %200 = arith.addf %193, %199 : vector<2x256xf32>
    %201 = vector.extract_strided_slice %101 {offsets = [6, 2, 0], sizes = [2, 1, 128], strides = [1, 1, 1]} : vector<8x8x128xf32> to vector<2x1x128xf32>
    %202 = vector.shape_cast %201 : vector<2x1x128xf32> to vector<2x128xf32>
    %203 = arith.truncf %202 : vector<2x128xf32> to vector<2x128xbf16>
    %c14 = arith.constant 14 : index
    %c0_187 = arith.constant 0 : index
    %c0_188 = arith.constant 0 : index
    %204 = vector.load %arg8[%c14, %c0_187, %c0_188] : memref<16x128x256xbf16, #tpu.memory_space<vmem>>, vector<1x128x256xbf16>
    %205 = vector.shape_cast %204 : vector<1x128x256xbf16> to vector<128x256xbf16>
    %cst_189 = arith.constant dense<0.000000e+00> : vector<2x256xf32>
    %206 = tpu.matmul %203, %205, %cst_189 {dimension_numbers = #tpu.dot_dimension_numbers<[1], [0], [0], [1], [0, 0, 1, 1], [], []>} : vector<2x128xbf16>, vector<128x256xbf16>, vector<2x256xf32> -> vector<2x256xf32>
    %207 = arith.addf %200, %206 : vector<2x256xf32>
    %208 = vector.extract_strided_slice %101 {offsets = [6, 3, 0], sizes = [2, 1, 128], strides = [1, 1, 1]} : vector<8x8x128xf32> to vector<2x1x128xf32>
    %209 = vector.shape_cast %208 : vector<2x1x128xf32> to vector<2x128xf32>
    %210 = arith.truncf %209 : vector<2x128xf32> to vector<2x128xbf16>
    %c15 = arith.constant 15 : index
    %c0_190 = arith.constant 0 : index
    %c0_191 = arith.constant 0 : index
    %211 = vector.load %arg8[%c15, %c0_190, %c0_191] : memref<16x128x256xbf16, #tpu.memory_space<vmem>>, vector<1x128x256xbf16>
    %212 = vector.shape_cast %211 : vector<1x128x256xbf16> to vector<128x256xbf16>
    %cst_192 = arith.constant dense<0.000000e+00> : vector<2x256xf32>
    %213 = tpu.matmul %210, %212, %cst_192 {dimension_numbers = #tpu.dot_dimension_numbers<[1], [0], [0], [1], [0, 0, 1, 1], [], []>} : vector<2x128xbf16>, vector<128x256xbf16>, vector<2x256xf32> -> vector<2x256xf32>
    %214 = arith.addf %207, %213 : vector<2x256xf32>
    %c0_193 = arith.constant 0 : index
    %c0_194 = arith.constant 0 : index
    %215 = vector.load %arg9[%c0_193, %c0_194] : memref<1x256xf32, #tpu.memory_space<vmem>>, vector<1x256xf32>
    %216 = vector.broadcast %215 : vector<1x256xf32> to vector<2x256xf32>
    %217 = arith.addf %214, %216 : vector<2x256xf32>
    %218 = math.tanh %217 : vector<2x256xf32>
    %219 = arith.truncf %218 : vector<2x256xf32> to vector<2x256xbf16>
    %c0_195 = arith.constant 0 : index
    %c0_196 = arith.constant 0 : index
    %220 = vector.load %arg10[%c0_195, %c0_196] : memref<256x64xbf16, #tpu.memory_space<vmem>>, vector<256x64xbf16>
    %cst_197 = arith.constant dense<0.000000e+00> : vector<2x64xf32>
    %221 = tpu.matmul %219, %220, %cst_197 {dimension_numbers = #tpu.dot_dimension_numbers<[1], [0], [0], [1], [0, 0, 1, 1], [], []>} : vector<2x256xbf16>, vector<256x64xbf16>, vector<2x64xf32> -> vector<2x64xf32>
    %c0_198 = arith.constant 0 : index
    %c0_199 = arith.constant 0 : index
    %222 = vector.load %arg11[%c0_198, %c0_199] : memref<1x64xf32, #tpu.memory_space<vmem>>, vector<1x64xf32>
    %223 = vector.broadcast %222 : vector<1x64xf32> to vector<2x64xf32>
    %224 = arith.addf %221, %223 : vector<2x64xf32>
    %225 = math.tanh %224 : vector<2x64xf32>
    %226 = arith.truncf %225 : vector<2x64xf32> to vector<2x64xbf16>
    %c0_200 = arith.constant 0 : index
    %c0_201 = arith.constant 0 : index
    %227 = vector.load %arg12[%c0_200, %c0_201] : memref<64x128xbf16, #tpu.memory_space<vmem>>, vector<64x128xbf16>
    %cst_202 = arith.constant dense<0.000000e+00> : vector<2x128xf32>
    %228 = tpu.matmul %226, %227, %cst_202 {dimension_numbers = #tpu.dot_dimension_numbers<[1], [0], [0], [1], [0, 0, 1, 1], [], []>} : vector<2x64xbf16>, vector<64x128xbf16>, vector<2x128xf32> -> vector<2x128xf32>
    %c0_203 = arith.constant 0 : index
    %c0_204 = arith.constant 0 : index
    %229 = vector.load %arg13[%c0_203, %c0_204] : memref<1x128xf32, #tpu.memory_space<vmem>>, vector<1x128xf32>
    %230 = vector.broadcast %229 : vector<1x128xf32> to vector<2x128xf32>
    %231 = arith.addf %228, %230 : vector<2x128xf32>
    %c0_205 = arith.constant 0 : index
    %c0_206 = arith.constant 0 : index
    %c0_207 = arith.constant 0 : index
    %232 = vector.load %arg14[%c0_205, %c0_206, %c0_207] : memref<1x2x128xf32, #tpu.memory_space<vmem>>, vector<1x2x128xf32>
    %233 = vector.shape_cast %232 : vector<1x2x128xf32> to vector<2x128xf32>
    %234 = vector.shape_cast %231 : vector<2x128xf32> to vector<1x2x128xf32>
    tpu.vector_store %arg14[%c0_205, %c0_206, %c0_207], %234 {strides = array<i32>} : memref<1x2x128xf32, #tpu.memory_space<vmem>>, vector<1x2x128xf32>,
    return
  }
  func.func @transform_0(%arg0: i32) -> (i32, i32) {
    %c0_i32 = arith.constant 0 : i32
    %c0_i32_0 = arith.constant 0 : i32
    %c0_i32_1 = arith.constant 0 : i32
    return %c0_i32, %c0_i32_0 : i32, i32
  }
  func.func @transform_1(%arg0: i32) -> (i32, i32, i32) {
    %c0_i32 = arith.constant 0 : i32
    %c0_i32_0 = arith.constant 0 : i32
    %c0_i32_1 = arith.constant 0 : i32
    return %arg0, %c0_i32, %c0_i32_0 : i32, i32, i32
  }
  func.func @transform_2(%arg0: i32) -> (i32, i32, i32) {
    %c0_i32 = arith.constant 0 : i32
    %c0_i32_0 = arith.constant 0 : i32
    %c0_i32_1 = arith.constant 0 : i32
    return %arg0, %c0_i32, %c0_i32_0 : i32, i32, i32
  }
  func.func @transform_3(%arg0: i32) -> (i32, i32, i32) {
    %c0_i32 = arith.constant 0 : i32
    %c0_i32_0 = arith.constant 0 : i32
    %c0_i32_1 = arith.constant 0 : i32
    return %arg0, %c0_i32, %c0_i32_0 : i32, i32, i32
  }
  func.func @transform_4(%arg0: i32) -> (i32, i32, i32) {
    %c0_i32 = arith.constant 0 : i32
    %c0_i32_0 = arith.constant 0 : i32
    %c0_i32_1 = arith.constant 0 : i32
    return %arg0, %c0_i32, %c0_i32_0 : i32, i32, i32
  }
  func.func @transform_5(%arg0: i32) -> (i32, i32, i32) {
    %c0_i32 = arith.constant 0 : i32
    %c0_i32_0 = arith.constant 0 : i32
    %c0_i32_1 = arith.constant 0 : i32
    return %arg0, %c0_i32, %c0_i32_0 : i32, i32, i32
  }
  func.func @transform_6(%arg0: i32) -> (i32, i32, i32) {
    %c0_i32 = arith.constant 0 : i32
    %c0_i32_0 = arith.constant 0 : i32
    %c0_i32_1 = arith.constant 0 : i32
    return %arg0, %c0_i32, %c0_i32_0 : i32, i32, i32
  }
  func.func @transform_7(%arg0: i32) -> (i32, i32, i32) {
    %c0_i32 = arith.constant 0 : i32
    %c0_i32_0 = arith.constant 0 : i32
    %c0_i32_1 = arith.constant 0 : i32
    %c0_i32_2 = arith.constant 0 : i32
    return %c0_i32, %c0_i32_0, %c0_i32_1 : i32, i32, i32
  }
  func.func @transform_8(%arg0: i32) -> (i32, i32) {
    %c0_i32 = arith.constant 0 : i32
    %c0_i32_0 = arith.constant 0 : i32
    %c0_i32_1 = arith.constant 0 : i32
    return %c0_i32, %c0_i32_0 : i32, i32
  }
  func.func @transform_9(%arg0: i32) -> (i32, i32) {
    %c0_i32 = arith.constant 0 : i32
    %c0_i32_0 = arith.constant 0 : i32
    %c0_i32_1 = arith.constant 0 : i32
    return %c0_i32, %c0_i32_0 : i32, i32
  }
  func.func @transform_10(%arg0: i32) -> (i32, i32) {
    %c0_i32 = arith.constant 0 : i32
    %c0_i32_0 = arith.constant 0 : i32
    %c0_i32_1 = arith.constant 0 : i32
    return %c0_i32, %c0_i32_0 : i32, i32
  }
  func.func @transform_11(%arg0: i32) -> (i32, i32) {
    %c0_i32 = arith.constant 0 : i32
    %c0_i32_0 = arith.constant 0 : i32
    %c0_i32_1 = arith.constant 0 : i32
    return %c0_i32, %c0_i32_0 : i32, i32
  }
  func.func @transform_12(%arg0: i32) -> (i32, i32) {
    %c0_i32 = arith.constant 0 : i32
    %c0_i32_0 = arith.constant 0 : i32
    %c0_i32_1 = arith.constant 0 : i32
    return %c0_i32, %c0_i32_0 : i32, i32
  }
  func.func @transform_13(%arg0: i32) -> (i32, i32, i32) {
    %c0_i32 = arith.constant 0 : i32
    %c0_i32_0 = arith.constant 0 : i32
    %c0_i32_1 = arith.constant 0 : i32
    return %arg0, %c0_i32, %c0_i32_0 : i32, i32, i32
  }
}

</mosaic_0001>

<bundles_post_ra>
// kernel: cnn_forward.1
= control target key start
LH: loop header
LB: loop body
LE: loop exit
PB: predicated region body
PF: predicated region fallthrough
CT: control target
= control target key end

     0   :  { %s15751_s0 = inlined_call_operand.vmem [shape: bf16[704,64], index: 0, kind: input, shape index: {}]   ;;  %s15752_s1 = inlined_call_operand.hbm [shape: bf16[3,64,128], index: 1, kind: input, shape index: {}]   ;;  %s15753_s2 = inlined_call_operand.hbm [shape: f32[3,3,128], index: 2, kind: input, shape index: {}]   ;;  %s15754_s3 = inlined_call_operand.hbm [shape: bf16[3,1152,256], index: 3, kind: input, shape index: {}]   ;;  %s15755_s4 = inlined_call_operand.hbm [shape: f32[3,3,256], index: 4, kind: input, shape index: {}]   ;;  %s15756_s5 = inlined_call_operand.hbm [shape: bf16[3,2304,128], index: 5, kind: input, shape index: {}]   ;;  %s15757_s6 = inlined_call_operand.hbm [shape: f32[3,3,128], index: 6, kind: input, shape index: {}]   ;;  %s15758_s7 = inlined_call_operand.vmem [shape: bf16[16,128,256], index: 7, kind: input, shape index: {}]   ;;  %s15759_s8 = inlined_call_operand.hbm [shape: f32[1,256], index: 8, kind: input, shape index: {}]   ;;  %s15760_s9 = inlined_call_operand.vmem [shape: bf16[256,64], index: 9, kind: input, shape index: {}]   ;;  %s15761_s10 = inlined_call_operand.hbm [shape: f32[1,64], index: 10, kind: input, shape index: {}]   ;;  %s15762_s11 = inlined_call_operand.hbm [shape: bf16[64,128], index: 11, kind: input, shape index: {}]   ;;  %s15763_s12 = inlined_call_operand.hbm [shape: f32[1,128], index: 12, kind: input, shape index: {}]   ;;  %s15764_s13 = inlined_call_operand.vmem [shape: f32[3,2,128], index: 13, kind: output, shape index: {}]  }
   0x1   :  { %15792 = sst [smem:[#allocation34_spill]] %s15751_s0 }
   0x2   :  { %15793 = sst [smem:[#allocation35_spill]] %s15753_s2 }
   0x3   :  { %15794 = sst [smem:[#allocation36_spill]] %s15755_s4 }
   0x4   :  { %15795 = sst [smem:[#allocation37_spill]] %s15758_s7 }
   0x5   :  { %15796 = sst [smem:[#allocation38_spill]] %s15759_s8 }
   0x6   :  { %15797 = sst [smem:[#allocation39_spill]] %s15760_s9 }
   0x7   :  { %15798 = sst [smem:[#allocation40_spill]] %s15761_s10 }
   0x8   :  { %15799 = sst [smem:[#allocation41_spill]] %s15764_s13 }
   0x9   :  { %18 = vsyncpa [#allocation7], 0 }
   0xa   :  { %20 = vsyncpa [#allocation7 + $0x1], 0 }
   0xb   :  { %21 = vsyncpa [#allocation9], 0 }
   0xc   :  { %23 = vsyncpa [#allocation9 + $0x1], 0 }
   0xd   :  { %24 = vsyncpa [#allocation12], 0 }
   0xe   :  { %26 = vsyncpa [#allocation12 + $0x1], 0 }
   0xf   :  { %27 = vsyncpa [#allocation15], 0 }
  0x10   :  { %29 = vsyncpa [#allocation15 + $0x1], 0 }
  0x11   :  { %30 = vsyncpa [#allocation18], 0 }
  0x12   :  { %31 = vsyncpa [#allocation21], 0  ;;  %s12935_s25 = smov 0   ;;  %s12937_s26 = smov 0  }
  0x13   :  { %s12939_s27 = smov 0   ;;  %s12941_s28 = smov 0  }
  0x14 LB: > { %15800 = sst [smem:[#allocation29_spill]] %s12842_s27  ;;  %s12954_s29 = sadd.s32 4294967295, %s12846_s28   ;;  %s12846_s28 = sphi %s12941_s28, %s15871_s28   ;;  %s12842_s27 = sphi %s12939_s27, %s15873_s27   ;;  %s12838_s26 = sphi %s12937_s26, %s15875_s26   ;;  %s12834_s25 = sphi %s12935_s25, %s15874_s25  }
  0x15   : > { %15801 = sst [smem:[#allocation30_spill]] %s12954_s29  ;;  %p78_p0 = scmp.ne.s32.totalorder %s12838_s26, %s12834_s25 }
  0x16   : > { %p15766_p1 = scmp.eq.s32.totalorder %s12954_s29, 0  ;;  %p9912_p2 = scmp.ge.s32.totalorder %s12846_s28, 1 }
  0x17   : > { %p371_p3 = scmp.lt.s32.totalorder %s12846_s28, 4  ;;  %s12848_s15 = smov [#allocation16]  }
  0x18   : > { %p12962_p4 = por %p15766_p1, %p78_p0  ;;  %s390_s16 = sshll.u32 %s12848_s15, 4  ;;  %s391_s16 = int_to_ptr.vmem [resolvable:$true] %s390_s16 }
  0x19   : > { %p12966_p5 = pnand %p9912_p2, %p371_p3  ;;  %s12849_s17 = smov [#allocation17]  }
  0x1a   : > { %s15802_s30 = scalar_select %p12962_p4, 1, 0 }
  0x1b   : > { %s15804_s14 = scalar_select %p12966_p5, 1, 0 }
  0x1c   : > { %15803 = sst [smem:[#allocation31_spill]] %s15802_s30  ;;  %p11555_p6 = pneg %p12966_p5 }
  0x1d   : > { %s404_s18 = sshll.u32 %s12849_s17, 4  ;;  %s12981_s20 = sadd.s32 1, %s12846_s28   ;;  %s12978_s18 = int_to_ptr.vmem [resolvable:$true] %s404_s18 }
  0x1e   : > { %p12974_p7 = pnand %p11555_p6, %p15766_p1  ;;  %15806 = sst [smem:[#allocation32_spill]] %s12981_s20 }
  0x1f   : > { %s15807_s8 = sld [smem:[#allocation38_spill]] }
  0x20   : > { %s15805_s19 = scalar_select %p12974_p7, 1, 0 }
  0x21   : > { %p12993_p9 = pneg %p12974_p7 }
  0x23   : > { %s15808_s17 = scalar_select %p12993_p9, 1, 0 }
  0x25   : > { %s12496_s24 = scalar_lea.hbm %s15807_s8, 32 }
  0x26   : > { %p12497_p8 = scmp.ne.s32.totalorder %s15807_s8, %s12496_s24  ;;  %p12503_p12 = scmp.lt.u32.totalorder %s12496_s24, %s15807_s8 }
  0x28   : > { %p12499_p10 = pnand %p12993_p9, %p12497_p8 }
  0x2a   : > { %p12500_p11 = pneg %p12499_p10 }
  0x2c   : > { %p12505_p13 = pnand %p12503_p12, %p12500_p11 }
  0x2e   : > { %12508 = shalt.err (!%p12505_p13)
}
  0x2f   : > { %s12509_s22 = scalar_lea.vmem %s391_s16, 32  ;;  %p12517_p6 = scmp.lt.s32.totalorder %s391_s16, %s391_s16 }
  0x30   : > { %p12510_p0 = scmp.ne.s32.totalorder %s391_s16, %s12509_s22  ;;  %p12518_p1 = scmp.lt.s32.totalorder %s12509_s22, %s12509_s22 }
  0x32   : > { %p12512_p2 = pnand %p12510_p0, %p12993_p9  ;;  %p12519_p4 = por %p12518_p1, %p12517_p6 }
  0x34   : > { %p12513_p3 = pneg %p12512_p2 }
  0x36   : > { %p12520_p5 = pnand %p12519_p4, %p12513_p3 }
  0x38   : > { %12523 = shalt.err (!%p12520_p5)
}
  0x39   : > { %11558 = dma.hbm_to_vmem [thread:$0]  (!%p12974_p7), %s15807_s8, 32, %s391_s16, [#allocation15]  }
  0x3a   : > { %s15809_s10 = sld [smem:[#allocation40_spill]] }
  0x40   : > { %s12524_s24 = scalar_lea.hbm %s15809_s10, 16 }
  0x41   : > { %p12525_p8 = scmp.ne.s32.totalorder %s15809_s10, %s12524_s24  ;;  %p12531_p4 = scmp.lt.u32.totalorder %s12524_s24, %s15809_s10 }
  0x43   : > { %p12527_p10 = pnand %p12525_p8, %p12993_p9 }
  0x45   : > { %p12528_p1 = pneg %p12527_p10 }
  0x47   : > { %p12533_p5 = pnand %p12531_p4, %p12528_p1 }
  0x49   : > { %12536 = shalt.err (!%p12533_p5)
}
  0x4a   : > { %s12537_s16 = scalar_lea.vmem %s12978_s18, 16  ;;  %s12544_s21 = scalar_lea.vmem %s12978_s18, 32 }
  0x4b   : > { %p12538_p11 = scmp.ne.s32.totalorder %s12978_s18, %s12537_s16  ;;  %p12545_p0 = scmp.lt.s32.totalorder %s12978_s18, %s12978_s18 }
  0x4c   : > { %p12546_p2 = scmp.lt.s32.totalorder %s12544_s21, %s12537_s16 }
  0x4d   : > { %p12540_p12 = pnand %p12538_p11, %p12993_p9 }
  0x4e   : > { %p12547_p3 = por %p12546_p2, %p12545_p0 }
  0x4f   : > { %p12541_p13 = pneg %p12540_p12 }
  0x51   : > { %p12548_p6 = pnand %p12547_p3, %p12541_p13 }
  0x53   : > { %12551 = shalt.err (!%p12548_p6)
}
  0x54   : > { %11561 = dma.hbm_to_vmem [thread:$0]  (!%p12974_p7), %s15809_s10, 16, %s12978_s18, [#allocation18]  }
  0x55   : > { %s15810_s25 = ssub.s32 %s12846_s28, %s12981_s20  ;;  %s65_s9 = sadd.s32 1, %s12842_s27 }
  0x56   : > { %p63_p8 = scmp.eq.s32.totalorder %s15810_s25, 0  ;;  %p72_p10 = scmp.ne.s32.totalorder %s12842_s27, %s12838_s26 }
  0x57   : > { %p73_p1 = scmp.eq.s32.totalorder %s12846_s28, 0  ;;  %p11591_p5 = scmp.lt.s32.totalorder %s12846_s28, 3 }
  0x58   : > { %s13041_s13 = scalar_select %p63_p8, %s12842_s27, %s65_s9  }
  0x59   : > { %p74_p4 = por %p73_p1, %p72_p10  ;;  %s13045_s24 = sand.u32 1, %s12842_s27  }
  0x5a   : > { %15811 = sst [smem:[#allocation33_spill]] %s13041_s13  ;;  %s13048_s15 = sand.u32 1, %s12846_s28  }
  0x5b   : > { %p13050_p11 = pnand %p11591_p5, %p74_p4  ;;  %s15771_s18 = sshll.u32 %s13045_s24, 2 }
  0x5c   : > { %s15770_s16 = sshll.u32 %s12846_s28, 6  ;;  %s15813_s2 = sld [smem:[#allocation35_spill]] }
  0x5d   : > { %s15812_s22 = scalar_select %p13050_p11, 1, 0 }
  0x5e   : > { %s464_s25 = scalar_lea.vmem [#allocation8], %s15771_s18  ;;  %p13072_p13 = pneg %p13050_p11 }
  0x5f   : > { %s471_s9 = sshll.u32 %s464_s25, 4  ;;  %s13065_s9 = int_to_ptr.vmem [resolvable:$true] %s471_s9 }
  0x60   : > { %s15814_s13 = scalar_select %p13072_p13, 1, 0 }
  0x62   : > { %s13061_s23 = scalar_lea.hbm %s15813_s2, %s15770_s16  ;;  %s12557_s16 = scalar_lea.hbm %s15813_s2, 192 }
  0x63   : > { %s12552_s10 = scalar_lea.hbm %s13061_s23, 64  ;;  %p12558_p3 = scmp.lt.u32.totalorder %s13061_s23, %s15813_s2 }
  0x64   : > { %p12553_p12 = scmp.ne.s32.totalorder %s13061_s23, %s12552_s10  ;;  %p12559_p6 = scmp.lt.u32.totalorder %s12557_s16, %s12552_s10 }
  0x65   : > { %p12561_p10 = scmp.lt.u32.totalorder %s12552_s10, %s13061_s23 }
  0x66   : > { %p12555_p0 = pnand %p13072_p13, %p12553_p12  ;;  %p12560_p8 = por %p12559_p6, %p12558_p3 }
  0x68   : > { %p12556_p2 = pneg %p12555_p0  ;;  %p12562_p1 = por %p12561_p10, %p12560_p8 }
  0x6a   : > { %p12563_p4 = pnand %p12562_p1, %p12556_p2 }
  0x6c   : > { %12566 = shalt.err (!%p12563_p4)
}
  0x6d   : > { %s12567_s8 = scalar_lea.vmem %s13065_s9, 64  ;;  %s12850_s21 = smov [#allocation8]  }
  0x6e   : > { %p12568_p5 = scmp.ne.s32.totalorder %s13065_s9, %s12567_s8  ;;  %s12572_s7 = sshll.u32 %s12850_s21, 4  ;;  %s12573_s7 = int_to_ptr.vmem [resolvable:$false] %s12572_s7 }
  0x6f   : > { %s12574_s18 = scalar_lea.vmem %s12573_s7, 128  ;;  %p12575_p7 = scmp.lt.s32.totalorder %s13065_s9, %s12573_s7 }
  0x70   : > { %p12570_p12 = pnand %p12568_p5, %p13072_p13  ;;  %p12576_p9 = scmp.lt.s32.totalorder %s12574_s18, %s12567_s8 }
  0x72   : > { %p12571_p0 = pneg %p12570_p12  ;;  %p12577_p3 = por %p12576_p9, %p12575_p7 }
  0x74   : > { %p12578_p6 = pnand %p12577_p3, %p12571_p0 }
  0x76   : > { %12581 = shalt.err (!%p12578_p6)
}
  0x77   : > { %s15815_s10 = scalar_lea.sflag [#allocation9], %s13048_s15  ;;  %s15816_s16 = sshll.u32 %s12846_s28, 6 }
  0x78   : > { %11574 = dma.hbm_to_vmem [thread:$0]  (!%p13050_p11), %s13061_s23, 64, %s13065_s9, %s15815_s10  }
  0x79   : > { %s13102_s8 = scalar_lea.hbm %s15757_s6, %s15816_s16  ;;  %s9924_s7 = sshll.u32 %s13045_s24, 3 }
  0x7a   : > { %s10850_s18 = sshll.u32 %s12846_s28, 7  ;;  %s15817_s4 = sld [smem:[#allocation36_spill]] }
  0x7b   : > { %s503_s0 = scalar_lea.vmem [#allocation11], %s9924_s7  ;;  %s12851_s23 = smov [#allocation19]  }
  0x7c   : > { %s511_s29 = sshll.u32 %s503_s0, 4  ;;  %s13113_s9 = sshll.u32 %s12851_s23, 4  ;;  %s13111_s29 = int_to_ptr.vmem [resolvable:$true] %s511_s29  ;;  %s415_s9 = int_to_ptr.vmem [resolvable:$true] %s13113_s9 }
  0x7d   : > { %s15784_s10 = scalar_lea.sflag [#allocation12], %s13048_s15 }
  0x80   : > { %s13109_s20 = scalar_lea.hbm %s15817_s4, %s10850_s18  ;;  %s12587_s25 = scalar_lea.hbm %s15817_s4, 384 }
  0x81   : > { %s12582_s16 = scalar_lea.hbm %s13109_s20, 128  ;;  %p12588_p8 = scmp.lt.u32.totalorder %s13109_s20, %s15817_s4 }
  0x82   : > { %p12583_p7 = scmp.ne.s32.totalorder %s13109_s20, %s12582_s16  ;;  %p12589_p10 = scmp.lt.u32.totalorder %s12587_s25, %s12582_s16 }
  0x83   : > { %p12591_p4 = scmp.lt.u32.totalorder %s12582_s16, %s13109_s20 }
  0x84   : > { %p12585_p9 = pnand %p12583_p7, %p13072_p13  ;;  %p12590_p1 = por %p12589_p10, %p12588_p8 }
  0x86   : > { %p12586_p2 = pneg %p12585_p9  ;;  %p12592_p5 = por %p12591_p4, %p12590_p1 }
  0x88   : > { %p12593_p12 = pnand %p12592_p5, %p12586_p2 }
  0x8a   : > { %12596 = shalt.err (!%p12593_p12)
}
  0x8b   : > { %s12597_s0 = scalar_lea.vmem %s13111_s29, 128  ;;  %s12852_s7 = smov [#allocation11]  }
  0x8c   : > { %p12598_p0 = scmp.ne.s32.totalorder %s13111_s29, %s12597_s0  ;;  %s12602_s23 = sshll.u32 %s12852_s7, 4  ;;  %s12603_s23 = int_to_ptr.vmem [resolvable:$false] %s12602_s23 }
  0x8d   : > { %s12604_s2 = scalar_lea.vmem %s12603_s23, 256  ;;  %p12605_p7 = scmp.lt.s32.totalorder %s13111_s29, %s12603_s23 }
  0x8e   : > { %p12600_p3 = pnand %p12598_p0, %p13072_p13  ;;  %p12606_p9 = scmp.lt.s32.totalorder %s12604_s2, %s12597_s0 }
  0x90   : > { %p12601_p6 = pneg %p12600_p3  ;;  %p12607_p8 = por %p12606_p9, %p12605_p7 }
  0x92   : > { %p12608_p10 = pnand %p12607_p8, %p12601_p6 }
  0x94   : > { %12611 = shalt.err (!%p12608_p10)
}
  0x95   : > { %11580 = dma.hbm_to_vmem [thread:$0]  (!%p13050_p11), %s13109_s20, 128, %s13111_s29, %s15784_s10  }
  0x96   : > { %s12612_s25 = scalar_lea.hbm %s15762_s11, 512  ;;  %p15818_p1 = scmp.ne.s32.totalorder %s15808_s17, 0 }
  0x97   : > { %p12613_p2 = scmp.ne.s32.totalorder %s15762_s11, %s12612_s25  ;;  %p12619_p12 = scmp.lt.u32.totalorder %s12612_s25, %s15762_s11 }
  0x99   : > { %p12615_p4 = pnand %p12613_p2, %p15818_p1 }
  0x9b   : > { %p12616_p5 = pneg %p12615_p4 }
  0x9d   : > { %p12621_p0 = pnand %p12619_p12, %p12616_p5 }
  0x9f   : > { %12624 = shalt.err (!%p12621_p0)
}
  0xa0   : > { %s12625_s23 = scalar_lea.vmem %s415_s9, 512  ;;  %p12633_p9 = scmp.lt.s32.totalorder %s415_s9, %s415_s9 }
  0xa1   : > { %p12626_p3 = scmp.ne.s32.totalorder %s415_s9, %s12625_s23  ;;  %p12634_p8 = scmp.lt.s32.totalorder %s12625_s23, %s12625_s23 }
  0xa3   : > { %p12628_p6 = pnand %p12626_p3, %p15818_p1  ;;  %p12635_p10 = por %p12634_p8, %p12633_p9 }
  0xa5   : > { %p12629_p7 = pneg %p12628_p6 }
  0xa7   : > { %p12636_p11 = pnand %p12635_p10, %p12629_p7 }
  0xa9   : > { %12639 = shalt.err (!%p12636_p11)
}
  0xaa   : > { %s12853_s29 = smov 64   ;;  %s12854_s20 = smov 4  }
  0xab   : > { %p15819_p2 = scmp.ne.s32.totalorder %s15805_s19, 0  ;;  %s12855_s27 = smov [#allocation20]  }
  0xac   : > { %s428_s25 = sshll.u32 %s12855_s27, 4  ;;  %s9918_s21 = sshll.u32 %s13045_s24, 5  ;;  %s429_s25 = int_to_ptr.vmem [resolvable:$true] %s428_s25 }
  0xad   : > { %11564 = dma.hbm_to_vmem [thread:$0]  (!%p15819_p2), %s15762_s11, 512, %s415_s9, [#allocation18], %s12853_s29, %s12853_s29, %s12854_s20  }
  0xae   : > { %s12640_s7 = scalar_lea.hbm %s15763_s12, 16 }
  0xaf   : > { %p12641_p11 = scmp.ne.s32.totalorder %s15763_s12, %s12640_s7  ;;  %p12647_p12 = scmp.lt.u32.totalorder %s12640_s7, %s15763_s12 }
  0xb1   : > { %p12643_p4 = pnand %p12641_p11, %p15818_p1 }
  0xb3   : > { %p12644_p5 = pneg %p12643_p4 }
  0xb5   : > { %p12649_p0 = pnand %p12647_p12, %p12644_p5 }
  0xb7   : > { %12652 = shalt.err (!%p12649_p0)
}
  0xb8   : > { %s12653_s9 = scalar_lea.vmem %s429_s25, 16  ;;  %s12660_s2 = scalar_lea.vmem %s429_s25, 32 }
  0xb9   : > { %p12654_p3 = scmp.ne.s32.totalorder %s429_s25, %s12653_s9  ;;  %p12661_p9 = scmp.lt.s32.totalorder %s429_s25, %s429_s25 }
  0xba   : > { %p12662_p8 = scmp.lt.s32.totalorder %s12660_s2, %s12653_s9 }
  0xbb   : > { %p12656_p6 = pnand %p12654_p3, %p15818_p1 }
  0xbc   : > { %p12663_p10 = por %p12662_p8, %p12661_p9 }
  0xbd   : > { %p12657_p7 = pneg %p12656_p6 }
  0xbf   : > { %p12664_p13 = pnand %p12663_p10, %p12657_p7 }
  0xc1   : > { %12667 = shalt.err (!%p12664_p13)
}
  0xc2   : > { %11567 = dma.hbm_to_vmem [thread:$0]  (!%p15819_p2), %s15763_s12, 16, %s429_s25, [#allocation21]  }
  0xc3   : > { %s10849_s4 = sshll.u32 %s12846_s28, 9  ;;  %s443_s18 = scalar_lea.vmem [#allocation6], %s9918_s21 }
  0xc4   : > { %s13184_s27 = scalar_lea.hbm %s15752_s1, %s10849_s4  ;;  %s450_s19 = sshll.u32 %s443_s18, 4  ;;  %s13186_s19 = int_to_ptr.vmem [resolvable:$true] %s450_s19 }
  0xc5   : > { %s11522_s0 = smul.u32 1152, %s13045_s24  ;;  %s440_s7 = scalar_lea.sflag [#allocation7], %s13045_s24 }
  0xc6   : > { %s12668_s23 = scalar_lea.hbm %s13184_s27, 512  ;;  %p15820_p1 = scmp.ne.s32.totalorder %s15814_s13, 0 }
  0xc7   : > { %p12669_p13 = scmp.ne.s32.totalorder %s13184_s27, %s12668_s23  ;;  %s12673_s2 = scalar_lea.hbm %s15752_s1, 1536 }
  0xc8   : > { %p12674_p4 = scmp.lt.u32.totalorder %s13184_s27, %s15752_s1  ;;  %p12675_p5 = scmp.lt.u32.totalorder %s12673_s2, %s12668_s23 }
  0xc9   : > { %p12671_p2 = pnand %p12669_p13, %p15820_p1  ;;  %p12677_p0 = scmp.lt.u32.totalorder %s12668_s23, %s13184_s27 }
  0xca   : > { %p12676_p12 = por %p12675_p5, %p12674_p4 }
  0xcb   : > { %p12672_p11 = pneg %p12671_p2 }
  0xcc   : > { %p12678_p3 = por %p12677_p0, %p12676_p12 }
  0xce   : > { %p12679_p6 = pnand %p12678_p3, %p12672_p11 }
  0xd0   : > { %12682 = shalt.err (!%p12679_p6)
}
  0xd1   : > { %s12683_s21 = scalar_lea.vmem %s13186_s19, 512  ;;  %s12856_s4 = smov [#allocation6]  }
  0xd2   : > { %p12684_p7 = scmp.ne.s32.totalorder %s13186_s19, %s12683_s21  ;;  %s12688_s30 = sshll.u32 %s12856_s4, 4  ;;  %s12689_s30 = int_to_ptr.vmem [resolvable:$false] %s12688_s30 }
  0xd3   : > { %s12690_s17 = scalar_lea.vmem %s12689_s30, 1024  ;;  %p12691_p10 = scmp.lt.s32.totalorder %s13186_s19, %s12689_s30 }
  0xd4   : > { %p12686_p9 = pnand %p12684_p7, %p15820_p1  ;;  %p12692_p13 = scmp.lt.s32.totalorder %s12690_s17, %s12683_s21 }
  0xd6   : > { %p12687_p8 = pneg %p12686_p9  ;;  %p12693_p2 = por %p12692_p13, %p12691_p10 }
  0xd8   : > { %p12694_p4 = pnand %p12693_p2, %p12687_p8 }
  0xda   : > { %12697 = shalt.err (!%p12694_p4)
}
  0xdb   : > { %p15821_p11 = scmp.ne.s32.totalorder %s15812_s22, 0  ;;  %s11523_s18 = smul.u32 18432, %s12846_s28 }
  0xdc   : > { %s482_s23 = scalar_lea.vmem [#allocation10], %s11522_s0 }
  0xdd   : > { %11571 = dma.hbm_to_vmem [thread:$0]  (!%p15821_p11), %s13184_s27, 512, %s13186_s19, %s440_s7, %s12853_s29, %s12853_s29, %s12854_s20  }
  0xde   : > { %s489_s25 = sshll.u32 %s482_s23, 4  ;;  %s13224_s10 = scalar_lea.hbm %s15754_s3, %s11523_s18  ;;  %s13226_s25 = int_to_ptr.vmem [resolvable:$true] %s489_s25 }
  0xdf   : > { %s12698_s16 = scalar_lea.hbm %s13224_s10, 18432  ;;  %s12703_s7 = scalar_lea.hbm %s15754_s3, 55296 }
  0xe0   : > { %p12699_p5 = scmp.ne.s32.totalorder %s13224_s10, %s12698_s16  ;;  %p12704_p3 = scmp.lt.u32.totalorder %s13224_s10, %s15754_s3 }
  0xe1   : > { %p12705_p6 = scmp.lt.u32.totalorder %s12703_s7, %s12698_s16  ;;  %p12707_p9 = scmp.lt.u32.totalorder %s12698_s16, %s13224_s10 }
  0xe2   : > { %p12701_p12 = pnand %p12699_p5, %p15820_p1 }
  0xe3   : > { %p12706_p7 = por %p12705_p6, %p12704_p3 }
  0xe4   : > { %p12702_p0 = pneg %p12701_p12 }
  0xe5   : > { %p12708_p8 = por %p12707_p9, %p12706_p7 }
  0xe7   : > { %p12709_p10 = pnand %p12708_p8, %p12702_p0 }
  0xe9   : > { %12712 = shalt.err (!%p12709_p10)
}
  0xea   : > { %s12713_s30 = scalar_lea.vmem %s13226_s25, 18432  ;;  %s12857_s17 = smov [#allocation10]  }
  0xeb   : > { %p12714_p13 = scmp.ne.s32.totalorder %s13226_s25, %s12713_s30  ;;  %s12718_s23 = sshll.u32 %s12857_s17, 4  ;;  %s12719_s23 = int_to_ptr.vmem [resolvable:$false] %s12718_s23 }
  0xec   : > { %s12720_s9 = scalar_lea.vmem %s12719_s23, 36864  ;;  %p12721_p5 = scmp.lt.s32.totalorder %s13226_s25, %s12719_s23 }
  0xed   : > { %p12716_p2 = pnand %p12714_p13, %p15820_p1  ;;  %p12722_p12 = scmp.lt.s32.totalorder %s12720_s9, %s12713_s30 }
  0xef   : > { %p12717_p4 = pneg %p12716_p2  ;;  %p12723_p3 = por %p12722_p12, %p12721_p5 }
  0xf1   : > { %p12724_p6 = pnand %p12723_p3, %p12717_p4 }
  0xf3   : > { %12727 = shalt.err (!%p12724_p6)
}
  0xf4   : > { %s12858_s2 = smov 128   ;;  %s12859_s16 = smov 8  }
  0xf5   : > { %s15822_s27 = scalar_lea.sflag [#allocation9], %s13048_s15  ;;  %s13256_s21 = scalar_lea.hbm %s15756_s5, %s11523_s18 }
  0xf6   : > { %11577 = dma.hbm_to_vmem [thread:$0]  (!%p15821_p11), %s13224_s10, 18432, %s13226_s25, %s15822_s27, %s12858_s2, %s12858_s2, %s12859_s16  }
  0xf7   : > { %s522_s4 = scalar_lea.vmem [#allocation13], %s11522_s0  ;;  %s12728_s17 = scalar_lea.hbm %s13256_s21, 18432 }
  0xf8   : > { %s529_s30 = sshll.u32 %s522_s4, 4  ;;  %p12729_p0 = scmp.ne.s32.totalorder %s13256_s21, %s12728_s17  ;;  %s13260_s30 = int_to_ptr.vmem [resolvable:$true] %s529_s30 }
  0xf9   : > { %s12733_s10 = scalar_lea.hbm %s15756_s5, 55296  ;;  %p12734_p8 = scmp.lt.u32.totalorder %s13256_s21, %s15756_s5 }
  0xfa   : > { %p12731_p7 = pnand %p12729_p0, %p15820_p1  ;;  %p12735_p10 = scmp.lt.u32.totalorder %s12733_s10, %s12728_s17 }
  0xfb   : > { %p12737_p2 = scmp.lt.u32.totalorder %s12728_s17, %s13256_s21 }
  0xfc   : > { %p12732_p9 = pneg %p12731_p7  ;;  %p12736_p13 = por %p12735_p10, %p12734_p8 }
  0xfe   : > { %p12738_p4 = por %p12737_p2, %p12736_p13 }
 0x100   : > { %p12739_p5 = pnand %p12738_p4, %p12732_p9 }
 0x102   : > { %12742 = shalt.err (!%p12739_p5)
}
 0x103   : > { %s12743_s0 = scalar_lea.vmem %s13260_s30, 18432  ;;  %s12860_s9 = smov [#allocation13]  }
 0x104   : > { %p12744_p12 = scmp.ne.s32.totalorder %s13260_s30, %s12743_s0  ;;  %s12748_s2 = sshll.u32 %s12860_s9, 4  ;;  %s12749_s2 = int_to_ptr.vmem [resolvable:$false] %s12748_s2 }
 0x105   : > { %s12750_s16 = scalar_lea.vmem %s12749_s2, 36864  ;;  %p12751_p0 = scmp.lt.s32.totalorder %s13260_s30, %s12749_s2 }
 0x106   : > { %p12746_p3 = pnand %p12744_p12, %p15820_p1  ;;  %p12752_p7 = scmp.lt.s32.totalorder %s12750_s16, %s12743_s0 }
 0x108   : > { %p12747_p6 = pneg %p12746_p3  ;;  %p12753_p8 = por %p12752_p7, %p12751_p0 }
 0x10a   : > { %p12754_p10 = pnand %p12753_p8, %p12747_p6 }
 0x10c   : > { %12757 = shalt.err (!%p12754_p10)
}
 0x10d   : > { %s15823_s27 = scalar_lea.sflag [#allocation12], %s13048_s15  ;;  %s15824_s19 = sshll.u32 %s13045_s24, 2 }
 0x10e   : > { %11583 = dma.hbm_to_vmem [thread:$0]  (!%p15821_p11), %s13256_s21, 18432, %s13260_s30, %s15823_s27, %s12853_s29, %s12853_s29, %s12854_s20  }
 0x10f   : > { %s543_s7 = scalar_lea.vmem [#allocation14], %s15824_s19  ;;  %s540_s17 = scalar_lea.sflag [#allocation15], %s13048_s15 }
 0x110   : > { %s550_s4 = sshll.u32 %s543_s7, 4  ;;  %s12758_s28 = scalar_lea.hbm %s13102_s8, 64  ;;  %s551_s4 = int_to_ptr.vmem [resolvable:$true] %s550_s4 }
 0x111   : > { %p12759_p9 = scmp.ne.s32.totalorder %s13102_s8, %s12758_s28  ;;  %s12763_s18 = scalar_lea.hbm %s15757_s6, 192 }
 0x112   : > { %p12764_p4 = scmp.lt.u32.totalorder %s13102_s8, %s15757_s6  ;;  %p12765_p5 = scmp.lt.u32.totalorder %s12763_s18, %s12758_s28 }
 0x113   : > { %p12761_p13 = pnand %p12759_p9, %p15820_p1  ;;  %p12767_p3 = scmp.lt.u32.totalorder %s12758_s28, %s13102_s8 }
 0x114   : > { %p12766_p12 = por %p12765_p5, %p12764_p4 }
 0x115   : > { %p12762_p2 = pneg %p12761_p13 }
 0x116   : > { %p12768_p6 = por %p12767_p3, %p12766_p12 }
 0x118   : > { %p12769_p0 = pnand %p12768_p6, %p12762_p2 }
 0x11a   : > { %12772 = shalt.err (!%p12769_p0)
}
 0x11b   : > { %s12773_s24 = scalar_lea.vmem %s551_s4, 64  ;;  %s12861_s15 = smov [#allocation14]  }
 0x11c   : > { %p12774_p7 = scmp.ne.s32.totalorder %s551_s4, %s12773_s24  ;;  %s12778_s29 = sshll.u32 %s12861_s15, 4  ;;  %s12779_s29 = int_to_ptr.vmem [resolvable:$false] %s12778_s29 }
 0x11d   : > { %s12780_s20 = scalar_lea.vmem %s12779_s29, 128  ;;  %p12781_p9 = scmp.lt.s32.totalorder %s551_s4, %s12779_s29 }
 0x11e   : > { %p12776_p8 = pnand %p12774_p7, %p15820_p1  ;;  %p12782_p13 = scmp.lt.s32.totalorder %s12780_s20, %s12773_s24 }
 0x120   : > { %p12777_p10 = pneg %p12776_p8  ;;  %p12783_p11 = por %p12782_p13, %p12781_p9 }
 0x122   : > { %p12784_p4 = pnand %p12783_p11, %p12777_p10 }
 0x124   : > { %12787 = shalt.err (!%p12784_p4)
}
 0x125   : > { %p15825_p5 = scmp.ne.s32.totalorder %s15812_s22, 0  ;;  %p15826_p2 = scmp.ne.s32.totalorder %s15804_s14, 0 }
 0x126   : > { %s15827_s13 = sld [smem:[#allocation31_spill]] (!%p15826_p2)  ;;  %s561_s21 = sand.u32 (!%p15826_p2), 1, %s12838_s26  }
 0x127   : > { %11586 = dma.hbm_to_vmem [thread:$0]  (!%p15825_p5), %s13102_s8, 64, %s551_s4, %s540_s17  }
 0x128   : > { %559 = sbr.rel (%p15826_p2) target bundleno = 2626 (0xa42), region = 72  ;;  %s9931_s30 = sshll.u32 (!%p15826_p2), %s561_s21, 5 }
 0x129   : > { %s562_s9 = scalar_lea.sflag (!%p15826_p2), [#allocation7], %s561_s21  ;;  %s13311_s2 = scalar_lea.vmem (!%p15826_p2), [#allocation6], %s9931_s30 }
 0x12c   : > { %p15828_p1 = scmp.ne.s32.totalorder (!%p15826_p2), %s15827_s13, 0 }
 0x12f   : > { %12805 = dma.done.wait (%p15828_p1), %s562_s9, 512  }
 0x130   : > { %12807 = vsyncadd (%p15828_p1), %s562_s9, 4294966784  ;;  %s15829_s16 = sld [smem:[#allocation30_spill]]  ;;  %s9932_s27 = sshll.u32 %s561_s21, 2 }
 0x131   : > { %s13318_s19 = scalar_lea.vmem [#allocation8], %s9932_s27 }
 0x136   : > { %s570_s22 = sand.u32 1, %s15829_s16  }
 0x137   : > { %s571_s8 = scalar_lea.sflag [#allocation9], %s570_s22 }
 0x138   : > { %12809 = dma.done.wait (%p15828_p1), %s571_s8, 18496  }
 0x139   : > { %12811 = vsyncadd (%p15828_p1), %s571_s8, 4294948800  ;;  %s11526_s14 = smul.u32 1152, %s561_s21  ;;  %s9933_s7 = sshll.u32 %s561_s21, 3 }
 0x13a   : > { %s589_s17 = scalar_lea.sflag [#allocation12], %s570_s22  ;;  %s13326_s28 = scalar_lea.vmem [#allocation11], %s9933_s7 }
 0x13b   : > { %s13324_s4 = scalar_lea.vmem [#allocation10], %s11526_s14 }
 0x13c   : > { %12813 = dma.done.wait (%p15828_p1), %s589_s17, 18560  }
 0x13d   : > { %12815 = vsyncadd (%p15828_p1), %s589_s17, 4294948736  ;;  %s13332_s25 = scalar_lea.vmem [#allocation13], %s11526_s14  ;;  %s607_s10 = scalar_lea.sflag [#allocation15], %s570_s22 }
 0x13e   : > { %s13334_s18 = scalar_lea.vmem [#allocation14], %s9932_s27 }
 0x13f   : > { %12817 = dma.done.wait (%p15828_p1), %s607_s10, 64  }
 0x140   : > { %12819 = vsyncadd (%p15828_p1), %s607_s10, 4294967232  ;;  %p15830_p11 = scmp.eq.s32.totalorder %s15829_s16, 0 }
 0x142   : > { %12821 = dma.done.wait (%p15830_p11), [#allocation15], 32   ;;  %p15831_p12 = pmov %p15830_p11 }
 0x143   : > { %p15832_p3 = pmov %p15830_p11 }
 0x144   : > { %12823 = vsyncadd (%p15831_p12), [#allocation15], 4294967264 }
 0x145   : > { %12825 = dma.done.wait (%p15832_p3), [#allocation18], 528   ;;  %p15833_p6 = pmov %p15832_p3 }
 0x146   : > { %p15834_p0 = pmov %p15832_p3 }
 0x147   : > { %12827 = vsyncadd (%p15833_p6), [#allocation18], 4294966768 }
 0x148   : > { %12829 = dma.done.wait (%p15834_p0), [#allocation21], 16   ;;  %p15835_p7 = pmov %p15834_p0 }
 0x149   : > { %v11639_v0 = vld [vmem:[%s13311_s2] sm:$0xff]   ;;  %v11640_v1 = vld [vmem:[%s13311_s2 + $0x8] sm:$0xff]   ;;  %v11641_v2 = vld [vmem:[%s13311_s2 + $0x10] sm:$0xff]   ;;  %vm1038_vm0 = vcmask 523264   ;;  %s15836_s24 = sld [smem:[#allocation34_spill]]  ;;  %s15869_s14 = sld [smem:[#allocation39_spill]] }
 0x14a   : > { %12831 = vsyncadd (%p15835_p7), [#allocation21], 4294967280  ;;  %11286 = vmatprep.subr.bf16.mxu0 %v11639_v0  ;;  %v11642_v4 = vld [vmem:[%s13311_s2 + $0x18] sm:$0xff]   ;;  %v11685_v15 = vld [vmem:[%s13324_s4 + $0x4] ss:$8 sps:$4 sm:$0xff]   ;;  %p693_p8 = scmp.lt.s32.totalorder %s15829_s16, 2 }
 0x14b   : > { %11287 = vmatpush3.bf16.msra.mxu0 %v11639_v0  ;;  %v11687_v16 = vld [vmem:[%s13324_s4] ss:$8 sps:$4 sm:$0xff]   ;;  %v11688_v17 = vld [vmem:[%s13324_s4 + $0x14] ss:$8 sps:$4 sm:$0xff]   ;;  %3467 = vmatprep.subr.bf16.mxu1 %v11685_v15  ;;  %v11690_v19 = vld [vmem:[%s13324_s4 + $0x10] ss:$8 sps:$4 sm:$0xff]  }
 0x14c   : > { %11288 = vmatprep.subr.bf16.mxu0 %v11640_v1  ;;  %3468 = vmatpush1.bf16.msra.mxu1 %v11687_v16  ;;  %v11691_v20 = vld [vmem:[%s13324_s4 + $0x24] ss:$8 sps:$4 sm:$0xff]   ;;  %v11693_v22 = vld [vmem:[%s13324_s4 + $0x20] ss:$8 sps:$4 sm:$0xff]   ;;  %v11694_v23 = vld [vmem:[%s13324_s4 + $0x34] ss:$8 sps:$4 sm:$0xff]  }
 0x14d   : > { %3469 = vmatprep.subr.bf16.mxu1 %v11688_v17  ;;  %v11696_v24 = vld [vmem:[%s13324_s4 + $0x30] ss:$8 sps:$4 sm:$0xff]   ;;  %v11697_v26 = vld [vmem:[%s13324_s4 + $0x44] ss:$8 sps:$4 sm:$0xff]   ;;  %v11699_v28 = vld [vmem:[%s13324_s4 + $0x40] ss:$8 sps:$4 sm:$0xff]  }
 0x14e   : > { %v11700_v29 = vld [vmem:[%s13324_s4 + $0x54] ss:$8 sps:$4 sm:$0xff]   ;;  %v11702_v30 = vld [vmem:[%s13324_s4 + $0x50] ss:$8 sps:$4 sm:$0xff]   ;;  %v11703_v32 = vld [vmem:[%s13324_s4 + $0x64] ss:$8 sps:$4 sm:$0xff]  }
 0x14f   : > { %v11643_v3 = vld [vmem:[%s15836_s24] sm:$0xff]   ;;  %11289 = vmatpush3.bf16.msra.mxu0 %v11640_v1  ;;  %v11644_v5 = vld [vmem:[%s15836_s24 + $0x8] sm:$0xff]   ;;  %v11645_v6 = vld [vmem:[%s15836_s24 + $0x10] sm:$0xff]   ;;  %s15877_s16 = smov (!%p693_p8, %s15829_s16), 2  ;;  %s15870_s30 = sld [smem:[#allocation41_spill]] }
 0x150   : > { %11294 = vmatprep.mubr.msk.bf16.mxu0 %vm1038_vm0, %v11643_v3  ;;  %11290 = vmatprep.subr.bf16.mxu0 %v11641_v2  ;;  %v11646_v7 = vld [vmem:[%s15836_s24 + $0x18] sm:$0xff]   ;;  %v11647_v8 = vld [vmem:[%s15836_s24 + $0x20] sm:$0xff]   ;;  %v11648_v9 = vld [vmem:[%s15836_s24 + $0x28] sm:$0xff]   ;;  %s9939_s20 = sshll.u32 %s15877_s16, 1 }
 0x151   : > { %v11649_v10 = vld [vmem:[%s15836_s24 + $0x30] sm:$0xff]   ;;  %v11650_v11 = vld [vmem:[%s15836_s24 + $0x38] sm:$0xff]   ;;  %v11651_v12 = vld [vmem:[%s15836_s24 + $0x40] sm:$0xff]   ;;  %3470 = vmatpush1.bf16.msra.mxu1 %v11690_v19 }
 0x152   : > { %v11652_v13 = vld [vmem:[%s15836_s24 + $0x48] sm:$0xff]   ;;  %v11653_v14 = vld [vmem:[%s15836_s24 + $0x50] sm:$0xff]   ;;  %v11654_v18 = vld [vmem:[%s15836_s24 + $0x58] sm:$0xff]   ;;  %3471 = vmatprep.subr.bf16.mxu1 %v11691_v20 }
 0x153   : > { %11291 = vmatpush3.bf16.msra.mxu0 %v11641_v2  ;;  %v11655_v21 = vld [vmem:[%s15836_s24 + $0x60] sm:$0xff]   ;;  %v11656_v25 = vld [vmem:[%s15836_s24 + $0x68] sm:$0xff]   ;;  %v11657_v27 = vld [vmem:[%s15836_s24 + $0x70] sm:$0xff]  }
 0x154   : > { %11292 = vmatprep.subr.bf16.mxu0 %v11642_v4  ;;  %v11658_v31 = vld [vmem:[%s15836_s24 + $0x78] sm:$0xff]   ;;  %v11659_v33 = vld [vmem:[%s15836_s24 + $0x80] sm:$0xff]   ;;  %v11705_v34 = vld [vmem:[%s13324_s4 + $0x60] ss:$8 sps:$4 sm:$0xff]  }
 0x155   : > { %3472 = vmatpush1.bf16.msra.mxu1 %v11693_v22  ;;  %v11706_v35 = vld [vmem:[%s13324_s4 + $0x74] ss:$8 sps:$4 sm:$0xff]   ;;  %v11708_v36 = vld [vmem:[%s13324_s4 + $0x70] ss:$8 sps:$4 sm:$0xff]   ;;  %v11660_v37 = vld [vmem:[%s15836_s24 + $0x88] sm:$0xff]   ;;  %s696_s9 = scalar_lea.vmem %s15870_s30, %s9939_s20 }
 0x156   : > { %3473 = vmatprep.subr.bf16.mxu1 %v11694_v23  ;;  %v11710_v38 = vld [vmem:[%s13324_s4 + $0x84] ss:$8 sps:$4 sm:$0xff]   ;;  %v11713_v40 = vld [vmem:[%s13324_s4 + $0x80] ss:$8 sps:$4 sm:$0xff]   ;;  %v11662_v41 = vld [vmem:[%s15836_s24 + $0x98] sm:$0xff]  }
 0x157   : > { %11293 = vmatpush3.bf16.msra.mxu0 %v11642_v4  ;;  %v11661_v39 = vld [vmem:[%s15836_s24 + $0x90] sm:$0xff]   ;;  %v11663_v42 = vld [vmem:[%s15836_s24 + $0xa0] sm:$0xff]   ;;  %v11664_v43 = vld [vmem:[%s15836_s24 + $0xa8] sm:$0xff]  }
 0x158   : > { %v11665_v44 = vld [vmem:[%s15836_s24 + $0xb0] sm:$0xff]   ;;  %v11714_v45 = vld [vmem:[%s13324_s4 + $0x94] ss:$8 sps:$4 sm:$0xff]   ;;  %v11716_v48 = vld [vmem:[%s13324_s4 + $0x90] ss:$8 sps:$4 sm:$0xff]  }
 0x159   : > { %3474 = vmatpush1.bf16.msra.mxu1 %v11696_v24  ;;  %v11666_v46 = vld [vmem:[%s15836_s24 + $0xb8] sm:$0xff]   ;;  %v11667_v47 = vld [vmem:[%s15836_s24 + $0xc0] sm:$0xff]   ;;  %v11717_v49 = vld [vmem:[%s13324_s4 + $0xa4] ss:$8 sps:$4 sm:$0xff]  }
 0x15a   : > { %11295 = vmatmul.mubr.msk.bf16.vlgmr.msra.gmra.mrb[0].mxu0 %vm1038_vm0, %v11644_v5  ;;  %3475 = vmatprep.subr.bf16.mxu1 %v11697_v26  ;;  %v11719_v50 = vld [vmem:[%s13324_s4 + $0xa0] ss:$8 sps:$4 sm:$0xff]   ;;  %v11720_v52 = vld [vmem:[%s13324_s4 + $0xb4] ss:$8 sps:$4 sm:$0xff]   ;;  %v11722_v54 = vld [vmem:[%s13324_s4 + $0xb0] ss:$8 sps:$4 sm:$0xff]  }
 0x15b   : > { %11298 = vmatprep.mubr.msk.bf16.mxu0 %vm1038_vm0, %v11645_v6  ;;  %v11668_v51 = vld [vmem:[%s15836_s24 + $0xc8] sm:$0xff]   ;;  %v11669_v53 = vld [vmem:[%s15836_s24 + $0xd0] sm:$0xff]   ;;  %v11670_v57 = vld [vmem:[%s15836_s24 + $0xd8] sm:$0xff]  }
 0x15c   : > { %v11723_v55 = vld [vmem:[%s13324_s4 + $0xc4] ss:$8 sps:$4 sm:$0xff]   ;;  %v11725_v56 = vld [vmem:[%s13324_s4 + $0xc0] ss:$8 sps:$4 sm:$0xff]   ;;  %v11726_v58 = vld [vmem:[%s13324_s4 + $0xd4] ss:$8 sps:$4 sm:$0xff]  }
 0x15d   : > { %3476 = vmatpush1.bf16.msra.mxu1 %v11699_v28  ;;  %v11671_v59 = vld [vmem:[%s15836_s24 + $0xe0] sm:$0xff]   ;;  %v11729_v61 = vld [vmem:[%s13324_s4 + $0xe4] ss:$8 sps:$4 sm:$0xff]   ;;  %v11731_v62 = vld [vmem:[%s13324_s4 + $0xe0] ss:$8 sps:$4 sm:$0xff]  }
 0x15e   : > { %3477 = vmatprep.subr.bf16.mxu1 %v11700_v29  ;;  %v11728_v60 = vld [vmem:[%s13324_s4 + $0xd0] ss:$8 sps:$4 sm:$0xff]   ;;  %v11672_v63 = vld [vmem:[%s15836_s24 + $0xe8] sm:$0xff]   ;;  %v11732_v0 = vld [vmem:[%s13324_s4 + $0xf4] ss:$8 sps:$4 sm:$0xff]  }
 0x15f   : > { %v11673_v1 = vld [vmem:[%s15836_s24 + $0xf0] sm:$0xff]   ;;  %v11734_v2 = vld [vmem:[%s13324_s4 + $0xf0] ss:$8 sps:$4 sm:$0xff]   ;;  %v11676_v5 = vld [vmem:[%s15836_s24 + $0x108] sm:$0xff]  }
 0x160   : > { %v11674_v3 = vld [vmem:[%s15836_s24 + $0xf8] sm:$0xff]   ;;  %v11675_v4 = vld [vmem:[%s15836_s24 + $0x100] sm:$0xff]   ;;  %v11677_v6 = vld [vmem:[%s15836_s24 + $0x110] sm:$0xff]  }
 0x161   : > { %3478 = vmatpush1.bf16.msra.mxu1 %v11702_v30  ;;  %v11712_v15 = vld [vmem:[%s15836_s24 + $0x158] sm:$0xff]   ;;  %v11737_v16 = vld [vmem:[%s13324_s4 + $0x104] ss:$8 sps:$4 sm:$0xff]   ;;  %v13566_v17 = vld [vmem:[%s13318_s19] ss:$0 sm:$0xff] }
 0x162   : > { %11299 = vmatmul.mubr.msk.bf16.gmra.mrb[4].mxu0 %vm1038_vm0, %v11646_v7  ;;  %3479 = vmatprep.subr.bf16.mxu1 %v11703_v32  ;;  %v11678_v7 = vld [vmem:[%s15836_s24 + $0x118] sm:$0xff]   ;;  %v13572_v20 = vld [vmem:[%s13318_s19 + $0x2] ss:$0 sm:$0xff] }
 0x163   : > { %11302 = vmatprep.mubr.msk.bf16.mxu0 %vm1038_vm0, %v11647_v8  ;;  %v11679_v8 = vld [vmem:[%s15836_s24 + $0x120] sm:$0xff]  }
 0x165   : > { %3480 = vmatpush1.bf16.msra.mxu1 %v11705_v34 }
 0x166   : > { %3481 = vmatprep.subr.bf16.mxu1 %v11706_v35 }
 0x169   : > { %3482 = vmatpush1.bf16.msra.mxu1 %v11708_v36 }
 0x16a   : > { %11303 = vmatmul.mubr.msk.bf16.gmra.mrb[8].mxu0 %vm1038_vm0, %v11648_v9  ;;  %3483 = vmatprep.subr.bf16.mxu1 %v11710_v38  ;;  %v11680_v9 = vld [vmem:[%s15836_s24 + $0x128] sm:$0xff]  }
 0x16b   : > { %11306 = vmatprep.mubr.msk.bf16.mxu0 %vm1038_vm0, %v11649_v10  ;;  %v11681_v10 = vld [vmem:[%s15836_s24 + $0x130] sm:$0xff]  }
 0x16d   : > { %3484 = vmatpush1.bf16.msra.mxu1 %v11713_v40 }
 0x16e   : > { %3485 = vmatprep.subr.bf16.mxu1 %v11714_v45 }
 0x171   : > { %3486 = vmatpush1.bf16.msra.mxu1 %v11716_v48 }
 0x172   : > { %11307 = vmatmul.mubr.msk.bf16.gmra.mrb[12].mxu0 %vm1038_vm0, %v11650_v11  ;;  %3487 = vmatprep.subr.bf16.mxu1 %v11717_v49  ;;  %v11682_v11 = vld [vmem:[%s15836_s24 + $0x138] sm:$0xff]  }
 0x173   : > { %11310 = vmatprep.mubr.msk.bf16.mxu0 %vm1038_vm0, %v11651_v12  ;;  %v11683_v12 = vld [vmem:[%s15836_s24 + $0x140] sm:$0xff]  }
 0x175   : > { %3488 = vmatpush1.bf16.msra.mxu1 %v11719_v50 }
 0x176   : > { %3489 = vmatprep.subr.bf16.mxu1 %v11720_v52 }
 0x179   : > { %3490 = vmatpush1.bf16.msra.mxu1 %v11722_v54 }
 0x17a   : > { %11311 = vmatmul.mubr.msk.bf16.gmra.mrb[16].mxu0 %vm1038_vm0, %v11652_v13  ;;  %3491 = vmatprep.subr.bf16.mxu1 %v11723_v55  ;;  %v11684_v13 = vld [vmem:[%s15836_s24 + $0x148] sm:$0xff]  }
 0x17b   : > { %11314 = vmatprep.mubr.msk.bf16.mxu0 %vm1038_vm0, %v11653_v14  ;;  %v11709_v14 = vld [vmem:[%s15836_s24 + $0x150] sm:$0xff]  }
 0x17d   : > { %3492 = vmatpush1.bf16.msra.mxu1 %v11725_v56 }
 0x17e   : > { %3493 = vmatprep.subr.bf16.mxu1 %v11726_v58 }
 0x181   : > { %3494 = vmatpush1.bf16.msra.mxu1 %v11728_v60 }
 0x182   : > { %11315 = vmatmul.mubr.msk.bf16.gmra.mrb[20].mxu0 %vm1038_vm0, %v11654_v18  ;;  %3495 = vmatprep.subr.bf16.mxu1 %v11729_v61  ;;  %v13569_v18 = vld [vmem:[%s13318_s19 + $0x1] ss:$0 sm:$0xff] }
 0x183   : > { %11318 = vmatprep.mubr.msk.bf16.mxu0 %vm1038_vm0, %v11655_v21 }
 0x185   : > { %3496 = vmatpush1.bf16.msra.mxu1 %v11731_v62 }
 0x186   : > { %3497 = vmatprep.subr.bf16.mxu1 %v11732_v0 }
 0x189   : > { %3498 = vmatpush1.bf16.msra.mxu1 %v11734_v2 }
 0x18a   : > { %11319 = vmatmul.mubr.msk.bf16.gmra.mrb[24].mxu0 %vm1038_vm0, %v11656_v25  ;;  %3580 = vmatprep.subr.bf16.mxu1 %v11737_v16 }
 0x18b   : > { %11322 = vmatprep.mubr.msk.bf16.mxu0 %vm1038_vm0, %v11657_v27 }
 0x192   : > { %11323 = vmatmul.mubr.msk.bf16.gmra.mrb[28].mxu0 %vm1038_vm0, %v11658_v31 }
 0x193   : > { %11326 = vmatprep.mubr.msk.bf16.mxu0 %vm1038_vm0, %v11659_v33 }
 0x19a   : > { %11327 = vmatmul.mubr.msk.bf16.gmra.mrb[32].mxu0 %vm1038_vm0, %v11660_v37 }
 0x19b   : > { %11330 = vmatprep.mubr.msk.bf16.mxu0 %vm1038_vm0, %v11661_v39 }
 0x1a2   : > { %11331 = vmatmul.mubr.msk.bf16.gmra.mrb[36].mxu0 %vm1038_vm0, %v11662_v41 }
 0x1a3   : > { %11334 = vmatprep.mubr.msk.bf16.mxu0 %vm1038_vm0, %v11663_v42 }
 0x1aa   : > { %11335 = vmatmul.mubr.msk.bf16.gmra.mrb[40].mxu0 %vm1038_vm0, %v11664_v43 }
 0x1ab   : > { %11338 = vmatprep.mubr.msk.bf16.mxu0 %vm1038_vm0, %v11665_v44 }
 0x1b2   : > { %11339 = vmatmul.mubr.msk.bf16.gmra.mrb[44].mxu0 %vm1038_vm0, %v11666_v46 }
 0x1b3   : > { %11342 = vmatprep.mubr.msk.bf16.mxu0 %vm1038_vm0, %v11667_v47 }
 0x1ba   : > { %11343 = vmatmul.mubr.msk.bf16.gmra.mrb[48].mxu0 %vm1038_vm0, %v11668_v51 }
 0x1bb   : > { %11346 = vmatprep.mubr.msk.bf16.mxu0 %vm1038_vm0, %v11669_v53 }
 0x1c2   : > { %11347 = vmatmul.mubr.msk.bf16.gmra.mrb[52].mxu0 %vm1038_vm0, %v11670_v57 }
 0x1c3   : > { %11350 = vmatprep.mubr.msk.bf16.mxu0 %vm1038_vm0, %v11671_v59 }
 0x1ca   : > { %11351 = vmatmul.mubr.msk.bf16.gmra.mrb[56].mxu0 %vm1038_vm0, %v11672_v63 }
 0x1cb   : > { %11354 = vmatprep.mubr.msk.bf16.mxu0 %vm1038_vm0, %v11673_v1 }
 0x1d2   : > { %11355 = vmatmul.mubr.msk.bf16.gmra.mrb[60].mxu0 %vm1038_vm0, %v11674_v3 }
 0x1d3   : > { %11358 = vmatprep.mubr.msk.bf16.mxu0 %vm1038_vm0, %v11675_v4 }
 0x1da   : > { %11359 = vmatmul.mubr.msk.bf16.gmra.mrb[64].mxu0 %vm1038_vm0, %v11676_v5 }
 0x1db   : > { %11362 = vmatprep.mubr.msk.bf16.mxu0 %vm1038_vm0, %v11677_v6 }
 0x1e2   : > { %11363 = vmatmul.mubr.msk.bf16.gmra.mrb[68].mxu0 %vm1038_vm0, %v11678_v7 }
 0x1e3   : > { %11366 = vmatprep.mubr.msk.bf16.mxu0 %vm1038_vm0, %v11679_v8 }
 0x1ea   : > { %11367 = vmatmul.mubr.msk.bf16.gmra.mrb[72].mxu0 %vm1038_vm0, %v11680_v9 }
 0x1eb   : > { %11370 = vmatprep.mubr.msk.bf16.mxu0 %vm1038_vm0, %v11681_v10 }
 0x1f2   : > { %11371 = vmatmul.mubr.msk.bf16.gmra.mrb[76].mxu0 %vm1038_vm0, %v11682_v11 }
 0x1f3   : > { %11374 = vmatprep.mubr.msk.bf16.mxu0 %vm1038_vm0, %v11683_v12 }
 0x1fa   : > { %11375 = vmatmul.mubr.msk.bf16.gmra.mrb[80].mxu0 %vm1038_vm0, %v11684_v13 }
 0x1fb   : > { %11378 = vmatprep.mubr.msk.bf16.mxu0 %vm1038_vm0, %v11709_v14 }
 0x202   : > { %11379 = vmatmul.mubr.msk.bf16.gmra.mrb[84].mxu0 %vm1038_vm0, %v11712_v15 }
 0x22d   : > { %v11296_v19 = vpop.f32.mrb[0].mxu0 }
 0x22e   : > { %v1565_v21 = vmul.f32 %v11296_v19, %v13566_v17  ;;  %v1205_v22 = vpop.f32.mrb[1].mxu0 }
 0x22f   : > { %v1563_v23 = vmul.f32 %v13566_v17, %v1205_v22  ;;  %v11297_v24 = vpop.f32.mrb[2].mxu0 }
 0x230   : > { %v1657_v25 = vadd.f32 %v13569_v18, %v1565_v21  ;;  %v1566_v26 = vmul.f32 %v11297_v24, %v13566_v17  ;;  %v1208_v27 = vpop.f32.mrb[3].mxu0 }
 0x231   : > { %v1655_v28 = vadd.f32 %v13569_v18, %v1563_v23  ;;  %v1564_v29 = vmul.f32 %v13566_v17, %v1208_v27 }
 0x232   : > { %vm1745_vm1 = vcmp.gt.f32.partialorder %v1657_v25, 0.0  ;;  %v1837_v30 = vmul.f32 %v13572_v20, %v1657_v25  ;;  %v1658_v31 = vadd.f32 %v13569_v18, %v1566_v26 }
 0x233   : > { %vm1743_vm2 = vcmp.gt.f32.partialorder %v1655_v28, 0.0  ;;  %v1835_v32 = vmul.f32 %v13572_v20, %v1655_v28  ;;  %v1656_v33 = vadd.f32 %v13569_v18, %v1564_v29 }
 0x234   : > { %v1925_v34 = vsel %vm1745_vm1, %v1657_v25, %v1837_v30  ;;  %vm1746_vm3 = vcmp.gt.f32.partialorder %v1658_v31, 0.0  ;;  %v1838_v35 = vmul.f32 %v13572_v20, %v1658_v31  ;;  %v11735_v30 = vld [vmem:[%s13324_s4 + $0x100] ss:$8 sps:$4 sm:$0xff]  }
 0x235   : > { %2013 = vst [vmem:[#allocation2 + $0x10] sm:$0xff] %v1925_v34  ;;  %v13585_v36 = vsel %vm1743_vm2, %v1655_v28, %v1835_v32  ;;  %vm1744_vm4 = vcmp.gt.f32.partialorder %v1656_v33, 0.0  ;;  %v1836_v37 = vmul.f32 %v13572_v20, %v1656_v33  ;;  %v11300_v38 = vpop.f32.mrb[4].mxu0 }
 0x236   : > { %v1926_v39 = vsel %vm1746_vm3, %v1658_v31, %v1838_v35  ;;  %v1569_v40 = vmul.f32 %v11300_v38, %v13566_v17  ;;  %v1221_v41 = vpop.f32.mrb[5].mxu0 }
 0x237   : > { %2014 = vst [vmem:[#allocation2 + $0x18] sm:$0xff] %v1926_v39  ;;  %v1924_v42 = vsel %vm1744_vm4, %v1656_v33, %v1836_v37  ;;  %v1567_v43 = vmul.f32 %v13566_v17, %v1221_v41  ;;  %v11301_v44 = vpop.f32.mrb[6].mxu0 }
 0x238   : > { %2012 = vst [vmem:[#allocation2 + $0x8] sm:$0xff] %v1924_v42  ;;  %v1661_v45 = vadd.f32 %v13569_v18, %v1569_v40  ;;  %v1570_v46 = vmul.f32 %v11301_v44, %v13566_v17  ;;  %v1224_v47 = vpop.f32.mrb[7].mxu0 }
 0x239   : > { %v1659_v48 = vadd.f32 %v13569_v18, %v1567_v43  ;;  %v1568_v49 = vmul.f32 %v13566_v17, %v1224_v47  ;;  %v11740_v43 = vld [vmem:[%s13324_s4 + $0x114] ss:$8 sps:$4 sm:$0xff]   ;;  %v11738_v47 = vld [vmem:[%s13324_s4 + $0x110] ss:$8 sps:$4 sm:$0xff]  }
 0x23a   : > { %vm1749_vm5 = vcmp.gt.f32.partialorder %v1661_v45, 0.0  ;;  %v1841_v50 = vmul.f32 %v13572_v20, %v1661_v45  ;;  %v1662_v51 = vadd.f32 %v13569_v18, %v1570_v46 }
 0x23b   : > { %vm1747_vm6 = vcmp.gt.f32.partialorder %v1659_v48, 0.0  ;;  %v1839_v52 = vmul.f32 %v13572_v20, %v1659_v48  ;;  %v1660_v53 = vadd.f32 %v13569_v18, %v1568_v49 }
 0x23c   : > { %v1929_v54 = vsel %vm1749_vm5, %v1661_v45, %v1841_v50  ;;  %vm1750_vm7 = vcmp.gt.f32.partialorder %v1662_v51, 0.0  ;;  %v1842_v55 = vmul.f32 %v13572_v20, %v1662_v51  ;;  %v2132_v56 = vld [vmem:[#allocation2 + $0x11] sm:$0xf] }
 0x23d   : > { %2017 = vst [vmem:[#allocation2 + $0x30] sm:$0xff] %v1929_v54  ;;  %v1927_v57 = vsel %vm1747_vm6, %v1659_v48, %v1839_v52  ;;  %vm1748_vm8 = vcmp.gt.f32.partialorder %v1660_v53, 0.0  ;;  %v1840_v58 = vmul.f32 %v13572_v20, %v1660_v53  ;;  %v11304_v59 = vpop.f32.mrb[8].mxu0  ;;  %2148 = vst [vmem:[#allocation3 + $0x50] sm:$0xf] %v2132_v56 }
 0x23e   : > { %v2163_v60 = vld [vmem:[#allocation2 + $0x12] sm:$0xff]  ;;  %v2164_v61 = vld [vmem:[#allocation2 + $0x1a] sm:$0xf]  ;;  %2015 = vst [vmem:[#allocation2 + $0x20] sm:$0xff] %v1927_v57  ;;  %v1930_v62 = vsel %vm1750_vm7, %v1662_v51, %v1842_v55  ;;  %v1573_v63 = vmul.f32 %v11304_v59, %v13566_v17  ;;  %v1237_v0 = vpop.f32.mrb[9].mxu0 }
 0x23f   : > { %2179 = vst [vmem:[#allocation3 + $0x10] sm:$0xff] %v2163_v60  ;;  %2180 = vst [vmem:[#allocation3 + $0x58] sm:$0xf] %v2164_v61  ;;  %v1928_v1 = vsel %vm1748_vm8, %v1660_v53, %v1840_v58  ;;  %v1571_v2 = vmul.f32 %v13566_v17, %v1237_v0  ;;  %v11305_v3 = vpop.f32.mrb[10].mxu0  ;;  %v2131_v4 = vld [vmem:[#allocation2 + $0x9] sm:$0xff] }
 0x240   : > { %2018 = vst [vmem:[#allocation2 + $0x38] sm:$0xff] %v1930_v62  ;;  %v2100_v5 = vld [vmem:[#allocation2 + $0x8] sm:$0xf]  ;;  %2016 = vst [vmem:[#allocation2 + $0x28] sm:$0xff] %v1928_v1  ;;  %v1665_v6 = vadd.f32 %v13569_v18, %v1573_v63  ;;  %v1574_v7 = vmul.f32 %v11305_v3, %v13566_v17  ;;  %v1240_v8 = vpop.f32.mrb[11].mxu0 }
 0x241   : > { %2116 = vst [vmem:[#allocation3 + $0x48] sm:$0xf] %v2100_v5  ;;  %v1663_v9 = vadd.f32 %v13569_v18, %v1571_v2  ;;  %v1572_v10 = vmul.f32 %v13566_v17, %v1240_v8  ;;  %v11743_v55 = vld [vmem:[%s13324_s4 + $0x124] ss:$8 sps:$4 sm:$0xff]   ;;  %v11741_v3 = vld [vmem:[%s13324_s4 + $0x120] ss:$8 sps:$4 sm:$0xff]  }
 0x242   : > { %vm1753_vm9 = vcmp.gt.f32.partialorder %v1665_v6, 0.0  ;;  %v1845_v11 = vmul.f32 %v13572_v20, %v1665_v6  ;;  %v1666_v12 = vadd.f32 %v13569_v18, %v1574_v7  ;;  %v11746_v8 = vld [vmem:[%s13324_s4 + $0x134] ss:$8 sps:$4 sm:$0xff]  }
 0x243   : > { %vm1751_vm10 = vcmp.gt.f32.partialorder %v1663_v9, 0.0  ;;  %v1843_v13 = vmul.f32 %v13572_v20, %v1663_v9  ;;  %v1664_v14 = vadd.f32 %v13569_v18, %v1572_v10 }
 0x244   : > { %v1933_v15 = vsel %vm1753_vm9, %v1665_v6, %v1845_v11  ;;  %vm1754_vm11 = vcmp.gt.f32.partialorder %v1666_v12, 0.0  ;;  %v1846_v16 = vmul.f32 %v13572_v20, %v1666_v12  ;;  %v2397_v19 = vld [vmem:[#allocation3 + $0x50] sm:$0xff]  ;;  %v11744_v11 = vld [vmem:[%s13324_s4 + $0x130] ss:$8 sps:$4 sm:$0xff]  }
 0x245   : > { %2021 = vst [vmem:[#allocation2 + $0x50] sm:$0xff] %v1933_v15  ;;  %v1931_v21 = vsel %vm1751_vm10, %v1663_v9, %v1843_v13  ;;  %vm1752_vm12 = vcmp.gt.f32.partialorder %v1664_v14, 0.0  ;;  %v1844_v22 = vmul.f32 %v13572_v20, %v1664_v14  ;;  %v11308_v23 = vpop.f32.mrb[12].mxu0  ;;  %v2532_v24 = vpack.c.bf16 %v2397_v19, %v2131_v4  ;;  %v2195_v25 = vld [vmem:[#allocation2 + $0x1b] sm:$0xff]  ;;  %v2196_v31 = vld [vmem:[#allocation2 + $0x23] sm:$0xf] }
 0x246   : > { %2019 = vst [vmem:[#allocation2 + $0x40] sm:$0xff] %v1931_v21  ;;  %v13612_v27 = vsel %vm1754_vm11, %v1666_v12, %v1846_v16  ;;  %v1577_v28 = vmul.f32 %v11308_v23, %v13566_v17  ;;  %v1253_v29 = vpop.f32.mrb[13].mxu0  ;;  %2211 = vst [vmem:[#allocation3 + $0x18] sm:$0xff] %v2195_v25  ;;  %v11749_v21 = vld [vmem:[%s13324_s4 + $0x144] ss:$8 sps:$4 sm:$0xff]  }
 0x247   : > { %v2291_v26 = vld [vmem:[#allocation2 + $0x36] sm:$0xff]  ;;  %v2227_v32 = vld [vmem:[#allocation2 + $0x24] sm:$0xff]  ;;  %v2228_v33 = vld [vmem:[#allocation2 + $0x2c] sm:$0xf]  ;;  %v1932_v34 = vsel %vm1752_vm12, %v1664_v14, %v1844_v22  ;;  %v1575_v35 = vmul.f32 %v13566_v17, %v1253_v29  ;;  %v11309_v37 = vpop.f32.mrb[14].mxu0  ;;  %3499 = vmatprep.mubr.bf16.mxu1 %v2532_v24 }
 0x248   : > { %2307 = vst [vmem:[#allocation3 + $0x30] sm:$0xff] %v2291_v26  ;;  %v2396_v38 = vld [vmem:[#allocation3 + $0x48] sm:$0xff]  ;;  %2212 = vst [vmem:[#allocation3 + $0x60] sm:$0xf] %v2196_v31  ;;  %v1669_v39 = vadd.f32 %v13569_v18, %v1577_v28  ;;  %v1578_v40 = vmul.f32 %v11309_v37, %v13566_v17  ;;  %v1256_v41 = vpop.f32.mrb[15].mxu0 }
 0x249   : > { %2243 = vst [vmem:[#allocation3 + $0x20] sm:$0xff] %v2227_v32  ;;  %2244 = vst [vmem:[#allocation3 + $0x68] sm:$0xf] %v2228_v33  ;;  %v2531_v42 = vpack.c.bf16 %v2396_v38, %v13585_v36  ;;  %v2259_v44 = vld [vmem:[#allocation2 + $0x2d] sm:$0xff]  ;;  %v1667_v45 = vadd.f32 %v13569_v18, %v1575_v35  ;;  %v1576_v46 = vmul.f32 %v13566_v17, %v1256_v41  ;;  %v2260_v48 = vld [vmem:[#allocation2 + $0x35] sm:$0xf] }
 0x24a   : > { %2020 = vst [vmem:[#allocation2 + $0x48] sm:$0xff] %v1932_v34  ;;  %2371 = vst [vmem:[#allocation3 + $0x40] sm:$0xff] %v1932_v34  ;;  %vm1757_vm13 = vcmp.gt.f32.partialorder %v1669_v39, 0.0  ;;  %v1849_v49 = vmul.f32 %v13572_v20, %v1669_v39  ;;  %v1670_v50 = vadd.f32 %v13569_v18, %v1578_v40  ;;  %v11747_v38 = vld [vmem:[%s13324_s4 + $0x140] ss:$8 sps:$4 sm:$0xff]  }
 0x24b   : > { %2275 = vst [vmem:[#allocation3 + $0x28] sm:$0xff] %v2259_v44  ;;  %3500 = vmatmul.mubr.bf16.vlgmr.msra.gmra.mrb[0].mxu1 %v2531_v42  ;;  %2276 = vst [vmem:[#allocation3 + $0x70] sm:$0xf] %v2260_v48  ;;  %vm1755_vm14 = vcmp.gt.f32.partialorder %v1667_v45, 0.0  ;;  %v1847_v36 = vmul.f32 %v13572_v20, %v1667_v45  ;;  %v1668_v51 = vadd.f32 %v13569_v18, %v1576_v46  ;;  %v11752_v42 = vld [vmem:[%s13324_s4 + $0x154] ss:$8 sps:$4 sm:$0xff]  }
 0x24c   : > { %3581 = vmatpush1.bf16.msra.mxu1 %v11735_v30  ;;  %v2356_v52 = vld [vmem:[#allocation2 + $0x50] sm:$0xf]  ;;  %v1937_v53 = vsel %vm1757_vm13, %v1669_v39, %v1849_v49  ;;  %vm1758_vm15 = vcmp.gt.f32.partialorder %v1670_v50, 0.0  ;;  %v1850_v54 = vmul.f32 %v13572_v20, %v1670_v50 }
 0x24d   : > { %3582 = vmatprep.subr.bf16.mxu1 %v11740_v43  ;;  %2372 = vst [vmem:[#allocation3 + $0x88] sm:$0xf] %v2356_v52  ;;  %v2292_v56 = vld [vmem:[#allocation2 + $0x3e] sm:$0xf]  ;;  %2025 = vst [vmem:[#allocation2 + $0x70] sm:$0xff] %v1937_v53  ;;  %v1935_v57 = vsel %vm1755_vm14, %v1667_v45, %v1847_v36  ;;  %vm1756_vm1 = vcmp.gt.f32.partialorder %v1668_v51, 0.0  ;;  %v1848_v58 = vmul.f32 %v13572_v20, %v1668_v51 }
 0x24e   : > { %v11312_v59 = vpop.f32.mrb[16].mxu0  ;;  %2308 = vst [vmem:[#allocation3 + $0x78] sm:$0xf] %v2292_v56  ;;  %2023 = vst [vmem:[#allocation2 + $0x60] sm:$0xff] %v1935_v57  ;;  %v1938_v60 = vsel %vm1758_vm15, %v1670_v50, %v1850_v54  ;;  %v2323_v63 = vld [vmem:[#allocation2 + $0x3f] sm:$0xff] }
 0x24f   : > { %v1581_v61 = vmul.f32 %v11312_v59, %v13566_v17  ;;  %v1269_v62 = vpop.f32.mrb[17].mxu0  ;;  %2026 = vst [vmem:[#allocation2 + $0x78] sm:$0xff] %v1938_v60  ;;  %v1936_v0 = vsel %vm1756_vm1, %v1668_v51, %v1848_v58  ;;  %2339 = vst [vmem:[#allocation3 + $0x38] sm:$0xff] %v2323_v63  ;;  %v11755_v53 = vld [vmem:[%s13324_s4 + $0x164] ss:$8 sps:$4 sm:$0xff]  }
 0x250   : > { %v1579_v1 = vmul.f32 %v13566_v17, %v1269_v62  ;;  %v11313_v2 = vpop.f32.mrb[18].mxu0  ;;  %3583 = vmatpush1.bf16.msra.mxu1 %v11738_v47  ;;  %2024 = vst [vmem:[#allocation2 + $0x68] sm:$0xff] %v1936_v0  ;;  %v11750_v47 = vld [vmem:[%s13324_s4 + $0x150] ss:$8 sps:$4 sm:$0xff]  }
 0x251   : > { %v2324_v4 = vld [vmem:[#allocation2 + $0x47] sm:$0xf]  ;;  %v1673_v5 = vadd.f32 %v13569_v18, %v1581_v61  ;;  %v1582_v6 = vmul.f32 %v11313_v2, %v13566_v17  ;;  %v1272_v7 = vpop.f32.mrb[19].mxu0  ;;  %3584 = vmatprep.subr.bf16.mxu1 %v11743_v55 }
 0x252   : > { %2340 = vst [vmem:[#allocation3 + $0x80] sm:$0xf] %v2324_v4  ;;  %v1671_v9 = vadd.f32 %v13569_v18, %v1579_v1  ;;  %v1580_v10 = vmul.f32 %v13566_v17, %v1272_v7 }
 0x253   : > { %vm1761_vm2 = vcmp.gt.f32.partialorder %v1673_v5, 0.0  ;;  %v1853_v12 = vmul.f32 %v13572_v20, %v1673_v5  ;;  %v1674_v13 = vadd.f32 %v13569_v18, %v1582_v6 }
 0x254   : > { %vm1759_vm3 = vcmp.gt.f32.partialorder %v1671_v9, 0.0  ;;  %v1851_v14 = vmul.f32 %v13572_v20, %v1671_v9  ;;  %v1672_v15 = vadd.f32 %v13569_v18, %v1580_v10  ;;  %3585 = vmatpush1.bf16.msra.mxu1 %v11741_v3  ;;  %v2166_v22 = vld [vmem:[#allocation2 + $0x72] sm:$0xf] }
 0x255   : > { %v1941_v16 = vsel %vm1761_vm2, %v1673_v5, %v1853_v12  ;;  %vm1762_vm4 = vcmp.gt.f32.partialorder %v1674_v13, 0.0  ;;  %v1854_v19 = vmul.f32 %v13572_v20, %v1674_v13  ;;  %3586 = vmatprep.subr.bf16.mxu1 %v11746_v8  ;;  %v11316_v25 = vpop.f32.mrb[20].mxu0  ;;  %v2102_v26 = vld [vmem:[#allocation2 + $0x60] sm:$0xf]  ;;  %2182 = vst [vmem:[#allocation3 + $0xe8] sm:$0xf] %v2166_v22 }
 0x256   : > { %2029 = vst [vmem:[#allocation2 + $0x90] sm:$0xff] %v1941_v16  ;;  %v1939_v23 = vsel %vm1759_vm3, %v1671_v9, %v1851_v14  ;;  %vm1760_vm5 = vcmp.gt.f32.partialorder %v1672_v15, 0.0  ;;  %v1852_v24 = vmul.f32 %v13572_v20, %v1672_v15  ;;  %v1585_v29 = vmul.f32 %v11316_v25, %v13566_v17  ;;  %v1285_v30 = vpop.f32.mrb[21].mxu0  ;;  %2118 = vst [vmem:[#allocation3 + $0xd8] sm:$0xf] %v2102_v26  ;;  %v2197_v31 = vld [vmem:[#allocation2 + $0x73] sm:$0xff] }
 0x257   : > { %2027 = vst [vmem:[#allocation2 + $0x80] sm:$0xff] %v1939_v23  ;;  %v1942_v28 = vsel %vm1762_vm4, %v1674_v13, %v1854_v19  ;;  %v1583_v33 = vmul.f32 %v13566_v17, %v1285_v30  ;;  %v11317_v34 = vpop.f32.mrb[22].mxu0  ;;  %v13650_v35 = vld [vmem:[#allocation2 + $0x61] sm:$0xff]  ;;  %v2134_v37 = vld [vmem:[#allocation2 + $0x69] sm:$0xf]  ;;  %2213 = vst [vmem:[#allocation3 + $0xa8] sm:$0xff] %v2197_v31 }
 0x258   : > { %2030 = vst [vmem:[#allocation2 + $0x98] sm:$0xff] %v1942_v28  ;;  %v1940_v32 = vsel %vm1760_vm5, %v1672_v15, %v1852_v24  ;;  %3587 = vmatpush1.bf16.msra.mxu1 %v11744_v11  ;;  %v1677_v39 = vadd.f32 %v13569_v18, %v1585_v29  ;;  %v1586_v40 = vmul.f32 %v11317_v34, %v13566_v17  ;;  %v1288_v41 = vpop.f32.mrb[23].mxu0  ;;  %2150 = vst [vmem:[#allocation3 + $0xe0] sm:$0xf] %v2134_v37  ;;  %v2198_v43 = vld [vmem:[#allocation2 + $0x7b] sm:$0xf] }
 0x259   : > { %2028 = vst [vmem:[#allocation2 + $0x88] sm:$0xff] %v1940_v32  ;;  %3588 = vmatprep.subr.bf16.mxu1 %v11749_v21  ;;  %v2165_v44 = vld [vmem:[#allocation2 + $0x6a] sm:$0xff]  ;;  %v1675_v45 = vadd.f32 %v13569_v18, %v1583_v33  ;;  %v1584_v46 = vmul.f32 %v13566_v17, %v1288_v41  ;;  %2214 = vst [vmem:[#allocation3 + $0xf0] sm:$0xf] %v2198_v43  ;;  %v11758_v16 = vld [vmem:[%s13324_s4 + $0x174] ss:$8 sps:$4 sm:$0xff]  }
 0x25a   : > { %2181 = vst [vmem:[#allocation3 + $0xa0] sm:$0xff] %v2165_v44  ;;  %vm1765_vm6 = vcmp.gt.f32.partialorder %v1677_v39, 0.0  ;;  %v1857_v48 = vmul.f32 %v13572_v20, %v1677_v39  ;;  %v1678_v49 = vadd.f32 %v13569_v18, %v1586_v40  ;;  %v11753_v11 = vld [vmem:[%s13324_s4 + $0x160] ss:$8 sps:$4 sm:$0xff]   ;;  %v11761_v26 = vld [vmem:[%s13324_s4 + $0x184] ss:$8 sps:$4 sm:$0xff]  }
 0x25b   : > { %vm1763_vm7 = vcmp.gt.f32.partialorder %v1675_v45, 0.0  ;;  %v1855_v50 = vmul.f32 %v13572_v20, %v1675_v45  ;;  %v1676_v36 = vadd.f32 %v13569_v18, %v1584_v46 }
 0x25c   : > { %3589 = vmatpush1.bf16.msra.mxu1 %v11747_v38  ;;  %v13663_v51 = vsel %vm1765_vm6, %v1677_v39, %v1857_v48  ;;  %vm1766_vm8 = vcmp.gt.f32.partialorder %v1678_v49, 0.0  ;;  %v1858_v52 = vmul.f32 %v13572_v20, %v1678_v49  ;;  %v11759_v38 = vld [vmem:[%s13324_s4 + $0x180] ss:$8 sps:$4 sm:$0xff]  }
 0x25d   : > { %3590 = vmatprep.subr.bf16.mxu1 %v11752_v42  ;;  %v1943_v54 = vsel %vm1763_vm7, %v1675_v45, %v1855_v50  ;;  %vm1764_vm9 = vcmp.gt.f32.partialorder %v1676_v36, 0.0  ;;  %v1856_v55 = vmul.f32 %v13572_v20, %v1676_v36  ;;  %v11320_v56 = vpop.f32.mrb[24].mxu0  ;;  %v2414_v57 = vld [vmem:[#allocation3 + $0xd8] sm:$0xff] }
 0x25e   : > { %v2229_v58 = vld [vmem:[#allocation2 + $0x7c] sm:$0xff]  ;;  %v2230_v59 = vld [vmem:[#allocation2 + $0x84] sm:$0xf]  ;;  %2031 = vst [vmem:[#allocation2 + $0xa0] sm:$0xff] %v1943_v54  ;;  %v1946_v60 = vsel %vm1766_vm8, %v1678_v49, %v1858_v52  ;;  %v1589_v61 = vmul.f32 %v11320_v56, %v13566_v17  ;;  %v1301_v62 = vpop.f32.mrb[25].mxu0  ;;  %v2540_v15 = vpack.c.bf16 %v2414_v57, %v13612_v27 }
 0x25f   : > { %2245 = vst [vmem:[#allocation3 + $0xb0] sm:$0xff] %v2229_v58  ;;  %2246 = vst [vmem:[#allocation3 + $0xf8] sm:$0xf] %v2230_v59  ;;  %v2325_v63 = vld [vmem:[#allocation2 + $0x97] sm:$0xff]  ;;  %v1944_v1 = vsel %vm1764_vm9, %v1676_v36, %v1856_v55  ;;  %v1587_v2 = vmul.f32 %v13566_v17, %v1301_v62  ;;  %v11321_v3 = vpop.f32.mrb[26].mxu0  ;;  %v2415_v4 = vld [vmem:[#allocation3 + $0xe0] sm:$0xff] }
 0x260   : > { %v2294_v0 = vld [vmem:[#allocation2 + $0x96] sm:$0xf]  ;;  %2034 = vst [vmem:[#allocation2 + $0xb8] sm:$0xff] %v1946_v60  ;;  %3591 = vmatpush1.bf16.msra.mxu1 %v11750_v47  ;;  %v2261_v5 = vld [vmem:[#allocation2 + $0x85] sm:$0xff]  ;;  %v2262_v6 = vld [vmem:[#allocation2 + $0x8d] sm:$0xf]  ;;  %v1681_v7 = vadd.f32 %v13569_v18, %v1589_v61  ;;  %v1590_v8 = vmul.f32 %v11321_v3, %v13566_v17  ;;  %v2541_v10 = vpack.c.bf16 %v2415_v4, %v13650_v35 }
 0x261   : > { %2341 = vst [vmem:[#allocation3 + $0xc8] sm:$0xff] %v2325_v63  ;;  %2310 = vst [vmem:[#allocation3 + $0x108] sm:$0xf] %v2294_v0  ;;  %v1304_v9 = vpop.f32.mrb[27].mxu0  ;;  %3592 = vmatprep.subr.bf16.mxu1 %v11755_v53  ;;  %v2293_v12 = vld [vmem:[#allocation2 + $0x8e] sm:$0xff]  ;;  %v1679_v13 = vadd.f32 %v13569_v18, %v1587_v2 }
 0x262   : > { %2032 = vst [vmem:[#allocation2 + $0xa8] sm:$0xff] %v1944_v1  ;;  %2277 = vst [vmem:[#allocation3 + $0xb8] sm:$0xff] %v2261_v5  ;;  %v1588_v14 = vmul.f32 %v13566_v17, %v1304_v9  ;;  %vm1769_vm10 = vcmp.gt.f32.partialorder %v1681_v7, 0.0  ;;  %v1861_v19 = vmul.f32 %v13572_v20, %v1681_v7  ;;  %v1682_v21 = vadd.f32 %v13569_v18, %v1590_v8  ;;  %v11756_v27 = vld [vmem:[%s13324_s4 + $0x170] ss:$8 sps:$4 sm:$0xff]  }
 0x263   : > { %2278 = vst [vmem:[#allocation3 + $0x100] sm:$0xf] %v2262_v6  ;;  %2309 = vst [vmem:[#allocation3 + $0xc0] sm:$0xff] %v2293_v12  ;;  %3509 = vmatprep.mubr.bf16.mxu1 %v2541_v10  ;;  %vm1767_vm11 = vcmp.gt.f32.partialorder %v1679_v13, 0.0  ;;  %v1859_v22 = vmul.f32 %v13572_v20, %v1679_v13  ;;  %v11764_v42 = vld [vmem:[%s13324_s4 + $0x194] ss:$8 sps:$4 sm:$0xff]  }
 0x264   : > { %v1680_v23 = vadd.f32 %v13569_v18, %v1588_v14  ;;  %3510 = vmatmul.mubr.bf16.gmra.mrb[4].mxu1 %v2540_v15  ;;  %v1949_v24 = vsel %vm1769_vm10, %v1681_v7, %v1861_v19  ;;  %vm1770_vm12 = vcmp.gt.f32.partialorder %v1682_v21, 0.0  ;;  %v1862_v25 = vmul.f32 %v13572_v20, %v1682_v21  ;;  %v11762_v53 = vld [vmem:[%s13324_s4 + $0x190] ss:$8 sps:$4 sm:$0xff]   ;;  %v11767_v54 = vld [vmem:[%s13324_s4 + $0x1a4] ss:$8 sps:$4 sm:$0xff]  }
 0x265   : > { %3593 = vmatpush1.bf16.msra.mxu1 %v11753_v11  ;;  %2037 = vst [vmem:[#allocation2 + $0xd0] sm:$0xff] %v1949_v24  ;;  %v1947_v28 = vsel %vm1767_vm11, %v1679_v13, %v1859_v22  ;;  %v11324_v30 = vpop.f32.mrb[28].mxu0  ;;  %v2326_v31 = vld [vmem:[#allocation2 + $0x9f] sm:$0xf]  ;;  %v11765_v7 = vld [vmem:[%s13324_s4 + $0x1a0] ss:$8 sps:$4 sm:$0xff]  }
 0x266   : > { %vm1768_vm13 = vcmp.gt.f32.partialorder %v1680_v23, 0.0  ;;  %v1860_v29 = vmul.f32 %v13572_v20, %v1680_v23  ;;  %3594 = vmatprep.subr.bf16.mxu1 %v11758_v16  ;;  %v2357_v32 = vld [vmem:[#allocation2 + $0xa0] sm:$0xff]  ;;  %2035 = vst [vmem:[#allocation2 + $0xc0] sm:$0xff] %v1947_v28  ;;  %v1950_v33 = vsel %vm1770_vm12, %v1682_v21, %v1862_v25  ;;  %v1593_v34 = vmul.f32 %v11324_v30, %v13566_v17  ;;  %v1317_v35 = vpop.f32.mrb[29].mxu0  ;;  %v11773_v25 = vld [vmem:[%s13324_s4 + $0x1c4] ss:$8 sps:$4 sm:$0xff]  }
 0x267   : > { %v2104_v37 = vld [vmem:[#allocation2 + $0xb8] sm:$0xf]  ;;  %2342 = vst [vmem:[#allocation3 + $0x110] sm:$0xf] %v2326_v31  ;;  %2373 = vst [vmem:[#allocation3 + $0xd0] sm:$0xff] %v2357_v32  ;;  %v1591_v40 = vmul.f32 %v13566_v17, %v1317_v35  ;;  %v11325_v41 = vpop.f32.mrb[30].mxu0 }
 0x268   : > { %2038 = vst [vmem:[#allocation2 + $0xd8] sm:$0xff] %v1950_v33  ;;  %v1948_v39 = vsel %vm1768_vm13, %v1680_v23, %v1860_v29  ;;  %2120 = vst [vmem:[#allocation3 + $0x168] sm:$0xf] %v2104_v37  ;;  %v1685_v44 = vadd.f32 %v13569_v18, %v1593_v34  ;;  %v1594_v45 = vmul.f32 %v11325_v41, %v13566_v17  ;;  %v1320_v46 = vpop.f32.mrb[31].mxu0  ;;  %v11770_v12 = vld [vmem:[%s13324_s4 + $0x1b4] ss:$8 sps:$4 sm:$0xff]  }
 0x269   : > { %v2358_v43 = vld [vmem:[#allocation2 + $0xa8] sm:$0xf]  ;;  %2036 = vst [vmem:[#allocation2 + $0xc8] sm:$0xff] %v1948_v39  ;;  %3595 = vmatpush1.bf16.msra.mxu1 %v11756_v27  ;;  %v1683_v47 = vadd.f32 %v13569_v18, %v1591_v40  ;;  %v1592_v48 = vmul.f32 %v13566_v17, %v1320_v46  ;;  %v11768_v24 = vld [vmem:[%s13324_s4 + $0x1b0] ss:$8 sps:$4 sm:$0xff]  }
 0x26a   : > { %2374 = vst [vmem:[#allocation3 + $0x118] sm:$0xf] %v2358_v43  ;;  %3596 = vmatprep.subr.bf16.mxu1 %v11761_v26  ;;  %vm1773_vm14 = vcmp.gt.f32.partialorder %v1685_v44, 0.0  ;;  %v1865_v49 = vmul.f32 %v13572_v20, %v1685_v44  ;;  %v1686_v50 = vadd.f32 %v13569_v18, %v1594_v45  ;;  %v13721_v33 = vld [vmem:[%s13318_s19] ss:$0 sm:$0xff] }
 0x26b   : > { %vm1771_vm15 = vcmp.gt.f32.partialorder %v1683_v47, 0.0  ;;  %v1863_v36 = vmul.f32 %v13572_v20, %v1683_v47  ;;  %v1684_v52 = vadd.f32 %v13569_v18, %v1592_v48  ;;  %v11771_v43 = vld [vmem:[%s13324_s4 + $0x1c0] ss:$8 sps:$4 sm:$0xff]   ;;  %v13732_v45 = vld [vmem:[%s13318_s19 + $0x1] ss:$0 sm:$0xff] }
 0x26c   : > { %v1953_v55 = vsel %vm1773_vm14, %v1685_v44, %v1865_v49  ;;  %vm1774_vm1 = vcmp.gt.f32.partialorder %v1686_v50, 0.0  ;;  %v1866_v56 = vmul.f32 %v13572_v20, %v1686_v50  ;;  %v2200_v57 = vld [vmem:[#allocation2 + $0xd3] sm:$0xf]  ;;  %v11776_v49 = vld [vmem:[%s13324_s4 + $0x1d4] ss:$8 sps:$4 sm:$0xff]  }
 0x26d   : > { %3597 = vmatpush1.bf16.msra.mxu1 %v11759_v38  ;;  %2041 = vst [vmem:[#allocation2 + $0xf0] sm:$0xff] %v1953_v55  ;;  %v1951_v58 = vsel %vm1771_vm15, %v1683_v47, %v1863_v36  ;;  %vm1772_vm2 = vcmp.gt.f32.partialorder %v1684_v52, 0.0  ;;  %v1864_v59 = vmul.f32 %v13572_v20, %v1684_v52  ;;  %v11328_v60 = vpop.f32.mrb[32].mxu0  ;;  %v13702_v61 = vld [vmem:[#allocation2 + $0xb9] sm:$0xff]  ;;  %v2136_v62 = vld [vmem:[#allocation2 + $0xc1] sm:$0xf] }
 0x26e   : > { %3598 = vmatprep.subr.bf16.mxu1 %v11764_v42  ;;  %2216 = vst [vmem:[#allocation3 + $0x180] sm:$0xf] %v2200_v57  ;;  %2039 = vst [vmem:[#allocation2 + $0xe0] sm:$0xff] %v1951_v58  ;;  %v1954_v63 = vsel %vm1774_vm1, %v1686_v50, %v1866_v56  ;;  %v1597_v0 = vmul.f32 %v11328_v60, %v13566_v17  ;;  %v1333_v1 = vpop.f32.mrb[33].mxu0  ;;  %v11779_v60 = vld [vmem:[%s13324_s4 + $0x1e4] ss:$8 sps:$4 sm:$0xff]  }
 0x26f   : > { %2152 = vst [vmem:[#allocation3 + $0x170] sm:$0xf] %v2136_v62  ;;  %v2231_v2 = vld [vmem:[#allocation2 + $0xd4] sm:$0xff]  ;;  %v2232_v3 = vld [vmem:[#allocation2 + $0xdc] sm:$0xf]  ;;  %2042 = vst [vmem:[#allocation2 + $0xf8] sm:$0xff] %v1954_v63  ;;  %v1952_v4 = vsel %vm1772_vm2, %v1684_v52, %v1864_v59  ;;  %v1595_v5 = vmul.f32 %v13566_v17, %v1333_v1 }
 0x270   : > { %v11329_v6 = vpop.f32.mrb[34].mxu0  ;;  %v2199_v8 = vld [vmem:[#allocation2 + $0xcb] sm:$0xff]  ;;  %2247 = vst [vmem:[#allocation3 + $0x140] sm:$0xff] %v2231_v2  ;;  %2248 = vst [vmem:[#allocation3 + $0x188] sm:$0xf] %v2232_v3  ;;  %v1689_v9 = vadd.f32 %v13569_v18, %v1597_v0  ;;  %v2167_v13 = vld [vmem:[#allocation2 + $0xc2] sm:$0xff] }
 0x271   : > { %2040 = vst [vmem:[#allocation2 + $0xe8] sm:$0xff] %v1952_v4  ;;  %v1598_v10 = vmul.f32 %v11329_v6, %v13566_v17  ;;  %v1336_v11 = vpop.f32.mrb[35].mxu0  ;;  %3599 = vmatpush1.bf16.msra.mxu1 %v11762_v53  ;;  %2215 = vst [vmem:[#allocation3 + $0x138] sm:$0xff] %v2199_v8  ;;  %v2168_v14 = vld [vmem:[#allocation2 + $0xca] sm:$0xf]  ;;  %v1687_v15 = vadd.f32 %v13569_v18, %v1595_v5 }
 0x272   : > { %v1596_v16 = vmul.f32 %v13566_v17, %v1336_v11  ;;  %3600 = vmatprep.subr.bf16.mxu1 %v11767_v54  ;;  %2183 = vst [vmem:[#allocation3 + $0x130] sm:$0xff] %v2167_v13  ;;  %2184 = vst [vmem:[#allocation3 + $0x178] sm:$0xf] %v2168_v14  ;;  %vm1777_vm3 = vcmp.gt.f32.partialorder %v1689_v9, 0.0  ;;  %v1869_v19 = vmul.f32 %v13572_v20, %v1689_v9  ;;  %v2432_v26 = vld [vmem:[#allocation3 + $0x168] sm:$0xff] }
 0x273   : > { %v1690_v21 = vadd.f32 %v13569_v18, %v1598_v10  ;;  %vm1775_vm4 = vcmp.gt.f32.partialorder %v1687_v15, 0.0  ;;  %v1867_v22 = vmul.f32 %v13572_v20, %v1687_v15  ;;  %v2549_v42 = vpack.c.bf16 %v2432_v26, %v13663_v51  ;;  %v13740_v54 = vld [vmem:[%s13318_s19 + $0x2] ss:$0 sm:$0xff] }
 0x274   : > { %v1688_v23 = vadd.f32 %v13569_v18, %v1596_v16  ;;  %v1957_v27 = vsel %vm1777_vm3, %v1689_v9, %v1869_v19  ;;  %v11774_v59 = vld [vmem:[%s13324_s4 + $0x1d0] ss:$8 sps:$4 sm:$0xff]  }
 0x275   : > { %vm1778_vm5 = vcmp.gt.f32.partialorder %v1690_v21, 0.0  ;;  %v1870_v17 = vmul.f32 %v13572_v20, %v1690_v21  ;;  %3601 = vmatpush1.bf16.msra.mxu1 %v11765_v7  ;;  %2045 = vst [vmem:[#allocation2 + $0x110] sm:$0xff] %v1957_v27  ;;  %v1955_v28 = vsel %vm1775_vm4, %v1687_v15, %v1867_v22  ;;  %v11332_v30 = vpop.f32.mrb[36].mxu0  ;;  %v2263_v32 = vld [vmem:[#allocation2 + $0xdd] sm:$0xff]  ;;  %v11777_v15 = vld [vmem:[%s13324_s4 + $0x1e0] ss:$8 sps:$4 sm:$0xff]  }
 0x276   : > { %vm1776_vm6 = vcmp.gt.f32.partialorder %v1688_v23, 0.0  ;;  %v1868_v29 = vmul.f32 %v13572_v20, %v1688_v23  ;;  %v2433_v31 = vld [vmem:[#allocation3 + $0x170] sm:$0xff]  ;;  %3602 = vmatprep.subr.bf16.mxu1 %v11770_v12  ;;  %2043 = vst [vmem:[#allocation2 + $0x100] sm:$0xff] %v1955_v28  ;;  %v1601_v34 = vmul.f32 %v13721_v33, %v11332_v30  ;;  %v1349_v35 = vpop.f32.mrb[37].mxu0  ;;  %2279 = vst [vmem:[#allocation3 + $0x148] sm:$0xff] %v2263_v32  ;;  %v2359_v39 = vld [vmem:[#allocation2 + $0xf8] sm:$0xff] }
 0x277   : > { %v1958_v18 = vsel %vm1778_vm5, %v1690_v21, %v1870_v17  ;;  %v2550_v37 = vpack.c.bf16 %v2433_v31, %v13702_v61  ;;  %v2328_v38 = vld [vmem:[#allocation2 + $0xf7] sm:$0xf]  ;;  %v1599_v40 = vmul.f32 %v13721_v33, %v1349_v35  ;;  %v11333_v41 = vpop.f32.mrb[38].mxu0  ;;  %2375 = vst [vmem:[#allocation3 + $0x160] sm:$0xff] %v2359_v39  ;;  %v11782_v21 = vld [vmem:[%s13324_s4 + $0x1f4] ss:$8 sps:$4 sm:$0xff]  }
 0x278   : > { %2046 = vst [vmem:[#allocation2 + $0x118] sm:$0xff] %v1958_v18  ;;  %v13726_v20 = vsel %vm1776_vm6, %v1688_v23, %v1868_v29  ;;  %v2327_v44 = vld [vmem:[#allocation2 + $0xef] sm:$0xff]  ;;  %2344 = vst [vmem:[#allocation3 + $0x1a0] sm:$0xf] %v2328_v38  ;;  %v1693_v46 = vadd.f32 %v13732_v45, %v1601_v34  ;;  %v1602_v47 = vmul.f32 %v13721_v33, %v11333_v41  ;;  %v1352_v48 = vpop.f32.mrb[39].mxu0  ;;  %v2295_v36 = vld [vmem:[#allocation2 + $0xe6] sm:$0xff] }
 0x279   : > { %3519 = vmatprep.mubr.bf16.mxu1 %v2550_v37  ;;  %3603 = vmatpush1.bf16.msra.mxu1 %v11768_v24  ;;  %v2264_v50 = vld [vmem:[#allocation2 + $0xe5] sm:$0xf]  ;;  %2343 = vst [vmem:[#allocation3 + $0x158] sm:$0xff] %v2327_v44  ;;  %v1691_v51 = vadd.f32 %v13732_v45, %v1599_v40  ;;  %v1600_v52 = vmul.f32 %v13721_v33, %v1352_v48  ;;  %v2296_v53 = vld [vmem:[#allocation2 + $0xee] sm:$0xf]  ;;  %2311 = vst [vmem:[#allocation3 + $0x150] sm:$0xff] %v2295_v36 }
 0x27a   : > { %3520 = vmatmul.mubr.bf16.gmra.mrb[8].mxu1 %v2549_v42  ;;  %3604 = vmatprep.subr.bf16.mxu1 %v11773_v25  ;;  %2280 = vst [vmem:[#allocation3 + $0x190] sm:$0xf] %v2264_v50  ;;  %vm1781_vm7 = vcmp.gt.f32.partialorder %v1693_v46, 0.0  ;;  %v1873_v55 = vmul.f32 %v13740_v54, %v1693_v46  ;;  %v1694_v56 = vadd.f32 %v13732_v45, %v1602_v47  ;;  %2312 = vst [vmem:[#allocation3 + $0x198] sm:$0xf] %v2296_v53 }
 0x27b   : > { %vm1779_vm8 = vcmp.gt.f32.partialorder %v1691_v51, 0.0  ;;  %v1871_v57 = vmul.f32 %v13740_v54, %v1691_v51  ;;  %v1692_v58 = vadd.f32 %v13732_v45, %v1600_v52  ;;  %v11780_v27 = vld [vmem:[%s13324_s4 + $0x1f0] ss:$8 sps:$4 sm:$0xff]   ;;  %v11785_v28 = vld [vmem:[%s13324_s4 + $0x204] ss:$8 sps:$4 sm:$0xff]  }
 0x27c   : > { %v1961_v61 = vsel %vm1781_vm7, %v1693_v46, %v1873_v55  ;;  %vm1782_vm9 = vcmp.gt.f32.partialorder %v1694_v56, 0.0  ;;  %v1874_v62 = vmul.f32 %v13740_v54, %v1694_v56  ;;  %v2106_v63 = vld [vmem:[#allocation2 + $0x110] sm:$0xf] }
 0x27d   : > { %3605 = vmatpush1.bf16.msra.mxu1 %v11771_v43  ;;  %2049 = vst [vmem:[#allocation2 + $0x130] sm:$0xff] %v1961_v61  ;;  %v1959_v0 = vsel %vm1779_vm8, %v1691_v51, %v1871_v57  ;;  %vm1780_vm10 = vcmp.gt.f32.partialorder %v1692_v58, 0.0  ;;  %v1872_v1 = vmul.f32 %v13740_v54, %v1692_v58  ;;  %v11336_v2 = vpop.f32.mrb[40].mxu0  ;;  %2122 = vst [vmem:[#allocation3 + $0x1f8] sm:$0xf] %v2106_v63 }
 0x27e   : > { %3606 = vmatprep.subr.bf16.mxu1 %v11776_v49  ;;  %v2360_v3 = vld [vmem:[#allocation2 + $0x100] sm:$0xf]  ;;  %2047 = vst [vmem:[#allocation2 + $0x120] sm:$0xff] %v1959_v0  ;;  %v1962_v4 = vsel %vm1782_vm9, %v1694_v56, %v1874_v62  ;;  %v1605_v5 = vmul.f32 %v13721_v33, %v11336_v2  ;;  %v1365_v6 = vpop.f32.mrb[41].mxu0 }
 0x27f   : > { %v13751_v7 = vld [vmem:[#allocation2 + $0x111] sm:$0xff]  ;;  %v2138_v8 = vld [vmem:[#allocation2 + $0x119] sm:$0xf]  ;;  %2376 = vst [vmem:[#allocation3 + $0x1a8] sm:$0xf] %v2360_v3  ;;  %2050 = vst [vmem:[#allocation2 + $0x138] sm:$0xff] %v1962_v4  ;;  %v1960_v9 = vsel %vm1780_vm10, %v1692_v58, %v1872_v1  ;;  %v1603_v10 = vmul.f32 %v13721_v33, %v1365_v6 }
 0x280   : > { %v11337_v11 = vpop.f32.mrb[42].mxu0  ;;  %2154 = vst [vmem:[#allocation3 + $0x200] sm:$0xf] %v2138_v8  ;;  %2048 = vst [vmem:[#allocation2 + $0x128] sm:$0xff] %v1960_v9  ;;  %v1697_v12 = vadd.f32 %v13732_v45, %v1605_v5 }
 0x281   : > { %v1606_v13 = vmul.f32 %v13721_v33, %v11337_v11  ;;  %v1368_v14 = vpop.f32.mrb[43].mxu0  ;;  %3607 = vmatpush1.bf16.msra.mxu1 %v11774_v59  ;;  %v1695_v16 = vadd.f32 %v13732_v45, %v1603_v10 }
 0x282   : > { %v1604_v19 = vmul.f32 %v13721_v33, %v1368_v14  ;;  %3608 = vmatprep.subr.bf16.mxu1 %v11779_v60  ;;  %vm1785_vm11 = vcmp.gt.f32.partialorder %v1697_v12, 0.0  ;;  %v1877_v22 = vmul.f32 %v13740_v54, %v1697_v12 }
 0x283   : > { %v1698_v23 = vadd.f32 %v13732_v45, %v1606_v13  ;;  %vm1783_vm12 = vcmp.gt.f32.partialorder %v1695_v16, 0.0  ;;  %v1875_v24 = vmul.f32 %v13740_v54, %v1695_v16 }
 0x284   : > { %v1696_v25 = vadd.f32 %v13732_v45, %v1604_v19  ;;  %v1965_v17 = vsel %vm1785_vm11, %v1697_v12, %v1877_v22  ;;  %v2234_v29 = vld [vmem:[#allocation2 + $0x134] sm:$0xf]  ;;  %v2450_v18 = vld [vmem:[#allocation3 + $0x1f8] sm:$0xff] }
 0x285   : > { %vm1786_vm13 = vcmp.gt.f32.partialorder %v1698_v23, 0.0  ;;  %v1878_v26 = vmul.f32 %v13740_v54, %v1698_v23  ;;  %3609 = vmatpush1.bf16.msra.mxu1 %v11777_v15  ;;  %2053 = vst [vmem:[#allocation2 + $0x150] sm:$0xff] %v1965_v17  ;;  %v1963_v30 = vsel %vm1783_vm12, %v1695_v16, %v1875_v24  ;;  %v11340_v32 = vpop.f32.mrb[44].mxu0  ;;  %v2169_v34 = vld [vmem:[#allocation2 + $0x11a] sm:$0xff]  ;;  %v2170_v35 = vld [vmem:[#allocation2 + $0x122] sm:$0xf]  ;;  %v2558_v51 = vpack.c.bf16 %v2450_v18, %v13726_v20 }
 0x286   : > { %vm1784_vm14 = vcmp.gt.f32.partialorder %v1696_v25, 0.0  ;;  %v1876_v31 = vmul.f32 %v13740_v54, %v1696_v25  ;;  %3610 = vmatprep.subr.bf16.mxu1 %v11782_v21  ;;  %2250 = vst [vmem:[#allocation3 + $0x218] sm:$0xf] %v2234_v29  ;;  %2051 = vst [vmem:[#allocation2 + $0x140] sm:$0xff] %v1963_v30  ;;  %v1609_v38 = vmul.f32 %v13721_v33, %v11340_v32  ;;  %v1381_v39 = vpop.f32.mrb[45].mxu0  ;;  %v2265_v41 = vld [vmem:[#allocation2 + $0x135] sm:$0xff] }
 0x287   : > { %v1966_v37 = vsel %vm1786_vm13, %v1698_v23, %v1878_v26  ;;  %v2451_v40 = vld [vmem:[#allocation3 + $0x200] sm:$0xff]  ;;  %2185 = vst [vmem:[#allocation3 + $0x1c0] sm:$0xff] %v2169_v34  ;;  %2186 = vst [vmem:[#allocation3 + $0x208] sm:$0xf] %v2170_v35  ;;  %v1607_v43 = vmul.f32 %v13721_v33, %v1381_v39  ;;  %v11341_v44 = vpop.f32.mrb[46].mxu0  ;;  %v2233_v52 = vld [vmem:[#allocation2 + $0x12c] sm:$0xff] }
 0x288   : > { %2054 = vst [vmem:[#allocation2 + $0x158] sm:$0xff] %v1966_v37  ;;  %v1964_v42 = vsel %vm1784_vm14, %v1696_v25, %v1876_v31  ;;  %v2559_v46 = vpack.c.bf16 %v2451_v40, %v13751_v7  ;;  %v2201_v47 = vld [vmem:[#allocation2 + $0x123] sm:$0xff]  ;;  %v2202_v48 = vld [vmem:[#allocation2 + $0x12b] sm:$0xf]  ;;  %2281 = vst [vmem:[#allocation3 + $0x1d8] sm:$0xff] %v2265_v41  ;;  %v1701_v49 = vadd.f32 %v13732_v45, %v1609_v38  ;;  %v1384_v36 = vpop.f32.mrb[47].mxu0 }
 0x289   : > { %2052 = vst [vmem:[#allocation2 + $0x148] sm:$0xff] %v1964_v42  ;;  %v1610_v50 = vmul.f32 %v13721_v33, %v11341_v44  ;;  %3611 = vmatpush1.bf16.msra.mxu1 %v11780_v27  ;;  %2217 = vst [vmem:[#allocation3 + $0x1c8] sm:$0xff] %v2201_v47  ;;  %v1699_v53 = vadd.f32 %v13732_v45, %v1607_v43  ;;  %v1608_v55 = vmul.f32 %v13721_v33, %v1384_v36 }
 0x28a   : > { %2218 = vst [vmem:[#allocation3 + $0x210] sm:$0xf] %v2202_v48  ;;  %3529 = vmatprep.mubr.bf16.mxu1 %v2559_v46  ;;  %3693 = vmatprep.subr.bf16.mxu1 %v11785_v28  ;;  %2249 = vst [vmem:[#allocation3 + $0x1d0] sm:$0xff] %v2233_v52  ;;  %vm1789_vm15 = vcmp.gt.f32.partialorder %v1701_v49, 0.0  ;;  %v1881_v56 = vmul.f32 %v13740_v54, %v1701_v49 }
 0x28b   : > { %v1702_v57 = vadd.f32 %v13732_v45, %v1610_v50  ;;  %3530 = vmatmul.mubr.bf16.gmra.mrb[12].mxu1 %v2558_v51  ;;  %vm1787_vm1 = vcmp.gt.f32.partialorder %v1699_v53, 0.0  ;;  %v1879_v20 = vmul.f32 %v13740_v54, %v1699_v53  ;;  %v1700_v58 = vadd.f32 %v13732_v45, %v1608_v55 }
 0x28c   : > { %v1969_v59 = vsel %vm1789_vm15, %v1701_v49, %v1881_v56  ;;  %v2361_v61 = vld [vmem:[#allocation2 + $0x150] sm:$0xff] }
 0x28d   : > { %vm1790_vm2 = vcmp.gt.f32.partialorder %v1702_v57, 0.0  ;;  %v1882_v60 = vmul.f32 %v13740_v54, %v1702_v57  ;;  %2057 = vst [vmem:[#allocation2 + $0x170] sm:$0xff] %v1969_v59  ;;  %v13783_v62 = vsel %vm1787_vm1, %v1699_v53, %v1879_v20  ;;  %vm1788_vm3 = vcmp.gt.f32.partialorder %v1700_v58, 0.0  ;;  %v11344_v0 = vpop.f32.mrb[48].mxu0  ;;  %v2266_v1 = vld [vmem:[#allocation2 + $0x13d] sm:$0xf] }
 0x28e   : > { %v1880_v63 = vmul.f32 %v13740_v54, %v1700_v58  ;;  %v2297_v2 = vld [vmem:[#allocation2 + $0x13e] sm:$0xff]  ;;  %2377 = vst [vmem:[#allocation3 + $0x1f0] sm:$0xff] %v2361_v61  ;;  %v1613_v4 = vmul.f32 %v13721_v33, %v11344_v0  ;;  %v1397_v5 = vpop.f32.mrb[49].mxu0  ;;  %2282 = vst [vmem:[#allocation3 + $0x220] sm:$0xf] %v2266_v1 }
 0x28f   : > { %v1970_v3 = vsel %vm1790_vm2, %v1702_v57, %v1882_v60  ;;  %2313 = vst [vmem:[#allocation3 + $0x1e0] sm:$0xff] %v2297_v2  ;;  %v2362_v6 = vld [vmem:[#allocation2 + $0x158] sm:$0xf]  ;;  %v1611_v8 = vmul.f32 %v13721_v33, %v1397_v5  ;;  %v11345_v9 = vpop.f32.mrb[50].mxu0 }
 0x290   : > { %2058 = vst [vmem:[#allocation2 + $0x178] sm:$0xff] %v1970_v3  ;;  %v1968_v7 = vsel %vm1788_vm3, %v1700_v58, %v1880_v63  ;;  %2378 = vst [vmem:[#allocation3 + $0x238] sm:$0xf] %v2362_v6  ;;  %v1705_v10 = vadd.f32 %v13732_v45, %v1613_v4  ;;  %v1614_v11 = vmul.f32 %v13721_v33, %v11345_v9  ;;  %v1400_v12 = vpop.f32.mrb[51].mxu0  ;;  %v2329_v13 = vld [vmem:[#allocation2 + $0x147] sm:$0xff] }
 0x291   : > { %2056 = vst [vmem:[#allocation2 + $0x168] sm:$0xff] %v1968_v7  ;;  %v2330_v14 = vld [vmem:[#allocation2 + $0x14f] sm:$0xf]  ;;  %v2298_v15 = vld [vmem:[#allocation2 + $0x146] sm:$0xf]  ;;  %v1703_v16 = vadd.f32 %v13732_v45, %v1611_v8  ;;  %v1612_v19 = vmul.f32 %v13721_v33, %v1400_v12  ;;  %2345 = vst [vmem:[#allocation3 + $0x1e8] sm:$0xff] %v2329_v13 }
 0x292   : > { %2346 = vst [vmem:[#allocation3 + $0x230] sm:$0xf] %v2330_v14  ;;  %2314 = vst [vmem:[#allocation3 + $0x228] sm:$0xf] %v2298_v15  ;;  %vm1793_vm4 = vcmp.gt.f32.partialorder %v1705_v10, 0.0  ;;  %v1885_v21 = vmul.f32 %v13740_v54, %v1705_v10  ;;  %v1706_v22 = vadd.f32 %v13732_v45, %v1614_v11 }
 0x293   : > { %vm1791_vm5 = vcmp.gt.f32.partialorder %v1703_v16, 0.0  ;;  %v1883_v23 = vmul.f32 %v13740_v54, %v1703_v16  ;;  %v1704_v24 = vadd.f32 %v13732_v45, %v1612_v19 }
 0x294   : > { %v1973_v25 = vsel %vm1793_vm4, %v1705_v10, %v1885_v21  ;;  %vm1794_vm6 = vcmp.gt.f32.partialorder %v1706_v22, 0.0  ;;  %v1886_v27 = vmul.f32 %v13740_v54, %v1706_v22  ;;  %v2140_v17 = vld [vmem:[#allocation2 + $0x171] sm:$0xf] }
 0x295   : > { %2061 = vst [vmem:[#allocation2 + $0x190] sm:$0xff] %v1973_v25  ;;  %v1971_v26 = vsel %vm1791_vm5, %v1703_v16, %v1883_v23  ;;  %vm1792_vm7 = vcmp.gt.f32.partialorder %v1704_v24, 0.0  ;;  %v1884_v28 = vmul.f32 %v13740_v54, %v1704_v24  ;;  %v11348_v29 = vpop.f32.mrb[52].mxu0  ;;  %2156 = vst [vmem:[#allocation3 + $0x290] sm:$0xf] %v2140_v17 }
 0x296   : > { %2059 = vst [vmem:[#allocation2 + $0x180] sm:$0xff] %v1971_v26  ;;  %v1974_v30 = vsel %vm1794_vm6, %v1706_v22, %v1886_v27  ;;  %v1617_v31 = vmul.f32 %v13721_v33, %v11348_v29  ;;  %v1413_v32 = vpop.f32.mrb[53].mxu0 }
 0x297   : > { %v2171_v18 = vld [vmem:[#allocation2 + $0x172] sm:$0xff]  ;;  %v2172_v34 = vld [vmem:[#allocation2 + $0x17a] sm:$0xf]  ;;  %2062 = vst [vmem:[#allocation2 + $0x198] sm:$0xff] %v1974_v30  ;;  %v1972_v35 = vsel %vm1792_vm7, %v1704_v24, %v1884_v28  ;;  %v1615_v37 = vmul.f32 %v13721_v33, %v1413_v32  ;;  %v11349_v38 = vpop.f32.mrb[54].mxu0 }
 0x298   : > { %v2139_v39 = vld [vmem:[#allocation2 + $0x169] sm:$0xff]  ;;  %2187 = vst [vmem:[#allocation3 + $0x250] sm:$0xff] %v2171_v18  ;;  %2188 = vst [vmem:[#allocation3 + $0x298] sm:$0xf] %v2172_v34  ;;  %v1709_v41 = vadd.f32 %v13732_v45, %v1617_v31  ;;  %v1618_v42 = vmul.f32 %v13721_v33, %v11349_v38  ;;  %v1416_v43 = vpop.f32.mrb[55].mxu0 }
 0x299   : > { %v2108_v40 = vld [vmem:[#allocation2 + $0x168] sm:$0xf]  ;;  %2060 = vst [vmem:[#allocation2 + $0x188] sm:$0xff] %v1972_v35  ;;  %v1707_v44 = vadd.f32 %v13732_v45, %v1615_v37  ;;  %v1616_v46 = vmul.f32 %v13721_v33, %v1416_v43 }
 0x29a   : > { %2124 = vst [vmem:[#allocation3 + $0x288] sm:$0xf] %v2108_v40  ;;  %vm1797_vm8 = vcmp.gt.f32.partialorder %v1709_v41, 0.0  ;;  %v1889_v47 = vmul.f32 %v13740_v54, %v1709_v41  ;;  %v1710_v48 = vadd.f32 %v13732_v45, %v1618_v42 }
 0x29b   : > { %vm1795_vm9 = vcmp.gt.f32.partialorder %v1707_v44, 0.0  ;;  %v1887_v49 = vmul.f32 %v13740_v54, %v1707_v44  ;;  %v1708_v50 = vadd.f32 %v13732_v45, %v1616_v46 }
 0x29c   : > { %v1977_v36 = vsel %vm1797_vm8, %v1709_v41, %v1889_v47  ;;  %vm1798_vm10 = vcmp.gt.f32.partialorder %v1710_v48, 0.0  ;;  %v1890_v51 = vmul.f32 %v13740_v54, %v1710_v48  ;;  %v2469_v52 = vld [vmem:[#allocation3 + $0x290] sm:$0xff] }
 0x29d   : > { %2065 = vst [vmem:[#allocation2 + $0x1b0] sm:$0xff] %v1977_v36  ;;  %v1975_v53 = vsel %vm1795_vm9, %v1707_v44, %v1887_v49  ;;  %vm1796_vm11 = vcmp.gt.f32.partialorder %v1708_v50, 0.0  ;;  %v1888_v55 = vmul.f32 %v13740_v54, %v1708_v50  ;;  %v11352_v56 = vpop.f32.mrb[56].mxu0  ;;  %v2568_v57 = vpack.c.bf16 %v2469_v52, %v2139_v39  ;;  %v13810_v20 = vld [vmem:[#allocation2 + $0x17b] sm:$0xff]  ;;  %v2204_v58 = vld [vmem:[#allocation2 + $0x183] sm:$0xf] }
 0x29e   : > { %2063 = vst [vmem:[#allocation2 + $0x1a0] sm:$0xff] %v1975_v53  ;;  %v13812_v59 = vsel %vm1798_vm10, %v1710_v48, %v1890_v51  ;;  %v1621_v60 = vmul.f32 %v13721_v33, %v11352_v56  ;;  %v1429_v61 = vpop.f32.mrb[57].mxu0  ;;  %2220 = vst [vmem:[#allocation3 + $0x2a0] sm:$0xf] %v2204_v58  ;;  %v2268_v63 = vld [vmem:[#allocation2 + $0x195] sm:$0xf] }
 0x29f   : > { %v2299_v0 = vld [vmem:[#allocation2 + $0x196] sm:$0xff]  ;;  %v1976_v1 = vsel %vm1796_vm11, %v1708_v50, %v1888_v55  ;;  %v1619_v2 = vmul.f32 %v13721_v33, %v1429_v61  ;;  %v11353_v3 = vpop.f32.mrb[58].mxu0  ;;  %3539 = vmatprep.mubr.bf16.mxu1 %v2568_v57  ;;  %2284 = vst [vmem:[#allocation3 + $0x2b0] sm:$0xf] %v2268_v63 }
 0x2a0   : > { %2315 = vst [vmem:[#allocation3 + $0x270] sm:$0xff] %v2299_v0  ;;  %2064 = vst [vmem:[#allocation2 + $0x1a8] sm:$0xff] %v1976_v1  ;;  %v1713_v5 = vadd.f32 %v13732_v45, %v1621_v60  ;;  %v1622_v6 = vmul.f32 %v13721_v33, %v11353_v3  ;;  %v1432_v7 = vpop.f32.mrb[59].mxu0  ;;  %v2267_v9 = vld [vmem:[#allocation2 + $0x18d] sm:$0xff]  ;;  %v2235_v10 = vld [vmem:[#allocation2 + $0x184] sm:$0xff] }
 0x2a1   : > { %v2468_v4 = vld [vmem:[#allocation3 + $0x288] sm:$0xff]  ;;  %v1711_v12 = vadd.f32 %v13732_v45, %v1619_v2  ;;  %v1620_v13 = vmul.f32 %v13721_v33, %v1432_v7  ;;  %2283 = vst [vmem:[#allocation3 + $0x268] sm:$0xff] %v2267_v9  ;;  %2251 = vst [vmem:[#allocation3 + $0x260] sm:$0xff] %v2235_v10 }
 0x2a2   : > { %v2567_v8 = vpack.c.bf16 %v2468_v4, %v13783_v62  ;;  %v2236_v11 = vld [vmem:[#allocation2 + $0x18c] sm:$0xf]  ;;  %vm1801_vm12 = vcmp.gt.f32.partialorder %v1713_v5, 0.0  ;;  %v1893_v14 = vmul.f32 %v13740_v54, %v1713_v5  ;;  %v1714_v15 = vadd.f32 %v13732_v45, %v1622_v6 }
 0x2a3   : > { %2252 = vst [vmem:[#allocation3 + $0x2a8] sm:$0xf] %v2236_v11  ;;  %vm1799_vm13 = vcmp.gt.f32.partialorder %v1711_v12, 0.0  ;;  %v1891_v16 = vmul.f32 %v13740_v54, %v1711_v12  ;;  %v1712_v62 = vadd.f32 %v13732_v45, %v1620_v13 }
 0x2a4   : > { %3540 = vmatmul.mubr.bf16.gmra.mrb[16].mxu1 %v2567_v8  ;;  %v1981_v19 = vsel %vm1801_vm12, %v1713_v5, %v1893_v14  ;;  %vm1802_vm14 = vcmp.gt.f32.partialorder %v1714_v15, 0.0  ;;  %v1894_v21 = vmul.f32 %v13740_v54, %v1714_v15  ;;  %v2364_v22 = vld [vmem:[#allocation2 + $0x1b0] sm:$0xf] }
 0x2a5   : > { %2069 = vst [vmem:[#allocation2 + $0x1d0] sm:$0xff] %v1981_v19  ;;  %v1979_v23 = vsel %vm1799_vm13, %v1711_v12, %v1891_v16  ;;  %vm1800_vm15 = vcmp.gt.f32.partialorder %v1712_v62, 0.0  ;;  %v1892_v24 = vmul.f32 %v13740_v54, %v1712_v62  ;;  %v11356_v25 = vpop.f32.mrb[60].mxu0  ;;  %v2331_v27 = vld [vmem:[#allocation2 + $0x19f] sm:$0xff]  ;;  %2380 = vst [vmem:[#allocation3 + $0x2c8] sm:$0xf] %v2364_v22 }
 0x2a6   : > { %v2300_v17 = vld [vmem:[#allocation2 + $0x19e] sm:$0xf]  ;;  %2067 = vst [vmem:[#allocation2 + $0x1c0] sm:$0xff] %v1979_v23  ;;  %v1982_v26 = vsel %vm1802_vm14, %v1714_v15, %v1894_v21  ;;  %v1625_v28 = vmul.f32 %v13721_v33, %v11356_v25  ;;  %v1445_v29 = vpop.f32.mrb[61].mxu0  ;;  %2347 = vst [vmem:[#allocation3 + $0x278] sm:$0xff] %v2331_v27 }
 0x2a7   : > { %2316 = vst [vmem:[#allocation3 + $0x2b8] sm:$0xf] %v2300_v17  ;;  %2070 = vst [vmem:[#allocation2 + $0x1d8] sm:$0xff] %v1982_v26  ;;  %v1980_v30 = vsel %vm1800_vm15, %v1712_v62, %v1892_v24  ;;  %v1623_v31 = vmul.f32 %v13721_v33, %v1445_v29  ;;  %v11357_v32 = vpop.f32.mrb[62].mxu0  ;;  %v2363_v18 = vld [vmem:[#allocation2 + $0x1a8] sm:$0xff] }
 0x2a8   : > { %2068 = vst [vmem:[#allocation2 + $0x1c8] sm:$0xff] %v1980_v30  ;;  %v1717_v34 = vadd.f32 %v13732_v45, %v1625_v28  ;;  %v1626_v35 = vmul.f32 %v13721_v33, %v11357_v32  ;;  %v1448_v37 = vpop.f32.mrb[63].mxu0  ;;  %v2332_v38 = vld [vmem:[#allocation2 + $0x1a7] sm:$0xf]  ;;  %2379 = vst [vmem:[#allocation3 + $0x280] sm:$0xff] %v2363_v18 }
 0x2a9   : > { %v1715_v39 = vadd.f32 %v13732_v45, %v1623_v31  ;;  %v1624_v40 = vmul.f32 %v13721_v33, %v1448_v37  ;;  %2348 = vst [vmem:[#allocation3 + $0x2c0] sm:$0xf] %v2332_v38 }
 0x2aa   : > { %vm1805_vm1 = vcmp.gt.f32.partialorder %v1717_v34, 0.0  ;;  %v1897_v41 = vmul.f32 %v13740_v54, %v1717_v34  ;;  %v1718_v42 = vadd.f32 %v13732_v45, %v1626_v35 }
 0x2ab   : > { %vm1803_vm2 = vcmp.gt.f32.partialorder %v1715_v39, 0.0  ;;  %v1895_v43 = vmul.f32 %v13740_v54, %v1715_v39  ;;  %v1716_v44 = vadd.f32 %v13732_v45, %v1624_v40 }
 0x2ac   : > { %v1985_v46 = vsel %vm1805_vm1, %v1717_v34, %v1897_v41  ;;  %vm1806_vm3 = vcmp.gt.f32.partialorder %v1718_v42, 0.0  ;;  %v1898_v47 = vmul.f32 %v13740_v54, %v1718_v42  ;;  %v2174_v48 = vld [vmem:[#allocation2 + $0x1d2] sm:$0xf] }
 0x2ad   : > { %2073 = vst [vmem:[#allocation2 + $0x1f0] sm:$0xff] %v1985_v46  ;;  %v1983_v49 = vsel %vm1803_vm2, %v1715_v39, %v1895_v43  ;;  %vm1804_vm4 = vcmp.gt.f32.partialorder %v1716_v44, 0.0  ;;  %v1896_v50 = vmul.f32 %v13740_v54, %v1716_v44  ;;  %v11360_v36 = vpop.f32.mrb[64].mxu0  ;;  %v2110_v51 = vld [vmem:[#allocation2 + $0x1c0] sm:$0xf] }
 0x2ae   : > { %2190 = vst [vmem:[#allocation3 + $0x328] sm:$0xf] %v2174_v48  ;;  %2071 = vst [vmem:[#allocation2 + $0x1e0] sm:$0xff] %v1983_v49  ;;  %v1986_v52 = vsel %vm1806_vm3, %v1718_v42, %v1898_v47  ;;  %v1629_v53 = vmul.f32 %v13721_v33, %v11360_v36  ;;  %v1461_v55 = vpop.f32.mrb[65].mxu0  ;;  %v13840_v56 = vld [vmem:[#allocation2 + $0x1d3] sm:$0xff] }
 0x2af   : > { %2126 = vst [vmem:[#allocation3 + $0x318] sm:$0xf] %v2110_v51  ;;  %v2206_v57 = vld [vmem:[#allocation2 + $0x1db] sm:$0xf]  ;;  %2074 = vst [vmem:[#allocation2 + $0x1f8] sm:$0xff] %v1986_v52  ;;  %v1984_v58 = vsel %vm1804_vm4, %v1716_v44, %v1896_v50  ;;  %v1627_v60 = vmul.f32 %v13721_v33, %v1461_v55  ;;  %v11361_v61 = vpop.f32.mrb[66].mxu0 }
 0x2b0   : > { %v2141_v63 = vld [vmem:[#allocation2 + $0x1c1] sm:$0xff]  ;;  %v2142_v0 = vld [vmem:[#allocation2 + $0x1c9] sm:$0xf]  ;;  %2222 = vst [vmem:[#allocation3 + $0x330] sm:$0xf] %v2206_v57  ;;  %2072 = vst [vmem:[#allocation2 + $0x1e8] sm:$0xff] %v1984_v58  ;;  %v1721_v2 = vadd.f32 %v13732_v45, %v1629_v53  ;;  %v1630_v3 = vmul.f32 %v13721_v33, %v11361_v61 }
 0x2b1   : > { %v13843_v1 = vld [vmem:[#allocation2 + $0x1ca] sm:$0xff]  ;;  %v1464_v4 = vpop.f32.mrb[67].mxu0  ;;  %2158 = vst [vmem:[#allocation3 + $0x320] sm:$0xf] %v2142_v0  ;;  %v1719_v5 = vadd.f32 %v13732_v45, %v1627_v60 }
 0x2b2   : > { %v1628_v6 = vmul.f32 %v13721_v33, %v1464_v4  ;;  %vm1809_vm5 = vcmp.gt.f32.partialorder %v1721_v2, 0.0  ;;  %v1901_v7 = vmul.f32 %v13740_v54, %v1721_v2  ;;  %v1722_v8 = vadd.f32 %v13732_v45, %v1630_v3  ;;  %v13880_v3 = vld [vmem:[%s13318_s19] ss:$0 sm:$0xff] }
 0x2b3   : > { %vm1807_vm6 = vcmp.gt.f32.partialorder %v1719_v5, 0.0  ;;  %v1899_v9 = vmul.f32 %v13740_v54, %v1719_v5 }
 0x2b4   : > { %v1720_v10 = vadd.f32 %v13732_v45, %v1628_v6  ;;  %v13853_v11 = vsel %vm1809_vm5, %v1721_v2, %v1901_v7  ;;  %vm1810_vm7 = vcmp.gt.f32.partialorder %v1722_v8, 0.0  ;;  %v1902_v12 = vmul.f32 %v13740_v54, %v1722_v8 }
 0x2b5   : > { %v1987_v13 = vsel %vm1807_vm6, %v1719_v5, %v1899_v9  ;;  %v11364_v15 = vpop.f32.mrb[68].mxu0  ;;  %v13857_v16 = vld [vmem:[#allocation2 + $0x1dc] sm:$0xff]  ;;  %v2238_v62 = vld [vmem:[#allocation2 + $0x1e4] sm:$0xf] }
 0x2b6   : > { %vm1808_vm8 = vcmp.gt.f32.partialorder %v1720_v10, 0.0  ;;  %v1900_v14 = vmul.f32 %v13740_v54, %v1720_v10  ;;  %2075 = vst [vmem:[#allocation2 + $0x200] sm:$0xff] %v1987_v13  ;;  %v1990_v19 = vsel %vm1810_vm7, %v1722_v8, %v1902_v12  ;;  %v1633_v21 = vmul.f32 %v13721_v33, %v11364_v15  ;;  %v1477_v22 = vpop.f32.mrb[69].mxu0  ;;  %v2486_v23 = vld [vmem:[#allocation3 + $0x318] sm:$0xff]  ;;  %2254 = vst [vmem:[#allocation3 + $0x338] sm:$0xf] %v2238_v62 }
 0x2b7   : > { %v2333_v24 = vld [vmem:[#allocation2 + $0x1f7] sm:$0xff]  ;;  %2078 = vst [vmem:[#allocation2 + $0x218] sm:$0xff] %v1990_v19  ;;  %v1631_v17 = vmul.f32 %v13721_v33, %v1477_v22  ;;  %v11365_v26 = vpop.f32.mrb[70].mxu0  ;;  %v13863_v18 = vld [vmem:[#allocation2 + $0x1e5] sm:$0xff]  ;;  %v2270_v34 = vld [vmem:[#allocation2 + $0x1ed] sm:$0xf]  ;;  %v2576_v39 = vpack.c.bf16 %v2486_v23, %v13812_v59 }
 0x2b8   : > { %v2302_v25 = vld [vmem:[#allocation2 + $0x1f6] sm:$0xf]  ;;  %v1988_v27 = vsel %vm1808_vm8, %v1720_v10, %v1900_v14  ;;  %v2487_v28 = vld [vmem:[#allocation3 + $0x320] sm:$0xff]  ;;  %2349 = vst [vmem:[#allocation3 + $0x308] sm:$0xff] %v2333_v24  ;;  %v1725_v29 = vadd.f32 %v13732_v45, %v1633_v21  ;;  %v1634_v30 = vmul.f32 %v13721_v33, %v11365_v26  ;;  %v1480_v31 = vpop.f32.mrb[71].mxu0  ;;  %v2301_v35 = vld [vmem:[#allocation2 + $0x1ee] sm:$0xff] }
 0x2b9   : > { %2318 = vst [vmem:[#allocation3 + $0x348] sm:$0xf] %v2302_v25  ;;  %2076 = vst [vmem:[#allocation2 + $0x208] sm:$0xff] %v1988_v27  ;;  %v2577_v32 = vpack.c.bf16 %v2487_v28, %v2141_v63  ;;  %v1723_v37 = vadd.f32 %v13732_v45, %v1631_v17  ;;  %v1632_v38 = vmul.f32 %v13721_v33, %v1480_v31  ;;  %v13898_v28 = vld [vmem:[%s13318_s19 + $0x1] ss:$0 sm:$0xff] }
 0x2ba   : > { %2286 = vst [vmem:[#allocation3 + $0x340] sm:$0xf] %v2270_v34  ;;  %2317 = vst [vmem:[#allocation3 + $0x300] sm:$0xff] %v2301_v35  ;;  %vm1813_vm9 = vcmp.gt.f32.partialorder %v1725_v29, 0.0  ;;  %v1905_v40 = vmul.f32 %v13740_v54, %v1725_v29  ;;  %v1726_v41 = vadd.f32 %v13732_v45, %v1634_v30  ;;  %v13905_v35 = vld [vmem:[%s13318_s19 + $0x2] ss:$0 sm:$0xff] }
 0x2bb   : > { %3549 = vmatprep.mubr.bf16.mxu1 %v2577_v32  ;;  %vm1811_vm10 = vcmp.gt.f32.partialorder %v1723_v37, 0.0  ;;  %v1903_v42 = vmul.f32 %v13740_v54, %v1723_v37  ;;  %v1724_v43 = vadd.f32 %v13732_v45, %v1632_v38 }
 0x2bc   : > { %3550 = vmatmul.mubr.bf16.gmra.mrb[20].mxu1 %v2576_v39  ;;  %v1993_v44 = vsel %vm1813_vm9, %v1725_v29, %v1905_v40  ;;  %vm1814_vm11 = vcmp.gt.f32.partialorder %v1726_v41, 0.0  ;;  %v1906_v46 = vmul.f32 %v13740_v54, %v1726_v41 }
 0x2bd   : > { %2081 = vst [vmem:[#allocation2 + $0x230] sm:$0xff] %v1993_v44  ;;  %v1991_v59 = vsel %vm1811_vm10, %v1723_v37, %v1903_v42  ;;  %vm1812_vm12 = vcmp.gt.f32.partialorder %v1724_v43, 0.0  ;;  %v1904_v47 = vmul.f32 %v13740_v54, %v1724_v43  ;;  %v11368_v48 = vpop.f32.mrb[72].mxu0  ;;  %v2334_v49 = vld [vmem:[#allocation2 + $0x1ff] sm:$0xf] }
 0x2be   : > { %v2365_v50 = vld [vmem:[#allocation2 + $0x200] sm:$0xff]  ;;  %2079 = vst [vmem:[#allocation2 + $0x220] sm:$0xff] %v1991_v59  ;;  %v1994_v36 = vsel %vm1814_vm11, %v1726_v41, %v1906_v46  ;;  %v1637_v51 = vmul.f32 %v13721_v33, %v11368_v48  ;;  %v1493_v52 = vpop.f32.mrb[73].mxu0  ;;  %v2112_v53 = vld [vmem:[#allocation2 + $0x218] sm:$0xf] }
 0x2bf   : > { %2350 = vst [vmem:[#allocation3 + $0x350] sm:$0xf] %v2334_v49  ;;  %2381 = vst [vmem:[#allocation3 + $0x310] sm:$0xff] %v2365_v50  ;;  %v1992_v55 = vsel %vm1812_vm12, %v1724_v43, %v1904_v47  ;;  %v1635_v57 = vmul.f32 %v13721_v33, %v1493_v52  ;;  %v11369_v58 = vpop.f32.mrb[74].mxu0 }
 0x2c0   : > { %2082 = vst [vmem:[#allocation2 + $0x238] sm:$0xff] %v1994_v36  ;;  %2128 = vst [vmem:[#allocation3 + $0x3a8] sm:$0xf] %v2112_v53  ;;  %v1729_v60 = vadd.f32 %v13732_v45, %v1637_v51  ;;  %v1638_v61 = vmul.f32 %v13721_v33, %v11369_v58  ;;  %v1496_v63 = vpop.f32.mrb[75].mxu0  ;;  %v2366_v0 = vld [vmem:[#allocation2 + $0x208] sm:$0xf] }
 0x2c1   : > { %2080 = vst [vmem:[#allocation2 + $0x228] sm:$0xff] %v1992_v55  ;;  %v1727_v2 = vadd.f32 %v13732_v45, %v1635_v57  ;;  %v1636_v4 = vmul.f32 %v13880_v3, %v1496_v63  ;;  %2382 = vst [vmem:[#allocation3 + $0x358] sm:$0xf] %v2366_v0 }
 0x2c2   : > { %vm1817_vm13 = vcmp.gt.f32.partialorder %v1729_v60, 0.0  ;;  %v1909_v5 = vmul.f32 %v13740_v54, %v1729_v60  ;;  %v1730_v6 = vadd.f32 %v13732_v45, %v1638_v61 }
 0x2c3   : > { %vm1815_vm14 = vcmp.gt.f32.partialorder %v1727_v2, 0.0  ;;  %v1907_v7 = vmul.f32 %v13740_v54, %v1727_v2  ;;  %v1728_v8 = vadd.f32 %v13732_v45, %v1636_v4 }
 0x2c4   : > { %v1997_v33 = vsel %vm1817_vm13, %v1729_v60, %v1909_v5  ;;  %vm1818_vm15 = vcmp.gt.f32.partialorder %v1730_v6, 0.0  ;;  %v1910_v9 = vmul.f32 %v13740_v54, %v1730_v6  ;;  %v2208_v10 = vld [vmem:[#allocation2 + $0x233] sm:$0xf] }
 0x2c5   : > { %2085 = vst [vmem:[#allocation2 + $0x250] sm:$0xff] %v1997_v33  ;;  %v1995_v12 = vsel %vm1815_vm14, %v1727_v2, %v1907_v7  ;;  %vm1816_vm1 = vcmp.gt.f32.partialorder %v1728_v8, 0.0  ;;  %v1908_v13 = vmul.f32 %v13740_v54, %v1728_v8  ;;  %v11372_v14 = vpop.f32.mrb[76].mxu0  ;;  %v2143_v15 = vld [vmem:[#allocation2 + $0x219] sm:$0xff]  ;;  %v2144_v62 = vld [vmem:[#allocation2 + $0x221] sm:$0xf] }
 0x2c6   : > { %2224 = vst [vmem:[#allocation3 + $0x3c0] sm:$0xf] %v2208_v10  ;;  %2083 = vst [vmem:[#allocation2 + $0x240] sm:$0xff] %v1995_v12  ;;  %v1998_v19 = vsel %vm1818_vm15, %v1730_v6, %v1910_v9  ;;  %v1641_v21 = vmul.f32 %v13880_v3, %v11372_v14  ;;  %v1509_v45 = vpop.f32.mrb[77].mxu0 }
 0x2c7   : > { %2160 = vst [vmem:[#allocation3 + $0x3b0] sm:$0xf] %v2144_v62  ;;  %v13890_v22 = vld [vmem:[#allocation2 + $0x234] sm:$0xff]  ;;  %v2240_v23 = vld [vmem:[#allocation2 + $0x23c] sm:$0xf]  ;;  %2086 = vst [vmem:[#allocation2 + $0x258] sm:$0xff] %v1998_v19  ;;  %v1996_v24 = vsel %vm1816_vm1, %v1728_v8, %v1908_v13  ;;  %v1639_v25 = vmul.f32 %v13880_v3, %v1509_v45 }
 0x2c8   : > { %v11373_v54 = vpop.f32.mrb[78].mxu0  ;;  %v13893_v27 = vld [vmem:[#allocation2 + $0x22b] sm:$0xff]  ;;  %v13895_v17 = vld [vmem:[#allocation2 + $0x222] sm:$0xff]  ;;  %2256 = vst [vmem:[#allocation3 + $0x3c8] sm:$0xf] %v2240_v23  ;;  %2084 = vst [vmem:[#allocation2 + $0x248] sm:$0xff] %v1996_v24  ;;  %v1733_v29 = vadd.f32 %v13898_v28, %v1641_v21 }
 0x2c9   : > { %v2176_v26 = vld [vmem:[#allocation2 + $0x22a] sm:$0xf]  ;;  %v1642_v30 = vmul.f32 %v13880_v3, %v11373_v54  ;;  %v1512_v31 = vpop.f32.mrb[79].mxu0  ;;  %v1731_v32 = vadd.f32 %v13898_v28, %v1639_v25 }
 0x2ca   : > { %2192 = vst [vmem:[#allocation3 + $0x3b8] sm:$0xf] %v2176_v26  ;;  %v1640_v34 = vmul.f32 %v13880_v3, %v1512_v31  ;;  %vm1821_vm2 = vcmp.gt.f32.partialorder %v1733_v29, 0.0  ;;  %v1913_v37 = vmul.f32 %v13905_v35, %v1733_v29  ;;  %v2504_v43 = vld [vmem:[#allocation3 + $0x3a8] sm:$0xff] }
 0x2cb   : > { %v1734_v38 = vadd.f32 %v13898_v28, %v1642_v30  ;;  %vm1819_vm3 = vcmp.gt.f32.partialorder %v1731_v32, 0.0  ;;  %v1911_v39 = vmul.f32 %v13905_v35, %v1731_v32  ;;  %v2585_v58 = vpack.c.bf16 %v2504_v43, %v13853_v11 }
 0x2cc   : > { %v1732_v40 = vadd.f32 %v13898_v28, %v1640_v34  ;;  %v2001_v41 = vsel %vm1821_vm2, %v1733_v29, %v1913_v37 }
 0x2cd   : > { %vm1822_vm4 = vcmp.gt.f32.partialorder %v1734_v38, 0.0  ;;  %v1914_v42 = vmul.f32 %v13905_v35, %v1734_v38  ;;  %2089 = vst [vmem:[#allocation2 + $0x270] sm:$0xff] %v2001_v41  ;;  %v1999_v44 = vsel %vm1819_vm3, %v1731_v32, %v1911_v39  ;;  %v11376_v59 = vpop.f32.mrb[80].mxu0  ;;  %v13913_v48 = vld [vmem:[#allocation2 + $0x23d] sm:$0xff]  ;;  %vm4678_vm3 = vcmask 1042432  }
 0x2ce   : > { %vm1820_vm5 = vcmp.gt.f32.partialorder %v1732_v40, 0.0  ;;  %v1912_v46 = vmul.f32 %v13905_v35, %v1732_v40  ;;  %v2505_v47 = vld [vmem:[#allocation3 + $0x3b0] sm:$0xff]  ;;  %2087 = vst [vmem:[#allocation2 + $0x260] sm:$0xff] %v1999_v44  ;;  %v1645_v50 = vmul.f32 %v13880_v3, %v11376_v59  ;;  %v1525_v36 = vpop.f32.mrb[81].mxu0  ;;  %v13916_v53 = vld [vmem:[#allocation2 + $0x258] sm:$0xff] }
 0x2cf   : > { %v2002_v49 = vsel %vm1822_vm4, %v1734_v38, %v1914_v42  ;;  %v2586_v51 = vpack.c.bf16 %v2505_v47, %v2143_v15  ;;  %v2336_v52 = vld [vmem:[#allocation2 + $0x257] sm:$0xf]  ;;  %v1643_v57 = vmul.f32 %v13880_v3, %v1525_v36  ;;  %v11377_v60 = vpop.f32.mrb[82].mxu0  ;;  %v2272_v2 = vld [vmem:[#allocation2 + $0x245] sm:$0xf]  ;;  %v13924_v4 = vld [vmem:[#allocation2 + $0x24f] sm:$0xff] }
 0x2d0   : > { %2090 = vst [vmem:[#allocation2 + $0x278] sm:$0xff] %v2002_v49  ;;  %v13918_v55 = vsel %vm1820_vm5, %v1732_v40, %v1912_v46  ;;  %2352 = vst [vmem:[#allocation3 + $0x3e0] sm:$0xf] %v2336_v52  ;;  %v1737_v61 = vadd.f32 %v13898_v28, %v1645_v50  ;;  %v1646_v63 = vmul.f32 %v13880_v3, %v11377_v60  ;;  %v1528_v0 = vpop.f32.mrb[83].mxu0  ;;  %v13926_v5 = vld [vmem:[#allocation2 + $0x246] sm:$0xff]  ;;  %vm4823_vm5 = vcmask 1041408  }
 0x2d1   : > { %3559 = vmatprep.mubr.bf16.mxu1 %v2586_v51  ;;  %v1735_v6 = vadd.f32 %v13898_v28, %v1643_v57  ;;  %v1644_v7 = vmul.f32 %v13880_v3, %v1528_v0  ;;  %2288 = vst [vmem:[#allocation3 + $0x3d0] sm:$0xf] %v2272_v2  ;;  %v2304_v11 = vld [vmem:[#allocation2 + $0x24e] sm:$0xf]  ;;  %v2399_v51 = vld [vmem:[#allocation3 + $0x60] sm:$0xff]  ;;  %v12463_v0 = vld [vmem:[#allocation3 + $0x18] sm:$0xff] }
 0x2d2   : > { %3560 = vmatmul.mubr.bf16.gmra.mrb[24].mxu1 %v2585_v58  ;;  %vm1825_vm6 = vcmp.gt.f32.partialorder %v1737_v61, 0.0  ;;  %v1917_v8 = vmul.f32 %v13905_v35, %v1737_v61  ;;  %v1738_v33 = vadd.f32 %v13898_v28, %v1646_v63  ;;  %2320 = vst [vmem:[#allocation3 + $0x3d8] sm:$0xf] %v2304_v11  ;;  %v2534_v2 = vpack.c.bf16 %v2399_v51, %v12463_v0  ;;  %v2398_v11 = vld [vmem:[#allocation3 + $0x58] sm:$0xff]  ;;  %v12469_v51 = vld [vmem:[#allocation3 + $0x1c0] sm:$0xff] }
 0x2d3   : > { %vm1823_vm7 = vcmp.gt.f32.partialorder %v1735_v6, 0.0  ;;  %v1915_v9 = vmul.f32 %v13905_v35, %v1735_v6  ;;  %v1736_v10 = vadd.f32 %v13898_v28, %v1644_v7  ;;  %v2470_v0 = vld [vmem:[#allocation3 + $0x298] sm:$0xff] }
 0x2d4   : > { %v2005_v12 = vsel %vm1825_vm6, %v1737_v61, %v1917_v8  ;;  %v2114_v13 = vld [vmem:[#allocation2 + $0x270] sm:$0xf]  ;;  %vm1826_vm8 = vcmp.gt.f32.partialorder %v1738_v33, 0.0  ;;  %v1918_v14 = vmul.f32 %v13905_v35, %v1738_v33  ;;  %vm4968_vm6 = vcmask 1040384  }
 0x2d5   : > { %2093 = vst [vmem:[#allocation2 + $0x290] sm:$0xff] %v2005_v12  ;;  %v2003_v15 = vsel %vm1823_vm7, %v1735_v6, %v1915_v9  ;;  %2130 = vst [vmem:[#allocation3 + $0x438] sm:$0xf] %v2114_v13  ;;  %vm1824_vm9 = vcmp.gt.f32.partialorder %v1736_v10, 0.0  ;;  %v1916_v62 = vmul.f32 %v13905_v35, %v1736_v10  ;;  %v11380_v19 = vpop.f32.mrb[84].mxu0  ;;  %v2389_v6 = vld [vmem:[#allocation3 + $0x10] sm:$0xff] }
 0x2d6   : > { %v2368_v21 = vld [vmem:[#allocation2 + $0x260] sm:$0xf]  ;;  %2091 = vst [vmem:[#allocation2 + $0x280] sm:$0xff] %v2003_v15  ;;  %v2006_v24 = vsel %vm1826_vm8, %v1738_v33, %v1918_v14  ;;  %v1649_v25 = vmul.f32 %v13880_v3, %v11380_v19  ;;  %v1541_v54 = vpop.f32.mrb[85].mxu0  ;;  %v2417_v9 = vld [vmem:[#allocation3 + $0xf0] sm:$0xff]  ;;  %v2533_v13 = vpack.c.bf16 %v2398_v11, %v2389_v6  ;;  %v12464_v19 = vld [vmem:[#allocation3 + $0xa8] sm:$0xff] }
 0x2d7   : > { %v2145_v45 = vld [vmem:[#allocation2 + $0x271] sm:$0xff]  ;;  %v2146_v23 = vld [vmem:[#allocation2 + $0x279] sm:$0xf]  ;;  %2384 = vst [vmem:[#allocation3 + $0x3e8] sm:$0xf] %v2368_v21  ;;  %2094 = vst [vmem:[#allocation2 + $0x298] sm:$0xff] %v2006_v24  ;;  %v2004_v26 = vsel %vm1824_vm9, %v1736_v10, %v1916_v62  ;;  %v1647_v29 = vmul.f32 %v13880_v3, %v1541_v54  ;;  %v2543_v21 = vpack.c.bf16 %v2417_v9, %v12464_v19 }
 0x2d8   : > { %2162 = vst [vmem:[#allocation3 + $0x440] sm:$0xf] %v2146_v23  ;;  %v11381_v30 = vpop.f32.mrb[86].mxu0  ;;  %2092 = vst [vmem:[#allocation2 + $0x288] sm:$0xff] %v2004_v26  ;;  %v1741_v31 = vadd.f32 %v13898_v28, %v1649_v25  ;;  %v11783_v10 = vld [vmem:[%s13324_s4 + $0x200] ss:$8 sps:$4 sm:$0xff]  }
 0x2d9   : > { %v1650_v32 = vmul.f32 %v13880_v3, %v11381_v30  ;;  %v1544_v34 = vpop.f32.mrb[87].mxu0  ;;  %v1739_v37 = vadd.f32 %v13898_v28, %v1647_v29  ;;  %v11788_v12 = vld [vmem:[%s13324_s4 + $0x214] ss:$8 sps:$4 sm:$0xff]   ;;  %v11791_v23 = vld [vmem:[%s13324_s4 + $0x224] ss:$8 sps:$4 sm:$0xff]  }
 0x2da   : > { %v1648_v38 = vmul.f32 %v13880_v3, %v1544_v34  ;;  %vm1829_vm10 = vcmp.gt.f32.partialorder %v1741_v31, 0.0  ;;  %v1921_v39 = vmul.f32 %v13905_v35, %v1741_v31  ;;  %v2416_v24 = vld [vmem:[#allocation3 + $0xe8] sm:$0xff]  ;;  %v2435_v25 = vld [vmem:[#allocation3 + $0x180] sm:$0xff]  ;;  %v12470_v11 = vld [vmem:[#allocation3 + $0x250] sm:$0xff] }
 0x2db   : > { %v1742_v40 = vadd.f32 %v13898_v28, %v1650_v32  ;;  %vm1827_vm11 = vcmp.gt.f32.partialorder %v1739_v37, 0.0  ;;  %v1919_v41 = vmul.f32 %v13905_v35, %v1739_v37  ;;  %v11789_v54 = vld [vmem:[%s13324_s4 + $0x220] ss:$8 sps:$4 sm:$0xff]   ;;  %v12465_v26 = vld [vmem:[#allocation3 + $0xa0] sm:$0xff] }
 0x2dc   : > { %v1740_v42 = vadd.f32 %v13898_v28, %v1648_v38  ;;  %v2009_v43 = vsel %vm1829_vm10, %v1741_v31, %v1921_v39  ;;  %v2242_v46 = vld [vmem:[#allocation2 + $0x294] sm:$0xf]  ;;  %v2522_v59 = vld [vmem:[#allocation3 + $0x438] sm:$0xff]  ;;  %v2542_v29 = vpack.c.bf16 %v2416_v24, %v12465_v26  ;;  %v11807_v6 = vld [vmem:[%s13324_s4 + $0x280] ss:$8 sps:$4 sm:$0xff]  }
 0x2dd   : > { %vm1830_vm12 = vcmp.gt.f32.partialorder %v1742_v40, 0.0  ;;  %v1922_v44 = vmul.f32 %v13905_v35, %v1742_v40  ;;  %2097 = vst [vmem:[#allocation2 + $0x2b0] sm:$0xff] %v2009_v43  ;;  %v2007_v47 = vsel %vm1827_vm11, %v1739_v37, %v1919_v41  ;;  %v13948_v49 = vld [vmem:[#allocation2 + $0x27a] sm:$0xff]  ;;  %v2178_v50 = vld [vmem:[#allocation2 + $0x282] sm:$0xf]  ;;  %v2594_v63 = vpack.c.bf16 %v2522_v59, %v13918_v55  ;;  %v2453_v39 = vld [vmem:[#allocation3 + $0x210] sm:$0xff] }
 0x2de   : > { %vm1828_vm13 = vcmp.gt.f32.partialorder %v1740_v42, 0.0  ;;  %v1920_v3 = vmul.f32 %v13905_v35, %v1740_v42  ;;  %2258 = vst [vmem:[#allocation3 + $0x458] sm:$0xf] %v2242_v46  ;;  %2095 = vst [vmem:[#allocation2 + $0x2a0] sm:$0xff] %v2007_v47  ;;  %v13950_v28 = vld [vmem:[#allocation2 + $0x295] sm:$0xff] }
 0x2df   : > { %v2523_v36 = vld [vmem:[#allocation3 + $0x440] sm:$0xff]  ;;  %v2010_v52 = vsel %vm1830_vm12, %v1742_v40, %v1922_v44  ;;  %2194 = vst [vmem:[#allocation3 + $0x448] sm:$0xf] %v2178_v50  ;;  %v2210_v61 = vld [vmem:[#allocation2 + $0x28b] sm:$0xf]  ;;  %v12466_v31 = vld [vmem:[#allocation3 + $0x138] sm:$0xff] }
 0x2e0   : > { %v2595_v57 = vpack.c.bf16 %v2523_v36, %v2145_v45  ;;  %2098 = vst [vmem:[#allocation2 + $0x2b8] sm:$0xff] %v2010_v52  ;;  %v2008_v58 = vsel %vm1828_vm13, %v1740_v42, %v1920_v3  ;;  %v13952_v60 = vld [vmem:[#allocation2 + $0x283] sm:$0xff]  ;;  %2226 = vst [vmem:[#allocation3 + $0x450] sm:$0xf] %v2210_v61  ;;  %v13955_v35 = vld [vmem:[#allocation2 + $0x28c] sm:$0xff]  ;;  %v2552_v32 = vpack.c.bf16 %v2435_v25, %v12466_v31 }
 0x2e1   : > { %2096 = vst [vmem:[#allocation2 + $0x2a8] sm:$0xff] %v2008_v58  ;;  %v11786_v45 = vld [vmem:[%s13324_s4 + $0x210] ss:$8 sps:$4 sm:$0xff]   ;;  %v11794_v30 = vld [vmem:[%s13324_s4 + $0x234] ss:$8 sps:$4 sm:$0xff]   ;;  %v12467_v41 = vld [vmem:[#allocation3 + $0x130] sm:$0xff] }
 0x2e2   : > { %3569 = vmatprep.mubr.bf16.mxu1 %v2595_v57  ;;  %v11792_v34 = vld [vmem:[%s13324_s4 + $0x230] ss:$8 sps:$4 sm:$0xff]   ;;  %v11797_v37 = vld [vmem:[%s13324_s4 + $0x244] ss:$8 sps:$4 sm:$0xff]   ;;  %v11795_v40 = vld [vmem:[%s13324_s4 + $0x240] ss:$8 sps:$4 sm:$0xff]  }
 0x2e3   : > { %3570 = vmatmul.mubr.bf16.gmra.mrb[28].mxu1 %v2594_v63  ;;  %v2434_v38 = vld [vmem:[#allocation3 + $0x178] sm:$0xff]  ;;  %v12468_v44 = vld [vmem:[#allocation3 + $0x1c8] sm:$0xff]  ;;  %v2471_v50 = vld [vmem:[#allocation3 + $0x2a0] sm:$0xff] }
 0x2e4   : > { %3612 = vmatprep.mubr.bf16.mxu1 %v2534_v2  ;;  %v13957_v7 = vld [vmem:[#allocation2 + $0x2b0] sm:$0xff]  ;;  %v2551_v42 = vpack.c.bf16 %v2434_v38, %v12467_v41  ;;  %v11800_v43 = vld [vmem:[%s13324_s4 + $0x254] ss:$8 sps:$4 sm:$0xff]   ;;  %v2561_v46 = vpack.c.bf16 %v2453_v39, %v12468_v44  ;;  %v11798_v59 = vld [vmem:[%s13324_s4 + $0x250] ss:$8 sps:$4 sm:$0xff]   ;;  %v2570_v58 = vpack.c.bf16 %v2471_v50, %v13810_v20 }
 0x2e5   : > { %v2274_v8 = vld [vmem:[#allocation2 + $0x29d] sm:$0xf]  ;;  %v11803_v47 = vld [vmem:[%s13324_s4 + $0x264] ss:$8 sps:$4 sm:$0xff]   ;;  %v11801_v36 = vld [vmem:[%s13324_s4 + $0x260] ss:$8 sps:$4 sm:$0xff]  }
 0x2e6   : > { %v13959_v33 = vld [vmem:[#allocation2 + $0x29e] sm:$0xff]  ;;  %2290 = vst [vmem:[#allocation3 + $0x460] sm:$0xf] %v2274_v8  ;;  %v2452_v3 = vld [vmem:[#allocation3 + $0x208] sm:$0xff]  ;;  %v2489_v2 = vld [vmem:[#allocation3 + $0x330] sm:$0xff]  ;;  %v2569_v8 = vpack.c.bf16 %v2470_v0, %v12470_v11 }
 0x2e7   : > { %v2370_v55 = vld [vmem:[#allocation2 + $0x2b8] sm:$0xf]  ;;  %v2560_v52 = vpack.c.bf16 %v2452_v3, %v12469_v51  ;;  %v11806_v57 = vld [vmem:[%s13324_s4 + $0x274] ss:$8 sps:$4 sm:$0xff]   ;;  %v11809_v63 = vld [vmem:[%s13324_s4 + $0x284] ss:$8 sps:$4 sm:$0xff]   ;;  %v2579_v20 = vpack.c.bf16 %v2489_v2, %v13840_v56 }
 0x2e8   : > { %2386 = vst [vmem:[#allocation3 + $0x478] sm:$0xf] %v2370_v55  ;;  %v13963_v14 = vld [vmem:[#allocation2 + $0x2a7] sm:$0xff]  ;;  %v2338_v15 = vld [vmem:[#allocation2 + $0x2af] sm:$0xf]  ;;  %v2418_v50 = vld [vmem:[#allocation3 + $0xf8] sm:$0xff] }
 0x2e9   : > { %v2306_v62 = vld [vmem:[#allocation2 + $0x2a6] sm:$0xf]  ;;  %2354 = vst [vmem:[#allocation3 + $0x470] sm:$0xf] %v2338_v15  ;;  %v11804_v61 = vld [vmem:[%s13324_s4 + $0x270] ss:$8 sps:$4 sm:$0xff]  }
 0x2ea   : > { %2322 = vst [vmem:[#allocation3 + $0x468] sm:$0xf] %v2306_v62  ;;  %v11812_v9 = vld [vmem:[%s13324_s4 + $0x294] ss:$8 sps:$4 sm:$0xff]   ;;  %v11810_v55 = vld [vmem:[%s13324_s4 + $0x290] ss:$8 sps:$4 sm:$0xff]  }
 0x2eb   : > { %3613 = vmatmul.mubr.bf16.vlgmr.msra.gmra.mrb[0].mxu1 %v2533_v13  ;;  %v2507_v13 = vld [vmem:[#allocation3 + $0x3c0] sm:$0xff]  ;;  %v11813_v15 = vld [vmem:[%s13324_s4 + $0x2a0] ss:$8 sps:$4 sm:$0xff]   ;;  %v11833_v39 = vld [vmem:[%s13324_s4 + $0x304] ss:$8 sps:$4 sm:$0xff]  }
 0x2ec   : > { %3694 = vmatpush1.bf16.msra.mxu1 %v11783_v10  ;;  %3622 = vmatprep.mubr.bf16.mxu1 %v2543_v21  ;;  %v11815_v10 = vld [vmem:[%s13324_s4 + $0x2a4] ss:$8 sps:$4 sm:$0xff]   ;;  %v11818_v19 = vld [vmem:[%s13324_s4 + $0x2b4] ss:$8 sps:$4 sm:$0xff]   ;;  %v2588_v56 = vpack.c.bf16 %v2507_v13, %v13893_v27  ;;  %v11816_v21 = vld [vmem:[%s13324_s4 + $0x2b0] ss:$8 sps:$4 sm:$0xff]  }
 0x2ed   : > { %3695 = vmatprep.subr.bf16.mxu1 %v11788_v12  ;;  %v2488_v12 = vld [vmem:[#allocation3 + $0x328] sm:$0xff]  ;;  %v2525_v24 = vld [vmem:[#allocation3 + $0x450] sm:$0xff]  ;;  %v11822_v26 = vld [vmem:[%s13324_s4 + $0x2d0] ss:$8 sps:$4 sm:$0xff]  }
 0x2ee   : > { %v2578_v62 = vpack.c.bf16 %v2488_v12, %v13843_v1  ;;  %v11819_v25 = vld [vmem:[%s13324_s4 + $0x2c0] ss:$8 sps:$4 sm:$0xff]   ;;  %v2597_v27 = vpack.c.bf16 %v2525_v24, %v13952_v60  ;;  %v11828_v38 = vld [vmem:[%s13324_s4 + $0x2f0] ss:$8 sps:$4 sm:$0xff]   ;;  %v11836_v44 = vld [vmem:[%s13324_s4 + $0x314] ss:$8 sps:$4 sm:$0xff]  }
 0x2ef   : > { %v2401_v31 = vld [vmem:[#allocation3 + $0x70] sm:$0xff]  ;;  %v2400_v41 = vld [vmem:[#allocation3 + $0x68] sm:$0xff]  ;;  %v11840_v0 = vld [vmem:[%s13324_s4 + $0x330] ss:$8 sps:$4 sm:$0xff]  }
 0x2f0   : > { %3696 = vmatpush1.bf16.msra.mxu1 %v11786_v45  ;;  %v11821_v45 = vld [vmem:[%s13324_s4 + $0x2c4] ss:$8 sps:$4 sm:$0xff]   ;;  %v11837_v51 = vld [vmem:[%s13324_s4 + $0x320] ss:$8 sps:$4 sm:$0xff]   ;;  %v2455_v11 = vld [vmem:[#allocation3 + $0x220] sm:$0xff] }
 0x2f1   : > { %3697 = vmatprep.subr.bf16.mxu1 %v11791_v23  ;;  %v2506_v23 = vld [vmem:[#allocation3 + $0x3b8] sm:$0xff]  ;;  %v11839_v3 = vld [vmem:[%s13324_s4 + $0x324] ss:$8 sps:$4 sm:$0xff]  }
 0x2f2   : > { %v2587_v1 = vpack.c.bf16 %v2506_v23, %v13895_v17  ;;  %v11830_v17 = vld [vmem:[%s13324_s4 + $0x2f4] ss:$8 sps:$4 sm:$0xff]   ;;  %v11845_v2 = vld [vmem:[%s13324_s4 + $0x344] ss:$8 sps:$4 sm:$0xff]   ;;  %v11846_v13 = vld [vmem:[%s13324_s4 + $0x350] ss:$8 sps:$4 sm:$0xff]  }
 0x2f3   : > { %3623 = vmatmul.mubr.bf16.gmra.mrb[4].mxu1 %v2542_v29  ;;  %v11827_v29 = vld [vmem:[%s13324_s4 + $0x2e4] ss:$8 sps:$4 sm:$0xff]   ;;  %v11854_v23 = vld [vmem:[%s13324_s4 + $0x374] ss:$8 sps:$4 sm:$0xff]  }
 0x2f4   : > { %3698 = vmatpush1.bf16.msra.mxu1 %v11789_v54  ;;  %3632 = vmatprep.mubr.bf16.mxu1 %v2552_v32  ;;  %v11824_v54 = vld [vmem:[%s13324_s4 + $0x2d4] ss:$8 sps:$4 sm:$0xff]   ;;  %v11825_v32 = vld [vmem:[%s13324_s4 + $0x2e0] ss:$8 sps:$4 sm:$0xff]  }
 0x2f5   : > { %3699 = vmatprep.subr.bf16.mxu1 %v11794_v30  ;;  %v2524_v30 = vld [vmem:[#allocation3 + $0x448] sm:$0xff] }
 0x2f6   : > { %v12478_v24 = vld [vmem:[#allocation3 + $0x268] sm:$0xff] }
 0x2f8   : > { %3700 = vmatpush1.bf16.msra.mxu1 %v11792_v34  ;;  %v2596_v34 = vpack.c.bf16 %v2524_v30, %v13948_v49  ;;  %v12479_v30 = vld [vmem:[#allocation3 + $0x260] sm:$0xff] }
 0x2f9   : > { %3701 = vmatprep.subr.bf16.mxu1 %v11797_v37  ;;  %v12471_v37 = vld [vmem:[#allocation3 + $0x28] sm:$0xff] }
 0x2fa   : > { %v2536_v60 = vpack.c.bf16 %v2401_v31, %v12471_v37  ;;  %v11863_v37 = vld [vmem:[%s13324_s4 + $0x3a4] ss:$8 sps:$4 sm:$0xff]  }
 0x2fb   : > { %3633 = vmatmul.mubr.bf16.gmra.mrb[8].mxu1 %v2551_v42  ;;  %v2419_v42 = vld [vmem:[#allocation3 + $0x100] sm:$0xff] }
 0x2fc   : > { %3702 = vmatpush1.bf16.msra.mxu1 %v11795_v40  ;;  %3642 = vmatprep.mubr.bf16.mxu1 %v2561_v46  ;;  %v2391_v40 = vld [vmem:[#allocation3 + $0x20] sm:$0xff]  ;;  %v12472_v46 = vld [vmem:[#allocation3 + $0xb8] sm:$0xff] }
 0x2fd   : > { %3703 = vmatprep.subr.bf16.mxu1 %v11800_v43  ;;  %v11831_v43 = vld [vmem:[%s13324_s4 + $0x300] ss:$8 sps:$4 sm:$0xff]   ;;  %v2535_v49 = vpack.c.bf16 %v2400_v41, %v2391_v40  ;;  %v11866_v41 = vld [vmem:[%s13324_s4 + $0x3b4] ss:$8 sps:$4 sm:$0xff]  }
 0x300   : > { %3704 = vmatpush1.bf16.msra.mxu1 %v11798_v59  ;;  %v2545_v59 = vpack.c.bf16 %v2419_v42, %v12472_v46  ;;  %v11864_v42 = vld [vmem:[%s13324_s4 + $0x3b0] ss:$8 sps:$4 sm:$0xff]   ;;  %v11867_v46 = vld [vmem:[%s13324_s4 + $0x3c0] ss:$8 sps:$4 sm:$0xff]  }
 0x301   : > { %3705 = vmatprep.subr.bf16.mxu1 %v11803_v47  ;;  %v11834_v47 = vld [vmem:[%s13324_s4 + $0x310] ss:$8 sps:$4 sm:$0xff]  }
 0x303   : > { %3643 = vmatmul.mubr.bf16.gmra.mrb[12].mxu1 %v2560_v52  ;;  %v12473_v52 = vld [vmem:[#allocation3 + $0xb0] sm:$0xff] }
 0x304   : > { %3706 = vmatpush1.bf16.msra.mxu1 %v11801_v36  ;;  %3652 = vmatprep.mubr.bf16.mxu1 %v2570_v58  ;;  %v2437_v36 = vld [vmem:[#allocation3 + $0x190] sm:$0xff]  ;;  %v11842_v58 = vld [vmem:[%s13324_s4 + $0x334] ss:$8 sps:$4 sm:$0xff]  }
 0x305   : > { %3707 = vmatprep.subr.bf16.mxu1 %v11806_v57  ;;  %v2544_v57 = vpack.c.bf16 %v2418_v50, %v12473_v52  ;;  %v2526_v50 = vld [vmem:[#allocation3 + $0x458] sm:$0xff] }
 0x306   : > { %v12480_v52 = vld [vmem:[#allocation3 + $0x38] sm:$0xff] }
 0x308   : > { %3708 = vmatpush1.bf16.msra.mxu1 %v11804_v61  ;;  %v12474_v61 = vld [vmem:[#allocation3 + $0x148] sm:$0xff] }
 0x309   : > { %3709 = vmatprep.subr.bf16.mxu1 %v11809_v63  ;;  %v2554_v63 = vpack.c.bf16 %v2437_v36, %v12474_v61  ;;  %v2403_v36 = vld [vmem:[#allocation3 + $0x80] sm:$0xff]  ;;  %v11904_v61 = vld [vmem:[%s13332_s25] sm:$0xff]  }
 0x30b   : > { %3653 = vmatmul.mubr.bf16.gmra.mrb[16].mxu1 %v2569_v8  ;;  %v11843_v8 = vld [vmem:[%s13324_s4 + $0x340] ss:$8 sps:$4 sm:$0xff]  }
 0x30c   : > { %3710 = vmatpush1.bf16.msra.mxu1 %v11807_v6  ;;  %3662 = vmatprep.mubr.bf16.mxu1 %v2579_v20  ;;  %v2436_v6 = vld [vmem:[#allocation3 + $0x188] sm:$0xff] }
 0x30d   : > { %3711 = vmatprep.subr.bf16.mxu1 %v11812_v9  ;;  %v12475_v9 = vld [vmem:[#allocation3 + $0x140] sm:$0xff] }
 0x30e   : > { %v2553_v20 = vpack.c.bf16 %v2436_v6, %v12475_v9  ;;  %v2402_v6 = vld [vmem:[#allocation3 + $0x78] sm:$0xff]  ;;  %v11879_v9 = vld [vmem:[%s13324_s4 + $0x400] ss:$8 sps:$4 sm:$0xff]  }
 0x310   : > { %3712 = vmatpush1.bf16.msra.mxu1 %v11810_v55  ;;  %v11848_v55 = vld [vmem:[%s13324_s4 + $0x354] ss:$8 sps:$4 sm:$0xff]  }
 0x311   : > { %3713 = vmatprep.subr.bf16.mxu1 %v11815_v10  ;;  %v12476_v10 = vld [vmem:[#allocation3 + $0x1d8] sm:$0xff] }
 0x312   : > { %v2563_v12 = vpack.c.bf16 %v2455_v11, %v12476_v10  ;;  %v2421_v11 = vld [vmem:[#allocation3 + $0x110] sm:$0xff]  ;;  %v11884_v10 = vld [vmem:[%s13324_s4 + $0x414] ss:$8 sps:$4 sm:$0xff]  }
 0x313   : > { %3663 = vmatmul.mubr.bf16.gmra.mrb[20].mxu1 %v2578_v62  ;;  %v2454_v62 = vld [vmem:[#allocation3 + $0x218] sm:$0xff] }
 0x314   : > { %3714 = vmatpush1.bf16.msra.mxu1 %v11813_v15  ;;  %3672 = vmatprep.mubr.bf16.mxu1 %v2588_v56  ;;  %v11851_v15 = vld [vmem:[%s13324_s4 + $0x364] ss:$8 sps:$4 sm:$0xff]   ;;  %v11849_v56 = vld [vmem:[%s13324_s4 + $0x360] ss:$8 sps:$4 sm:$0xff]  }
 0x315   : > { %3715 = vmatprep.subr.bf16.mxu1 %v11818_v19  ;;  %v2473_v19 = vld [vmem:[#allocation3 + $0x2b0] sm:$0xff] }
 0x318   : > { %3716 = vmatpush1.bf16.msra.mxu1 %v11816_v21  ;;  %v12477_v21 = vld [vmem:[#allocation3 + $0x1d0] sm:$0xff] }
 0x319   : > { %3717 = vmatprep.subr.bf16.mxu1 %v11821_v45  ;;  %v2562_v45 = vpack.c.bf16 %v2454_v62, %v12477_v21  ;;  %v11909_v62 = vld [vmem:[%s13332_s25 + $0x58] sm:$0xff]   ;;  %v2420_v21 = vld [vmem:[#allocation3 + $0x108] sm:$0xff] }
 0x31b   : > { %3673 = vmatmul.mubr.bf16.gmra.mrb[24].mxu1 %v2587_v1  ;;  %v11852_v1 = vld [vmem:[%s13324_s4 + $0x370] ss:$8 sps:$4 sm:$0xff]  }
 0x31c   : > { %3718 = vmatpush1.bf16.msra.mxu1 %v11819_v25  ;;  %3682 = vmatprep.mubr.bf16.mxu1 %v2597_v27  ;;  %v2572_v25 = vpack.c.bf16 %v2473_v19, %v12478_v24  ;;  %v2472_v27 = vld [vmem:[#allocation3 + $0x2a8] sm:$0xff]  ;;  %v11882_v19 = vld [vmem:[%s13324_s4 + $0x410] ss:$8 sps:$4 sm:$0xff]  }
 0x31d   : > { %3719 = vmatprep.subr.bf16.mxu1 %v11824_v54  ;;  %v11857_v54 = vld [vmem:[%s13324_s4 + $0x384] ss:$8 sps:$4 sm:$0xff]   ;;  %v2571_v31 = vpack.c.bf16 %v2472_v27, %v12479_v30  ;;  %v11911_v24 = vld [vmem:[%s13332_s25 + $0x60] sm:$0xff]  }
 0x31e   : > { %v11890_v27 = vld [vmem:[%s13324_s4 + $0x434] ss:$8 sps:$4 sm:$0xff]  }
 0x31f   : > { %v11912_v30 = vld [vmem:[%s13332_s25 + $0x20] sm:$0xff]  }
 0x320   : > { %3720 = vmatpush1.bf16.msra.mxu1 %v11822_v26  ;;  %v2491_v26 = vld [vmem:[#allocation3 + $0x340] sm:$0xff] }
 0x321   : > { %3721 = vmatprep.subr.bf16.mxu1 %v11827_v29  ;;  %v11855_v29 = vld [vmem:[%s13324_s4 + $0x380] ss:$8 sps:$4 sm:$0xff]  }
 0x323   : > { %3683 = vmatmul.mubr.bf16.gmra.mrb[28].mxu1 %v2596_v34  ;;  %v2581_v34 = vpack.c.bf16 %v2491_v26, %v13863_v18  ;;  %v12483_v26 = vld [vmem:[#allocation3 + $0x158] sm:$0xff] }
 0x324   : > { %3722 = vmatpush1.bf16.msra.mxu1 %v11825_v32  ;;  %3725 = vmatprep.mubr.bf16.mxu1 %v2536_v60  ;;  %v11860_v32 = vld [vmem:[%s13324_s4 + $0x394] ss:$8 sps:$4 sm:$0xff]  }
 0x325   : > { %3723 = vmatprep.subr.bf16.mxu1 %v11830_v17  ;;  %v11858_v17 = vld [vmem:[%s13324_s4 + $0x390] ss:$8 sps:$4 sm:$0xff]  }
 0x326   : > { %v2490_v60 = vld [vmem:[#allocation3 + $0x338] sm:$0xff] }
 0x327   : > { %v2580_v40 = vpack.c.bf16 %v2490_v60, %v13857_v16  ;;  %v2457_v60 = vld [vmem:[#allocation3 + $0x230] sm:$0xff] }
 0x328   : > { %3724 = vmatpush1.bf16.msra.mxu1 %v11828_v38  ;;  %v2509_v38 = vld [vmem:[#allocation3 + $0x3d0] sm:$0xff] }
 0x329   : > { %3806 = vmatprep.subr.bf16.mxu1 %v11833_v39  ;;  %v11861_v39 = vld [vmem:[%s13324_s4 + $0x3a0] ss:$8 sps:$4 sm:$0xff]   ;;  %v2590_v18 = vpack.c.bf16 %v2509_v38, %v13913_v48 }
 0x32a   : > { %v11891_v38 = vld [vmem:[%s13324_s4 + $0x440] ss:$8 sps:$4 sm:$0xff]  }
 0x32b   : > { %3726 = vmatmul.mubr.bf16.vlgmr.msra.gmra.mrb[0].mxu1 %v2535_v49  ;;  %v2508_v49 = vld [vmem:[#allocation3 + $0x3c8] sm:$0xff] }
 0x32c   : > { %3807 = vmatpush1.bf16.msra.mxu1 %v11831_v43  ;;  %3735 = vmatprep.mubr.bf16.mxu1 %v2545_v59  ;;  %v11869_v43 = vld [vmem:[%s13324_s4 + $0x3c4] ss:$8 sps:$4 sm:$0xff]   ;;  %v2589_v16 = vpack.c.bf16 %v2508_v49, %v13890_v22  ;;  %v11872_v59 = vld [vmem:[%s13324_s4 + $0x3d4] ss:$8 sps:$4 sm:$0xff]   ;;  %v2598_v22 = vpack.c.bf16 %v2526_v50, %v13955_v35 }
 0x32d   : > { %3808 = vmatprep.subr.bf16.mxu1 %v11836_v44  ;;  %v2527_v44 = vld [vmem:[#allocation3 + $0x460] sm:$0xff]  ;;  %v11899_v49 = vld [vmem:[%s13324_s4 + $0x464] ss:$8 sps:$4 sm:$0xff]  }
 0x32e   : > { %v2599_v48 = vpack.c.bf16 %v2527_v44, %v13950_v28  ;;  %v11878_v28 = vld [vmem:[%s13324_s4 + $0x3f4] ss:$8 sps:$4 sm:$0xff]   ;;  %v2456_v44 = vld [vmem:[#allocation3 + $0x228] sm:$0xff] }
 0x32f   : > { %v11906_v35 = vld [vmem:[%s13332_s25 + $0x8] sm:$0xff]  }
 0x330   : > { %3809 = vmatpush1.bf16.msra.mxu1 %v11834_v47  ;;  %v11870_v47 = vld [vmem:[%s13324_s4 + $0x3d0] ss:$8 sps:$4 sm:$0xff]  }
 0x331   : > { %3810 = vmatprep.subr.bf16.mxu1 %v11839_v3  ;;  %v11875_v3 = vld [vmem:[%s13324_s4 + $0x3e4] ss:$8 sps:$4 sm:$0xff]  }
 0x333   : > { %3736 = vmatmul.mubr.bf16.gmra.mrb[4].mxu1 %v2544_v57  ;;  %v2538_v57 = vpack.c.bf16 %v2403_v36, %v12480_v52  ;;  %v11900_v36 = vld [vmem:[%s13324_s4 + $0x470] ss:$8 sps:$4 sm:$0xff]  }
 0x334   : > { %3811 = vmatpush1.bf16.msra.mxu1 %v11837_v51  ;;  %3745 = vmatprep.mubr.bf16.mxu1 %v2554_v63  ;;  %v11873_v51 = vld [vmem:[%s13324_s4 + $0x3e0] ss:$8 sps:$4 sm:$0xff]   ;;  %v11905_v63 = vld [vmem:[%s13332_s25 + $0x48] sm:$0xff]  }
 0x335   : > { %3812 = vmatprep.subr.bf16.mxu1 %v11842_v58  ;;  %v11903_v58 = vld [vmem:[%s13332_s25 + $0x40] sm:$0xff]  }
 0x336   : > { %10899 = vmatprep.subr.bf16.mxu0 %v11903_v58 }
 0x337   : > { %10900 = vmatpush3.bf16.msra.mxu0 %v11904_v61  ;;  %v2492_v61 = vld [vmem:[#allocation3 + $0x348] sm:$0xff] }
 0x338   : > { %3813 = vmatpush1.bf16.msra.mxu1 %v11840_v0  ;;  %v11876_v0 = vld [vmem:[%s13324_s4 + $0x3f0] ss:$8 sps:$4 sm:$0xff]   ;;  %10901 = vmatprep.subr.bf16.mxu0 %v11905_v63 }
 0x339   : > { %3814 = vmatprep.subr.bf16.mxu1 %v11845_v2  ;;  %v11881_v2 = vld [vmem:[%s13324_s4 + $0x404] ss:$8 sps:$4 sm:$0xff]   ;;  %v2511_v63 = vld [vmem:[#allocation3 + $0x3e0] sm:$0xff] }
 0x33b   : > { %3746 = vmatmul.mubr.bf16.gmra.mrb[8].mxu1 %v2553_v20  ;;  %v2393_v20 = vld [vmem:[#allocation3 + $0x30] sm:$0xff]  ;;  %10902 = vmatpush3.bf16.msra.mxu0 %v11906_v35  ;;  %v2510_v35 = vld [vmem:[#allocation3 + $0x3d8] sm:$0xff] }
 0x33c   : > { %3815 = vmatpush1.bf16.msra.mxu1 %v11843_v8  ;;  %3755 = vmatprep.mubr.bf16.mxu1 %v2563_v12  ;;  %v11907_v8 = vld [vmem:[%s13332_s25 + $0x50] sm:$0xff]  }
 0x33d   : > { %3816 = vmatprep.subr.bf16.mxu1 %v11848_v55  ;;  %v2537_v55 = vpack.c.bf16 %v2402_v6, %v2393_v20  ;;  %v12481_v12 = vld [vmem:[#allocation3 + $0xc8] sm:$0xff]  ;;  %10903 = vmatprep.subr.bf16.mxu0 %v11907_v8  ;;  %v2592_v6 = vpack.c.bf16 %v2511_v63, %v13924_v4  ;;  %v2591_v8 = vpack.c.bf16 %v2510_v35, %v13926_v5 }
 0x33e   : > { %v2528_v20 = vld [vmem:[#allocation3 + $0x468] sm:$0xff] }
 0x340   : > { %3817 = vmatpush1.bf16.msra.mxu1 %v11846_v13  ;;  %v2547_v13 = vpack.c.bf16 %v2421_v11, %v12481_v12  ;;  %v2529_v11 = vld [vmem:[#allocation3 + $0x470] sm:$0xff]  ;;  %v2404_v12 = vld [vmem:[#allocation3 + $0x88] sm:$0xff] }
 0x341   : > { %3818 = vmatprep.subr.bf16.mxu1 %v11851_v15  ;;  %v11908_v15 = vld [vmem:[%s13332_s25 + $0x10] sm:$0xff]  }
 0x342   : > { %10904 = vmatpush3.bf16.msra.mxu0 %v11908_v15  ;;  %v2422_v15 = vld [vmem:[#allocation3 + $0x118] sm:$0xff] }
 0x343   : > { %3756 = vmatmul.mubr.bf16.gmra.mrb[12].mxu1 %v2562_v45  ;;  %v11910_v45 = vld [vmem:[%s13332_s25 + $0x18] sm:$0xff]   ;;  %10905 = vmatprep.subr.bf16.mxu0 %v11909_v62 }
 0x344   : > { %3819 = vmatpush1.bf16.msra.mxu1 %v11849_v56  ;;  %3765 = vmatprep.mubr.bf16.mxu1 %v2572_v25  ;;  %v11887_v56 = vld [vmem:[%s13324_s4 + $0x424] ss:$8 sps:$4 sm:$0xff]   ;;  %v11885_v25 = vld [vmem:[%s13324_s4 + $0x420] ss:$8 sps:$4 sm:$0xff]  }
 0x345   : > { %3820 = vmatprep.subr.bf16.mxu1 %v11854_v23  ;;  %v2439_v23 = vld [vmem:[#allocation3 + $0x1a0] sm:$0xff]  ;;  %v12491_v62 = vld [vmem:[#allocation3 + $0xd0] sm:$0xff] }
 0x346   : > { %10906 = vmatpush3.bf16.msra.mxu0 %v11910_v45  ;;  %v2548_v5 = vpack.c.bf16 %v2422_v15, %v12491_v62 }
 0x347   : > { %10907 = vmatprep.subr.bf16.mxu0 %v11911_v24  ;;  %v12494_v24 = vld [vmem:[#allocation3 + $0x280] sm:$0xff] }
 0x348   : > { %3821 = vmatpush1.bf16.msra.mxu1 %v11852_v1  ;;  %v12482_v1 = vld [vmem:[#allocation3 + $0xc0] sm:$0xff] }
 0x349   : > { %3822 = vmatprep.subr.bf16.mxu1 %v11857_v54  ;;  %v2546_v54 = vpack.c.bf16 %v2420_v21, %v12482_v1  ;;  %v12493_v21 = vld [vmem:[#allocation3 + $0x1f0] sm:$0xff]  ;;  %v2494_v1 = vld [vmem:[#allocation3 + $0x358] sm:$0xff] }
 0x34a   : > { %10908 = vmatpush3.bf16.msra.mxu0 %v11912_v30  ;;  %v2530_v30 = vld [vmem:[#allocation3 + $0x478] sm:$0xff] }
 0x34b   : > { %3766 = vmatmul.mubr.bf16.gmra.mrb[16].mxu1 %v2571_v31  ;;  %v11913_v31 = vld [vmem:[%s13332_s25 + $0x68] sm:$0xff]  }
 0x34c   : > { %3823 = vmatpush1.bf16.msra.mxu1 %v11855_v29  ;;  %3775 = vmatprep.mubr.bf16.mxu1 %v2581_v34  ;;  %v2556_v29 = vpack.c.bf16 %v2439_v23, %v12483_v26  ;;  %v11893_v34 = vld [vmem:[%s13324_s4 + $0x444] ss:$8 sps:$4 sm:$0xff]  }
 0x34d   : > { %3824 = vmatprep.subr.bf16.mxu1 %v11860_v32  ;;  %v11888_v32 = vld [vmem:[%s13324_s4 + $0x430] ss:$8 sps:$4 sm:$0xff]   ;;  %10909 = vmatprep.subr.bf16.mxu0 %v11913_v31  ;;  %v2476_v23 = vld [vmem:[#allocation3 + $0x2c8] sm:$0xff]  ;;  %v2602_v31 = vpack.c.bf16 %v2530_v30, %v13957_v7 }
 0x34e   : > { %v2512_v26 = vld [vmem:[#allocation3 + $0x3e8] sm:$0xff] }
 0x34f   : > { %v11919_v7 = vld [vmem:[%s13332_s25 + $0x70] sm:$0xff]  }
 0x350   : > { %3825 = vmatpush1.bf16.msra.mxu1 %v11858_v17  ;;  %v2438_v17 = vld [vmem:[#allocation3 + $0x198] sm:$0xff] }
 0x351   : > { %3826 = vmatprep.subr.bf16.mxu1 %v11863_v37  ;;  %v11914_v37 = vld [vmem:[%s13332_s25 + $0x28] sm:$0xff]  }
 0x352   : > { %10910 = vmatpush3.bf16.msra.mxu0 %v11914_v37  ;;  %v11921_v37 = vld [vmem:[%s13332_s25 + $0x3d0] sm:$0xff]  }
 0x353   : > { %3776 = vmatmul.mubr.bf16.gmra.mrb[20].mxu1 %v2580_v40  ;;  %10911 = vmatprep.subr.bf16.mxu0 %v11919_v7 }
 0x354   : > { %3827 = vmatpush1.bf16.msra.mxu1 %v11861_v39  ;;  %3785 = vmatprep.mubr.bf16.mxu1 %v2590_v18  ;;  %v12484_v39 = vld [vmem:[#allocation3 + $0x150] sm:$0xff]  ;;  %v12485_v18 = vld [vmem:[#allocation3 + $0x1e8] sm:$0xff] }
 0x355   : > { %3828 = vmatprep.subr.bf16.mxu1 %v11866_v41  ;;  %v2555_v40 = vpack.c.bf16 %v2438_v17, %v12484_v39  ;;  %v11896_v41 = vld [vmem:[%s13324_s4 + $0x454] ss:$8 sps:$4 sm:$0xff]   ;;  %v11924_v39 = vld [vmem:[%s13332_s25 + $0x398] sm:$0xff]  }
 0x356   : > { %v11917_v17 = vld [vmem:[%s13332_s25 + $0x3c8] sm:$0xff]  }
 0x358   : > { %3829 = vmatpush1.bf16.msra.mxu1 %v11864_v42  ;;  %v2565_v42 = vpack.c.bf16 %v2457_v60, %v12485_v18  ;;  %v11922_v60 = vld [vmem:[%s13332_s25 + $0x390] sm:$0xff]  }
 0x359   : > { %3830 = vmatprep.subr.bf16.mxu1 %v11869_v43  ;;  %v11894_v43 = vld [vmem:[%s13324_s4 + $0x450] ss:$8 sps:$4 sm:$0xff]   ;;  %v11920_v18 = vld [vmem:[%s13332_s25 + $0x30] sm:$0xff]  }
 0x35a   : > { %10912 = vmatpush3.bf16.msra.mxu0 %v11920_v18 }
 0x35b   : > { %3786 = vmatmul.mubr.bf16.gmra.mrb[24].mxu1 %v2589_v16  ;;  %v11897_v16 = vld [vmem:[%s13324_s4 + $0x460] ss:$8 sps:$4 sm:$0xff]  }
 0x35c   : > { %3831 = vmatpush1.bf16.msra.mxu1 %v11867_v46  ;;  %3795 = vmatprep.mubr.bf16.mxu1 %v2599_v48  ;;  %v2475_v46 = vld [vmem:[#allocation3 + $0x2c0] sm:$0xff] }
 0x35d   : > { %3832 = vmatprep.subr.bf16.mxu1 %v11872_v59  ;;  %v12486_v59 = vld [vmem:[#allocation3 + $0x1e0] sm:$0xff] }
 0x35e   : > { %v2564_v48 = vpack.c.bf16 %v2456_v44, %v12486_v59  ;;  %v11930_v44 = vld [vmem:[%s13332_s25 + $0x38] sm:$0xff]  }
 0x35f   : > { %v11933_v59 = vld [vmem:[%s13332_s25 + $0x3f8] sm:$0xff]  }
 0x360   : > { %3833 = vmatpush1.bf16.msra.mxu1 %v11870_v47  ;;  %v11902_v47 = vld [vmem:[%s13324_s4 + $0x474] ss:$8 sps:$4 sm:$0xff]  }
 0x361   : > { %3834 = vmatprep.subr.bf16.mxu1 %v11875_v3  ;;  %v12487_v3 = vld [vmem:[#allocation3 + $0x278] sm:$0xff] }
 0x362   : > { %v2574_v50 = vpack.c.bf16 %v2475_v46, %v12487_v3  ;;  %v11931_v46 = vld [vmem:[%s13332_s25 + $0x3f0] sm:$0xff]   ;;  %v4038_v3 = vlaneseq }
 0x363   : > { %3796 = vmatmul.mubr.bf16.gmra.mrb[28].mxu1 %v2598_v22  ;;  %v2493_v22 = vld [vmem:[#allocation3 + $0x350] sm:$0xff] }
 0x364   : > { %3835 = vmatpush1.bf16.msra.mxu1 %v11873_v51  ;;  %3838 = vmatprep.mubr.bf16.mxu1 %v2538_v57  ;;  %v2474_v51 = vld [vmem:[#allocation3 + $0x2b8] sm:$0xff]  ;;  %v12489_v57 = vld [vmem:[#allocation3 + $0x308] sm:$0xff] }
 0x365   : > { %3836 = vmatprep.subr.bf16.mxu1 %v11878_v28  ;;  %v12488_v28 = vld [vmem:[#allocation3 + $0x270] sm:$0xff]  ;;  %v2583_v58 = vpack.c.bf16 %v2493_v22, %v12489_v57 }
 0x366   : > { %v2573_v52 = vpack.c.bf16 %v2474_v51, %v12488_v28  ;;  %v4032_v51 = vld [vmem:[%s13326_s28] ss:$4 sm:$0x3]  ;;  %v10179_v28 = vld [vmem:[%s13326_s28 + $0x1] ss:$4 sm:$0x3] }
 0x367   : > { %v10180_v57 = vld [vmem:[%s13326_s28 + $0x2] ss:$4 sm:$0x3]  ;;  %s15867_s28 = sld [smem:[#allocation37_spill]] }
 0x368   : > { %3837 = vmatpush1.bf16.msra.mxu1 %v11876_v0  ;;  %v12490_v0 = vld [vmem:[#allocation3 + $0x300] sm:$0xff] }
 0x369   : > { %3919 = vmatprep.subr.bf16.mxu1 %v11881_v2  ;;  %v2582_v2 = vpack.c.bf16 %v2492_v61, %v12490_v0 }
 0x36b   : > { %3839 = vmatmul.mubr.bf16.vlgmr.msra.gmra.mrb[0].mxu1 %v2537_v55  ;;  %v2600_v55 = vpack.c.bf16 %v2528_v20, %v13959_v33  ;;  %v2458_v33 = vld [vmem:[#allocation3 + $0x238] sm:$0xff] }
 0x36c   : > { %3920 = vmatpush1.bf16.msra.mxu1 %v11879_v9  ;;  %3848 = vmatprep.mubr.bf16.mxu1 %v2547_v13  ;;  %v2601_v9 = vpack.c.bf16 %v2529_v11, %v13963_v14  ;;  %v2395_v13 = vld [vmem:[#allocation3 + $0x40] sm:$0xff]  ;;  %v2440_v14 = vld [vmem:[#allocation3 + $0x1a8] sm:$0xff]  ;;  %v2566_v45 = vpack.c.bf16 %v2458_v33, %v12493_v21 }
 0x36d   : > { %3921 = vmatprep.subr.bf16.mxu1 %v11884_v10  ;;  %v15790_v10 = vmov 0   ;;  %v2539_v4 = vpack.c.bf16 %v2404_v12, %v2395_v13  ;;  %s15868_s29 = smov %s15867_s28 }
 0x370   : > { %3922 = vmatpush1.bf16.msra.mxu1 %v11882_v19  ;;  %v12492_v19 = vld [vmem:[#allocation3 + $0x160] sm:$0xff] }
 0x371   : > { %3923 = vmatprep.subr.bf16.mxu1 %v11887_v56  ;;  %v2557_v56 = vpack.c.bf16 %v2440_v14, %v12492_v19 }
 0x373   : > { %3849 = vmatmul.mubr.bf16.gmra.mrb[4].mxu1 %v2546_v54  ;;  %v12495_v54 = vld [vmem:[#allocation3 + $0x310] sm:$0xff] }
 0x374   : > { %3858 = vmatprep.mubr.bf16.mxu1 %v2556_v29  ;;  %3924 = vmatpush1.bf16.msra.mxu1 %v11885_v25  ;;  %v2575_v25 = vpack.c.bf16 %v2476_v23, %v12494_v24  ;;  %v2593_v29 = vpack.c.bf16 %v2512_v26, %v13916_v53  ;;  %v11918_v53 = vld [vmem:[%s13332_s25 + $0x388] sm:$0xff]  }
 0x375   : > { %3925 = vmatprep.subr.bf16.mxu1 %v11890_v27  ;;  %v2584_v27 = vpack.c.bf16 %v2494_v1, %v12495_v54 }
 0x378   : > { %3926 = vmatpush1.bf16.msra.mxu1 %v11888_v32  ;;  %v11915_v32 = vld [vmem:[%s13332_s25 + $0x3c0] sm:$0xff]  }
 0x379   : > { %3927 = vmatprep.subr.bf16.mxu1 %v11893_v34  ;;  %v11916_v34 = vld [vmem:[%s13332_s25 + $0x380] sm:$0xff]  }
 0x37b   : > { %3859 = vmatmul.mubr.bf16.gmra.mrb[8].mxu1 %v2555_v40  ;;  %v11925_v40 = vld [vmem:[%s13332_s25 + $0x3e0] sm:$0xff]  }
 0x37c   : > { %3868 = vmatprep.mubr.bf16.mxu1 %v2565_v42  ;;  %3928 = vmatpush1.bf16.msra.mxu1 %v11891_v38  ;;  %v11923_v38 = vld [vmem:[%s13332_s25 + $0x3d8] sm:$0xff]   ;;  %v11927_v42 = vld [vmem:[%s13332_s25 + $0x3e8] sm:$0xff]  }
 0x37d   : > { %3929 = vmatprep.subr.bf16.mxu1 %v11896_v41  ;;  %v11926_v41 = vld [vmem:[%s13332_s25 + $0x3a0] sm:$0xff]  }
 0x380   : > { %3930 = vmatpush1.bf16.msra.mxu1 %v11894_v43  ;;  %v11928_v43 = vld [vmem:[%s13332_s25 + $0x3a8] sm:$0xff]  }
 0x381   : > { %3931 = vmatprep.subr.bf16.mxu1 %v11899_v49  ;;  %v11929_v49 = vld [vmem:[%s13332_s25 + $0x78] sm:$0xff]  }
 0x382   : > { %10913 = vmatprep.subr.bf16.mxu0 %v11929_v49 }
 0x383   : > { %3869 = vmatmul.mubr.bf16.gmra.mrb[12].mxu1 %v2564_v48  ;;  %10914 = vmatpush3.bf16.msra.mxu0 %v11930_v44  ;;  %v11934_v48 = vld [vmem:[%s13332_s25 + $0x3b8] sm:$0xff]  }
 0x384   : > { %3878 = vmatprep.mubr.bf16.mxu1 %v2574_v50  ;;  %3932 = vmatpush1.bf16.msra.mxu1 %v11897_v16  ;;  %v11932_v16 = vld [vmem:[%s13332_s25 + $0x3b0] sm:$0xff]   ;;  %v4039_v50 = vshrl.u32 %v4038_v3, 7 }
 0x385   : > { %3933 = vmatprep.subr.bf16.mxu1 %v11902_v47  ;;  %v11935_v47 = vld [vmem:[%s13332_s25 + $0xc0] sm:$0xff]  }
 0x386   : > { %10939 = vmatprep.subr.bf16.mxu0 %v11935_v47  ;;  %v14105_v22 = vsub.s32 1, %v4039_v50 }
 0x388   : > { %3934 = vmatpush1.bf16.msra.mxu1 %v11900_v36  ;;  %v14102_v36 = vsub.s32 0, %v4039_v50  ;;  %v14119_v0 = vrot.slane %v10179_v28, %v14105_v22 }
 0x389   : > { %11179 = vmatprep.subr.bf16.mxu1 %v11915_v32 }
 0x38a   : > { %v14116_v61 = vrot.slane %v10179_v28, %v14102_v36 }
 0x38b   : > { %3879 = vmatmul.mubr.bf16.gmra.mrb[16].mxu1 %v2573_v52  ;;  %v14109_v52 = vrot.slane %v4032_v51, %v14102_v36 }
 0x38c   : > { %3888 = vmatprep.mubr.bf16.mxu1 %v2583_v58  ;;  %v14113_v58 = vrot.slane %v4032_v51, %v14105_v22 }
 0x393   : > { %3889 = vmatmul.mubr.bf16.gmra.mrb[20].mxu1 %v2582_v2 }
 0x394   : > { %3898 = vmatprep.mubr.bf16.mxu1 %v2592_v6  ;;  %v14123_v6 = vrot.slane %v10180_v57, %v14102_v36 }
 0x39b   : > { %3899 = vmatmul.mubr.bf16.gmra.mrb[24].mxu1 %v2591_v8  ;;  %v14127_v8 = vrot.slane %v10180_v57, %v14105_v22 }
 0x39c   : > { %3908 = vmatprep.mubr.bf16.mxu1 %v2601_v9 }
 0x3a3   : > { %3909 = vmatmul.mubr.bf16.gmra.mrb[28].mxu1 %v2600_v55 }
 0x3a4   : > { %3951 = vmatprep.mubr.bf16.mxu1 %v15790_v10 }
 0x3ab   : > { %3952 = vmatmul.mubr.bf16.vlgmr.msra.gmra.mrb[0].mxu1 %v2539_v4 }
 0x3ac   : > { %3961 = vmatprep.mubr.bf16.mxu1 %v15790_v10  ;;  %11180 = vmatpush3.bf16.msra.mxu1 %v11916_v34 }
 0x3ad   : > { %11181 = vmatprep.subr.bf16.mxu1 %v11917_v17 }
 0x3b0   : > { %11182 = vmatpush3.bf16.msra.mxu1 %v11918_v53 }
 0x3b1   : > { %11183 = vmatprep.subr.bf16.mxu1 %v11921_v37 }
 0x3b3   : > { %3962 = vmatmul.mubr.bf16.gmra.mrb[4].mxu1 %v2548_v5 }
 0x3b4   : > { %3971 = vmatprep.mubr.bf16.mxu1 %v15790_v10  ;;  %11184 = vmatpush3.bf16.msra.mxu1 %v11922_v60 }
 0x3b5   : > { %11185 = vmatprep.subr.bf16.mxu1 %v11923_v38 }
 0x3b8   : > { %11186 = vmatpush3.bf16.msra.mxu1 %v11924_v39 }
 0x3b9   : > { %11187 = vmatprep.subr.bf16.mxu1 %v11925_v40 }
 0x3bb   : > { %3972 = vmatmul.mubr.bf16.gmra.mrb[8].mxu1 %v2557_v56 }
 0x3bc   : > { %3981 = vmatprep.mubr.bf16.mxu1 %v15790_v10  ;;  %11188 = vmatpush3.bf16.msra.mxu1 %v11926_v41 }
 0x3bd   : > { %11189 = vmatprep.subr.bf16.mxu1 %v11927_v42 }
 0x3c0   : > { %11190 = vmatpush3.bf16.msra.mxu1 %v11928_v43 }
 0x3c1   : > { %11191 = vmatprep.subr.bf16.mxu1 %v11931_v46 }
 0x3c3   : > { %3982 = vmatmul.mubr.bf16.gmra.mrb[12].mxu1 %v2566_v45 }
 0x3c4   : > { %3991 = vmatprep.mubr.bf16.mxu1 %v15790_v10  ;;  %11192 = vmatpush3.bf16.msra.mxu1 %v11932_v16 }
 0x3c5   : > { %11193 = vmatprep.subr.bf16.mxu1 %v11933_v59 }
 0x3c8   : > { %11194 = vmatpush3.bf16.msra.mxu1 %v11934_v48 }
 0x3cb   : > { %3992 = vmatmul.mubr.bf16.gmra.mrb[16].mxu1 %v2575_v25 }
 0x3cc   : > { %4001 = vmatprep.mubr.bf16.mxu1 %v15790_v10 }
 0x3d3   : > { %4002 = vmatmul.mubr.bf16.gmra.mrb[20].mxu1 %v2584_v27 }
 0x3d4   : > { %4011 = vmatprep.mubr.bf16.mxu1 %v15790_v10 }
 0x3db   : > { %4012 = vmatmul.mubr.bf16.gmra.mrb[24].mxu1 %v2593_v29 }
 0x3dc   : > { %4021 = vmatprep.mubr.bf16.mxu1 %v15790_v10 }
 0x3e3   : > { %4022 = vmatmul.mubr.bf16.gmra.mrb[28].mxu1 %v2602_v31 }
 0x47e   : > { %v3953_v63 = vpop.f32.mrb[0].mxu1 }
 0x47f   : > { %v4048_v2 = vmul.f32 %v14109_v52, %v3953_v63  ;;  %v3955_v35 = vpop.f32.mrb[1].mxu1 }
 0x480   : > { %v4049_v11 = vmul.f32 %v14113_v58, %v3955_v35  ;;  %v3957_v9 = vpop.f32.mrb[2].mxu1 }
 0x481   : > { %v4091_v20 = vadd.f32 %v14116_v61, %v4048_v2  ;;  %v4050_v55 = vmul.f32 %v14109_v52, %v3957_v9  ;;  %v3959_v12 = vpop.f32.mrb[3].mxu1 }
 0x482   : > { %v4092_v13 = vadd.f32 %v14119_v0, %v4049_v11  ;;  %v4051_v4 = vmul.f32 %v14113_v58, %v3959_v12 }
 0x483   : > { %vm4123_vm14 = vcmp.gt.f32.partialorder %v4091_v20, 0.0  ;;  %v4166_v15 = vmul.f32 %v14123_v6, %v4091_v20  ;;  %v4093_v62 = vadd.f32 %v14116_v61, %v4050_v55 }
 0x484   : > { %vm4124_vm15 = vcmp.gt.f32.partialorder %v4092_v13, 0.0  ;;  %v4167_v5 = vmul.f32 %v14127_v8, %v4092_v13  ;;  %v4094_v14 = vadd.f32 %v14119_v0, %v4051_v4 }
 0x485   : > { %v4198_v19 = vsel %vm4123_vm14, %v4091_v20, %v4166_v15  ;;  %vm4125_vm1 = vcmp.gt.f32.partialorder %v4093_v62, 0.0  ;;  %v4168_v56 = vmul.f32 %v14123_v6, %v4093_v62 }
 0x486   : > { %4230 = vst [vmem:[#allocation4] sm:$0xff] %v4198_v19  ;;  %v4199_v33 = vsel %vm4124_vm15, %v4092_v13, %v4167_v5  ;;  %vm4126_vm2 = vcmp.gt.f32.partialorder %v4094_v14, 0.0  ;;  %v4169_v21 = vmul.f32 %v14127_v8, %v4094_v14  ;;  %v3963_v45 = vpop.f32.mrb[4].mxu1 }
 0x487   : > { %4231 = vst [vmem:[#allocation4 + $0x8] sm:$0xff] %v4199_v33  ;;  %v4200_v23 = vsel %vm4125_vm1, %v4093_v62, %v4168_v56  ;;  %v4052_v24 = vmul.f32 %v14109_v52, %v3963_v45  ;;  %v3965_v25 = vpop.f32.mrb[5].mxu1 }
 0x488   : > { %4232 = vst [vmem:[#allocation4 + $0x10] sm:$0xff] %v4200_v23  ;;  %v4201_v1 = vsel %vm4126_vm2, %v4094_v14, %v4169_v21  ;;  %v4053_v54 = vmul.f32 %v14113_v58, %v3965_v25  ;;  %v3967_v27 = vpop.f32.mrb[6].mxu1 }
 0x489   : > { %4233 = vst [vmem:[#allocation4 + $0x18] sm:$0xff] %v4201_v1  ;;  %v4095_v26 = vadd.f32 %v14116_v61, %v4052_v24  ;;  %v3969_v29 = vpop.f32.mrb[7].mxu1  ;;  %v4054_v31 = vmul.f32 %v14109_v52, %v3967_v27 }
 0x48a   : > { %v4096_v30 = vadd.f32 %v14119_v0, %v4053_v54  ;;  %v4055_v34 = vmul.f32 %v14113_v58, %v3969_v29 }
 0x48b   : > { %vm4127_vm4 = vcmp.gt.f32.partialorder %v4095_v26, 0.0  ;;  %v4170_v32 = vmul.f32 %v14123_v6, %v4095_v26  ;;  %v4097_v42 = vadd.f32 %v14116_v61, %v4054_v31 }
 0x48c   : > { %vm4128_vm7 = vcmp.gt.f32.partialorder %v4096_v30, 0.0  ;;  %v4171_v17 = vmul.f32 %v14127_v8, %v4096_v30  ;;  %v4098_v16 = vadd.f32 %v14119_v0, %v4055_v34 }
 0x48d   : > { %v4262_v53 = vld [vmem:[#allocation4] sm:$0xf]  ;;  %v4202_v7 = vsel %vm4127_vm4, %v4095_v26, %v4170_v32  ;;  %v4534_v41 = vld [vmem:[#allocation4] sm:$0xf0]  ;;  %v4172_v9 = vmul.f32 %v14123_v6, %v4097_v42  ;;  %vm4129_vm8 = vcmp.gt.f32.partialorder %v4097_v42, 0.0 }
 0x48e   : > { %v4294_v37 = vld [vmem:[#allocation4] sm:$0x1e]  ;;  %4278 = vst [vmem:[#allocation5] sm:$0xf] %v4262_v53  ;;  %4234 = vst [vmem:[#allocation4 + $0x20] sm:$0xff] %v4202_v7  ;;  %v4203_v18 = vsel %vm4128_vm7, %v4096_v30, %v4171_v17  ;;  %v4566_v49 = vrot.slane %v4534_v41, 4  ;;  %v4173_v4 = vmul.f32 %v14127_v8, %v4098_v16 }
 0x48f   : > { %v4374_v60 = vld [vmem:[#allocation4] sm:$0x3c]  ;;  %v4326_v38 = vrot.slane %v4294_v37, 1  ;;  %v4759_v46 = vld [vmem:[#allocation4] sm:$0xc0]  ;;  %4235 = vst [vmem:[#allocation4 + $0x28] sm:$0xff] %v4203_v18  ;;  %v4204_v54 = vsel %vm4129_vm8, %v4097_v42, %v4172_v9 }
 0x490   : > { %v4406_v39 = vrot.slane %v4374_v60, 2  ;;  %v4454_v40 = vld [vmem:[#allocation4] sm:$0x78]  ;;  %v4824_v48 = vrot.slane %v4759_v46, 6  ;;  %v4904_v47 = vld [vmem:[#allocation4] sm:$0x80] }
 0x491   : > { %v4486_v43 = vrot.slane %v4454_v40, 3  ;;  %v4614_v44 = vld [vmem:[#allocation4] sm:$0xe0]  ;;  %4358 = vst [vmem:[#allocation5 + $0x10] sm:$0xf] %v4326_v38  ;;  %v4969_v50 = vrot.slane %v4904_v47, 7 }
 0x492   : > { %4438 = vst [vmem:[#allocation5 + $0x20] sm:$0xf] %v4406_v39  ;;  %v4679_v59 = vrot.slane %v4614_v44, 5  ;;  %v4615_v3 = vld [vmem:[#allocation4 + $0x8] sm:$0xe0]  ;;  %vm4130_vm9 = vcmp.gt.f32.partialorder %v4098_v16, 0.0 }
 0x493   : > { %4518 = vst [vmem:[#allocation5 + $0x30] sm:$0xf] %v4486_v43  ;;  %4598 = vst [vmem:[#allocation5 + $0x40] sm:$0xf] %v4566_v49  ;;  %v4682_v51 = vrot.slane %v4615_v3, 5  ;;  %v4205_v31 = vsel %vm4130_vm9, %v4098_v16, %v4173_v4  ;;  %v3973_v43 = vpop.f32.mrb[8].mxu1 }
 0x494   : > { %v4760_v28 = vld [vmem:[#allocation4 + $0x8] sm:$0xc0]  ;;  %v4616_v35 = vld [vmem:[#allocation4 + $0x10] sm:$0x1]  ;;  %v4617_v62 = vld [vmem:[#allocation4 + $0x18] sm:$0x1]  ;;  %v4056_v46 = vmul.f32 %v14109_v52, %v3973_v43 }
 0x495   : > { %v4905_v57 = vld [vmem:[#allocation4 + $0x8] sm:$0x80]  ;;  %v4827_v63 = vrot.slane %v4760_v28, 6  ;;  %v4761_v11 = vld [vmem:[#allocation4 + $0x10] sm:$0x3]  ;;  %v4680_v20 = vrot.slane %v4616_v35, 5 }
 0x496   : > { %v4972_v2 = vrot.slane %v4905_v57, 7  ;;  %v4825_v55 = vrot.slane %v4761_v11, 6  ;;  %v4906_v12 = vld [vmem:[#allocation4 + $0x10] sm:$0x7]  ;;  %v4762_v5 = vld [vmem:[#allocation4 + $0x18] sm:$0x3]  ;;  %v4099_v11 = vadd.f32 %v14116_v61, %v4056_v46 }
 0x497   : > { %v5049_v13 = vld [vmem:[#allocation4 + $0x10] sm:$0xf]  ;;  %v4970_v15 = vrot.slane %v4906_v12, 7  ;;  %v4681_v14 = vsel %vm4678_vm3, %v4679_v59, %v4680_v20  ;;  %v4683_v56 = vrot.slane %v4617_v62, 5  ;;  %v4828_v33 = vrot.slane %v4762_v5, 6  ;;  %4236 = vst [vmem:[#allocation4 + $0x30] sm:$0xff] %v4204_v54 }
 0x498   : > { %5065 = vst [vmem:[#allocation5 + $0x80] sm:$0xf] %v5049_v13  ;;  %v4826_v19 = vsel %vm4823_vm5, %v4824_v48, %v4825_v55  ;;  %v4907_v21 = vld [vmem:[#allocation4 + $0x18] sm:$0x7]  ;;  %v4264_v45 = vld [vmem:[#allocation4 + $0x20] sm:$0xf] }
 0x499   : > { %v4971_v23 = vsel %vm4968_vm6, %v4969_v50, %v4970_v15  ;;  %4743 = vst [vmem:[#allocation5 + $0x50] sm:$0xf] %v4681_v14  ;;  %4888 = vst [vmem:[#allocation5 + $0x60] sm:$0xf] %v4826_v19  ;;  %v4973_v24 = vrot.slane %v4907_v21, 7  ;;  %v4684_v32 = vsel %vm4678_vm3, %v4682_v51, %v4683_v56  ;;  %v4829_v7 = vsel %vm4823_vm5, %v4827_v63, %v4828_v33  ;;  %v3975_v16 = vpop.f32.mrb[9].mxu1 }
 0x49a   : > { %4280 = vst [vmem:[#allocation5 + $0x90] sm:$0xf] %v4264_v45  ;;  %v4296_v25 = vld [vmem:[#allocation4 + $0x20] sm:$0x1e]  ;;  %5033 = vst [vmem:[#allocation5 + $0x70] sm:$0xf] %v4971_v23  ;;  %v4057_v50 = vmul.f32 %v14113_v58, %v3975_v16  ;;  %v4174_v19 = vmul.f32 %v14123_v6, %v4099_v11 }
 0x49b   : > { %v4376_v1 = vld [vmem:[#allocation4 + $0x20] sm:$0x3c]  ;;  %v4328_v27 = vrot.slane %v4296_v25, 1  ;;  %v4763_v37 = vld [vmem:[#allocation4 + $0x20] sm:$0xc0]  ;;  %4237 = vst [vmem:[#allocation4 + $0x38] sm:$0xff] %v4205_v31  ;;  %v4974_v60 = vsel %vm4968_vm6, %v4972_v2, %v4973_v24 }
 0x49c   : > { %v4408_v26 = vrot.slane %v4376_v1, 2  ;;  %v4456_v29 = vld [vmem:[#allocation4 + $0x20] sm:$0x78]  ;;  %4744 = vst [vmem:[#allocation5 + $0x58] sm:$0xf] %v4684_v32  ;;  %v4830_v18 = vrot.slane %v4763_v37, 6  ;;  %v4100_v4 = vadd.f32 %v14119_v0, %v4057_v50 }
 0x49d   : > { %v4536_v30 = vld [vmem:[#allocation4 + $0x20] sm:$0xf0]  ;;  %v4488_v34 = vrot.slane %v4456_v29, 3  ;;  %4360 = vst [vmem:[#allocation5 + $0xa0] sm:$0xf] %v4328_v27  ;;  %v3977_v51 = vpop.f32.mrb[10].mxu1 }
 0x49e   : > { %v4568_v17 = vrot.slane %v4536_v30, 4  ;;  %v4618_v53 = vld [vmem:[#allocation4 + $0x20] sm:$0xe0]  ;;  %4440 = vst [vmem:[#allocation5 + $0xb0] sm:$0xf] %v4408_v26  ;;  %v4058_v9 = vmul.f32 %v14109_v52, %v3977_v51  ;;  %v3979_v15 = vpop.f32.mrb[11].mxu1  ;;  %v4175_v30 = vmul.f32 %v14127_v8, %v4100_v4 }
 0x49f   : > { %v4908_v38 = vld [vmem:[#allocation4 + $0x20] sm:$0x80]  ;;  %v14157_v39 = vld [vmem:[#allocation4 + $0x28] sm:$0xe0]  ;;  %5034 = vst [vmem:[#allocation5 + $0x78] sm:$0xf] %v4974_v60  ;;  %v4059_v33 = vmul.f32 %v14113_v58, %v3979_v15 }
 0x4a0   : > { %4889 = vst [vmem:[#allocation5 + $0x68] sm:$0xf] %v4829_v7  ;;  %4520 = vst [vmem:[#allocation5 + $0xc0] sm:$0xf] %v4488_v34  ;;  %v14159_v40 = vld [vmem:[#allocation4 + $0x28] sm:$0xc0]  ;;  %v4101_v56 = vadd.f32 %v14116_v61, %v4058_v9 }
 0x4a1   : > { %4600 = vst [vmem:[#allocation5 + $0xd0] sm:$0xf] %v4568_v17  ;;  %v4685_v41 = vrot.slane %v4618_v53, 5  ;;  %v4975_v42 = vrot.slane %v4908_v38, 7  ;;  %v4263_v49 = vld [vmem:[#allocation4 + $0x8] sm:$0xf]  ;;  %v4102_v34 = vadd.f32 %v14119_v0, %v4059_v33 }
 0x4a2   : > { %v4688_v44 = vrot.slane %v14157_v39, 5  ;;  %v4265_v59 = vld [vmem:[#allocation4 + $0x28] sm:$0xf]  ;;  %4279 = vst [vmem:[#allocation5 + $0x8] sm:$0xf] %v4263_v49  ;;  %v14167_v28 = vld [vmem:[#allocation5 + $0x90] sm:$0xff]  ;;  %v4176_v31 = vmul.f32 %v14123_v6, %v4101_v56 }
 0x4a3   : > { %v4295_v48 = vld [vmem:[#allocation4 + $0x8] sm:$0x1e]  ;;  %v14164_v3 = vld [vmem:[#allocation4 + $0x28] sm:$0x80]  ;;  %4281 = vst [vmem:[#allocation5 + $0x98] sm:$0xf] %v4265_v59  ;;  %v4177_v16 = vmul.f32 %v14127_v8, %v4102_v34 }
 0x4a4   : > { %v4327_v57 = vrot.slane %v4295_v48, 1  ;;  %v4620_v63 = vld [vmem:[#allocation4 + $0x30] sm:$0x1]  ;;  %v4978_v62 = vrot.slane %v14164_v3, 7  ;;  %v14173_v5 = vld [vmem:[#allocation4 + $0x38] sm:$0x1] }
 0x4a5   : > { %v4765_v2 = vld [vmem:[#allocation4 + $0x30] sm:$0x3]  ;;  %v4686_v20 = vrot.slane %v4620_v63, 5  ;;  %v14175_v14 = vld [vmem:[#allocation4 + $0x38] sm:$0x3]  ;;  %v5081_v21 = vld [vmem:[#allocation5] sm:$0xff] }
 0x4a6   : > { %v4910_v35 = vld [vmem:[#allocation4 + $0x30] sm:$0x7]  ;;  %v4831_v55 = vrot.slane %v4765_v2, 6  ;;  %4359 = vst [vmem:[#allocation5 + $0x18] sm:$0xf] %v4327_v57  ;;  %v3983_v25 = vpop.f32.mrb[12].mxu1  ;;  %v5225_v1 = vpack.c.bf16 %v14167_v28, %v5081_v21 }
 0x4a7   : > { %v4976_v12 = vrot.slane %v4910_v35, 7  ;;  %v5051_v13 = vld [vmem:[#allocation4 + $0x30] sm:$0xf]  ;;  %v4687_v45 = vsel %vm4678_vm3, %v4685_v41, %v4686_v20  ;;  %v4689_v54 = vrot.slane %v14173_v5, 5  ;;  %vm4131_vm10 = vcmp.gt.f32.partialorder %v4099_v11, 0.0  ;;  %v3985_v26 = vpop.f32.mrb[13].mxu1 }
 0x4a8   : > { %5067 = vst [vmem:[#allocation5 + $0x110] sm:$0xf] %v5051_v13  ;;  %v4832_v23 = vsel %vm4823_vm5, %v4830_v18, %v4831_v55  ;;  %4745 = vst [vmem:[#allocation5 + $0xe0] sm:$0xf] %v4687_v45  ;;  %vm4132_vm11 = vcmp.gt.f32.partialorder %v4100_v4, 0.0  ;;  %v4206_v29 = vsel %vm4131_vm10, %v4099_v11, %v4174_v19  ;;  %vm4133_vm12 = vcmp.gt.f32.partialorder %v4101_v56, 0.0 }
 0x4a9   : > { %v4977_v24 = vsel %vm4968_vm6, %v4975_v42, %v4976_v12  ;;  %4890 = vst [vmem:[#allocation5 + $0xf0] sm:$0xf] %v4832_v23  ;;  %v3987_v32 = vpop.f32.mrb[14].mxu1  ;;  %4238 = vst [vmem:[#allocation4 + $0x40] sm:$0xff] %v4206_v29  ;;  %v4060_v17 = vmul.f32 %v14109_v52, %v3983_v25  ;;  %v4061_v53 = vmul.f32 %v14113_v58, %v3985_v26  ;;  %v5082_v7 = vld [vmem:[#allocation5 + $0x8] sm:$0xff]  ;;  %v11936_v46 = vld [vmem:[%s13332_s25 + $0x80] sm:$0xff]  }
 0x4aa   : > { %5035 = vst [vmem:[#allocation5 + $0x100] sm:$0xf] %v4977_v24  ;;  %v4062_v37 = vmul.f32 %v14109_v52, %v3987_v32  ;;  %v3989_v60 = vpop.f32.mrb[15].mxu1  ;;  %v5100_v38 = vld [vmem:[#allocation5 + $0x98] sm:$0xff]  ;;  %v4207_v41 = vsel %vm4132_vm11, %v4100_v4, %v4175_v30  ;;  %v4208_v18 = vsel %vm4133_vm12, %v4101_v56, %v4176_v31  ;;  %vm4134_vm13 = vcmp.gt.f32.partialorder %v4102_v34, 0.0  ;;  %v11937_v51 = vld [vmem:[%s13332_s25 + $0xc8] sm:$0xff]  }
 0x4ab   : > { %v4063_v42 = vmul.f32 %v14113_v58, %v3989_v60  ;;  %v3993_v43 = vpop.f32.mrb[16].mxu1  ;;  %v5226_v49 = vpack.c.bf16 %v5100_v38, %v5082_v7  ;;  %4239 = vst [vmem:[#allocation4 + $0x48] sm:$0xff] %v4207_v41  ;;  %4240 = vst [vmem:[#allocation4 + $0x50] sm:$0xff] %v4208_v18  ;;  %v4103_v59 = vadd.f32 %v14116_v61, %v4060_v17  ;;  %v14203_v55 = vld [vmem:[#allocation4 + $0x38] sm:$0x7]  ;;  %v11938_v15 = vld [vmem:[%s13332_s25 + $0x88] sm:$0xff]  }
 0x4ac   : > { %v4104_v48 = vadd.f32 %v14119_v0, %v4061_v53  ;;  %v3995_v50 = vpop.f32.mrb[17].mxu1  ;;  %v4105_v28 = vadd.f32 %v14116_v61, %v4062_v37  ;;  %v4064_v63 = vmul.f32 %v14109_v52, %v3993_v43  ;;  %v4209_v11 = vsel %vm4134_vm13, %v4102_v34, %v4177_v16  ;;  %v11939_v23 = vld [vmem:[%s13332_s25 + $0xd0] sm:$0xff]   ;;  %v11941_v38 = vld [vmem:[%s13332_s25 + $0xd8] sm:$0xff]  }
 0x4ad   : > { %v4106_v57 = vadd.f32 %v14119_v0, %v4063_v42  ;;  %v4065_v2 = vmul.f32 %v14113_v58, %v3995_v50  ;;  %v3997_v35 = vpop.f32.mrb[18].mxu1  ;;  %6481 = vmatprep.mubr.bf16.mxu0 %v5226_v49  ;;  %vm4135_vm14 = vcmp.gt.f32.partialorder %v4103_v59, 0.0  ;;  %v4178_v9 = vmul.f32 %v14123_v6, %v4103_v59  ;;  %4241 = vst [vmem:[#allocation4 + $0x58] sm:$0xff] %v4209_v11  ;;  %v11940_v32 = vld [vmem:[%s13332_s25 + $0x90] sm:$0xff]   ;;  %v11942_v11 = vld [vmem:[%s13332_s25 + $0x98] sm:$0xff]  }
 0x4ae   : > { %vm4136_vm15 = vcmp.gt.f32.partialorder %v4104_v48, 0.0  ;;  %v3999_v20 = vpop.f32.mrb[19].mxu1  ;;  %6482 = vmatmul.mubr.bf16.vlgmr.msra.gmra.mrb[88].mxu0 %v5225_v1  ;;  %v4179_v12 = vmul.f32 %v14127_v8, %v4104_v48  ;;  %vm4137_vm1 = vcmp.gt.f32.partialorder %v4105_v28, 0.0  ;;  %v4180_v13 = vmul.f32 %v14123_v6, %v4105_v28 }
 0x4af   : > { %vm4138_vm2 = vcmp.gt.f32.partialorder %v4106_v57, 0.0  ;;  %v14207_v4 = vpop.f32.mrb[20].mxu1  ;;  %10940 = vmatpush3.bf16.msra.mxu0 %v11936_v46  ;;  %v4210_v19 = vsel %vm4135_vm14, %v4103_v59, %v4178_v9  ;;  %v4181_v56 = vmul.f32 %v14127_v8, %v4106_v57  ;;  %v4107_v33 = vadd.f32 %v14116_v61, %v4064_v63 }
 0x4b0   : > { %v4108_v21 = vadd.f32 %v14119_v0, %v4065_v2  ;;  %v14213_v45 = vpop.f32.mrb[21].mxu1  ;;  %10941 = vmatprep.subr.bf16.mxu0 %v11937_v51  ;;  %v14216_v24 = vld [vmem:[#allocation4 + $0x40] sm:$0xe0]  ;;  %4242 = vst [vmem:[#allocation4 + $0x60] sm:$0xff] %v4210_v19  ;;  %v4211_v26 = vsel %vm4136_vm15, %v4104_v48, %v4179_v12  ;;  %v4212_v29 = vsel %vm4137_vm1, %v4105_v28, %v4180_v13  ;;  %v4979_v34 = vrot.slane %v14203_v55, 7 }
 0x4b1   : > { %v14218_v25 = vld [vmem:[#allocation4 + $0x40] sm:$0xc0]  ;;  %v4066_v30 = vmul.f32 %v14109_v52, %v3997_v35  ;;  %v4067_v31 = vmul.f32 %v14113_v58, %v3999_v20  ;;  %4243 = vst [vmem:[#allocation4 + $0x68] sm:$0xff] %v4211_v26  ;;  %4244 = vst [vmem:[#allocation4 + $0x70] sm:$0xff] %v4212_v29  ;;  %v4213_v37 = vsel %vm4138_vm2, %v4106_v57, %v4181_v56  ;;  %v14231_v60 = vpop.f32.mrb[22].mxu1  ;;  %vm4139_vm4 = vcmp.gt.f32.partialorder %v4107_v33, 0.0 }
 0x4b2   : > { %v14220_v1 = vld [vmem:[#allocation4 + $0x40] sm:$0x80]  ;;  %v4266_v7 = vld [vmem:[#allocation4 + $0x40] sm:$0xf]  ;;  %v14234_v41 = vld [vmem:[#allocation4 + $0x48] sm:$0xe0]  ;;  %v4182_v43 = vmul.f32 %v14123_v6, %v4107_v33  ;;  %v4183_v49 = vmul.f32 %v14127_v8, %v4108_v21 }
 0x4b3   : > { %v14236_v18 = vld [vmem:[#allocation4 + $0x48] sm:$0xc0]  ;;  %4245 = vst [vmem:[#allocation4 + $0x78] sm:$0xff] %v4213_v37  ;;  %v4109_v46 = vadd.f32 %v14116_v61, %v4066_v30  ;;  %v4110_v16 = vadd.f32 %v14119_v0, %v4067_v31  ;;  %4282 = vst [vmem:[#allocation5 + $0x120] sm:$0xf] %v4266_v7  ;;  %10942 = vmatpush3.bf16.msra.mxu0 %v11938_v15  ;;  %v4981_v59 = vrot.slane %v14220_v1, 7 }
 0x4b4   : > { %v14238_v42 = vld [vmem:[#allocation4 + $0x48] sm:$0x80]  ;;  %v4694_v48 = vrot.slane %v14234_v41, 5  ;;  %v14247_v51 = vld [vmem:[#allocation4 + $0x50] sm:$0x1]  ;;  %10943 = vmatprep.subr.bf16.mxu0 %v11939_v23  ;;  %v4214_v2 = vsel %vm4139_vm4, %v4107_v33, %v4182_v43  ;;  %vm4140_vm7 = vcmp.gt.f32.partialorder %v4108_v21, 0.0  ;;  %v4068_v7 = vmul.f32 %v14109_v52, %v14207_v4 }
 0x4b5   : > { %v4984_v28 = vrot.slane %v14238_v42, 7  ;;  %v14250_v57 = vld [vmem:[#allocation4 + $0x50] sm:$0x3]  ;;  %v4184_v35 = vmul.f32 %v14123_v6, %v4109_v46  ;;  %v14258_v12 = vld [vmem:[#allocation4 + $0x58] sm:$0x1]  ;;  %4246 = vst [vmem:[#allocation4 + $0x80] sm:$0xff] %v4214_v2  ;;  %v4215_v15 = vsel %vm4140_vm7, %v4108_v21, %v4183_v49  ;;  %v4185_v19 = vmul.f32 %v14127_v8, %v4110_v16 }
 0x4b6   : > { %v14252_v63 = vld [vmem:[#allocation4 + $0x50] sm:$0x7]  ;;  %v14260_v13 = vld [vmem:[#allocation4 + $0x58] sm:$0x3]  ;;  %v4695_v33 = vrot.slane %v14258_v12, 5  ;;  %4247 = vst [vmem:[#allocation4 + $0x88] sm:$0xff] %v4215_v15  ;;  %v4980_v4 = vsel %vm4968_vm6, %v4978_v62, %v4979_v34 }
 0x4b7   : > { %v11943_v56 = vld [vmem:[%s13332_s25 + $0xe0] sm:$0xff]   ;;  %v4982_v23 = vrot.slane %v14252_v63, 7  ;;  %vm4141_vm8 = vcmp.gt.f32.partialorder %v4109_v46, 0.0  ;;  %vm4142_vm9 = vcmp.gt.f32.partialorder %v4110_v16, 0.0  ;;  %10944 = vmatpush3.bf16.msra.mxu0 %v11940_v32  ;;  %v14267_v30 = vld [vmem:[#allocation4 + $0x60] sm:$0xe0] }
 0x4b8   : > { %v4915_v26 = vld [vmem:[#allocation4 + $0x58] sm:$0x7]  ;;  %v14269_v31 = vld [vmem:[#allocation4 + $0x60] sm:$0xc0]  ;;  %v4216_v21 = vsel %vm4141_vm8, %v4109_v46, %v4184_v35  ;;  %v4217_v37 = vsel %vm4142_vm9, %v4110_v16, %v4185_v19  ;;  %v4009_v49 = vpop.f32.mrb[23].mxu1  ;;  %10945 = vmatprep.subr.bf16.mxu0 %v11941_v38  ;;  %v4069_v46 = vmul.f32 %v14113_v58, %v14213_v45  ;;  %v14302_v45 = vadd.f32 %v14116_v61, %v4068_v7  ;;  %v11948_v1 = vld [vmem:[%s13332_s25 + $0xb0] sm:$0xff]  }
 0x4b9   : > { %v14273_v43 = vld [vmem:[#allocation5 + $0x100] sm:$0xff]  ;;  %v4985_v2 = vrot.slane %v4915_v26, 7  ;;  %v14278_v10 = vld [vmem:[#allocation4 + $0x68] sm:$0xe0]  ;;  %4248 = vst [vmem:[#allocation4 + $0x90] sm:$0xff] %v4216_v21  ;;  %4249 = vst [vmem:[#allocation4 + $0x98] sm:$0xff] %v4217_v37  ;;  %v4071_v3 = vmul.f32 %v14113_v58, %v4009_v49  ;;  %v4983_v42 = vsel %vm4968_vm6, %v4981_v59, %v4982_v23  ;;  %v4696_v5 = vsel %vm4678_vm3, %v4694_v48, %v4695_v33 }
 0x4ba   : > { %v14276_v15 = vld [vmem:[#allocation4 + $0x60] sm:$0x80]  ;;  %v11944_v38 = vld [vmem:[%s13332_s25 + $0xa0] sm:$0xff]   ;;  %v14290_v19 = vld [vmem:[#allocation4 + $0x68] sm:$0xc0]  ;;  %v4700_v55 = vrot.slane %v14278_v10, 5  ;;  %v14308_v50 = vadd.f32 %v14119_v0, %v4069_v46 }
 0x4bb   : > { %v4987_v35 = vrot.slane %v14276_v15, 7  ;;  %v4917_v26 = vld [vmem:[#allocation4 + $0x68] sm:$0x80]  ;;  %5036 = vst [vmem:[#allocation5 + $0x108] sm:$0xf] %v4980_v4  ;;  %v14292_v21 = vld [vmem:[#allocation5 + $0x70] sm:$0xff]  ;;  %v4070_v15 = vmul.f32 %v14109_v52, %v14231_v60  ;;  %10946 = vmatpush3.bf16.msra.mxu0 %v11942_v11 }
 0x4bc   : > { %v11945_v37 = vld [vmem:[%s13332_s25 + $0xe8] sm:$0xff]   ;;  %v14297_v62 = vld [vmem:[#allocation4 + $0x70] sm:$0x1]  ;;  %v4990_v4 = vrot.slane %v4917_v26, 7  ;;  %v4629_v20 = vld [vmem:[#allocation4 + $0x78] sm:$0x1]  ;;  %10947 = vmatprep.subr.bf16.mxu0 %v11943_v56  ;;  %v14325_v56 = vadd.f32 %v14119_v0, %v4071_v3 }
 0x4bd   : > { %v14299_v34 = vld [vmem:[#allocation4 + $0x70] sm:$0x3]  ;;  %v14312_v47 = vld [vmem:[#allocation4 + $0x78] sm:$0x3]  ;;  %v14317_v11 = vadd.f32 %v14116_v61, %v4070_v15  ;;  %v11946_v26 = vld [vmem:[%s13332_s25 + $0xa8] sm:$0xff]   ;;  %v4701_v32 = vrot.slane %v4629_v20, 5  ;;  %v4187_v15 = vmul.f32 %v14127_v8, %v14308_v50 }
 0x4be   : > { %v4918_v53 = vld [vmem:[#allocation4 + $0x70] sm:$0x7]  ;;  %v4919_v27 = vld [vmem:[#allocation4 + $0x78] sm:$0x7]  ;;  %v14320_v16 = vld [vmem:[#allocation4 + $0x80] sm:$0xe0]  ;;  %v4189_v59 = vmul.f32 %v14127_v8, %v14325_v56 }
 0x4bf   : > { %v4988_v29 = vrot.slane %v4918_v53, 7  ;;  %v4991_v46 = vrot.slane %v4919_v27, 7  ;;  %v14322_v17 = vld [vmem:[#allocation4 + $0x80] sm:$0xc0]  ;;  %v4986_v53 = vsel %vm4968_vm6, %v4984_v28, %v4985_v2  ;;  %v11947_v49 = vld [vmem:[%s13332_s25 + $0xf0] sm:$0xff]   ;;  %v4186_v27 = vmul.f32 %v14123_v6, %v14302_v45  ;;  %10948 = vmatpush3.bf16.msra.mxu0 %v11944_v38  ;;  %v5096_v60 = vld [vmem:[#allocation5 + $0x78] sm:$0xff] }
 0x4c0   : > { %v14333_v9 = vld [vmem:[#allocation4 + $0x80] sm:$0x80]  ;;  %v14335_v20 = vld [vmem:[#allocation4 + $0x88] sm:$0xe0]  ;;  %5038 = vst [vmem:[#allocation5 + $0x198] sm:$0xf] %v4986_v53  ;;  %10949 = vmatprep.subr.bf16.mxu0 %v11945_v37  ;;  %v4188_v38 = vmul.f32 %v14123_v6, %v14317_v11  ;;  %v4702_v39 = vsel %vm4678_vm3, %v4700_v55, %v4701_v32 }
 0x4c1   : > { %v14346_v3 = vld [vmem:[#allocation4 + $0x88] sm:$0xc0]  ;;  %v4992_v53 = vsel %vm4968_vm6, %v4990_v4, %v4991_v46  ;;  %5037 = vst [vmem:[#allocation5 + $0x190] sm:$0xf] %v4983_v42  ;;  %v14355_v63 = vld [vmem:[#allocation4 + $0x90] sm:$0x1]  ;;  %v4989_v28 = vsel %vm4968_vm6, %v4987_v35, %v4988_v29 }
 0x4c2   : > { %v14348_v7 = vld [vmem:[#allocation4 + $0x88] sm:$0x80]  ;;  %v14357_v23 = vld [vmem:[#allocation4 + $0x90] sm:$0x3]  ;;  %5040 = vst [vmem:[#allocation5 + $0x228] sm:$0xf] %v4992_v53  ;;  %v4690_v53 = vsel %vm4678_vm3, %v4688_v44, %v4689_v54 }
 0x4c3   : > { %v4996_v4 = vrot.slane %v14348_v7, 7  ;;  %v4922_v37 = vld [vmem:[#allocation4 + $0x90] sm:$0x7]  ;;  %v14364_v42 = vld [vmem:[#allocation4 + $0x98] sm:$0x1]  ;;  %10950 = vmatpush3.bf16.msra.mxu0 %v11946_v26  ;;  %vm4143_vm10 = vcmp.gt.f32.partialorder %v14302_v45, 0.0 }
 0x4c4   : > { %5039 = vst [vmem:[#allocation5 + $0x220] sm:$0xf] %v4989_v28  ;;  %v4994_v35 = vrot.slane %v4922_v37, 7  ;;  %v4923_v7 = vld [vmem:[#allocation4 + $0x98] sm:$0x7]  ;;  %v11949_v2 = vld [vmem:[%s13332_s25 + $0xf8] sm:$0xff]   ;;  %10951 = vmatprep.subr.bf16.mxu0 %v11947_v49  ;;  %v4218_v41 = vsel %vm4143_vm10, %v14302_v45, %v4186_v27 }
 0x4c5   : > { %v14375_v46 = vld [vmem:[#allocation4 + $0x28] sm:$0x1e]  ;;  %4746 = vst [vmem:[#allocation5 + $0xe8] sm:$0xf] %v4690_v53  ;;  %v4707_v44 = vrot.slane %v14364_v42, 5  ;;  %v4997_v54 = vrot.slane %v4923_v7, 7 }
 0x4c6   : > { %v5114_v26 = vld [vmem:[#allocation5 + $0x108] sm:$0xff]  ;;  %vm4144_vm11 = vcmp.gt.f32.partialorder %v14308_v50, 0.0  ;;  %v4013_v28 = vpop.f32.mrb[24].mxu1  ;;  %4748 = vst [vmem:[#allocation5 + $0x178] sm:$0xf] %v4696_v5  ;;  %vm4145_vm12 = vcmp.gt.f32.partialorder %v14317_v11, 0.0 }
 0x4c7   : > { %4750 = vst [vmem:[#allocation5 + $0x208] sm:$0xf] %v4702_v39  ;;  %v5240_v12 = vpack.c.bf16 %v5114_v26, %v5096_v60  ;;  %v4219_v48 = vsel %vm4144_vm11, %v14308_v50, %v4187_v15  ;;  %v4015_v10 = vpop.f32.mrb[25].mxu1  ;;  %v4267_v33 = vld [vmem:[#allocation4 + $0x48] sm:$0xf]  ;;  %4250 = vst [vmem:[#allocation4 + $0xa0] sm:$0xff] %v4218_v41  ;;  %v4220_v37 = vsel %vm4145_vm12, %v14317_v11, %v4188_v38  ;;  %10952 = vmatpush3.bf16.msra.mxu0 %v11948_v1 }
 0x4c8   : > { %v4269_v32 = vld [vmem:[#allocation4 + $0x68] sm:$0xf]  ;;  %v14392_v55 = vld [vmem:[#allocation4 + $0x98] sm:$0x3]  ;;  %4251 = vst [vmem:[#allocation4 + $0xa8] sm:$0xff] %v4219_v48  ;;  %vm4146_vm13 = vcmp.gt.f32.partialorder %v14325_v56, 0.0  ;;  %v4072_v49 = vmul.f32 %v14109_v52, %v4013_v28  ;;  %v4073_v45 = vmul.f32 %v14113_v58, %v4015_v10  ;;  %v4998_v7 = vsel %vm4968_vm6, %v4996_v4, %v4997_v54  ;;  %10953 = vmatprep.subr.bf16.mxu0 %v11949_v2 }
 0x4c9   : > { %v4017_v60 = vpop.f32.mrb[26].mxu1  ;;  %4283 = vst [vmem:[#allocation5 + $0x128] sm:$0xf] %v4267_v33  ;;  %4285 = vst [vmem:[#allocation5 + $0x1b8] sm:$0xf] %v4269_v32  ;;  %6936 = vmatprep.mubr.bf16.mxu1 %v5240_v12  ;;  %v4221_v15 = vsel %vm4146_vm13, %v14325_v56, %v4189_v59  ;;  %v15837_v5 = vrot.slane %v14333_v9, 7  ;;  %v15838_v28 = vpack.c.bf16 %v14273_v43, %v14292_v21 }
 0x4ca   : > { %v4268_v50 = vld [vmem:[#allocation4 + $0x60] sm:$0xf]  ;;  %4252 = vst [vmem:[#allocation4 + $0xb0] sm:$0xff] %v4220_v37  ;;  %v4074_v27 = vmul.f32 %v14109_v52, %v4017_v60  ;;  %v4019_v53 = vpop.f32.mrb[27].mxu1  ;;  %v4271_v11 = vld [vmem:[#allocation4 + $0x88] sm:$0xf]  ;;  %v4115_v56 = vadd.f32 %v14116_v61, %v4072_v49  ;;  %v4116_v59 = vadd.f32 %v14119_v0, %v4073_v45 }
 0x4cb   : > { %4284 = vst [vmem:[#allocation5 + $0x1b0] sm:$0xf] %v4268_v50  ;;  %v4270_v38 = vld [vmem:[#allocation4 + $0x80] sm:$0xf]  ;;  %v4995_v39 = vsel %vm4968_vm6, %v15837_v5, %v4994_v35  ;;  %v11950_v26 = vld [vmem:[%s13332_s25 + $0xb8] sm:$0xff]   ;;  %6937 = vmatmul.mubr.bf16.vlgmr.msra.gmra.mrb[32].mxu1 %v15838_v28  ;;  %4253 = vst [vmem:[#allocation4 + $0xb8] sm:$0xff] %v4221_v15  ;;  %v4075_v41 = vmul.f32 %v14113_v58, %v4019_v53 }
 0x4cc   : > { %v4023_v12 = vpop.f32.mrb[28].mxu1  ;;  %v5132_v48 = vld [vmem:[#allocation5 + $0x198] sm:$0xff]  ;;  %v5150_v4 = vld [vmem:[#allocation5 + $0x228] sm:$0xff]  ;;  %4287 = vst [vmem:[#allocation5 + $0x248] sm:$0xf] %v4271_v11  ;;  %v4329_v9 = vrot.slane %v14375_v46, 1  ;;  %v4117_v21 = vadd.f32 %v14116_v61, %v4074_v27  ;;  %v4190_v37 = vmul.f32 %v14123_v6, %v4115_v56  ;;  %v4191_v49 = vmul.f32 %v14127_v8, %v4116_v59  ;;  %10954 = vmatpush3.bf16.msra.mxu0 %v11950_v26 }
 0x4cd   : > { %4286 = vst [vmem:[#allocation5 + $0x240] sm:$0xf] %v4270_v38  ;;  %5042 = vst [vmem:[#allocation5 + $0x2b8] sm:$0xf] %v4998_v7  ;;  %v4299_v43 = vld [vmem:[#allocation4 + $0x48] sm:$0x1e]  ;;  %v4076_v35 = vmul.f32 %v14109_v52, %v4023_v12  ;;  %v5258_v54 = vpack.c.bf16 %v5150_v4, %v5132_v48  ;;  %v4118_v50 = vadd.f32 %v14119_v0, %v4075_v41 }
 0x4ce   : > { %5041 = vst [vmem:[#allocation5 + $0x2b0] sm:$0xf] %v4995_v39  ;;  %v4025_v10 = vpop.f32.mrb[29].mxu1  ;;  %v11951_v33 = vld [vmem:[%s13332_s25 + $0x140] sm:$0xff]   ;;  %v4331_v32 = vrot.slane %v4299_v43, 1  ;;  %vm4147_vm14 = vcmp.gt.f32.partialorder %v4115_v56, 0.0  ;;  %v4192_v60 = vmul.f32 %v14123_v6, %v4117_v21 }
 0x4cf   : > { %vm4148_vm15 = vcmp.gt.f32.partialorder %v4116_v59, 0.0  ;;  %v5149_v45 = vld [vmem:[#allocation5 + $0x220] sm:$0xff]  ;;  %v4027_v1 = vpop.f32.mrb[30].mxu1  ;;  %4361 = vst [vmem:[#allocation5 + $0xa8] sm:$0xf] %v4329_v9  ;;  %vm4149_vm1 = vcmp.gt.f32.partialorder %v4117_v21, 0.0  ;;  %6944 = vmatprep.mubr.bf16.mxu1 %v5258_v54  ;;  %v4222_v15 = vsel %vm4147_vm14, %v4115_v56, %v4190_v37  ;;  %v4119_v53 = vadd.f32 %v14116_v61, %v4076_v35  ;;  %10979 = vmatprep.subr.bf16.mxu0 %v11951_v33 }
 0x4d0   : > { %v4029_v2 = vpop.f32.mrb[31].mxu1  ;;  %4363 = vst [vmem:[#allocation5 + $0x138] sm:$0xf] %v4331_v32  ;;  %v4223_v27 = vsel %vm4148_vm15, %v4116_v59, %v4191_v49  ;;  %v4077_v11 = vmul.f32 %v14113_v58, %v4025_v10  ;;  %v5131_v38 = vld [vmem:[#allocation5 + $0x190] sm:$0xff]  ;;  %v14422_v7 = vld [vmem:[#allocation4 + $0xa0] sm:$0xe0]  ;;  %v4224_v28 = vsel %vm4149_vm1, %v4117_v21, %v4192_v60  ;;  %v4193_v41 = vmul.f32 %v14127_v8, %v4118_v50 }
 0x4d1   : > { %v14424_v5 = vld [vmem:[#allocation4 + $0xa0] sm:$0xc0]  ;;  %4254 = vst [vmem:[#allocation4 + $0xc0] sm:$0xff] %v4222_v15  ;;  %4255 = vst [vmem:[#allocation4 + $0xc8] sm:$0xff] %v4223_v27  ;;  %v5257_v56 = vpack.c.bf16 %v5149_v45, %v5131_v38  ;;  %v4078_v59 = vmul.f32 %v14109_v52, %v4027_v1  ;;  %v14434_v4 = vld [vmem:[#allocation4 + $0xa8] sm:$0xe0]  ;;  %v4194_v49 = vmul.f32 %v14123_v6, %v4119_v53 }
 0x4d2   : > { %v14426_v39 = vld [vmem:[#allocation4 + $0xa0] sm:$0x80]  ;;  %4256 = vst [vmem:[#allocation4 + $0xd0] sm:$0xff] %v4224_v28  ;;  %vm4150_vm2 = vcmp.gt.f32.partialorder %v4118_v50, 0.0  ;;  %v4712_v9 = vrot.slane %v14434_v4, 5  ;;  %v4120_v52 = vadd.f32 %v14119_v0, %v4077_v11  ;;  %v4079_v45 = vmul.f32 %v14113_v58, %v4029_v2  ;;  %v5118_v15 = vld [vmem:[#allocation5 + $0x128] sm:$0xff] }
 0x4d3   : > { %v4999_v48 = vrot.slane %v14426_v39, 7  ;;  %v14437_v43 = vld [vmem:[#allocation4 + $0xa8] sm:$0xc0]  ;;  %v4225_v35 = vsel %vm4150_vm2, %v4118_v50, %v4193_v41  ;;  %v4121_v54 = vadd.f32 %v14116_v61, %v4078_v59  ;;  %v14445_v32 = vld [vmem:[#allocation4 + $0xb0] sm:$0x1]  ;;  %6945 = vmatmul.mubr.bf16.gmra.mrb[36].mxu1 %v5257_v56  ;;  %v5117_v59 = vld [vmem:[#allocation5 + $0x120] sm:$0xff] }
 0x4d4   : > { %v14439_v21 = vld [vmem:[#allocation4 + $0xa8] sm:$0x80]  ;;  %v14447_v37 = vld [vmem:[#allocation4 + $0xb0] sm:$0x3]  ;;  %4257 = vst [vmem:[#allocation4 + $0xd8] sm:$0xff] %v4225_v35  ;;  %v4710_v1 = vrot.slane %v14445_v32, 5  ;;  %v4195_v27 = vmul.f32 %v14127_v8, %v4120_v52  ;;  %v4122_v58 = vadd.f32 %v14119_v0, %v4079_v45 }
 0x4d5   : > { %v5002_v33 = vrot.slane %v14439_v21, 7  ;;  %v4926_v50 = vld [vmem:[#allocation4 + $0xb0] sm:$0x7]  ;;  %v14453_v61 = vld [vmem:[#allocation4 + $0xb8] sm:$0x1]  ;;  %v4196_v11 = vmul.f32 %v14123_v6, %v4121_v54  ;;  %v15839_v2 = vrot.slane %v14247_v51, 5 }
 0x4d6   : > { %v5000_v38 = vrot.slane %v4926_v50, 7  ;;  %v4713_v28 = vrot.slane %v14453_v61, 5  ;;  %v14458_v41 = vld [vmem:[#allocation4 + $0xb8] sm:$0x3]  ;;  %v15840_v21 = vrot.slane %v14216_v24, 5  ;;  %v5135_v6 = vld [vmem:[#allocation5 + $0x1b0] sm:$0xff] }
 0x4d7   : > { %v4927_v56 = vld [vmem:[#allocation4 + $0xb8] sm:$0x7]  ;;  %vm4151_vm4 = vcmp.gt.f32.partialorder %v4119_v53, 0.0  ;;  %vm4152_vm7 = vcmp.gt.f32.partialorder %v4120_v52, 0.0  ;;  %v5243_v26 = vpack.c.bf16 %v5135_v6, %v5117_v59  ;;  %vm4153_vm8 = vcmp.gt.f32.partialorder %v4121_v54, 0.0 }
 0x4d8   : > { %v4693_v35 = vsel %vm4678_vm3, %v15840_v21, %v15839_v2  ;;  %v5003_v60 = vrot.slane %v4927_v56, 7  ;;  %v5136_v29 = vld [vmem:[#allocation5 + $0x1b8] sm:$0xff]  ;;  %v14467_v50 = vld [vmem:[#allocation4 + $0xc0] sm:$0xe0]  ;;  %v4226_v45 = vsel %vm4151_vm4, %v4119_v53, %v4194_v49  ;;  %v4227_v51 = vsel %vm4152_vm7, %v4120_v52, %v4195_v27  ;;  %v4639_v21 = vld [vmem:[#allocation4 + $0xc8] sm:$0xe0] }
 0x4d9   : > { %4747 = vst [vmem:[#allocation5 + $0x170] sm:$0xf] %v4693_v35  ;;  %v14469_v61 = vld [vmem:[#allocation4 + $0xc0] sm:$0xc0]  ;;  %v5244_v0 = vpack.c.bf16 %v5136_v29, %v5118_v15  ;;  %v4715_v24 = vrot.slane %v14467_v50, 5  ;;  %4258 = vst [vmem:[#allocation4 + $0xe0] sm:$0xff] %v4226_v45  ;;  %v4228_v12 = vsel %vm4153_vm8, %v4121_v54, %v4196_v11  ;;  %v4197_v29 = vmul.f32 %v14127_v8, %v4122_v58 }
 0x4da   : > { %v4928_v10 = vld [vmem:[#allocation4 + $0xc0] sm:$0x80]  ;;  %4259 = vst [vmem:[#allocation4 + $0xe8] sm:$0xff] %v4227_v51  ;;  %v14473_v46 = vld [vmem:[#allocation4 + $0xc8] sm:$0xc0]  ;;  %vm4154_vm9 = vcmp.gt.f32.partialorder %v4122_v58, 0.0  ;;  %v5001_v59 = vsel %vm4968_vm6, %v4999_v48, %v5000_v38  ;;  %v4714_v38 = vsel %vm4678_vm3, %v4712_v9, %v4713_v28 }
 0x4db   : > { %v5005_v56 = vrot.slane %v4928_v10, 7  ;;  %v4929_v35 = vld [vmem:[#allocation4 + $0xc8] sm:$0x80]  ;;  %6489 = vmatprep.mubr.bf16.mxu0 %v5244_v0  ;;  %v4301_v53 = vld [vmem:[#allocation4 + $0x68] sm:$0x1e]  ;;  %v4718_v49 = vrot.slane %v4639_v21, 5  ;;  %v5004_v10 = vsel %vm4968_vm6, %v5002_v33, %v5003_v60  ;;  %v4229_v0 = vsel %vm4154_vm9, %v4122_v58, %v4197_v29 }
 0x4dc   : > { %v4298_v52 = vld [vmem:[#allocation4 + $0x40] sm:$0x1e]  ;;  %v4863_v15 = vrot.slane %v14473_v46, 6  ;;  %v4640_v27 = vld [vmem:[#allocation4 + $0xd0] sm:$0x1]  ;;  %6490 = vmatmul.mubr.bf16.gmra.mrb[92].mxu0 %v5243_v26  ;;  %4260 = vst [vmem:[#allocation4 + $0xf0] sm:$0xff] %v4228_v12 }
 0x4dd   : > { %v14477_v2 = vld [vmem:[#allocation4 + $0xd0] sm:$0x3]  ;;  %v5008_v54 = vrot.slane %v4929_v35, 7  ;;  %v4716_v11 = vrot.slane %v4640_v27, 5  ;;  %v4641_v8 = vld [vmem:[#allocation4 + $0xd8] sm:$0x1] }
 0x4de   : > { %v4930_v6 = vld [vmem:[#allocation4 + $0xd0] sm:$0x7]  ;;  %5044 = vst [vmem:[#allocation5 + $0x348] sm:$0xf] %v5004_v10  ;;  %5043 = vst [vmem:[#allocation5 + $0x340] sm:$0xf] %v5001_v59 }
 0x4df   : > { %v15841_v45 = vrot.slane %v14297_v62, 5  ;;  %v15842_v51 = vrot.slane %v14267_v30, 5  ;;  %v5006_v26 = vrot.slane %v4930_v6, 7  ;;  %v4719_v33 = vrot.slane %v4641_v8, 5  ;;  %v4931_v60 = vld [vmem:[#allocation4 + $0xd8] sm:$0x7] }
 0x4e0   : > { %4261 = vst [vmem:[#allocation4 + $0xf8] sm:$0xff] %v4229_v0  ;;  %v15843_v39 = vrot.slane %v14335_v20, 5  ;;  %v4861_v62 = vrot.slane %v14477_v2, 6  ;;  %v14498_v30 = vld [vmem:[#allocation4 + $0xd8] sm:$0x3]  ;;  %v5009_v58 = vrot.slane %v4931_v60, 7  ;;  %v4717_v32 = vsel %vm4678_vm3, %v4715_v24, %v4716_v11 }
 0x4e1   : > { %v4699_v12 = vsel %vm4678_vm3, %v15842_v51, %v15841_v45  ;;  %v4273_v21 = vld [vmem:[#allocation4 + $0xa8] sm:$0xf]  ;;  %4754 = vst [vmem:[#allocation5 + $0x328] sm:$0xf] %v4714_v38  ;;  %v15844_v35 = vrot.slane %v14355_v63, 5  ;;  %v15845_v42 = vrot.slane %v14320_v16, 5  ;;  %v5007_v28 = vsel %vm4968_vm6, %v5005_v56, %v5006_v26 }
 0x4e2   : > { %4749 = vst [vmem:[#allocation5 + $0x200] sm:$0xf] %v4699_v12  ;;  %v4708_v48 = vsel %vm4678_vm3, %v15843_v39, %v4707_v44  ;;  %v15846_v44 = vrot.slane %v14422_v7, 5  ;;  %4289 = vst [vmem:[#allocation5 + $0x2d8] sm:$0xf] %v4273_v21  ;;  %v4333_v29 = vrot.slane %v4301_v53, 1  ;;  %v4720_v63 = vsel %vm4678_vm3, %v4718_v49, %v4719_v33 }
 0x4e3   : > { %4752 = vst [vmem:[#allocation5 + $0x298] sm:$0xf] %v4708_v48  ;;  %v4705_v20 = vsel %vm4678_vm3, %v15845_v42, %v15844_v35  ;;  %v4272_v9 = vld [vmem:[#allocation4 + $0xa0] sm:$0xf]  ;;  %v4330_v27 = vrot.slane %v4298_v52, 1  ;;  %v5010_v7 = vsel %vm4968_vm6, %v5008_v54, %v5009_v58  ;;  %v15848_v56 = vrot.slane %v14159_v40, 6 }
 0x4e4   : > { %v4711_v4 = vsel %vm4678_vm3, %v15846_v44, %v4710_v1  ;;  %4751 = vst [vmem:[#allocation5 + $0x290] sm:$0xf] %v4705_v20  ;;  %v14512_v10 = vld [vmem:[#allocation4 + $0xe0] sm:$0xe0]  ;;  %4288 = vst [vmem:[#allocation5 + $0x2d0] sm:$0xf] %v4272_v9 }
 0x4e5   : > { %4753 = vst [vmem:[#allocation5 + $0x320] sm:$0xf] %v4711_v4  ;;  %v14514_v16 = vld [vmem:[#allocation4 + $0xe0] sm:$0xc0]  ;;  %5045 = vst [vmem:[#allocation5 + $0x3d0] sm:$0xf] %v5007_v28 }
 0x4e6   : > { %v14516_v59 = vld [vmem:[#allocation4 + $0xe0] sm:$0x80]  ;;  %4756 = vst [vmem:[#allocation5 + $0x3b8] sm:$0xf] %v4720_v63  ;;  %v15847_v1 = vrot.slane %v14175_v14, 6  ;;  %v15849_v52 = vrot.slane %v14260_v13, 6 }
 0x4e7   : > { %v15850_v49 = vrot.slane %v14236_v18, 6  ;;  %v4864_v54 = vrot.slane %v14498_v30, 6  ;;  %v4721_v8 = vrot.slane %v14512_v10, 5  ;;  %v4866_v50 = vrot.slane %v14514_v16, 6  ;;  %v14535_v0 = vld [vmem:[#allocation4 + $0xe8] sm:$0xe0] }
 0x4e8   : > { %v4835_v53 = vsel %vm4823_vm5, %v15848_v56, %v15847_v1  ;;  %5046 = vst [vmem:[#allocation5 + $0x3d8] sm:$0xf] %v5010_v7  ;;  %4365 = vst [vmem:[#allocation5 + $0x1c8] sm:$0xf] %v4333_v29  ;;  %v14537_v14 = vld [vmem:[#allocation4 + $0x60] sm:$0x1e] }
 0x4e9   : > { %v4841_v6 = vsel %vm4823_vm5, %v15850_v49, %v15849_v52  ;;  %4362 = vst [vmem:[#allocation5 + $0x130] sm:$0xf] %v4330_v27  ;;  %4755 = vst [vmem:[#allocation5 + $0x3b0] sm:$0xf] %v4717_v32  ;;  %v15851_v40 = vrot.slane %v14312_v47, 6  ;;  %v15852_v18 = vrot.slane %v14290_v19, 6 }
 0x4ea   : > { %4891 = vst [vmem:[#allocation5 + $0xf8] sm:$0xf] %v4835_v53  ;;  %4893 = vst [vmem:[#allocation5 + $0x188] sm:$0xf] %v4841_v6  ;;  %v5011_v24 = vrot.slane %v14516_v59, 7  ;;  %v4724_v11 = vrot.slane %v14535_v0, 5 }
 0x4eb   : > { %v4847_v13 = vsel %vm4823_vm5, %v15852_v18, %v15851_v40  ;;  %v14546_v45 = vld [vmem:[#allocation4 + $0xe8] sm:$0xc0]  ;;  %v15853_v12 = vrot.slane %v14250_v57, 6  ;;  %v15854_v26 = vrot.slane %v14218_v25, 6  ;;  %v15855_v47 = vrot.slane %v14299_v34, 6  ;;  %v5168_v28 = vld [vmem:[#allocation5 + $0x2b8] sm:$0xff] }
 0x4ec   : > { %v4933_v51 = vld [vmem:[#allocation4 + $0xe8] sm:$0x80]  ;;  %4895 = vst [vmem:[#allocation5 + $0x218] sm:$0xf] %v4847_v13  ;;  %v15856_v19 = vrot.slane %v14269_v31, 6  ;;  %v4869_v39 = vrot.slane %v14546_v45, 6 }
 0x4ed   : > { %v4838_v33 = vsel %vm4823_vm5, %v15854_v26, %v15853_v12  ;;  %v5014_v48 = vrot.slane %v4933_v51, 7  ;;  %v4644_v38 = vld [vmem:[#allocation4 + $0xf0] sm:$0x1]  ;;  %v14561_v58 = vld [vmem:[#allocation4 + $0x88] sm:$0x1e]  ;;  %v15857_v25 = vrot.slane %v14392_v55, 6 }
 0x4ee   : > { %v4844_v60 = vsel %vm4823_vm5, %v15856_v19, %v15855_v47  ;;  %v14559_v30 = vld [vmem:[#allocation4 + $0xf0] sm:$0x3]  ;;  %4892 = vst [vmem:[#allocation5 + $0x180] sm:$0xf] %v4838_v33  ;;  %v15858_v57 = vrot.slane %v14346_v3, 6  ;;  %v15859_v31 = vrot.slane %v14458_v41, 6 }
 0x4ef   : > { %4894 = vst [vmem:[#allocation5 + $0x210] sm:$0xf] %v4844_v60  ;;  %v15860_v21 = vrot.slane %v14437_v43, 6  ;;  %v4722_v42 = vrot.slane %v4644_v38, 5  ;;  %v4867_v20 = vrot.slane %v14559_v30, 6  ;;  %v5154_v9 = vld [vmem:[#allocation5 + $0x248] sm:$0xff] }
 0x4f0   : > { %v4853_v34 = vsel %vm4823_vm5, %v15858_v57, %v15857_v25  ;;  %v4934_v44 = vld [vmem:[#allocation4 + $0xf0] sm:$0x7]  ;;  %v4645_v4 = vld [vmem:[#allocation4 + $0xf8] sm:$0x1]  ;;  %v14574_v27 = vld [vmem:[#allocation4 + $0x80] sm:$0x1e] }
 0x4f1   : > { %v4859_v35 = vsel %vm4823_vm5, %v15860_v21, %v15859_v31  ;;  %v5167_v29 = vld [vmem:[#allocation5 + $0x2b0] sm:$0xff]  ;;  %v14576_v55 = vld [vmem:[#allocation4 + $0x8] sm:$0x3c]  ;;  %4897 = vst [vmem:[#allocation5 + $0x2a8] sm:$0xf] %v4853_v34  ;;  %v15861_v43 = vrot.slane %v14357_v23, 6  ;;  %v4865_v23 = vsel %vm4823_vm5, %v4863_v15, %v4864_v54  ;;  %v4723_v12 = vsel %vm4678_vm3, %v4721_v8, %v4722_v42 }
 0x4f2   : > { %v14578_v3 = vld [vmem:[#allocation4 + $0x28] sm:$0x3c]  ;;  %4899 = vst [vmem:[#allocation5 + $0x338] sm:$0xf] %v4859_v35  ;;  %v15862_v41 = vrot.slane %v14322_v17, 6  ;;  %v15863_v10 = vrot.slane %v14447_v37, 6  ;;  %v4868_v31 = vsel %vm4823_vm5, %v4866_v50, %v4867_v20 }
 0x4f3   : > { %v15864_v59 = vrot.slane %v14424_v5, 6  ;;  %v5012_v32 = vrot.slane %v4934_v44, 7  ;;  %v4725_v1 = vrot.slane %v4645_v4, 5  ;;  %v4790_v56 = vld [vmem:[#allocation4 + $0xf8] sm:$0x3]  ;;  %v5153_v52 = vld [vmem:[#allocation5 + $0x240] sm:$0xff] }
 0x4f4   : > { %v4850_v63 = vsel %vm4823_vm5, %v15862_v41, %v15861_v43  ;;  %v4935_v53 = vld [vmem:[#allocation4 + $0xf8] sm:$0x7]  ;;  %v15865_v17 = vrot.slane %v14469_v61, 6  ;;  %v4870_v5 = vrot.slane %v4790_v56, 6  ;;  %v5186_v40 = vld [vmem:[#allocation5 + $0x348] sm:$0xff]  ;;  %v5185_v18 = vld [vmem:[#allocation5 + $0x340] sm:$0xff] }
 0x4f5   : > { %v4856_v7 = vsel %vm4823_vm5, %v15864_v59, %v15863_v10  ;;  %4896 = vst [vmem:[#allocation5 + $0x2a0] sm:$0xf] %v4850_v63  ;;  %v5015_v49 = vrot.slane %v4935_v53, 7  ;;  %v5172_v6 = vld [vmem:[#allocation5 + $0x2d8] sm:$0xff]  ;;  %v4332_v13 = vrot.slane %v14537_v14, 1  ;;  %v5171_v15 = vld [vmem:[#allocation5 + $0x2d0] sm:$0xff]  ;;  %v5276_v54 = vpack.c.bf16 %v5186_v40, %v5168_v28 }
 0x4f6   : > { %4898 = vst [vmem:[#allocation5 + $0x330] sm:$0xf] %v4856_v7  ;;  %v4862_v37 = vsel %vm4823_vm5, %v15865_v17, %v4861_v62  ;;  %v4379_v51 = vld [vmem:[#allocation4 + $0x48] sm:$0x3c]  ;;  %4901 = vst [vmem:[#allocation5 + $0x3c8] sm:$0xf] %v4865_v23  ;;  %v5262_v46 = vpack.c.bf16 %v5172_v6, %v5154_v9  ;;  %v5275_v2 = vpack.c.bf16 %v5185_v18, %v5167_v29 }
 0x4f7   : > { %4900 = vst [vmem:[#allocation5 + $0x3c0] sm:$0xf] %v4862_v37  ;;  %v4275_v26 = vld [vmem:[#allocation4 + $0xc8] sm:$0xf]  ;;  %v5013_v62 = vsel %vm4968_vm6, %v5011_v24, %v5012_v32  ;;  %4757 = vst [vmem:[#allocation5 + $0x440] sm:$0xf] %v4723_v12  ;;  %v5261_v33 = vpack.c.bf16 %v5171_v15, %v5153_v52  ;;  %v5016_v14 = vsel %vm4968_vm6, %v5014_v48, %v5015_v49  ;;  %6952 = vmatprep.mubr.bf16.mxu1 %v5276_v54 }
 0x4f8   : > { %v4277_v61 = vld [vmem:[#allocation4 + $0xe8] sm:$0xf]  ;;  %4291 = vst [vmem:[#allocation5 + $0x368] sm:$0xf] %v4275_v26  ;;  %v4274_v47 = vld [vmem:[#allocation4 + $0xc0] sm:$0xf]  ;;  %v4726_v60 = vsel %vm4678_vm3, %v4724_v11, %v4725_v1  ;;  %6497 = vmatprep.mubr.bf16.mxu0 %v5262_v46  ;;  %6953 = vmatmul.mubr.bf16.gmra.mrb[40].mxu1 %v5275_v2 }
 0x4f9   : > { %4293 = vst [vmem:[#allocation5 + $0x3f8] sm:$0xf] %v4277_v61  ;;  %v4276_v19 = vld [vmem:[#allocation4 + $0xe0] sm:$0xf]  ;;  %5047 = vst [vmem:[#allocation5 + $0x460] sm:$0xf] %v5013_v62  ;;  %6498 = vmatmul.mubr.bf16.gmra.mrb[96].mxu0 %v5261_v33 }
 0x4fa   : > { %4364 = vst [vmem:[#allocation5 + $0x1c0] sm:$0xf] %v4332_v13  ;;  %v4335_v8 = vrot.slane %v14561_v58, 1  ;;  %4290 = vst [vmem:[#allocation5 + $0x360] sm:$0xf] %v4274_v47  ;;  %v4334_v24 = vrot.slane %v14574_v27, 1  ;;  %v4871_v58 = vsel %vm4823_vm5, %v4869_v39, %v4870_v5 }
 0x4fb   : > { %4292 = vst [vmem:[#allocation5 + $0x3f0] sm:$0xf] %v4276_v19  ;;  %5048 = vst [vmem:[#allocation5 + $0x468] sm:$0xf] %v5016_v14  ;;  %v4407_v38 = vrot.slane %v14576_v55, 2  ;;  %v4409_v25 = vrot.slane %v14578_v3, 2 }
 0x4fc   : > { %v4381_v48 = vld [vmem:[#allocation4 + $0x68] sm:$0x3c]  ;;  %4758 = vst [vmem:[#allocation5 + $0x448] sm:$0xf] %v4726_v60  ;;  %4367 = vst [vmem:[#allocation5 + $0x258] sm:$0xf] %v4335_v8 }
 0x4fd   : > { %v4305_v0 = vld [vmem:[#allocation4 + $0xa8] sm:$0x1e]  ;;  %v4304_v11 = vld [vmem:[#allocation4 + $0xa0] sm:$0x1e]  ;;  %4903 = vst [vmem:[#allocation5 + $0x458] sm:$0xf] %v4871_v58 }
 0x4fe   : > { %v4307_v57 = vld [vmem:[#allocation4 + $0xc8] sm:$0x1e]  ;;  %v4337_v21 = vrot.slane %v4305_v0, 1  ;;  %v4336_v35 = vrot.slane %v4304_v11, 1  ;;  %4366 = vst [vmem:[#allocation5 + $0x250] sm:$0xf] %v4334_v24 }
 0x4ff   : > { %v4455_v34 = vld [vmem:[#allocation4 + $0x8] sm:$0x78]  ;;  %v4339_v42 = vrot.slane %v4307_v57, 1  ;;  %4439 = vst [vmem:[#allocation5 + $0x28] sm:$0xf] %v4407_v38  ;;  %v4411_v39 = vrot.slane %v4379_v51, 2 }
 0x500   : > { %v4309_v45 = vld [vmem:[#allocation4 + $0xe8] sm:$0x1e]  ;;  %4441 = vst [vmem:[#allocation5 + $0xb8] sm:$0xf] %v4409_v25  ;;  %4902 = vst [vmem:[#allocation5 + $0x450] sm:$0xf] %v4868_v31 }
 0x501   : > { %v4457_v44 = vld [vmem:[#allocation4 + $0x28] sm:$0x78]  ;;  %v4341_v4 = vrot.slane %v4309_v45, 1  ;;  %v4306_v9 = vld [vmem:[#allocation4 + $0xc0] sm:$0x1e]  ;;  %v4413_v29 = vrot.slane %v4381_v48, 2 }
 0x502   : > { %v4308_v28 = vld [vmem:[#allocation4 + $0xe0] sm:$0x1e]  ;;  %v5102_v27 = vld [vmem:[#allocation5 + $0xa8] sm:$0xff]  ;;  %4369 = vst [vmem:[#allocation5 + $0x2e8] sm:$0xf] %v4337_v21  ;;  %v4338_v16 = vrot.slane %v4306_v9, 1 }
 0x503   : > { %4368 = vst [vmem:[#allocation5 + $0x2e0] sm:$0xf] %v4336_v35  ;;  %4371 = vst [vmem:[#allocation5 + $0x378] sm:$0xf] %v4339_v42  ;;  %v4340_v50 = vrot.slane %v4308_v28, 1  ;;  %v5204_v55 = vld [vmem:[#allocation5 + $0x3d8] sm:$0xff] }
 0x504   : > { %4443 = vst [vmem:[#allocation5 + $0x148] sm:$0xf] %v4411_v39  ;;  %v4378_v30 = vld [vmem:[#allocation4 + $0x40] sm:$0x3c]  ;;  %4373 = vst [vmem:[#allocation5 + $0x408] sm:$0xf] %v4341_v4 }
 0x505   : > { %v4380_v20 = vld [vmem:[#allocation4 + $0x60] sm:$0x3c]  ;;  %4445 = vst [vmem:[#allocation5 + $0x1d8] sm:$0xf] %v4413_v29  ;;  %v4410_v3 = vrot.slane %v4378_v30, 2  ;;  %v5190_v10 = vld [vmem:[#allocation5 + $0x368] sm:$0xff] }
 0x506   : > { %v4412_v43 = vrot.slane %v4380_v20, 2  ;;  %v4383_v41 = vld [vmem:[#allocation4 + $0x88] sm:$0x3c]  ;;  %v5208_v59 = vld [vmem:[#allocation5 + $0x3f8] sm:$0xff]  ;;  %v5221_v7 = vld [vmem:[#allocation5 + $0x460] sm:$0xff]  ;;  %v4487_v56 = vrot.slane %v4455_v34, 3 }
 0x507   : > { %v4385_v63 = vld [vmem:[#allocation4 + $0xa8] sm:$0x3c]  ;;  %4370 = vst [vmem:[#allocation5 + $0x370] sm:$0xf] %v4338_v16  ;;  %4372 = vst [vmem:[#allocation5 + $0x400] sm:$0xf] %v4340_v50  ;;  %v5280_v53 = vpack.c.bf16 %v5208_v59, %v5190_v10 }
 0x508   : > { %v4415_v32 = vrot.slane %v4383_v41, 2  ;;  %v4417_v1 = vrot.slane %v4385_v63, 2  ;;  %v5189_v52 = vld [vmem:[#allocation5 + $0x360] sm:$0xff]  ;;  %v5207_v23 = vld [vmem:[#allocation5 + $0x3f0] sm:$0xff]  ;;  %v5222_v17 = vld [vmem:[#allocation5 + $0x468] sm:$0xff]  ;;  %v4489_v37 = vrot.slane %v4457_v44, 3 }
 0x509   : > { %4442 = vst [vmem:[#allocation5 + $0x140] sm:$0xf] %v4410_v3  ;;  %4444 = vst [vmem:[#allocation5 + $0x1d0] sm:$0xf] %v4412_v43  ;;  %v5279_v5 = vpack.c.bf16 %v5207_v23, %v5189_v52  ;;  %v5084_v49 = vld [vmem:[#allocation5 + $0x18] sm:$0xff]  ;;  %v5294_v6 = vpack.c.bf16 %v5222_v17, %v5204_v55  ;;  %v5203_v40 = vld [vmem:[#allocation5 + $0x3d0] sm:$0xff]  ;;  %6505 = vmatprep.mubr.bf16.mxu0 %v5280_v53 }
 0x50a   : > { %4447 = vst [vmem:[#allocation5 + $0x268] sm:$0xf] %v4415_v32  ;;  %4449 = vst [vmem:[#allocation5 + $0x2f8] sm:$0xf] %v4417_v1  ;;  %v4382_v18 = vld [vmem:[#allocation4 + $0x80] sm:$0x3c]  ;;  %v5228_v13 = vpack.c.bf16 %v5102_v27, %v5084_v49  ;;  %v5293_v51 = vpack.c.bf16 %v5221_v7, %v5203_v40 }
 0x50b   : > { %4519 = vst [vmem:[#allocation5 + $0x38] sm:$0xf] %v4487_v56  ;;  %v4414_v12 = vrot.slane %v4382_v18, 2  ;;  %4521 = vst [vmem:[#allocation5 + $0xc8] sm:$0xf] %v4489_v37  ;;  %6506 = vmatmul.mubr.bf16.gmra.mrb[100].mxu0 %v5279_v5  ;;  %6960 = vmatprep.mubr.bf16.mxu1 %v5294_v6  ;;  %v15866_v62 = vmov 0  }
 0x50c   : > { %v4384_v46 = vld [vmem:[#allocation4 + $0xa0] sm:$0x3c]  ;;  %v4387_v15 = vld [vmem:[#allocation4 + $0xc8] sm:$0x3c]  ;;  %6546 = vmatprep.mubr.bf16.mxu0 %v5228_v13  ;;  %6961 = vmatmul.mubr.bf16.gmra.mrb[44].mxu1 %v5293_v51  ;;  %v5083_v60 = vld [vmem:[#allocation5 + $0x10] sm:$0xff]  ;;  %vm7129_vm6 = vcmask 1041409  }
 0x50d   : > { %v4389_v54 = vld [vmem:[#allocation4 + $0xe8] sm:$0x3c]  ;;  %v4416_v2 = vrot.slane %v4384_v46, 2  ;;  %4446 = vst [vmem:[#allocation5 + $0x260] sm:$0xf] %v4414_v12  ;;  %v4419_v26 = vrot.slane %v4387_v15, 2  ;;  %7245 = vmatprep.mubr.bf16.mxu1 %v15866_v62 }
 0x50e   : > { %v4421_v61 = vrot.slane %v4389_v54, 2  ;;  %v5101_v33 = vld [vmem:[#allocation5 + $0xa0] sm:$0xff]  ;;  %v5138_v19 = vld [vmem:[#allocation5 + $0x1c8] sm:$0xff]  ;;  %v11952_v24 = vld [vmem:[%s13332_s25 + $0x100] sm:$0xff]   ;;  %vm12864_vm1 = vmmov 0  }
 0x50f   : > { %4448 = vst [vmem:[#allocation5 + $0x2f0] sm:$0xf] %v4416_v2  ;;  %4451 = vst [vmem:[#allocation5 + $0x388] sm:$0xf] %v4419_v26  ;;  %v4386_v47 = vld [vmem:[#allocation4 + $0xc0] sm:$0x3c]  ;;  %v5227_v25 = vpack.c.bf16 %v5101_v33, %v5083_v60 }
 0x510   : > { %4453 = vst [vmem:[#allocation5 + $0x418] sm:$0xf] %v4421_v61  ;;  %v4388_v14 = vld [vmem:[#allocation4 + $0xe0] sm:$0x3c]  ;;  %v4418_v8 = vrot.slane %v4386_v47, 2  ;;  %v5120_v48 = vld [vmem:[#allocation5 + $0x138] sm:$0xff] }
 0x511   : > { %v4420_v38 = vrot.slane %v4388_v14, 2  ;;  %v11953_v58 = vld [vmem:[%s13332_s25 + $0x148] sm:$0xff]   ;;  %v4459_v0 = vld [vmem:[#allocation4 + $0x48] sm:$0x78]  ;;  %v5246_v11 = vpack.c.bf16 %v5138_v19, %v5120_v48  ;;  %v5119_v20 = vld [vmem:[#allocation5 + $0x130] sm:$0xff] }
 0x512   : > { %4450 = vst [vmem:[#allocation5 + $0x380] sm:$0xf] %v4418_v8  ;;  %v4461_v57 = vld [vmem:[#allocation4 + $0x68] sm:$0x78]  ;;  %v4491_v34 = vrot.slane %v4459_v0, 3  ;;  %v11954_v35 = vld [vmem:[%s13332_s25 + $0x108] sm:$0xff]  }
 0x513   : > { %4452 = vst [vmem:[#allocation5 + $0x410] sm:$0xf] %v4420_v38  ;;  %6547 = vmatmul.mubr.bf16.vlgmr.msra.gmra.mrb[104].mxu0 %v5227_v25  ;;  %v4493_v31 = vrot.slane %v4461_v57, 3  ;;  %v4458_v21 = vld [vmem:[#allocation4 + $0x40] sm:$0x78]  ;;  %v11955_v44 = vld [vmem:[%s13332_s25 + $0x150] sm:$0xff]  }
 0x514   : > { %10980 = vmatpush3.bf16.msra.mxu0 %v11952_v24  ;;  %6554 = vmatprep.mubr.bf16.mxu0 %v5246_v11  ;;  %4523 = vst [vmem:[#allocation5 + $0x158] sm:$0xf] %v4491_v34  ;;  %v4460_v45 = vld [vmem:[#allocation4 + $0x60] sm:$0x78]  ;;  %v4490_v42 = vrot.slane %v4458_v21, 3  ;;  %v5174_v27 = vld [vmem:[#allocation5 + $0x2e8] sm:$0xff] }
 0x515   : > { %v4463_v39 = vld [vmem:[#allocation4 + $0x88] sm:$0x78]  ;;  %10981 = vmatprep.subr.bf16.mxu0 %v11953_v58  ;;  %4525 = vst [vmem:[#allocation5 + $0x1e8] sm:$0xf] %v4493_v31  ;;  %v4492_v4 = vrot.slane %v4460_v45, 3  ;;  %v5137_v28 = vld [vmem:[#allocation5 + $0x1c0] sm:$0xff] }
 0x516   : > { %v4495_v9 = vrot.slane %v4463_v39, 3  ;;  %4522 = vst [vmem:[#allocation5 + $0x150] sm:$0xf] %v4490_v42  ;;  %v4465_v29 = vld [vmem:[#allocation4 + $0xa8] sm:$0x78]  ;;  %v5245_v63 = vpack.c.bf16 %v5137_v28, %v5119_v20  ;;  %v5156_v10 = vld [vmem:[#allocation5 + $0x258] sm:$0xff] }
 0x517   : > { %4524 = vst [vmem:[#allocation5 + $0x1e0] sm:$0xf] %v4492_v4  ;;  %v4497_v16 = vrot.slane %v4465_v29, 3  ;;  %v4462_v50 = vld [vmem:[#allocation4 + $0x80] sm:$0x78]  ;;  %v11956_v55 = vld [vmem:[%s13332_s25 + $0x110] sm:$0xff]   ;;  %v5264_v1 = vpack.c.bf16 %v5174_v27, %v5156_v10 }
 0x518   : > { %4527 = vst [vmem:[#allocation5 + $0x278] sm:$0xf] %v4495_v9  ;;  %v4464_v30 = vld [vmem:[#allocation4 + $0xa0] sm:$0x78]  ;;  %10982 = vmatpush3.bf16.msra.mxu0 %v11954_v35  ;;  %v4494_v3 = vrot.slane %v4462_v50, 3  ;;  %v11957_v59 = vld [vmem:[%s13332_s25 + $0x158] sm:$0xff]  }
 0x519   : > { %v4496_v43 = vrot.slane %v4464_v30, 3  ;;  %v4467_v41 = vld [vmem:[#allocation4 + $0xc8] sm:$0x78]  ;;  %10983 = vmatprep.subr.bf16.mxu0 %v11955_v44  ;;  %4529 = vst [vmem:[#allocation5 + $0x308] sm:$0xf] %v4497_v16  ;;  %v11958_v17 = vld [vmem:[%s13332_s25 + $0x118] sm:$0xff]  }
 0x51a   : > { %v4469_v7 = vld [vmem:[#allocation4 + $0xe8] sm:$0x78]  ;;  %v4499_v32 = vrot.slane %v4467_v41, 3  ;;  %4526 = vst [vmem:[#allocation5 + $0x270] sm:$0xf] %v4494_v3  ;;  %v11959_v6 = vld [vmem:[%s13332_s25 + $0x160] sm:$0xff]  }
 0x51b   : > { %4528 = vst [vmem:[#allocation5 + $0x300] sm:$0xf] %v4496_v43  ;;  %v4501_v56 = vrot.slane %v4469_v7, 3  ;;  %v4466_v53 = vld [vmem:[#allocation4 + $0xc0] sm:$0x78]  ;;  %6555 = vmatmul.mubr.bf16.gmra.mrb[108].mxu0 %v5245_v63  ;;  %v11960_v51 = vld [vmem:[%s13332_s25 + $0x120] sm:$0xff]  }
 0x51c   : > { %4531 = vst [vmem:[#allocation5 + $0x398] sm:$0xf] %v4499_v32  ;;  %v4468_v52 = vld [vmem:[#allocation4 + $0xe0] sm:$0x78]  ;;  %v4498_v23 = vrot.slane %v4466_v53, 3  ;;  %10984 = vmatpush3.bf16.msra.mxu0 %v11956_v55  ;;  %6562 = vmatprep.mubr.bf16.mxu0 %v5264_v1  ;;  %v5210_v12 = vld [vmem:[#allocation5 + $0x408] sm:$0xff] }
 0x51d   : > { %4533 = vst [vmem:[#allocation5 + $0x428] sm:$0xf] %v4501_v56  ;;  %v4500_v37 = vrot.slane %v4468_v52, 3  ;;  %v4535_v5 = vld [vmem:[#allocation4 + $0x8] sm:$0xf0]  ;;  %10985 = vmatprep.subr.bf16.mxu0 %v11957_v59  ;;  %v5173_v13 = vld [vmem:[#allocation5 + $0x2e0] sm:$0xff] }
 0x51e   : > { %v4537_v49 = vld [vmem:[#allocation4 + $0x28] sm:$0xf0]  ;;  %4530 = vst [vmem:[#allocation5 + $0x390] sm:$0xf] %v4498_v23  ;;  %v4567_v40 = vrot.slane %v4535_v5, 4  ;;  %v5155_v46 = vld [vmem:[#allocation5 + $0x250] sm:$0xff] }
 0x51f   : > { %v4569_v18 = vrot.slane %v4537_v49, 4  ;;  %4532 = vst [vmem:[#allocation5 + $0x420] sm:$0xf] %v4500_v37  ;;  %v4539_v15 = vld [vmem:[#allocation4 + $0x48] sm:$0xf0]  ;;  %v5263_v2 = vpack.c.bf16 %v5173_v13, %v5155_v46  ;;  %v5192_v26 = vld [vmem:[#allocation5 + $0x378] sm:$0xff] }
 0x520   : > { %4599 = vst [vmem:[#allocation5 + $0x48] sm:$0xf] %v4567_v40  ;;  %10986 = vmatpush3.bf16.msra.mxu0 %v11958_v17  ;;  %v4541_v54 = vld [vmem:[#allocation4 + $0x68] sm:$0xf0]  ;;  %v11961_v61 = vld [vmem:[%s13332_s25 + $0x168] sm:$0xff]   ;;  %v4571_v33 = vrot.slane %v4539_v15, 4  ;;  %v5282_v19 = vpack.c.bf16 %v5210_v12, %v5192_v26 }
 0x521   : > { %4601 = vst [vmem:[#allocation5 + $0xd8] sm:$0xf] %v4569_v18  ;;  %10987 = vmatprep.subr.bf16.mxu0 %v11959_v6  ;;  %v4573_v47 = vrot.slane %v4541_v54, 4  ;;  %v4538_v14 = vld [vmem:[#allocation4 + $0x40] sm:$0xf0]  ;;  %v11963_v48 = vld [vmem:[%s13332_s25 + $0x170] sm:$0xff]  }
 0x522   : > { %4603 = vst [vmem:[#allocation5 + $0x168] sm:$0xf] %v4571_v33  ;;  %v4540_v8 = vld [vmem:[#allocation4 + $0x60] sm:$0xf0]  ;;  %v4570_v24 = vrot.slane %v4538_v14, 4  ;;  %v5104_v34 = vld [vmem:[#allocation5 + $0xb8] sm:$0xff] }
 0x523   : > { %6563 = vmatmul.mubr.bf16.gmra.mrb[112].mxu0 %v5263_v2  ;;  %4605 = vst [vmem:[#allocation5 + $0x1f8] sm:$0xf] %v4573_v47  ;;  %v11962_v60 = vld [vmem:[%s13332_s25 + $0x128] sm:$0xff]   ;;  %v4572_v38 = vrot.slane %v4540_v8, 4  ;;  %v4543_v25 = vld [vmem:[#allocation4 + $0x88] sm:$0xf0] }
 0x524   : > { %10988 = vmatpush3.bf16.msra.mxu0 %v11960_v51  ;;  %6570 = vmatprep.mubr.bf16.mxu0 %v5282_v19  ;;  %v4545_v58 = vld [vmem:[#allocation4 + $0xa8] sm:$0xf0]  ;;  %v4575_v0 = vrot.slane %v4543_v25, 4  ;;  %v5209_v11 = vld [vmem:[#allocation5 + $0x400] sm:$0xff]  ;;  %4602 = vst [vmem:[#allocation5 + $0x160] sm:$0xf] %v4570_v24 }
 0x525   : > { %10989 = vmatprep.subr.bf16.mxu0 %v11961_v61  ;;  %4604 = vst [vmem:[#allocation5 + $0x1f0] sm:$0xf] %v4572_v38  ;;  %v4577_v57 = vrot.slane %v4545_v58, 4  ;;  %v4542_v31 = vld [vmem:[#allocation4 + $0x80] sm:$0xf0]  ;;  %v5191_v35 = vld [vmem:[#allocation5 + $0x370] sm:$0xff] }
 0x526   : > { %4607 = vst [vmem:[#allocation5 + $0x288] sm:$0xf] %v4575_v0  ;;  %v4544_v21 = vld [vmem:[#allocation4 + $0xa0] sm:$0xf0]  ;;  %v11964_v45 = vld [vmem:[%s13332_s25 + $0x130] sm:$0xff]   ;;  %v4574_v42 = vrot.slane %v4542_v31, 4  ;;  %v5281_v4 = vpack.c.bf16 %v5209_v11, %v5191_v35 }
 0x527   : > { %4609 = vst [vmem:[#allocation5 + $0x318] sm:$0xf] %v4577_v57  ;;  %v4576_v39 = vrot.slane %v4544_v21, 4  ;;  %v4547_v44 = vld [vmem:[#allocation4 + $0xc8] sm:$0xf0]  ;;  %v11965_v28 = vld [vmem:[%s13332_s25 + $0x178] sm:$0xff]  }
 0x528   : > { %10990 = vmatpush3.bf16.msra.mxu0 %v11962_v60  ;;  %v5086_v9 = vld [vmem:[#allocation5 + $0x28] sm:$0xff]  ;;  %v4579_v27 = vrot.slane %v4547_v44, 4  ;;  %4606 = vst [vmem:[#allocation5 + $0x280] sm:$0xf] %v4574_v42  ;;  %v4546_v30 = vld [vmem:[#allocation4 + $0xc0] sm:$0xf0] }
 0x529   : > { %10991 = vmatprep.subr.bf16.mxu0 %v11963_v48  ;;  %v4549_v29 = vld [vmem:[#allocation4 + $0xe8] sm:$0xf0]  ;;  %v5230_v16 = vpack.c.bf16 %v5104_v34, %v5086_v9  ;;  %4608 = vst [vmem:[#allocation5 + $0x310] sm:$0xf] %v4576_v39  ;;  %v4548_v20 = vld [vmem:[#allocation4 + $0xe0] sm:$0xf0] }
 0x52a   : > { %v4581_v50 = vrot.slane %v4549_v29, 4  ;;  %4611 = vst [vmem:[#allocation5 + $0x3a8] sm:$0xf] %v4579_v27  ;;  %v4578_v55 = vrot.slane %v4546_v30, 4  ;;  %v11966_v3 = vld [vmem:[%s13332_s25 + $0x138] sm:$0xff]   ;;  %v4580_v43 = vrot.slane %v4548_v20, 4 }
 0x52b   : > { %6571 = vmatmul.mubr.bf16.gmra.mrb[116].mxu0 %v5281_v4  ;;  %v11967_v41 = vld [vmem:[%s13332_s25 + $0x1c0] sm:$0xff]   ;;  %v5103_v63 = vld [vmem:[#allocation5 + $0xb0] sm:$0xff]  ;;  %v5085_v59 = vld [vmem:[#allocation5 + $0x20] sm:$0xff] }
 0x52c   : > { %10992 = vmatpush3.bf16.msra.mxu0 %v11964_v45  ;;  %6611 = vmatprep.mubr.bf16.mxu0 %v5230_v16  ;;  %4613 = vst [vmem:[#allocation5 + $0x438] sm:$0xf] %v4581_v50  ;;  %4610 = vst [vmem:[#allocation5 + $0x3a0] sm:$0xf] %v4578_v55  ;;  %v5140_v10 = vld [vmem:[#allocation5 + $0x1d8] sm:$0xff]  ;;  %v5229_v32 = vpack.c.bf16 %v5103_v63, %v5085_v59  ;;  %v5122_v1 = vld [vmem:[#allocation5 + $0x148] sm:$0xff] }
 0x52d   : > { %10993 = vmatprep.subr.bf16.mxu0 %v11965_v28  ;;  %4612 = vst [vmem:[#allocation5 + $0x430] sm:$0xf] %v4580_v43  ;;  %v11968_v7 = vld [vmem:[%s13332_s25 + $0x180] sm:$0xff]   ;;  %v11969_v56 = vld [vmem:[%s13332_s25 + $0x1c8] sm:$0xff]   ;;  %v5248_v53 = vpack.c.bf16 %v5140_v10, %v5122_v1  ;;  %v11971_v23 = vld [vmem:[%s13332_s25 + $0x1d0] sm:$0xff]  }
 0x52e   : > { %v11970_v52 = vld [vmem:[%s13332_s25 + $0x188] sm:$0xff]   ;;  %v5139_v17 = vld [vmem:[#allocation5 + $0x1d0] sm:$0xff]  ;;  %v5176_v37 = vld [vmem:[#allocation5 + $0x2f8] sm:$0xff] }
 0x52f   : > { %v5121_v5 = vld [vmem:[#allocation5 + $0x140] sm:$0xff]  ;;  %v11972_v49 = vld [vmem:[%s13332_s25 + $0x190] sm:$0xff]   ;;  %v11973_v18 = vld [vmem:[%s13332_s25 + $0x1d8] sm:$0xff]  }
 0x530   : > { %10994 = vmatpush3.bf16.msra.mxu0 %v11966_v3  ;;  %v5247_v6 = vpack.c.bf16 %v5139_v17, %v5121_v5  ;;  %v5158_v40 = vld [vmem:[#allocation5 + $0x268] sm:$0xff]  ;;  %v11974_v51 = vld [vmem:[%s13332_s25 + $0x198] sm:$0xff]   ;;  %v11975_v12 = vld [vmem:[%s13332_s25 + $0x1e0] sm:$0xff]  }
 0x531   : > { %11019 = vmatprep.subr.bf16.mxu0 %v11967_v41  ;;  %v5266_v13 = vpack.c.bf16 %v5176_v37, %v5158_v40  ;;  %v5175_v46 = vld [vmem:[#allocation5 + $0x2f0] sm:$0xff]  ;;  %v5212_v15 = vld [vmem:[#allocation5 + $0x418] sm:$0xff]  ;;  %v5157_v54 = vld [vmem:[#allocation5 + $0x260] sm:$0xff] }
 0x532   : > { %v11976_v2 = vld [vmem:[%s13332_s25 + $0x1a0] sm:$0xff]   ;;  %v5265_v26 = vpack.c.bf16 %v5175_v46, %v5157_v54  ;;  %v5194_v61 = vld [vmem:[#allocation5 + $0x388] sm:$0xff]  ;;  %v11977_v33 = vld [vmem:[%s13332_s25 + $0x1e8] sm:$0xff]  }
 0x533   : > { %6612 = vmatmul.mubr.bf16.vlgmr.msra.gmra.mrb[120].mxu0 %v5229_v32  ;;  %v5050_v47 = vld [vmem:[#allocation4 + $0x18] sm:$0xf]  ;;  %v5284_v19 = vpack.c.bf16 %v5212_v15, %v5194_v61  ;;  %v11978_v14 = vld [vmem:[%s13332_s25 + $0x1a8] sm:$0xff]   ;;  %v11979_v60 = vld [vmem:[%s13332_s25 + $0x1f0] sm:$0xff]  }
 0x534   : > { %11020 = vmatpush3.bf16.msra.mxu0 %v11968_v7  ;;  %6619 = vmatprep.mubr.bf16.mxu0 %v5248_v53  ;;  %v5052_v8 = vld [vmem:[#allocation4 + $0x38] sm:$0xf]  ;;  %5066 = vst [vmem:[#allocation5 + $0x88] sm:$0xf] %v5050_v47  ;;  %v5053_v25 = vld [vmem:[#allocation4 + $0x50] sm:$0xf] }
 0x535   : > { %11021 = vmatprep.subr.bf16.mxu0 %v11969_v56  ;;  %5068 = vst [vmem:[#allocation5 + $0x118] sm:$0xf] %v5052_v8  ;;  %v5054_v24 = vld [vmem:[#allocation4 + $0x58] sm:$0xf]  ;;  %v5055_v48 = vld [vmem:[#allocation4 + $0x70] sm:$0xf] }
 0x536   : > { %v5056_v38 = vld [vmem:[#allocation4 + $0x78] sm:$0xf]  ;;  %5070 = vst [vmem:[#allocation5 + $0x1a8] sm:$0xf] %v5054_v24  ;;  %5069 = vst [vmem:[#allocation5 + $0x1a0] sm:$0xf] %v5053_v25 }
 0x537   : > { %5072 = vst [vmem:[#allocation5 + $0x238] sm:$0xf] %v5056_v38  ;;  %v5058_v58 = vld [vmem:[#allocation4 + $0x98] sm:$0xf]  ;;  %5071 = vst [vmem:[#allocation5 + $0x230] sm:$0xf] %v5055_v48 }
 0x538   : > { %11022 = vmatpush3.bf16.msra.mxu0 %v11970_v52  ;;  %v5060_v0 = vld [vmem:[#allocation4 + $0xb8] sm:$0xf]  ;;  %5074 = vst [vmem:[#allocation5 + $0x2c8] sm:$0xf] %v5058_v58  ;;  %v5057_v11 = vld [vmem:[#allocation4 + $0x90] sm:$0xf] }
 0x539   : > { %11023 = vmatprep.subr.bf16.mxu0 %v11971_v23  ;;  %5076 = vst [vmem:[#allocation5 + $0x358] sm:$0xf] %v5060_v0  ;;  %v5059_v57 = vld [vmem:[#allocation4 + $0xb0] sm:$0xf]  ;;  %v5062_v34 = vld [vmem:[#allocation4 + $0xd8] sm:$0xf] }
 0x53a   : > { %v5211_v31 = vld [vmem:[#allocation5 + $0x410] sm:$0xff]  ;;  %5073 = vst [vmem:[#allocation5 + $0x2c0] sm:$0xf] %v5057_v11  ;;  %5075 = vst [vmem:[#allocation5 + $0x350] sm:$0xf] %v5059_v57  ;;  %v5106_v45 = vld [vmem:[#allocation5 + $0xc8] sm:$0xff] }
 0x53b   : > { %6620 = vmatmul.mubr.bf16.gmra.mrb[124].mxu0 %v5247_v6  ;;  %v5064_v21 = vld [vmem:[#allocation4 + $0xf8] sm:$0xf]  ;;  %5078 = vst [vmem:[#allocation5 + $0x3e8] sm:$0xf] %v5062_v34  ;;  %v5061_v35 = vld [vmem:[#allocation4 + $0xd0] sm:$0xf] }
 0x53c   : > { %11024 = vmatpush3.bf16.msra.mxu0 %v11972_v49  ;;  %6627 = vmatprep.mubr.bf16.mxu0 %v5266_v13  ;;  %5080 = vst [vmem:[#allocation5 + $0x478] sm:$0xf] %v5064_v21  ;;  %v5063_v42 = vld [vmem:[#allocation4 + $0xf0] sm:$0xf]  ;;  %5077 = vst [vmem:[#allocation5 + $0x3e0] sm:$0xf] %v5061_v35 }
 0x53d   : > { %11025 = vmatprep.subr.bf16.mxu0 %v11973_v18  ;;  %v5193_v39 = vld [vmem:[#allocation5 + $0x380] sm:$0xff]  ;;  %v11980_v44 = vld [vmem:[%s13332_s25 + $0x1b0] sm:$0xff]   ;;  %5079 = vst [vmem:[#allocation5 + $0x470] sm:$0xf] %v5063_v42  ;;  %v5088_v9 = vld [vmem:[#allocation5 + $0x38] sm:$0xff] }
 0x53e   : > { %v5283_v4 = vpack.c.bf16 %v5211_v31, %v5193_v39  ;;  %v11981_v28 = vld [vmem:[%s13332_s25 + $0x1f8] sm:$0xff]   ;;  %v5232_v29 = vpack.c.bf16 %v5106_v45, %v5088_v9  ;;  %v11983_v16 = vld [vmem:[%s13332_s25 + $0x240] sm:$0xff]   ;;  %v5105_v50 = vld [vmem:[#allocation5 + $0xc0] sm:$0xff] }
 0x53f   : > { %v11982_v27 = vld [vmem:[%s13332_s25 + $0x1b8] sm:$0xff]   ;;  %v5142_v30 = vld [vmem:[#allocation5 + $0x1e8] sm:$0xff]  ;;  %v11984_v55 = vld [vmem:[%s13332_s25 + $0x200] sm:$0xff]  }
 0x540   : > { %11026 = vmatpush3.bf16.msra.mxu0 %v11974_v51  ;;  %v5087_v20 = vld [vmem:[#allocation5 + $0x30] sm:$0xff]  ;;  %v5124_v43 = vld [vmem:[#allocation5 + $0x158] sm:$0xff]  ;;  %v11985_v41 = vld [vmem:[%s13332_s25 + $0x248] sm:$0xff]  }
 0x541   : > { %11027 = vmatprep.subr.bf16.mxu0 %v11975_v12  ;;  %v5231_v3 = vpack.c.bf16 %v5105_v50, %v5087_v20  ;;  %v5250_v63 = vpack.c.bf16 %v5142_v30, %v5124_v43  ;;  %v11986_v10 = vld [vmem:[%s13332_s25 + $0x208] sm:$0xff]   ;;  %v11987_v59 = vld [vmem:[%s13332_s25 + $0x250] sm:$0xff]   ;;  %v5123_v1 = vld [vmem:[#allocation5 + $0x150] sm:$0xff] }
 0x542   : > { %v5141_v7 = vld [vmem:[#allocation5 + $0x1e0] sm:$0xff]  ;;  %v5178_v32 = vld [vmem:[#allocation5 + $0x308] sm:$0xff]  ;;  %v5160_v52 = vld [vmem:[#allocation5 + $0x278] sm:$0xff] }
 0x543   : > { %6628 = vmatmul.mubr.bf16.gmra.mrb[128].mxu0 %v5265_v26  ;;  %v11988_v56 = vld [vmem:[%s13332_s25 + $0x210] sm:$0xff]   ;;  %v5249_v53 = vpack.c.bf16 %v5141_v7, %v5123_v1  ;;  %v11989_v23 = vld [vmem:[%s13332_s25 + $0x258] sm:$0xff]   ;;  %v5268_v17 = vpack.c.bf16 %v5178_v32, %v5160_v52  ;;  %v11991_v5 = vld [vmem:[%s13332_s25 + $0x260] sm:$0xff]  }
 0x544   : > { %11028 = vmatpush3.bf16.msra.mxu0 %v11976_v2  ;;  %6635 = vmatprep.mubr.bf16.mxu0 %v5284_v19  ;;  %v11990_v37 = vld [vmem:[%s13332_s25 + $0x218] sm:$0xff]   ;;  %v5177_v49 = vld [vmem:[#allocation5 + $0x300] sm:$0xff]  ;;  %v5214_v6 = vld [vmem:[#allocation5 + $0x428] sm:$0xff] }
 0x545   : > { %11029 = vmatprep.subr.bf16.mxu0 %v11977_v33  ;;  %v5159_v40 = vld [vmem:[#allocation5 + $0x270] sm:$0xff]  ;;  %v11992_v18 = vld [vmem:[%s13332_s25 + $0x220] sm:$0xff]   ;;  %v11993_v12 = vld [vmem:[%s13332_s25 + $0x268] sm:$0xff]  }
 0x546   : > { %v5267_v13 = vpack.c.bf16 %v5177_v49, %v5159_v40  ;;  %v5196_v51 = vld [vmem:[#allocation5 + $0x398] sm:$0xff]  ;;  %v11994_v15 = vld [vmem:[%s13332_s25 + $0x228] sm:$0xff]   ;;  %v11995_v54 = vld [vmem:[%s13332_s25 + $0x270] sm:$0xff]  }
 0x547   : > { %v5286_v46 = vpack.c.bf16 %v5214_v6, %v5196_v51  ;;  %v5213_v2 = vld [vmem:[#allocation5 + $0x420] sm:$0xff]  ;;  %v5108_v26 = vld [vmem:[#allocation5 + $0xd8] sm:$0xff]  ;;  %v5195_v61 = vld [vmem:[#allocation5 + $0x390] sm:$0xff] }
 0x548   : > { %11030 = vmatpush3.bf16.msra.mxu0 %v11978_v14  ;;  %v11996_v33 = vld [vmem:[%s13332_s25 + $0x230] sm:$0xff]   ;;  %v5285_v47 = vpack.c.bf16 %v5213_v2, %v5195_v61  ;;  %v11997_v14 = vld [vmem:[%s13332_s25 + $0x278] sm:$0xff]   ;;  %v11999_v24 = vld [vmem:[%s13332_s25 + $0x2c0] sm:$0xff]  }
 0x549   : > { %11031 = vmatprep.subr.bf16.mxu0 %v11979_v60  ;;  %v5090_v19 = vld [vmem:[#allocation5 + $0x48] sm:$0xff]  ;;  %v11998_v60 = vld [vmem:[%s13332_s25 + $0x238] sm:$0xff]   ;;  %v5144_v25 = vld [vmem:[#allocation5 + $0x1f8] sm:$0xff] }
 0x54a   : > { %v5234_v8 = vpack.c.bf16 %v5108_v26, %v5090_v19  ;;  %v5107_v38 = vld [vmem:[#allocation5 + $0xd0] sm:$0xff]  ;;  %v5089_v48 = vld [vmem:[#allocation5 + $0x40] sm:$0xff]  ;;  %v12000_v58 = vld [vmem:[%s13332_s25 + $0x280] sm:$0xff]  }
 0x54b   : > { %6636 = vmatmul.mubr.bf16.gmra.mrb[132].mxu0 %v5283_v4  ;;  %v5233_v0 = vpack.c.bf16 %v5107_v38, %v5089_v48  ;;  %v5126_v11 = vld [vmem:[#allocation5 + $0x168] sm:$0xff]  ;;  %v12001_v57 = vld [vmem:[%s13332_s25 + $0x2c8] sm:$0xff]   ;;  %v5143_v35 = vld [vmem:[#allocation5 + $0x1f0] sm:$0xff] }
 0x54c   : > { %11032 = vmatpush3.bf16.msra.mxu0 %v11980_v44  ;;  %6676 = vmatprep.mubr.bf16.mxu0 %v5232_v29  ;;  %v5252_v34 = vpack.c.bf16 %v5144_v25, %v5126_v11  ;;  %v12002_v31 = vld [vmem:[%s13332_s25 + $0x288] sm:$0xff]   ;;  %v12003_v21 = vld [vmem:[%s13332_s25 + $0x2d0] sm:$0xff]   ;;  %v5180_v45 = vld [vmem:[#allocation5 + $0x318] sm:$0xff] }
 0x54d   : > { %11033 = vmatprep.subr.bf16.mxu0 %v11981_v28  ;;  %v5125_v42 = vld [vmem:[#allocation5 + $0x160] sm:$0xff]  ;;  %v12004_v39 = vld [vmem:[%s13332_s25 + $0x290] sm:$0xff]   ;;  %v12005_v9 = vld [vmem:[%s13332_s25 + $0x2d8] sm:$0xff]  }
 0x54e   : > { %v5251_v44 = vpack.c.bf16 %v5143_v35, %v5125_v42  ;;  %v5162_v4 = vld [vmem:[#allocation5 + $0x288] sm:$0xff]  ;;  %v12006_v29 = vld [vmem:[%s13332_s25 + $0x298] sm:$0xff]   ;;  %v5216_v50 = vld [vmem:[#allocation5 + $0x438] sm:$0xff] }
 0x54f   : > { %v5270_v28 = vpack.c.bf16 %v5180_v45, %v5162_v4  ;;  %v5161_v30 = vld [vmem:[#allocation5 + $0x280] sm:$0xff]  ;;  %v12008_v20 = vld [vmem:[%s13332_s25 + $0x2a0] sm:$0xff]   ;;  %v5110_v7 = vld [vmem:[#allocation5 + $0xe8] sm:$0xff] }
 0x550   : > { %11034 = vmatpush3.bf16.msra.mxu0 %v11982_v27  ;;  %v12007_v27 = vld [vmem:[%s13332_s25 + $0x2e0] sm:$0xff]   ;;  %v12009_v43 = vld [vmem:[%s13332_s25 + $0x2e8] sm:$0xff]   ;;  %v12012_v1 = vld [vmem:[%s13332_s25 + $0x2b0] sm:$0xff]  }
 0x551   : > { %11059 = vmatprep.subr.bf16.mxu0 %v11983_v16  ;;  %v5179_v16 = vld [vmem:[#allocation5 + $0x310] sm:$0xff]  ;;  %v5197_v32 = vld [vmem:[#allocation5 + $0x3a0] sm:$0xff]  ;;  %v5146_v49 = vld [vmem:[#allocation5 + $0x208] sm:$0xff] }
 0x552   : > { %v12013_v52 = vld [vmem:[%s13332_s25 + $0x2f8] sm:$0xff]   ;;  %v12016_v40 = vld [vmem:[%s13332_s25 + $0x300] sm:$0xff]   ;;  %v12017_v51 = vld [vmem:[%s13332_s25 + $0x348] sm:$0xff]  }
 0x553   : > { %6677 = vmatmul.mubr.bf16.vlgmr.msra.gmra.mrb[136].mxu0 %v5231_v3  ;;  %v5198_v3 = vld [vmem:[#allocation5 + $0x3a8] sm:$0xff]  ;;  %v5091_v6 = vld [vmem:[#allocation5 + $0x50] sm:$0xff]  ;;  %v5181_v38 = vld [vmem:[#allocation5 + $0x320] sm:$0xff] }
 0x554   : > { %11060 = vmatpush3.bf16.msra.mxu0 %v11984_v55  ;;  %6684 = vmatprep.mubr.bf16.mxu0 %v5250_v63  ;;  %v5269_v55 = vpack.c.bf16 %v5179_v16, %v5161_v30  ;;  %v12010_v63 = vld [vmem:[%s13332_s25 + $0x2a8] sm:$0xff]   ;;  %v5182_v2 = vld [vmem:[#allocation5 + $0x328] sm:$0xff]  ;;  %v5127_v26 = vld [vmem:[#allocation5 + $0x170] sm:$0xff] }
 0x555   : > { %11061 = vmatprep.subr.bf16.mxu0 %v11985_v41  ;;  %v5288_v41 = vpack.c.bf16 %v5216_v50, %v5198_v3  ;;  %v12020_v61 = vld [vmem:[%s13332_s25 + $0x310] sm:$0xff]   ;;  %v12021_v19 = vld [vmem:[%s13332_s25 + $0x358] sm:$0xff]   ;;  %v12025_v35 = vld [vmem:[%s13332_s25 + $0x368] sm:$0xff]  }
 0x556   : > { %v5218_v48 = vld [vmem:[#allocation5 + $0x448] sm:$0xff]  ;;  %v5163_v11 = vld [vmem:[#allocation5 + $0x290] sm:$0xff]  ;;  %v5217_v4 = vld [vmem:[#allocation5 + $0x440] sm:$0xff] }
 0x557   : > { %v5094_v16 = vld [vmem:[#allocation5 + $0x68] sm:$0xff]  ;;  %v12029_v50 = vld [vmem:[%s13332_s25 + $0x378] sm:$0xff]  }
 0x558   : > { %11062 = vmatpush3.bf16.msra.mxu0 %v11986_v10  ;;  %v12011_v10 = vld [vmem:[%s13332_s25 + $0x2f0] sm:$0xff]   ;;  %v5111_v3 = vld [vmem:[#allocation5 + $0xf0] sm:$0xff] }
 0x559   : > { %11063 = vmatprep.subr.bf16.mxu0 %v11987_v59  ;;  %v5215_v59 = vld [vmem:[#allocation5 + $0x430] sm:$0xff] }
 0x55b   : > { %6685 = vmatmul.mubr.bf16.gmra.mrb[140].mxu0 %v5249_v53  ;;  %v5092_v53 = vld [vmem:[#allocation5 + $0x58] sm:$0xff] }
 0x55c   : > { %11064 = vmatpush3.bf16.msra.mxu0 %v11988_v56  ;;  %6692 = vmatprep.mubr.bf16.mxu0 %v5268_v17  ;;  %v5287_v56 = vpack.c.bf16 %v5215_v59, %v5197_v32  ;;  %v12014_v17 = vld [vmem:[%s13332_s25 + $0x2b8] sm:$0xff]   ;;  %v5130_v59 = vld [vmem:[#allocation5 + $0x188] sm:$0xff] }
 0x55d   : > { %11065 = vmatprep.subr.bf16.mxu0 %v11989_v23  ;;  %v5236_v23 = vpack.c.bf16 %v5110_v7, %v5092_v53  ;;  %v12033_v7 = vld [vmem:[%s13332_s25 + $0x448] sm:$0xff]   ;;  %v5147_v53 = vld [vmem:[#allocation5 + $0x210] sm:$0xff] }
 0x560   : > { %11066 = vmatpush3.bf16.msra.mxu0 %v11990_v37  ;;  %v12015_v37 = vld [vmem:[%s13332_s25 + $0x340] sm:$0xff]  }
 0x561   : > { %11067 = vmatprep.subr.bf16.mxu0 %v11991_v5  ;;  %v5109_v5 = vld [vmem:[#allocation5 + $0xe0] sm:$0xff] }
 0x563   : > { %6693 = vmatmul.mubr.bf16.gmra.mrb[144].mxu0 %v5267_v13  ;;  %v5128_v13 = vld [vmem:[#allocation5 + $0x178] sm:$0xff] }
 0x564   : > { %11068 = vmatpush3.bf16.msra.mxu0 %v11992_v18  ;;  %6700 = vmatprep.mubr.bf16.mxu0 %v5286_v46  ;;  %v5235_v18 = vpack.c.bf16 %v5109_v5, %v5091_v6  ;;  %v12018_v46 = vld [vmem:[%s13332_s25 + $0x308] sm:$0xff]   ;;  %v12036_v5 = vld [vmem:[%s13332_s25 + $0x410] sm:$0xff]  }
 0x565   : > { %11069 = vmatprep.subr.bf16.mxu0 %v11993_v12  ;;  %v5254_v12 = vpack.c.bf16 %v5146_v49, %v5128_v13  ;;  %v12037_v13 = vld [vmem:[%s13332_s25 + $0x458] sm:$0xff]  }
 0x568   : > { %11070 = vmatpush3.bf16.msra.mxu0 %v11994_v15  ;;  %v12019_v15 = vld [vmem:[%s13332_s25 + $0x350] sm:$0xff]  }
 0x569   : > { %11071 = vmatprep.subr.bf16.mxu0 %v11995_v54  ;;  %v5145_v54 = vld [vmem:[#allocation5 + $0x200] sm:$0xff] }
 0x56b   : > { %6701 = vmatmul.mubr.bf16.gmra.mrb[148].mxu0 %v5285_v47  ;;  %v5164_v47 = vld [vmem:[#allocation5 + $0x298] sm:$0xff] }
 0x56c   : > { %11072 = vmatpush3.bf16.msra.mxu0 %v11996_v33  ;;  %6741 = vmatprep.mubr.bf16.mxu0 %v5234_v8  ;;  %v5253_v33 = vpack.c.bf16 %v5145_v54, %v5127_v26  ;;  %v12022_v8 = vld [vmem:[%s13332_s25 + $0x318] sm:$0xff]   ;;  %v12039_v54 = vld [vmem:[%s13332_s25 + $0x460] sm:$0xff]  }
 0x56d   : > { %11073 = vmatprep.subr.bf16.mxu0 %v11997_v14  ;;  %v5272_v14 = vpack.c.bf16 %v5182_v2, %v5164_v47  ;;  %v5183_v2 = vld [vmem:[#allocation5 + $0x330] sm:$0xff]  ;;  %v12040_v47 = vld [vmem:[%s13332_s25 + $0x420] sm:$0xff]  }
 0x570   : > { %11074 = vmatpush3.bf16.msra.mxu0 %v11998_v60  ;;  %v12023_v60 = vld [vmem:[%s13332_s25 + $0x360] sm:$0xff]  }
 0x571   : > { %11099 = vmatprep.subr.bf16.mxu0 %v11999_v24 }
 0x573   : > { %6742 = vmatmul.mubr.bf16.vlgmr.msra.gmra.mrb[152].mxu0 %v5233_v0 }
 0x574   : > { %11100 = vmatpush3.bf16.msra.mxu0 %v12000_v58  ;;  %6749 = vmatprep.mubr.bf16.mxu0 %v5252_v34 }
 0x575   : > { %11101 = vmatprep.subr.bf16.mxu0 %v12001_v57  ;;  %v12024_v57 = vld [vmem:[%s13332_s25 + $0x320] sm:$0xff]  }
 0x578   : > { %11102 = vmatpush3.bf16.msra.mxu0 %v12002_v31  ;;  %v5271_v31 = vpack.c.bf16 %v5181_v38, %v5163_v11  ;;  %v12041_v38 = vld [vmem:[%s13332_s25 + $0x468] sm:$0xff]  }
 0x579   : > { %11103 = vmatprep.subr.bf16.mxu0 %v12003_v21  ;;  %v5200_v21 = vld [vmem:[#allocation5 + $0x3b8] sm:$0xff]  ;;  %v12042_v11 = vld [vmem:[%s13332_s25 + $0x428] sm:$0xff]  }
 0x57a   : > { %v5290_v42 = vpack.c.bf16 %v5218_v48, %v5200_v21 }
 0x57b   : > { %6750 = vmatmul.mubr.bf16.gmra.mrb[156].mxu0 %v5251_v44  ;;  %v12027_v44 = vld [vmem:[%s13332_s25 + $0x370] sm:$0xff]  }
 0x57c   : > { %11104 = vmatpush3.bf16.msra.mxu0 %v12004_v39  ;;  %6757 = vmatprep.mubr.bf16.mxu0 %v5270_v28  ;;  %v12026_v39 = vld [vmem:[%s13332_s25 + $0x328] sm:$0xff]   ;;  %v5199_v28 = vld [vmem:[#allocation5 + $0x3b0] sm:$0xff] }
 0x57d   : > { %11105 = vmatprep.subr.bf16.mxu0 %v12005_v9  ;;  %v5112_v9 = vld [vmem:[#allocation5 + $0xf8] sm:$0xff] }
 0x57e   : > { %v5238_v30 = vpack.c.bf16 %v5112_v9, %v5094_v16 }
 0x580   : > { %11106 = vmatpush3.bf16.msra.mxu0 %v12006_v29  ;;  %v12028_v29 = vld [vmem:[%s13332_s25 + $0x330] sm:$0xff]  }
 0x581   : > { %11107 = vmatprep.subr.bf16.mxu0 %v12007_v27  ;;  %v10915_v24 = vpop.f32.mrb[88].mxu0  ;;  %v5289_v27 = vpack.c.bf16 %v5217_v4, %v5199_v28  ;;  %v12044_v4 = vld [vmem:[%s13332_s25 + $0x430] sm:$0xff]  }
 0x582   : > { %v10916_v25 = vpop.f32.mrb[89].mxu0 }
 0x583   : > { %6758 = vmatmul.mubr.bf16.gmra.mrb[160].mxu0 %v5269_v55  ;;  %v14690_v58 = vadd.f32 %v10916_v25, %v10915_v24  ;;  %v10918_v0 = vpop.f32.mrb[90].mxu0  ;;  %v12031_v55 = vld [vmem:[%s13332_s25 + $0x440] sm:$0xff]  }
 0x584   : > { %11108 = vmatpush3.bf16.msra.mxu0 %v12008_v20  ;;  %6765 = vmatprep.mubr.bf16.mxu0 %v5288_v41  ;;  %v10919_v34 = vpop.f32.mrb[91].mxu0  ;;  %v12030_v20 = vld [vmem:[%s13332_s25 + $0x338] sm:$0xff]   ;;  %v5093_v41 = vld [vmem:[#allocation5 + $0x60] sm:$0xff] }
 0x585   : > { %11109 = vmatprep.subr.bf16.mxu0 %v12009_v43  ;;  %v14694_v45 = vadd.f32 %v10919_v34, %v10918_v0  ;;  %v5148_v43 = vld [vmem:[#allocation5 + $0x218] sm:$0xff] }
 0x586   : > { %v5256_v32 = vpack.c.bf16 %v5148_v43, %v5130_v59 }
 0x588   : > { %11110 = vmatpush3.bf16.msra.mxu0 %v12010_v63  ;;  %v12032_v63 = vld [vmem:[%s13332_s25 + $0x400] sm:$0xff]  }
 0x589   : > { %11111 = vmatprep.subr.bf16.mxu0 %v12011_v10  ;;  %v5237_v10 = vpack.c.bf16 %v5111_v3, %v5093_v41  ;;  %v5097_v3 = vld [vmem:[#allocation5 + $0x80] sm:$0xff]  ;;  %v5134_v41 = vld [vmem:[#allocation5 + $0x1a8] sm:$0xff] }
 0x58b   : > { %6766 = vmatmul.mubr.bf16.gmra.mrb[164].mxu0 %v5287_v56  ;;  %v12035_v56 = vld [vmem:[%s13332_s25 + $0x450] sm:$0xff]  }
 0x58c   : > { %11112 = vmatpush3.bf16.msra.mxu0 %v12012_v1  ;;  %6806 = vmatprep.mubr.bf16.mxu0 %v5236_v23  ;;  %v12034_v1 = vld [vmem:[%s13332_s25 + $0x408] sm:$0xff]   ;;  %v5184_v23 = vld [vmem:[#allocation5 + $0x338] sm:$0xff] }
 0x58d   : > { %11113 = vmatprep.subr.bf16.mxu0 %v12013_v52 }
 0x590   : > { %11114 = vmatpush3.bf16.msra.mxu0 %v12014_v17 }
 0x591   : > { %11139 = vmatprep.subr.bf16.mxu0 %v12015_v37  ;;  %v5129_v37 = vld [vmem:[#allocation5 + $0x180] sm:$0xff] }
 0x593   : > { %6807 = vmatmul.mubr.bf16.vlgmr.msra.gmra.mrb[168].mxu0 %v5235_v18  ;;  %v5166_v18 = vld [vmem:[#allocation5 + $0x2a8] sm:$0xff] }
 0x594   : > { %11140 = vmatpush3.bf16.msra.mxu0 %v12016_v40  ;;  %6814 = vmatprep.mubr.bf16.mxu0 %v5254_v12  ;;  %v5255_v40 = vpack.c.bf16 %v5147_v53, %v5129_v37  ;;  %v5274_v12 = vpack.c.bf16 %v5184_v23, %v5166_v18 }
 0x595   : > { %11141 = vmatprep.subr.bf16.mxu0 %v12017_v51 }
 0x598   : > { %11142 = vmatpush3.bf16.msra.mxu0 %v12018_v46 }
 0x599   : > { %11143 = vmatprep.subr.bf16.mxu0 %v12019_v15  ;;  %v12038_v15 = vld [vmem:[%s13332_s25 + $0x418] sm:$0xff]  }
 0x59b   : > { %6815 = vmatmul.mubr.bf16.gmra.mrb[172].mxu0 %v5253_v33  ;;  %v5165_v33 = vld [vmem:[#allocation5 + $0x2a0] sm:$0xff] }
 0x59c   : > { %11144 = vmatpush3.bf16.msra.mxu0 %v12020_v61  ;;  %6822 = vmatprep.mubr.bf16.mxu0 %v5272_v14  ;;  %v5220_v61 = vld [vmem:[#allocation5 + $0x458] sm:$0xff]  ;;  %v5273_v14 = vpack.c.bf16 %v5183_v2, %v5165_v33 }
 0x59d   : > { %11145 = vmatprep.subr.bf16.mxu0 %v12021_v19 }
 0x59e   : > { %v11195_v52 = vpop.f32.mrb[32].mxu1 }
 0x59f   : > { %v11196_v17 = vpop.f32.mrb[33].mxu1 }
 0x5a0   : > { %11146 = vmatpush3.bf16.msra.mxu0 %v12022_v8  ;;  %v14707_v49 = vadd.f32 %v11196_v17, %v11195_v52  ;;  %v11198_v6 = vpop.f32.mrb[34].mxu1  ;;  %v5202_v8 = vld [vmem:[#allocation5 + $0x3c8] sm:$0xff]  ;;  %v5188_v17 = vld [vmem:[#allocation5 + $0x358] sm:$0xff] }
 0x5a1   : > { %11147 = vmatprep.subr.bf16.mxu0 %v12023_v60  ;;  %v11199_v51 = vpop.f32.mrb[35].mxu1  ;;  %v5292_v25 = vpack.c.bf16 %v5220_v61, %v5202_v8  ;;  %v5224_v61 = vld [vmem:[#allocation5 + $0x478] sm:$0xff] }
 0x5a2   : > { %v14710_v46 = vadd.f32 %v11199_v51, %v11198_v6  ;;  %v5133_v6 = vld [vmem:[#allocation5 + $0x1a0] sm:$0xff]  ;;  %v5170_v51 = vld [vmem:[#allocation5 + $0x2c8] sm:$0xff] }
 0x5a3   : > { %6823 = vmatmul.mubr.bf16.gmra.mrb[176].mxu0 %v5271_v31  ;;  %v5219_v31 = vld [vmem:[#allocation5 + $0x450] sm:$0xff] }
 0x5a4   : > { %11148 = vmatpush3.bf16.msra.mxu0 %v12024_v57  ;;  %6830 = vmatprep.mubr.bf16.mxu0 %v5290_v42  ;;  %v12043_v57 = vld [vmem:[%s13332_s25 + $0x470] sm:$0xff]  }
 0x5a5   : > { %11149 = vmatprep.subr.bf16.mxu0 %v12025_v35  ;;  %v5116_v35 = vld [vmem:[#allocation5 + $0x118] sm:$0xff] }
 0x5a6   : > { %v11201_v26 = vpop.f32.mrb[36].mxu1 }
 0x5a7   : > { %v11202_v19 = vpop.f32.mrb[37].mxu1 }
 0x5a8   : > { %11150 = vmatpush3.bf16.msra.mxu0 %v12026_v39  ;;  %v14715_v60 = vadd.f32 %v11202_v19, %v11201_v26  ;;  %v11204_v24 = vpop.f32.mrb[38].mxu1  ;;  %v5169_v19 = vld [vmem:[#allocation5 + $0x2c0] sm:$0xff] }
 0x5a9   : > { %11151 = vmatprep.subr.bf16.mxu0 %v12027_v44  ;;  %v11205_v48 = vpop.f32.mrb[39].mxu1  ;;  %v5201_v44 = vld [vmem:[#allocation5 + $0x3c0] sm:$0xff] }
 0x5aa   : > { %v14718_v0 = vadd.f32 %v11205_v48, %v11204_v24  ;;  %v5291_v28 = vpack.c.bf16 %v5219_v31, %v5201_v44 }
 0x5ab   : > { %6831 = vmatmul.mubr.bf16.gmra.mrb[180].mxu0 %v5289_v27  ;;  %v12045_v27 = vld [vmem:[%s13332_s25 + $0x478] sm:$0xff]  }
 0x5ac   : > { %11152 = vmatpush3.bf16.msra.mxu0 %v12028_v29  ;;  %6871 = vmatprep.mubr.bf16.mxu0 %v5238_v30  ;;  %v5098_v29 = vld [vmem:[#allocation5 + $0x88] sm:$0xff]  ;;  %v12046_v30 = vld [vmem:[%s13332_s25 + $0x438] sm:$0xff]  }
 0x5ad   : > { %11153 = vmatprep.subr.bf16.mxu0 %v12029_v50  ;;  %v5242_v50 = vpack.c.bf16 %v5116_v35, %v5098_v29  ;;  %v5223_v35 = vld [vmem:[#allocation5 + $0x470] sm:$0xff] }
 0x5af   : > { %v10921_v34 = vpop.f32.mrb[92].mxu0 }
 0x5b0   : > { %11154 = vmatpush3.bf16.msra.mxu0 %v12030_v20  ;;  %v10922_v21 = vpop.f32.mrb[93].mxu0  ;;  %v5115_v20 = vld [vmem:[#allocation5 + $0x110] sm:$0xff] }
 0x5b1   : > { %11219 = vmatprep.subr.bf16.mxu0 %v12031_v55  ;;  %v14722_v42 = vadd.f32 %v10922_v21, %v10921_v34  ;;  %v10924_v39 = vpop.f32.mrb[94].mxu0  ;;  %v5152_v55 = vld [vmem:[#allocation5 + $0x238] sm:$0xff]  ;;  %v5241_v43 = vpack.c.bf16 %v5115_v20, %v5097_v3 }
 0x5b2   : > { %v10925_v9 = vpop.f32.mrb[95].mxu0 }
 0x5b3   : > { %6872 = vmatmul.mubr.bf16.vlgmr.msra.gmra.mrb[184].mxu0 %v5237_v10  ;;  %v14726_v16 = vadd.f32 %v10925_v9, %v10924_v39  ;;  %v5205_v9 = vld [vmem:[#allocation5 + $0x3e0] sm:$0xff] }
 0x5b4   : > { %11220 = vmatpush3.bf16.msra.mxu0 %v12032_v63  ;;  %6879 = vmatprep.mubr.bf16.mxu0 %v5256_v32  ;;  %v5260_v63 = vpack.c.bf16 %v5152_v55, %v5134_v41  ;;  %v5295_v29 = vpack.c.bf16 %v5223_v35, %v5205_v9 }
 0x5b5   : > { %11221 = vmatprep.subr.bf16.mxu0 %v12033_v7 }
 0x5b8   : > { %11222 = vmatpush3.bf16.msra.mxu0 %v12034_v1  ;;  %v5151_v1 = vld [vmem:[#allocation5 + $0x230] sm:$0xff] }
 0x5b9   : > { %11223 = vmatprep.subr.bf16.mxu0 %v12035_v56 }
 0x5bb   : > { %6880 = vmatmul.mubr.bf16.gmra.mrb[188].mxu0 %v5255_v40 }
 0x5bc   : > { %11224 = vmatpush3.bf16.msra.mxu0 %v12036_v5  ;;  %6887 = vmatprep.mubr.bf16.mxu0 %v5274_v12  ;;  %v5278_v12 = vpack.c.bf16 %v5188_v17, %v5170_v51 }
 0x5bd   : > { %11225 = vmatprep.subr.bf16.mxu0 %v12037_v13  ;;  %v5259_v13 = vpack.c.bf16 %v5151_v1, %v5133_v6 }
 0x5c0   : > { %11226 = vmatpush3.bf16.msra.mxu0 %v12038_v15 }
 0x5c1   : > { %11227 = vmatprep.subr.bf16.mxu0 %v12039_v54  ;;  %v5187_v54 = vld [vmem:[#allocation5 + $0x350] sm:$0xff] }
 0x5c2   : > { %v5277_v24 = vpack.c.bf16 %v5187_v54, %v5169_v19 }
 0x5c3   : > { %6888 = vmatmul.mubr.bf16.gmra.mrb[192].mxu0 %v5273_v14 }
 0x5c4   : > { %11228 = vmatpush3.bf16.msra.mxu0 %v12040_v47  ;;  %6895 = vmatprep.mubr.bf16.mxu0 %v5292_v25  ;;  %v5206_v25 = vld [vmem:[#allocation5 + $0x3e8] sm:$0xff] }
 0x5c5   : > { %11229 = vmatprep.subr.bf16.mxu0 %v12041_v38 }
 0x5c8   : > { %11230 = vmatpush3.bf16.msra.mxu0 %v12042_v11 }
 0x5c9   : > { %11231 = vmatprep.subr.bf16.mxu0 %v12043_v57  ;;  %v5296_v57 = vpack.c.bf16 %v5224_v61, %v5206_v25 }
 0x5cb   : > { %6896 = vmatmul.mubr.bf16.gmra.mrb[196].mxu0 %v5291_v28  ;;  %v11207_v59 = vpop.f32.mrb[40].mxu1 }
 0x5cc   : > { %11232 = vmatpush3.bf16.msra.mxu0 %v12044_v4  ;;  %7001 = vmatprep.mubr.bf16.mxu0 %v5242_v50  ;;  %v10927_v10 = vpop.f32.mrb[96].mxu0  ;;  %v11208_v32 = vpop.f32.mrb[41].mxu1 }
 0x5cd   : > { %11233 = vmatprep.subr.bf16.mxu0 %v12045_v27  ;;  %v10928_v7 = vpop.f32.mrb[97].mxu0  ;;  %v14729_v52 = vadd.f32 %v11208_v32, %v11207_v59  ;;  %v11210_v23 = vpop.f32.mrb[42].mxu1 }
 0x5ce   : > { %v10929_v56 = vadd.f32 %v10928_v7, %v10927_v10  ;;  %v10930_v53 = vpop.f32.mrb[98].mxu0  ;;  %v11211_v5 = vpop.f32.mrb[43].mxu1 }
 0x5cf   : > { %v10931_v37 = vpop.f32.mrb[99].mxu0  ;;  %v14731_v18 = vadd.f32 %v11211_v5, %v11210_v23 }
 0x5d0   : > { %11234 = vmatpush3.bf16.msra.mxu0 %v12046_v30  ;;  %v10932_v40 = vadd.f32 %v10931_v37, %v10930_v53 }
 0x5d3   : > { %7002 = vmatmul.mubr.bf16.vlgmr.msra.gmra.mrb[200].mxu0 %v5241_v43 }
 0x5d4   : > { %7009 = vmatprep.mubr.bf16.mxu0 %v5260_v63 }
 0x5db   : > { %7010 = vmatmul.mubr.bf16.gmra.mrb[204].mxu0 %v5259_v13 }
 0x5dc   : > { %7017 = vmatprep.mubr.bf16.mxu0 %v5278_v12 }
 0x5de   : > { %v10933_v15 = vpop.f32.mrb[100].mxu0 }
 0x5df   : > { %v10934_v2 = vpop.f32.mrb[101].mxu0  ;;  %v11213_v26 = vpop.f32.mrb[44].mxu1 }
 0x5e0   : > { %v10935_v33 = vadd.f32 %v10934_v2, %v10933_v15  ;;  %v10936_v47 = vpop.f32.mrb[102].mxu0  ;;  %v11214_v14 = vpop.f32.mrb[45].mxu1 }
 0x5e1   : > { %v10937_v8 = vpop.f32.mrb[103].mxu0  ;;  %v14733_v38 = vadd.f32 %v11214_v14, %v11213_v26  ;;  %v11216_v48 = vpop.f32.mrb[46].mxu1 }
 0x5e2   : > { %v10938_v11 = vadd.f32 %v10937_v8, %v10936_v47  ;;  %v11217_v34 = vpop.f32.mrb[47].mxu1 }
 0x5e3   : > { %7018 = vmatmul.mubr.bf16.gmra.mrb[208].mxu0 %v5277_v24  ;;  %v14735_v31 = vadd.f32 %v11217_v34, %v11216_v48 }
 0x5e4   : > { %7025 = vmatprep.mubr.bf16.mxu0 %v5296_v57 }
 0x5e6   : > { %v10955_v21 = vpop.f32.mrb[104].mxu0 }
 0x5e7   : > { %v10956_v39 = vpop.f32.mrb[105].mxu0 }
 0x5e8   : > { %v10957_v44 = vadd.f32 %v10956_v39, %v10955_v21  ;;  %v10958_v4 = vpop.f32.mrb[106].mxu0 }
 0x5e9   : > { %v10959_v28 = vpop.f32.mrb[107].mxu0 }
 0x5ea   : > { %v6549_v27 = vadd.f32 %v10957_v44, %v14690_v58  ;;  %v10960_v50 = vadd.f32 %v10959_v28, %v10958_v4  ;;  %v12047_v28 = vld [vmem:[%s15867_s28 + $0x80] ss:$8 sps:$4 sm:$0xff]  }
 0x5eb   : > { %7026 = vmatmul.mubr.bf16.gmra.mrb[212].mxu0 %v5295_v29  ;;  %v12049_v29 = vld [vmem:[%s15868_s29 + $0x84] ss:$8 sps:$4 sm:$0xff]  }
 0x5ec   : > { %v6552_v30 = vadd.f32 %v10960_v50, %v14694_v45  ;;  %7370 = vmatprep.mubr.bf16.mxu0 %v15866_v62  ;;  %v12052_v50 = vld [vmem:[%s15868_s29 + $0x4] ss:$8 sps:$4 sm:$0xff]   ;;  %7213 = vmatprep.subr.bf16.mxu1 %v12049_v29  ;;  %v12077_v29 = vld [vmem:[%s15868_s29 + $0xd0] ss:$8 sps:$4 sm:$0xff]  }
 0x5ed   : > { %7214 = vmatpush1.bf16.msra.mxu1 %v12047_v28  ;;  %7338 = vmatprep.subr.bf16.mxu0 %v12052_v50 }
 0x5ee   : > { %v10961_v20 = vpop.f32.mrb[108].mxu0 }
 0x5ef   : > { %v10962_v55 = vpop.f32.mrb[109].mxu0 }
 0x5f0   : > { %v10963_v3 = vadd.f32 %v10962_v55, %v10961_v20  ;;  %v10964_v43 = vpop.f32.mrb[110].mxu0 }
 0x5f1   : > { %v10965_v41 = vpop.f32.mrb[111].mxu0 }
 0x5f2   : > { %v6557_v63 = vadd.f32 %v10963_v3, %v14722_v42  ;;  %v10966_v10 = vadd.f32 %v10965_v41, %v10964_v43 }
 0x5f4   : > { %v6560_v59 = vadd.f32 %v10966_v10, %v14726_v16  ;;  %v12053_v10 = vld [vmem:[%s15868_s29 + $0x90] ss:$8 sps:$4 sm:$0xff]  }
 0x5f6   : > { %v10967_v7 = vpop.f32.mrb[112].mxu0 }
 0x5f7   : > { %v10968_v32 = vpop.f32.mrb[113].mxu0 }
 0x5f8   : > { %v10969_v1 = vadd.f32 %v10968_v32, %v10967_v7  ;;  %v10970_v58 = vpop.f32.mrb[114].mxu0  ;;  %v12056_v32 = vld [vmem:[%s15868_s29 + $0x10] ss:$8 sps:$4 sm:$0xff]  }
 0x5f9   : > { %v10971_v53 = vpop.f32.mrb[115].mxu0 }
 0x5fa   : > { %v6565_v23 = vadd.f32 %v10969_v1, %v10929_v56  ;;  %v10972_v17 = vadd.f32 %v10971_v53, %v10970_v58  ;;  %v12058_v1 = vld [vmem:[%s15868_s29 + $0x14] ss:$8 sps:$4 sm:$0xff]   ;;  %v12059_v58 = vld [vmem:[%s15868_s29 + $0xa0] ss:$8 sps:$4 sm:$0xff]   ;;  %v12061_v53 = vld [vmem:[%s15868_s29 + $0xa4] ss:$8 sps:$4 sm:$0xff]  }
 0x5fc   : > { %v6568_v45 = vadd.f32 %v10972_v17, %v10932_v40 }
 0x5fe   : > { %v10973_v37 = vpop.f32.mrb[116].mxu0 }
 0x5ff   : > { %v10974_v5 = vpop.f32.mrb[117].mxu0 }
 0x600   : > { %v10975_v6 = vadd.f32 %v10974_v5, %v10973_v37  ;;  %v10976_v13 = vpop.f32.mrb[118].mxu0  ;;  %v12062_v37 = vld [vmem:[%s15868_s29 + $0x20] ss:$8 sps:$4 sm:$0xff]  }
 0x601   : > { %v10977_v51 = vpop.f32.mrb[119].mxu0 }
 0x602   : > { %v6573_v12 = vadd.f32 %v10975_v6, %v10935_v33  ;;  %v10978_v15 = vadd.f32 %v10977_v51, %v10976_v13 }
 0x604   : > { %v6576_v54 = vadd.f32 %v10978_v15, %v10938_v11 }
 0x606   : > { %v10995_v42 = vpop.f32.mrb[120].mxu0 }
 0x607   : > { %v10996_v2 = vpop.f32.mrb[121].mxu0 }
 0x608   : > { %v10997_v26 = vadd.f32 %v10996_v2, %v10995_v42  ;;  %v10998_v16 = vpop.f32.mrb[122].mxu0 }
 0x609   : > { %v10999_v61 = vpop.f32.mrb[123].mxu0 }
 0x60a   : > { %v6614_v47 = vadd.f32 %v10997_v26, %v6549_v27  ;;  %v11000_v19 = vadd.f32 %v10999_v61, %v10998_v16  ;;  %v12050_v27 = vld [vmem:[%s15868_s29] ss:$8 sps:$4 sm:$0xff]  }
 0x60b   : > { %7339 = vmatpush1.bf16.msra.mxu0 %v12050_v27 }
 0x60c   : > { %v6617_v14 = vadd.f32 %v11000_v19, %v6552_v30  ;;  %7340 = vmatprep.subr.bf16.mxu0 %v12058_v1  ;;  %v12086_v1 = vld [vmem:[%s15868_s29 + $0x60] ss:$8 sps:$4 sm:$0xff]  }
 0x60e   : > { %v11001_v8 = vpop.f32.mrb[124].mxu0 }
 0x60f   : > { %v11002_v56 = vpop.f32.mrb[125].mxu0  ;;  %7341 = vmatpush1.bf16.msra.mxu0 %v12056_v32  ;;  %v12088_v32 = vld [vmem:[%s15868_s29 + $0x64] ss:$8 sps:$4 sm:$0xff]  }
 0x610   : > { %v11003_v24 = vadd.f32 %v11002_v56, %v11001_v8  ;;  %v11004_v40 = vpop.f32.mrb[126].mxu0  ;;  %v12065_v56 = vld [vmem:[%s15868_s29 + $0xb0] ss:$8 sps:$4 sm:$0xff]  }
 0x611   : > { %v11005_v25 = vpop.f32.mrb[127].mxu0 }
 0x612   : > { %v6622_v48 = vadd.f32 %v11003_v24, %v6557_v63  ;;  %v11006_v57 = vadd.f32 %v11005_v25, %v11004_v40  ;;  %v12068_v40 = vld [vmem:[%s15868_s29 + $0x30] ss:$8 sps:$4 sm:$0xff]   ;;  %v12070_v25 = vld [vmem:[%s15868_s29 + $0x34] ss:$8 sps:$4 sm:$0xff]  }
 0x614   : > { %v6625_v34 = vadd.f32 %v11006_v57, %v6560_v59  ;;  %v12055_v59 = vld [vmem:[%s15868_s29 + $0x94] ss:$8 sps:$4 sm:$0xff]  }
 0x615   : > { %7215 = vmatprep.subr.bf16.mxu1 %v12055_v59 }
 0x616   : > { %v11007_v21 = vpop.f32.mrb[128].mxu0  ;;  %7216 = vmatpush1.bf16.msra.mxu1 %v12053_v10 }
 0x617   : > { %v11008_v33 = vpop.f32.mrb[129].mxu0  ;;  %7217 = vmatprep.subr.bf16.mxu1 %v12061_v53  ;;  %v12091_v53 = vld [vmem:[%s15868_s29 + $0xf4] ss:$8 sps:$4 sm:$0xff]  }
 0x618   : > { %v11009_v35 = vadd.f32 %v11008_v33, %v11007_v21  ;;  %v11010_v11 = vpop.f32.mrb[130].mxu0  ;;  %v12073_v21 = vld [vmem:[%s15868_s29 + $0xc4] ss:$8 sps:$4 sm:$0xff]  }
 0x619   : > { %v11011_v39 = vpop.f32.mrb[131].mxu0 }
 0x61a   : > { %v14742_v44 = vadd.f32 %v11009_v35, %v6565_v23  ;;  %v11012_v4 = vadd.f32 %v11011_v39, %v11010_v11  ;;  %v12064_v23 = vld [vmem:[%s15868_s29 + $0x24] ss:$8 sps:$4 sm:$0xff]   ;;  %7218 = vmatpush1.bf16.msra.mxu1 %v12059_v58 }
 0x61b   : > { %7342 = vmatprep.subr.bf16.mxu0 %v12064_v23  ;;  %v12076_v35 = vld [vmem:[%s15868_s29 + $0x44] ss:$8 sps:$4 sm:$0xff]  }
 0x61c   : > { %v14744_v9 = vadd.f32 %v11012_v4, %v6568_v45  ;;  %7343 = vmatpush1.bf16.msra.mxu0 %v12062_v37  ;;  %v12074_v4 = vld [vmem:[%s15868_s29 + $0x40] ss:$8 sps:$4 sm:$0xff]  }
 0x61d   : > { %7344 = vmatprep.subr.bf16.mxu0 %v12070_v25 }
 0x61e   : > { %v11013_v30 = vpop.f32.mrb[132].mxu0 }
 0x61f   : > { %v11014_v20 = vpop.f32.mrb[133].mxu0 }
 0x620   : > { %v11015_v55 = vadd.f32 %v11014_v20, %v11013_v30  ;;  %v11016_v3 = vpop.f32.mrb[134].mxu0  ;;  %7345 = vmatpush1.bf16.msra.mxu0 %v12068_v40 }
 0x621   : > { %v11017_v43 = vpop.f32.mrb[135].mxu0  ;;  %7346 = vmatprep.subr.bf16.mxu0 %v12076_v35 }
 0x622   : > { %v14758_v41 = vadd.f32 %v11015_v55, %v6573_v12  ;;  %v11018_v63 = vadd.f32 %v11017_v43, %v11016_v3  ;;  %v12082_v55 = vld [vmem:[%s15868_s29 + $0x54] ss:$8 sps:$4 sm:$0xff]   ;;  %v12083_v43 = vld [vmem:[%s15868_s29 + $0xe0] ss:$8 sps:$4 sm:$0xff]  }
 0x624   : > { %v14766_v7 = vadd.f32 %v11018_v63, %v6576_v54  ;;  %7347 = vmatpush1.bf16.msra.mxu0 %v12074_v4  ;;  %v12085_v63 = vld [vmem:[%s15868_s29 + $0xe4] ss:$8 sps:$4 sm:$0xff]  }
 0x625   : > { %7348 = vmatprep.subr.bf16.mxu0 %v12082_v55 }
 0x626   : > { %v11035_v17 = vpop.f32.mrb[136].mxu0 }
 0x627   : > { %v11036_v45 = vpop.f32.mrb[137].mxu0 }
 0x628   : > { %v11037_v5 = vadd.f32 %v11036_v45, %v11035_v17  ;;  %v11038_v6 = vpop.f32.mrb[138].mxu0  ;;  %v12092_v45 = vld [vmem:[%s15868_s29 + $0x70] ss:$8 sps:$4 sm:$0xff]  }
 0x629   : > { %v11039_v13 = vpop.f32.mrb[139].mxu0 }
 0x62a   : > { %v14786_v51 = vadd.f32 %v11037_v5, %v6614_v47  ;;  %v11040_v12 = vadd.f32 %v11039_v13, %v11038_v6  ;;  %v12067_v47 = vld [vmem:[%s15868_s29 + $0xb4] ss:$8 sps:$4 sm:$0xff]   ;;  %v12097_v6 = vld [vmem:[%s15868_s29 + $0x104] ss:$8 sps:$4 sm:$0xff]  }
 0x62b   : > { %7219 = vmatprep.subr.bf16.mxu1 %v12067_v47 }
 0x62c   : > { %v14788_v15 = vadd.f32 %v11040_v12, %v6617_v14  ;;  %7220 = vmatpush1.bf16.msra.mxu1 %v12065_v56  ;;  %v12100_v12 = vld [vmem:[%s15868_s29 + $0x184] ss:$8 sps:$4 sm:$0xff]  }
 0x62d   : > { %7221 = vmatprep.subr.bf16.mxu1 %v12073_v21 }
 0x62e   : > { %v11041_v54 = vpop.f32.mrb[140].mxu0 }
 0x62f   : > { %v11042_v42 = vpop.f32.mrb[141].mxu0 }
 0x630   : > { %v11043_v2 = vadd.f32 %v11042_v42, %v11041_v54  ;;  %v11044_v26 = vpop.f32.mrb[142].mxu0 }
 0x631   : > { %v11045_v16 = vpop.f32.mrb[143].mxu0 }
 0x632   : > { %v14790_v61 = vadd.f32 %v11043_v2, %v6622_v48  ;;  %v11046_v19 = vadd.f32 %v11045_v16, %v11044_v26 }
 0x634   : > { %v14792_v8 = vadd.f32 %v11046_v19, %v6625_v34  ;;  %v12071_v34 = vld [vmem:[%s15868_s29 + $0xc0] ss:$8 sps:$4 sm:$0xff]  }
 0x635   : > { %7222 = vmatpush1.bf16.msra.mxu1 %v12071_v34 }
 0x636   : > { %v11047_v14 = vpop.f32.mrb[144].mxu0 }
 0x637   : > { %v11048_v24 = vpop.f32.mrb[145].mxu0 }
 0x638   : > { %v11049_v48 = vadd.f32 %v11048_v24, %v11047_v14  ;;  %v11050_v57 = vpop.f32.mrb[146].mxu0 }
 0x639   : > { %v11051_v33 = vpop.f32.mrb[147].mxu0 }
 0x63a   : > { %v14816_v11 = vadd.f32 %v11049_v48, %v14742_v44  ;;  %v11052_v39 = vadd.f32 %v11051_v33, %v11050_v57  ;;  %v12079_v44 = vld [vmem:[%s15868_s29 + $0xd4] ss:$8 sps:$4 sm:$0xff]  }
 0x63b   : > { %7223 = vmatprep.subr.bf16.mxu1 %v12079_v44 }
 0x63c   : > { %v6698_v28 = vadd.f32 %v11052_v39, %v14744_v9  ;;  %7224 = vmatpush1.bf16.msra.mxu1 %v12077_v29  ;;  %v12080_v9 = vld [vmem:[%s15868_s29 + $0x50] ss:$8 sps:$4 sm:$0xff]  }
 0x63d   : > { %7349 = vmatpush1.bf16.msra.mxu0 %v12080_v9  ;;  %7225 = vmatprep.subr.bf16.mxu1 %v12085_v63 }
 0x63e   : > { %v11053_v27 = vpop.f32.mrb[148].mxu0  ;;  %7350 = vmatprep.subr.bf16.mxu0 %v12088_v32 }
 0x63f   : > { %v11054_v50 = vpop.f32.mrb[149].mxu0 }
 0x640   : > { %v11055_v30 = vadd.f32 %v11054_v50, %v11053_v27  ;;  %v11056_v20 = vpop.f32.mrb[150].mxu0  ;;  %7226 = vmatpush1.bf16.msra.mxu1 %v12083_v43 }
 0x641   : > { %v11057_v3 = vpop.f32.mrb[151].mxu0  ;;  %7351 = vmatpush1.bf16.msra.mxu0 %v12086_v1  ;;  %7227 = vmatprep.subr.bf16.mxu1 %v12091_v53 }
 0x642   : > { %v6703_v10 = vadd.f32 %v11055_v30, %v14758_v41  ;;  %v11058_v59 = vadd.f32 %v11057_v3, %v11056_v20  ;;  %v12089_v41 = vld [vmem:[%s15868_s29 + $0xf0] ss:$8 sps:$4 sm:$0xff]  }
 0x644   : > { %v6706_v58 = vadd.f32 %v11058_v59, %v14766_v7  ;;  %v12094_v7 = vld [vmem:[%s15868_s29 + $0x74] ss:$8 sps:$4 sm:$0xff]   ;;  %7228 = vmatpush1.bf16.msra.mxu1 %v12089_v41 }
 0x645   : > { %7352 = vmatprep.subr.bf16.mxu0 %v12094_v7  ;;  %7481 = vmatprep.subr.bf16.mxu1 %v12097_v6 }
 0x646   : > { %v11075_v23 = vpop.f32.mrb[152].mxu0  ;;  %7353 = vmatpush1.bf16.msra.mxu0 %v12092_v45 }
 0x647   : > { %v11076_v17 = vpop.f32.mrb[153].mxu0  ;;  %7626 = vmatprep.subr.bf16.mxu0 %v12100_v12 }
 0x648   : > { %v11077_v37 = vadd.f32 %v11076_v17, %v11075_v23  ;;  %v11078_v5 = vpop.f32.mrb[154].mxu0 }
 0x649   : > { %v11079_v13 = vpop.f32.mrb[155].mxu0 }
 0x64a   : > { %v6744_v54 = vadd.f32 %v11077_v37, %v14786_v51  ;;  %v11080_v42 = vadd.f32 %v11079_v13, %v11078_v5 }
 0x64c   : > { %v6747_v2 = vadd.f32 %v11080_v42, %v14788_v15 }
 0x64e   : > { %v11081_v26 = vpop.f32.mrb[156].mxu0 }
 0x64f   : > { %v11082_v16 = vpop.f32.mrb[157].mxu0 }
 0x650   : > { %v11083_v19 = vadd.f32 %v11082_v16, %v11081_v26  ;;  %v11084_v56 = vpop.f32.mrb[158].mxu0 }
 0x651   : > { %v11085_v47 = vpop.f32.mrb[159].mxu0 }
 0x652   : > { %v6752_v14 = vadd.f32 %v11083_v19, %v14790_v61  ;;  %v11086_v24 = vadd.f32 %v11085_v47, %v11084_v56 }
 0x654   : > { %v6755_v40 = vadd.f32 %v11086_v24, %v14792_v8 }
 0x656   : > { %v11087_v25 = vpop.f32.mrb[160].mxu0 }
 0x657   : > { %v11088_v48 = vpop.f32.mrb[161].mxu0 }
 0x658   : > { %v11089_v57 = vadd.f32 %v11088_v48, %v11087_v25  ;;  %v11090_v51 = vpop.f32.mrb[162].mxu0 }
 0x659   : > { %v11091_v34 = vpop.f32.mrb[163].mxu0 }
 0x65a   : > { %v6760_v21 = vadd.f32 %v11089_v57, %v14816_v11  ;;  %v11092_v33 = vadd.f32 %v11091_v34, %v11090_v51 }
 0x65c   : > { %v6763_v15 = vadd.f32 %v11092_v33, %v6698_v28 }
 0x65e   : > { %v11093_v35 = vpop.f32.mrb[164].mxu0 }
 0x65f   : > { %v11094_v39 = vpop.f32.mrb[165].mxu0 }
 0x660   : > { %v11095_v4 = vadd.f32 %v11094_v39, %v11093_v35  ;;  %v11096_v29 = vpop.f32.mrb[166].mxu0 }
 0x661   : > { %v11097_v44 = vpop.f32.mrb[167].mxu0 }
 0x662   : > { %v6768_v27 = vadd.f32 %v11095_v4, %v6703_v10  ;;  %v11098_v50 = vadd.f32 %v11097_v44, %v11096_v29 }
 0x664   : > { %v6771_v61 = vadd.f32 %v11098_v50, %v6706_v58 }
 0x666   : > { %v11115_v30 = vpop.f32.mrb[168].mxu0 }
 0x667   : > { %v11116_v20 = vpop.f32.mrb[169].mxu0 }
 0x668   : > { %v11117_v8 = vadd.f32 %v11116_v20, %v11115_v30  ;;  %v11118_v9 = vpop.f32.mrb[170].mxu0 }
 0x669   : > { %v11119_v55 = vpop.f32.mrb[171].mxu0 }
 0x66a   : > { %v6809_v3 = vadd.f32 %v11117_v8, %v6744_v54  ;;  %v11120_v43 = vadd.f32 %v11119_v55, %v11118_v9 }
 0x66c   : > { %v6812_v63 = vadd.f32 %v11120_v43, %v6747_v2 }
 0x66e   : > { %v11121_v59 = vpop.f32.mrb[172].mxu0 }
 0x66f   : > { %v11122_v11 = vpop.f32.mrb[173].mxu0 }
 0x670   : > { %v11123_v32 = vadd.f32 %v11122_v11, %v11121_v59  ;;  %v11124_v28 = vpop.f32.mrb[174].mxu0 }
 0x671   : > { %v11125_v1 = vpop.f32.mrb[175].mxu0 }
 0x672   : > { %v6817_v41 = vadd.f32 %v11123_v32, %v6752_v14  ;;  %v11126_v53 = vadd.f32 %v11125_v1, %v11124_v28 }
 0x674   : > { %v6820_v23 = vadd.f32 %v11126_v53, %v6755_v40 }
 0x676   : > { %v11127_v17 = vpop.f32.mrb[176].mxu0 }
 0x677   : > { %v11128_v10 = vpop.f32.mrb[177].mxu0 }
 0x678   : > { %v11129_v45 = vadd.f32 %v11128_v10, %v11127_v17  ;;  %v11130_v58 = vpop.f32.mrb[178].mxu0  ;;  %v14888_v10 = vld [vmem:[%s13334_s18] ss:$0 sm:$0xff] }
 0x679   : > { %v11131_v7 = vpop.f32.mrb[179].mxu0 }
 0x67a   : > { %v6825_v37 = vadd.f32 %v11129_v45, %v6760_v21  ;;  %v11132_v5 = vadd.f32 %v11131_v7, %v11130_v58 }
 0x67c   : > { %v6828_v6 = vadd.f32 %v11132_v5, %v6763_v15 }
 0x67e   : > { %v11133_v13 = vpop.f32.mrb[180].mxu0 }
 0x67f   : > { %v11134_v12 = vpop.f32.mrb[181].mxu0 }
 0x680   : > { %v11135_v54 = vadd.f32 %v11134_v12, %v11133_v13  ;;  %v11136_v42 = vpop.f32.mrb[182].mxu0  ;;  %v14895_v13 = vld [vmem:[%s13334_s18 + $0x2] ss:$0 sm:$0xff] }
 0x681   : > { %v11137_v2 = vpop.f32.mrb[183].mxu0 }
 0x682   : > { %v6833_v26 = vadd.f32 %v11135_v54, %v6768_v27  ;;  %v11138_v16 = vadd.f32 %v11137_v2, %v11136_v42 }
 0x684   : > { %v6836_v19 = vadd.f32 %v11138_v16, %v6771_v61 }
 0x686   : > { %v11155_v56 = vpop.f32.mrb[184].mxu0 }
 0x687   : > { %v11156_v47 = vpop.f32.mrb[185].mxu0 }
 0x688   : > { %v11157_v14 = vadd.f32 %v11156_v47, %v11155_v56  ;;  %v11158_v24 = vpop.f32.mrb[186].mxu0 }
 0x689   : > { %v11159_v40 = vpop.f32.mrb[187].mxu0 }
 0x68a   : > { %v6874_v25 = vadd.f32 %v11157_v14, %v6809_v3  ;;  %v11160_v48 = vadd.f32 %v11159_v40, %v11158_v24 }
 0x68c   : > { %v6877_v57 = vadd.f32 %v11160_v48, %v6812_v63  ;;  %v6939_v51 = vadd.f32 %v14707_v49, %v6874_v25 }
 0x68e   : > { %v11161_v34 = vpop.f32.mrb[188].mxu0  ;;  %v6942_v21 = vadd.f32 %v14710_v46, %v6877_v57 }
 0x68f   : > { %v11162_v33 = vpop.f32.mrb[189].mxu0 }
 0x690   : > { %v11163_v15 = vadd.f32 %v11162_v33, %v11161_v34  ;;  %v11164_v35 = vpop.f32.mrb[190].mxu0 }
 0x691   : > { %v11165_v39 = vpop.f32.mrb[191].mxu0 }
 0x692   : > { %v6882_v4 = vadd.f32 %v11163_v15, %v6817_v41  ;;  %v11166_v29 = vadd.f32 %v11165_v39, %v11164_v35 }
 0x694   : > { %v6885_v44 = vadd.f32 %v11166_v29, %v6820_v23  ;;  %v6947_v27 = vadd.f32 %v14715_v60, %v6882_v4 }
 0x696   : > { %v11167_v50 = vpop.f32.mrb[192].mxu0  ;;  %v6950_v61 = vadd.f32 %v14718_v0, %v6885_v44 }
 0x697   : > { %v11168_v30 = vpop.f32.mrb[193].mxu0 }
 0x698   : > { %v11169_v20 = vadd.f32 %v11168_v30, %v11167_v50  ;;  %v11170_v8 = vpop.f32.mrb[194].mxu0 }
 0x699   : > { %v11171_v9 = vpop.f32.mrb[195].mxu0 }
 0x69a   : > { %v6890_v49 = vadd.f32 %v11169_v20, %v6825_v37  ;;  %v11172_v55 = vadd.f32 %v11171_v9, %v11170_v8  ;;  %v14891_v37 = vld [vmem:[%s13334_s18 + $0x1] ss:$0 sm:$0xff] }
 0x69c   : > { %v6893_v3 = vadd.f32 %v11172_v55, %v6828_v6  ;;  %v14876_v46 = vadd.f32 %v14729_v52, %v6890_v49 }
 0x69e   : > { %v11173_v43 = vpop.f32.mrb[196].mxu0  ;;  %v14879_v63 = vadd.f32 %v14731_v18, %v6893_v3 }
 0x69f   : > { %v11174_v59 = vpop.f32.mrb[197].mxu0 }
 0x6a0   : > { %v11175_v60 = vadd.f32 %v11174_v59, %v11173_v43  ;;  %v11176_v11 = vpop.f32.mrb[198].mxu0 }
 0x6a1   : > { %v11177_v0 = vpop.f32.mrb[199].mxu0 }
 0x6a2   : > { %v6898_v32 = vadd.f32 %v11175_v60, %v6833_v26  ;;  %v11178_v28 = vadd.f32 %v11177_v0, %v11176_v11  ;;  %v12103_v60 = vld [vmem:[%s15868_s29 + $0x114] ss:$8 sps:$4 sm:$0xff]  }
 0x6a4   : > { %v6901_v1 = vadd.f32 %v11178_v28, %v6836_v19  ;;  %v14882_v41 = vadd.f32 %v14733_v38, %v6898_v32  ;;  %v12098_v32 = vld [vmem:[%s15868_s29 + $0x180] ss:$8 sps:$4 sm:$0xff]  }
 0x6a6   : > { %v11235_v53 = vpop.f32.mrb[200].mxu0  ;;  %v14885_v52 = vadd.f32 %v14735_v31, %v6901_v1 }
 0x6a7   : > { %v11236_v23 = vpop.f32.mrb[201].mxu0 }
 0x6a8   : > { %v11237_v17 = vadd.f32 %v11236_v23, %v11235_v53  ;;  %v11238_v18 = vpop.f32.mrb[202].mxu0  ;;  %v12106_v23 = vld [vmem:[%s15868_s29 + $0x194] ss:$8 sps:$4 sm:$0xff]  }
 0x6a9   : > { %v11239_v45 = vpop.f32.mrb[203].mxu0 }
 0x6aa   : > { %v7004_v58 = vadd.f32 %v11237_v17, %v6939_v51  ;;  %v11240_v7 = vadd.f32 %v11239_v45, %v11238_v18 }
 0x6ac   : > { %v7041_v5 = vmul.f32 %v14888_v10, %v7004_v58  ;;  %v7007_v6 = vadd.f32 %v11240_v7, %v6942_v21  ;;  %v12101_v58 = vld [vmem:[%s15868_s29 + $0x110] ss:$8 sps:$4 sm:$0xff]  }
 0x6ae   : > { %v7053_v38 = vadd.f32 %v14891_v37, %v7041_v5  ;;  %v7042_v31 = vmul.f32 %v14888_v10, %v7007_v6  ;;  %v11241_v12 = vpop.f32.mrb[204].mxu0 }
 0x6af   : > { %v11242_v54 = vpop.f32.mrb[205].mxu0 }
 0x6b0   : > { %vm7061_vm3 = vcmp.gt.f32.partialorder %v7053_v38, 0.0  ;;  %v7073_v42 = vmul.f32 %v14895_v13, %v7053_v38  ;;  %v7054_v2 = vadd.f32 %v14891_v37, %v7042_v31  ;;  %v11243_v26 = vadd.f32 %v11242_v54, %v11241_v12  ;;  %v11244_v16 = vpop.f32.mrb[206].mxu0  ;;  %v12109_v12 = vld [vmem:[%s15868_s29 + $0x124] ss:$8 sps:$4 sm:$0xff]  }
 0x6b1   : > { %v11245_v19 = vpop.f32.mrb[207].mxu0 }
 0x6b2   : > { %v7081_v56 = vsel %vm7061_vm3, %v7053_v38, %v7073_v42  ;;  %vm7062_vm5 = vcmp.gt.f32.partialorder %v7054_v2, 0.0  ;;  %v7074_v47 = vmul.f32 %v14895_v13, %v7054_v2  ;;  %v7012_v14 = vadd.f32 %v11243_v26, %v6947_v27  ;;  %v12104_v42 = vld [vmem:[%s15868_s29 + $0x190] ss:$8 sps:$4 sm:$0xff]  }
 0x6b3   : > { %v7089_v24 = vpack.c.bf16 %v7081_v56, %v7081_v56  ;;  %v11246_v40 = vadd.f32 %v11245_v19, %v11244_v16 }
 0x6b4   : > { %v7082_v25 = vsel %vm7062_vm5, %v7054_v2, %v7074_v47  ;;  %v7043_v48 = vmul.f32 %v14888_v10, %v7012_v14  ;;  %v12112_v14 = vld [vmem:[%s15868_s29 + $0x1a4] ss:$8 sps:$4 sm:$0xff]  }
 0x6b5   : > { %v7126_v57 = vunpack.c.l.b16 %v7089_v24  ;;  %v7090_v51 = vpack.c.bf16 %v7082_v25, %v7082_v25  ;;  %v7015_v34 = vadd.f32 %v11246_v40, %v6950_v61  ;;  %v12095_v61 = vld [vmem:[%s15868_s29 + $0x100] ss:$8 sps:$4 sm:$0xff]  }
 0x6b6   : > { %v7055_v21 = vadd.f32 %v14891_v37, %v7043_v48  ;;  %v11247_v33 = vpop.f32.mrb[208].mxu0  ;;  %v12107_v25 = vld [vmem:[%s15868_s29 + $0x120] ss:$8 sps:$4 sm:$0xff]  }
 0x6b7   : > { %v7127_v15 = vunpack.c.l.b16 %v7090_v51  ;;  %v7044_v35 = vmul.f32 %v14888_v10, %v7015_v34  ;;  %v11248_v39 = vpop.f32.mrb[209].mxu0  ;;  %v7128_v4 = vrot.slane %v7126_v57, 1  ;;  %v7396_v50 = vrot.slane %v7126_v57, 2  ;;  %v12115_v34 = vld [vmem:[%s15868_s29 + $0x134] ss:$8 sps:$4 sm:$0xff]  }
 0x6b8   : > { %vm7063_vm10 = vcmp.gt.f32.partialorder %v7055_v21, 0.0  ;;  %v7075_v29 = vmul.f32 %v14895_v13, %v7055_v21  ;;  %v11249_v44 = vadd.f32 %v11248_v39, %v11247_v33  ;;  %v11250_v27 = vpop.f32.mrb[210].mxu0 }
 0x6b9   : > { %v7056_v30 = vadd.f32 %v14891_v37, %v7044_v35  ;;  %v11251_v20 = vpop.f32.mrb[211].mxu0  ;;  %v7130_v8 = vsel %vm7129_vm6, %v7127_v15, %v7128_v4  ;;  %v7254_v9 = vrot.slane %v7127_v15, 7  ;;  %v7397_v49 = vrot.slane %v7127_v15, 1 }
 0x6ba   : > { %v7083_v55 = vsel %vm7063_vm10, %v7055_v21, %v7075_v29  ;;  %v7020_v3 = vadd.f32 %v11249_v44, %v14876_v46  ;;  %v11252_v43 = vadd.f32 %v11251_v20, %v11250_v27  ;;  %v7131_v59 = vpack.c.b16 %v7130_v8, %v7130_v8  ;;  %v12118_v44 = vld [vmem:[%s15868_s29 + $0x1b4] ss:$8 sps:$4 sm:$0xff]  }
 0x6bb   : > { %v7669_v11 = vpack.c.bf16 %v7083_v55, %v7083_v55  ;;  %vm7064_vm11 = vcmp.gt.f32.partialorder %v7056_v30, 0.0  ;;  %v7076_v0 = vmul.f32 %v14895_v13, %v7056_v30  ;;  %v7255_v28 = vsel %vm7129_vm6, %v7254_v9, %v7126_v57  ;;  %v12121_v9 = vld [vmem:[%s15868_s29 + $0x144] ss:$8 sps:$4 sm:$0xff]  }
 0x6bc   : > { %v7045_v1 = vmul.f32 %v14888_v10, %v7020_v3  ;;  %v7023_v46 = vadd.f32 %v11252_v43, %v14879_v63  ;;  %7246 = vmatmul.mubr.bf16.vlgmr.msra.gmra.mrb[48].mxu1 %v7131_v59  ;;  %v7256_v53 = vpack.c.b16 %v7255_v28, %v7255_v28  ;;  %v14926_v17 = vsel %vm7129_vm6, %v7397_v49, %v7396_v50 }
 0x6bd   : > { %v14928_v18 = vunpack.c.l.b16 %v7669_v11  ;;  %v7084_v45 = vsel %vm7064_vm11, %v7056_v30, %v7076_v0  ;;  %7482 = vmatpush1.bf16.msra.mxu1 %v12095_v61  ;;  %7513 = vmatprep.mubr.bf16.mxu1 %v15866_v62  ;;  %v7541_v63 = vrot.slane %v7126_v57, 3  ;;  %v7542_v7 = vrot.slane %v7127_v15, 2  ;;  %v12110_v15 = vld [vmem:[%s15868_s29 + $0x1a0] ss:$8 sps:$4 sm:$0xff]   ;;  %v12113_v61 = vld [vmem:[%s15868_s29 + $0x130] ss:$8 sps:$4 sm:$0xff]  }
 0x6be   : > { %v7670_v5 = vpack.c.bf16 %v7084_v45, %v7084_v45  ;;  %v7057_v6 = vadd.f32 %v14891_v37, %v7045_v1  ;;  %v7046_v38 = vmul.f32 %v14888_v10, %v7023_v46  ;;  %v11253_v31 = vpop.f32.mrb[212].mxu0  ;;  %7371 = vmatmul.mubr.bf16.vlgmr.msra.gmra.mrb[216].mxu0 %v7256_v53  ;;  %7483 = vmatprep.subr.bf16.mxu1 %v12103_v60  ;;  %v12116_v60 = vld [vmem:[%s15868_s29 + $0x1b0] ss:$8 sps:$4 sm:$0xff]   ;;  %v12124_v0 = vld [vmem:[%s15868_s29 + $0x1c4] ss:$8 sps:$4 sm:$0xff]  }
 0x6bf   : > { %7627 = vmatpush1.bf16.msra.mxu0 %v12098_v32  ;;  %v11254_v54 = vpop.f32.mrb[213].mxu0  ;;  %7658 = vmatprep.mubr.bf16.mxu0 %v15866_v62  ;;  %v14944_v2 = vsel %vm7129_vm6, %v7542_v7, %v7541_v63  ;;  %v7836_v26 = vrot.slane %v14928_v18, 1  ;;  %v7980_v27 = vrot.slane %v14928_v18, 2  ;;  %v8125_v55 = vrot.slane %v14928_v18, 3  ;;  %v12119_v1 = vld [vmem:[%s15868_s29 + $0x140] ss:$8 sps:$4 sm:$0xff]  }
 0x6c0   : > { %v7691_v16 = vunpack.c.l.b16 %v7670_v5  ;;  %vm7065_vm12 = vcmp.gt.f32.partialorder %v7057_v6, 0.0  ;;  %v7077_v19 = vmul.f32 %v14895_v13, %v7057_v6  ;;  %v7058_v56 = vadd.f32 %v14891_v37, %v7046_v38  ;;  %v11256_v47 = vpop.f32.mrb[214].mxu0  ;;  %7628 = vmatprep.subr.bf16.mxu0 %v12106_v23  ;;  %v12127_v23 = vld [vmem:[%s15868_s29 + $0x154] ss:$8 sps:$4 sm:$0xff]   ;;  %v12122_v63 = vld [vmem:[%s15868_s29 + $0x1c0] ss:$8 sps:$4 sm:$0xff]  }
 0x6c1   : > { %v11255_v24 = vadd.f32 %v11254_v54, %v11253_v31  ;;  %7484 = vmatpush1.bf16.msra.mxu1 %v12101_v58  ;;  %v11257_v40 = vpop.f32.mrb[215].mxu0  ;;  %v12130_v31 = vld [vmem:[%s15868_s29 + $0x1d4] ss:$8 sps:$4 sm:$0xff]  }
 0x6c2   : > { %v7085_v48 = vsel %vm7065_vm12, %v7057_v6, %v7077_v19  ;;  %vm7066_vm13 = vcmp.gt.f32.partialorder %v7058_v56, 0.0  ;;  %v7078_v57 = vmul.f32 %v14895_v13, %v7058_v56  ;;  %v11258_v51 = vadd.f32 %v11257_v40, %v11256_v47  ;;  %7485 = vmatprep.subr.bf16.mxu1 %v12109_v12  ;;  %v12133_v19 = vld [vmem:[%s15868_s29 + $0x164] ss:$8 sps:$4 sm:$0xff]   ;;  %v12128_v47 = vld [vmem:[%s15868_s29 + $0x1d0] ss:$8 sps:$4 sm:$0xff]  }
 0x6c3   : > { %v8253_v21 = vpack.c.bf16 %v7085_v48, %v7085_v48  ;;  %v7028_v33 = vadd.f32 %v11255_v24, %v14882_v41  ;;  %7629 = vmatpush1.bf16.msra.mxu0 %v12104_v42  ;;  %v7692_v35 = vrot.slane %v7691_v16, 7  ;;  %v14964_v39 = vsel %vm7129_vm6, %v7691_v16, %v7836_v26  ;;  %v12125_v42 = vld [vmem:[%s15868_s29 + $0x150] ss:$8 sps:$4 sm:$0xff]   ;;  %v12131_v40 = vld [vmem:[%s15868_s29 + $0x160] ss:$8 sps:$4 sm:$0xff]  }
 0x6c4   : > { %v7086_v4 = vsel %vm7066_vm13, %v7058_v56, %v7078_v57  ;;  %v7031_v29 = vadd.f32 %v11258_v51, %v14885_v52  ;;  %7630 = vmatprep.subr.bf16.mxu0 %v12112_v14  ;;  %v7981_v41 = vrot.slane %v7691_v16, 1  ;;  %v8126_v3 = vrot.slane %v7691_v16, 2  ;;  %v12136_v14 = vld [vmem:[%s15868_s29 + $0x1e4] ss:$8 sps:$4 sm:$0xff]   ;;  %v12139_v51 = vld [vmem:[%s15868_s29 + $0x174] ss:$8 sps:$4 sm:$0xff]  }
 0x6c5   : > { %v8274_v50 = vunpack.c.l.b16 %v8253_v21  ;;  %v8254_v30 = vpack.c.bf16 %v7086_v4, %v7086_v4  ;;  %v7047_v20 = vmul.f32 %v14888_v10, %v7028_v33  ;;  %7486 = vmatpush1.bf16.msra.mxu1 %v12107_v25  ;;  %v14977_v52 = vsel %vm7129_vm6, %v7692_v35, %v14928_v18 }
 0x6c6   : > { %v7048_v8 = vmul.f32 %v14888_v10, %v7031_v29  ;;  %7487 = vmatprep.subr.bf16.mxu1 %v12115_v34  ;;  %v14984_v49 = vsel %vm7129_vm6, %v7981_v41, %v7980_v27  ;;  %v14996_v32 = vsel %vm7129_vm6, %v8126_v3, %v8125_v55  ;;  %v12142_v29 = vld [vmem:[%s15868_s29 + $0x1f4] ss:$8 sps:$4 sm:$0xff]   ;;  %v12137_v27 = vld [vmem:[%s15868_s29 + $0x170] ss:$8 sps:$4 sm:$0xff]   ;;  %v12145_v41 = vld [vmem:[%s15868_s29 + $0x204] ss:$8 sps:$4 sm:$0xff]   ;;  %v7544_v55 = vpack.c.b16 %v14944_v2, %v14944_v2 }
 0x6c7   : > { %v8275_v43 = vunpack.c.l.b16 %v8254_v30  ;;  %v7059_v59 = vadd.f32 %v14891_v37, %v7047_v20  ;;  %7631 = vmatpush1.bf16.msra.mxu0 %v12110_v15  ;;  %v8420_v10 = vrot.slane %v8274_v50, 1  ;;  %v8564_v53 = vrot.slane %v8274_v50, 2  ;;  %v12134_v15 = vld [vmem:[%s15868_s29 + $0x1e0] ss:$8 sps:$4 sm:$0xff]   ;;  %v12148_v30 = vld [vmem:[%s15868_s29 + $0x284] ss:$8 sps:$4 sm:$0xff]  }
 0x6c8   : > { %v7060_v11 = vadd.f32 %v14891_v37, %v7048_v8  ;;  %7632 = vmatprep.subr.bf16.mxu0 %v12118_v44  ;;  %v8709_v5 = vrot.slane %v8274_v50, 3  ;;  %v12143_v20 = vld [vmem:[%s15868_s29 + $0x200] ss:$8 sps:$4 sm:$0xff]   ;;  %v12151_v8 = vld [vmem:[%s15868_s29 + $0x214] ss:$8 sps:$4 sm:$0xff]  }
 0x6c9   : > { %vm7067_vm14 = vcmp.gt.f32.partialorder %v7059_v59, 0.0  ;;  %v7079_v28 = vmul.f32 %v14895_v13, %v7059_v59  ;;  %7488 = vmatpush1.bf16.msra.mxu1 %v12113_v61  ;;  %v8276_v46 = vrot.slane %v8275_v43, 7  ;;  %v15007_v18 = vsel %vm7129_vm6, %v8275_v43, %v8420_v10  ;;  %v12154_v3 = vld [vmem:[%s15868_s29 + $0x294] ss:$8 sps:$4 sm:$0xff]   ;;  %v12152_v2 = vld [vmem:[%s15868_s29 + $0x290] ss:$8 sps:$4 sm:$0xff]  }
 0x6ca   : > { %vm7068_vm15 = vcmp.gt.f32.partialorder %v7060_v11, 0.0  ;;  %v7080_v37 = vmul.f32 %v14895_v13, %v7060_v11  ;;  %7489 = vmatprep.subr.bf16.mxu1 %v12121_v9  ;;  %v8565_v45 = vrot.slane %v8275_v43, 1  ;;  %v8710_v13 = vrot.slane %v8275_v43, 2  ;;  %v12146_v9 = vld [vmem:[%s15868_s29 + $0x280] ss:$8 sps:$4 sm:$0xff]  }
 0x6cb   : > { %v7087_v58 = vsel %vm7067_vm14, %v7059_v59, %v7079_v28  ;;  %7633 = vmatpush1.bf16.msra.mxu0 %v12116_v60  ;;  %v15013_v7 = vsel %vm7129_vm6, %v8276_v46, %v8274_v50  ;;  %v12140_v50 = vld [vmem:[%s15868_s29 + $0x1f0] ss:$8 sps:$4 sm:$0xff]   ;;  %v7399_v61 = vpack.c.b16 %v14926_v17, %v14926_v17  ;;  %v12157_v43 = vld [vmem:[%s15868_s29 + $0x224] ss:$8 sps:$4 sm:$0xff]   ;;  %v12155_v60 = vld [vmem:[%s15868_s29 + $0x220] ss:$8 sps:$4 sm:$0xff]  }
 0x6cc   : > { %v8837_v6 = vpack.c.bf16 %v7087_v58, %v7087_v58  ;;  %v7088_v38 = vsel %vm7068_vm15, %v7060_v11, %v7080_v37  ;;  %7634 = vmatprep.subr.bf16.mxu0 %v12124_v0  ;;  %v15019_v12 = vsel %vm7129_vm6, %v8565_v45, %v8564_v53  ;;  %v15025_v26 = vsel %vm7129_vm6, %v8710_v13, %v8709_v5  ;;  %v12149_v17 = vld [vmem:[%s15868_s29 + $0x210] ss:$8 sps:$4 sm:$0xff]   ;;  %v12160_v59 = vld [vmem:[%s15868_s29 + $0x2a4] ss:$8 sps:$4 sm:$0xff]   ;;  %v12163_v10 = vld [vmem:[%s15868_s29 + $0x234] ss:$8 sps:$4 sm:$0xff]  }
 0x6cd   : > { %v8838_v54 = vpack.c.bf16 %v7088_v38, %v7088_v38  ;;  %7490 = vmatpush1.bf16.msra.mxu1 %v12119_v1  ;;  %v12158_v11 = vld [vmem:[%s15868_s29 + $0x2a0] ss:$8 sps:$4 sm:$0xff]   ;;  %v12166_v0 = vld [vmem:[%s15868_s29 + $0x2b4] ss:$8 sps:$4 sm:$0xff]   ;;  %v12161_v28 = vld [vmem:[%s15868_s29 + $0x230] ss:$8 sps:$4 sm:$0xff]  }
 0x6ce   : > { %v8858_v16 = vunpack.c.l.b16 %v8837_v6  ;;  %7491 = vmatprep.subr.bf16.mxu1 %v12127_v23  ;;  %v12169_v1 = vld [vmem:[%s15868_s29 + $0x244] ss:$8 sps:$4 sm:$0xff]   ;;  %v12164_v46 = vld [vmem:[%s15868_s29 + $0x2b0] ss:$8 sps:$4 sm:$0xff]   ;;  %v12167_v37 = vld [vmem:[%s15868_s29 + $0x240] ss:$8 sps:$4 sm:$0xff]  }
 0x6cf   : > { %v8859_v56 = vunpack.c.l.b16 %v8838_v54  ;;  %7635 = vmatpush1.bf16.msra.mxu0 %v12122_v63  ;;  %v12172_v53 = vld [vmem:[%s15868_s29 + $0x2c4] ss:$8 sps:$4 sm:$0xff]   ;;  %v12175_v23 = vld [vmem:[%s15868_s29 + $0x254] ss:$8 sps:$4 sm:$0xff]   ;;  %v12170_v45 = vld [vmem:[%s15868_s29 + $0x2c0] ss:$8 sps:$4 sm:$0xff]  }
 0x6d0   : > { %7636 = vmatprep.subr.bf16.mxu0 %v12130_v31  ;;  %v9004_v24 = vrot.slane %v8858_v16, 1  ;;  %v9148_v48 = vrot.slane %v8858_v16, 2  ;;  %v9293_v21 = vrot.slane %v8858_v16, 3  ;;  %v12178_v58 = vld [vmem:[%s15868_s29 + $0x2d4] ss:$8 sps:$4 sm:$0xff]  }
 0x6d1   : > { %7492 = vmatpush1.bf16.msra.mxu1 %v12125_v42  ;;  %v8860_v25 = vrot.slane %v8859_v56, 7  ;;  %v9149_v57 = vrot.slane %v8859_v56, 1  ;;  %v9294_v33 = vrot.slane %v8859_v56, 2  ;;  %v12173_v63 = vld [vmem:[%s15868_s29 + $0x250] ss:$8 sps:$4 sm:$0xff]  }
 0x6d2   : > { %7493 = vmatprep.subr.bf16.mxu1 %v12133_v19  ;;  %v15043_v34 = vsel %vm7129_vm6, %v8859_v56, %v9004_v24  ;;  %v12181_v5 = vld [vmem:[%s15868_s29 + $0x264] ss:$8 sps:$4 sm:$0xff]   ;;  %v12176_v13 = vld [vmem:[%s15868_s29 + $0x2d0] ss:$8 sps:$4 sm:$0xff]   ;;  %v12179_v38 = vld [vmem:[%s15868_s29 + $0x260] ss:$8 sps:$4 sm:$0xff]   ;;  %v7694_v24 = vpack.c.b16 %v14977_v52, %v14977_v52 }
 0x6d3   : > { %7637 = vmatpush1.bf16.msra.mxu0 %v12128_v47  ;;  %v15049_v35 = vsel %vm7129_vm6, %v8860_v25, %v8858_v16  ;;  %v15052_v4 = vsel %vm7129_vm6, %v9149_v57, %v9148_v48  ;;  %v15058_v44 = vsel %vm7129_vm6, %v9294_v33, %v9293_v21  ;;  %v12184_v6 = vld [vmem:[%s15868_s29 + $0x2e4] ss:$8 sps:$4 sm:$0xff]   ;;  %v12187_v31 = vld [vmem:[%s15868_s29 + $0x274] ss:$8 sps:$4 sm:$0xff]   ;;  %v12182_v54 = vld [vmem:[%s15868_s29 + $0x2e0] ss:$8 sps:$4 sm:$0xff]   ;;  %v7838_v48 = vpack.c.b16 %v14964_v39, %v14964_v39 }
 0x6d4   : > { %7638 = vmatprep.subr.bf16.mxu0 %v12136_v14  ;;  %v12190_v42 = vld [vmem:[%s15868_s29 + $0x2f4] ss:$8 sps:$4 sm:$0xff]   ;;  %v12185_v16 = vld [vmem:[%s15868_s29 + $0x270] ss:$8 sps:$4 sm:$0xff]   ;;  %v12193_v19 = vld [vmem:[%s15868_s29 + $0x304] ss:$8 sps:$4 sm:$0xff]  }
 0x6d5   : > { %7494 = vmatpush1.bf16.msra.mxu1 %v12131_v40  ;;  %v12188_v56 = vld [vmem:[%s15868_s29 + $0x2f0] ss:$8 sps:$4 sm:$0xff]   ;;  %v12196_v47 = vld [vmem:[%s15868_s29 + $0x384] ss:$8 sps:$4 sm:$0xff]   ;;  %v12191_v14 = vld [vmem:[%s15868_s29 + $0x300] ss:$8 sps:$4 sm:$0xff]  }
 0x6d6   : > { %7495 = vmatprep.subr.bf16.mxu1 %v12139_v51  ;;  %v12199_v40 = vld [vmem:[%s15868_s29 + $0x314] ss:$8 sps:$4 sm:$0xff]   ;;  %v12194_v25 = vld [vmem:[%s15868_s29 + $0x380] ss:$8 sps:$4 sm:$0xff]   ;;  %v12197_v52 = vld [vmem:[%s15868_s29 + $0x310] ss:$8 sps:$4 sm:$0xff]  }
 0x6d7   : > { %7639 = vmatpush1.bf16.msra.mxu0 %v12134_v15  ;;  %v12202_v57 = vld [vmem:[%s15868_s29 + $0x394] ss:$8 sps:$4 sm:$0xff]   ;;  %v12205_v51 = vld [vmem:[%s15868_s29 + $0x324] ss:$8 sps:$4 sm:$0xff]   ;;  %v12200_v39 = vld [vmem:[%s15868_s29 + $0x390] ss:$8 sps:$4 sm:$0xff]  }
 0x6d8   : > { %7640 = vmatprep.subr.bf16.mxu0 %v12142_v29  ;;  %v12208_v21 = vld [vmem:[%s15868_s29 + $0x3a4] ss:$8 sps:$4 sm:$0xff]   ;;  %v12203_v33 = vld [vmem:[%s15868_s29 + $0x320] ss:$8 sps:$4 sm:$0xff]   ;;  %v12211_v15 = vld [vmem:[%s15868_s29 + $0x334] ss:$8 sps:$4 sm:$0xff]  }
 0x6d9   : > { %7496 = vmatpush1.bf16.msra.mxu1 %v12137_v27  ;;  %v12206_v29 = vld [vmem:[%s15868_s29 + $0x3a0] ss:$8 sps:$4 sm:$0xff]   ;;  %v12214_v27 = vld [vmem:[%s15868_s29 + $0x3b4] ss:$8 sps:$4 sm:$0xff]  }
 0x6da   : > { %7776 = vmatprep.subr.bf16.mxu1 %v12145_v41  ;;  %v12209_v41 = vld [vmem:[%s15868_s29 + $0x330] ss:$8 sps:$4 sm:$0xff]  }
 0x6db   : > { %7641 = vmatpush1.bf16.msra.mxu0 %v12140_v50  ;;  %v12217_v50 = vld [vmem:[%s15868_s29 + $0x344] ss:$8 sps:$4 sm:$0xff]  }
 0x6dc   : > { %7514 = vmatmul.mubr.bf16.vlgmr.msra.gmra.mrb[52].mxu1 %v7399_v61  ;;  %7920 = vmatprep.subr.bf16.mxu0 %v12148_v30  ;;  %v12212_v30 = vld [vmem:[%s15868_s29 + $0x3b0] ss:$8 sps:$4 sm:$0xff]   ;;  %v12215_v61 = vld [vmem:[%s15868_s29 + $0x340] ss:$8 sps:$4 sm:$0xff]  }
 0x6dd   : > { %7777 = vmatpush1.bf16.msra.mxu1 %v12143_v20  ;;  %7808 = vmatprep.mubr.bf16.mxu1 %v15866_v62  ;;  %v12220_v20 = vld [vmem:[%s15868_s29 + $0x3c4] ss:$8 sps:$4 sm:$0xff]  }
 0x6de   : > { %7659 = vmatmul.mubr.bf16.vlgmr.msra.gmra.mrb[220].mxu0 %v7544_v55  ;;  %7778 = vmatprep.subr.bf16.mxu1 %v12151_v8  ;;  %v12223_v8 = vld [vmem:[%s15868_s29 + $0x354] ss:$8 sps:$4 sm:$0xff]  }
 0x6df   : > { %7921 = vmatpush1.bf16.msra.mxu0 %v12146_v9  ;;  %7952 = vmatprep.mubr.bf16.mxu0 %v15866_v62  ;;  %v12218_v9 = vld [vmem:[%s15868_s29 + $0x3c0] ss:$8 sps:$4 sm:$0xff]   ;;  %v12226_v55 = vld [vmem:[%s15868_s29 + $0x3d4] ss:$8 sps:$4 sm:$0xff]  }
 0x6e0   : > { %7922 = vmatprep.subr.bf16.mxu0 %v12154_v3  ;;  %v12221_v3 = vld [vmem:[%s15868_s29 + $0x350] ss:$8 sps:$4 sm:$0xff]  }
 0x6e1   : > { %7779 = vmatpush1.bf16.msra.mxu1 %v12149_v17  ;;  %v12229_v17 = vld [vmem:[%s15868_s29 + $0x364] ss:$8 sps:$4 sm:$0xff]  }
 0x6e2   : > { %7780 = vmatprep.subr.bf16.mxu1 %v12157_v43  ;;  %v12224_v43 = vld [vmem:[%s15868_s29 + $0x3d0] ss:$8 sps:$4 sm:$0xff]  }
 0x6e3   : > { %7923 = vmatpush1.bf16.msra.mxu0 %v12152_v2  ;;  %v12232_v2 = vld [vmem:[%s15868_s29 + $0x3e4] ss:$8 sps:$4 sm:$0xff]  }
 0x6e4   : > { %7924 = vmatprep.subr.bf16.mxu0 %v12160_v59  ;;  %v12227_v59 = vld [vmem:[%s15868_s29 + $0x360] ss:$8 sps:$4 sm:$0xff]  }
 0x6e5   : > { %7781 = vmatpush1.bf16.msra.mxu1 %v12155_v60  ;;  %v12235_v60 = vld [vmem:[%s15868_s29 + $0x374] ss:$8 sps:$4 sm:$0xff]  }
 0x6e6   : > { %7782 = vmatprep.subr.bf16.mxu1 %v12163_v10  ;;  %v12230_v10 = vld [vmem:[%s15868_s29 + $0x3e0] ss:$8 sps:$4 sm:$0xff]  }
 0x6e7   : > { %7925 = vmatpush1.bf16.msra.mxu0 %v12158_v11  ;;  %v12238_v11 = vld [vmem:[%s15868_s29 + $0x3f4] ss:$8 sps:$4 sm:$0xff]  }
 0x6e8   : > { %7926 = vmatprep.subr.bf16.mxu0 %v12166_v0  ;;  %v12233_v0 = vld [vmem:[%s15868_s29 + $0x370] ss:$8 sps:$4 sm:$0xff]  }
 0x6e9   : > { %7783 = vmatpush1.bf16.msra.mxu1 %v12161_v28  ;;  %v12241_v28 = vld [vmem:[%s15868_s29 + $0x404] ss:$8 sps:$4 sm:$0xff]  }
 0x6ea   : > { %7784 = vmatprep.subr.bf16.mxu1 %v12169_v1  ;;  %v12236_v1 = vld [vmem:[%s15868_s29 + $0x3f0] ss:$8 sps:$4 sm:$0xff]  }
 0x6eb   : > { %7927 = vmatpush1.bf16.msra.mxu0 %v12164_v46  ;;  %v12244_v46 = vld [vmem:[%s15868_s29 + $0x484] ss:$8 sps:$4 sm:$0xff]  }
 0x6ec   : > { %7928 = vmatprep.subr.bf16.mxu0 %v12172_v53  ;;  %v12239_v53 = vld [vmem:[%s15868_s29 + $0x400] ss:$8 sps:$4 sm:$0xff]  }
 0x6ed   : > { %7785 = vmatpush1.bf16.msra.mxu1 %v12167_v37  ;;  %v7983_v37 = vpack.c.b16 %v14984_v49, %v14984_v49  ;;  %v12245_v49 = vld [vmem:[%s15868_s29 + $0x410] ss:$8 sps:$4 sm:$0xff]  }
 0x6ee   : > { %7786 = vmatprep.subr.bf16.mxu1 %v12175_v23  ;;  %v12247_v23 = vld [vmem:[%s15868_s29 + $0x414] ss:$8 sps:$4 sm:$0xff]  }
 0x6ef   : > { %7929 = vmatpush1.bf16.msra.mxu0 %v12170_v45  ;;  %v12242_v45 = vld [vmem:[%s15868_s29 + $0x480] ss:$8 sps:$4 sm:$0xff]  }
 0x6f0   : > { %7930 = vmatprep.subr.bf16.mxu0 %v12178_v58  ;;  %v8128_v58 = vpack.c.b16 %v14996_v32, %v14996_v32  ;;  %v12248_v32 = vld [vmem:[%s15868_s29 + $0x490] ss:$8 sps:$4 sm:$0xff]  }
 0x6f1   : > { %7787 = vmatpush1.bf16.msra.mxu1 %v12173_v63  ;;  %v12250_v63 = vld [vmem:[%s15868_s29 + $0x494] ss:$8 sps:$4 sm:$0xff]  }
 0x6f2   : > { %7788 = vmatprep.subr.bf16.mxu1 %v12181_v5  ;;  %v12253_v5 = vld [vmem:[%s15868_s29 + $0x424] ss:$8 sps:$4 sm:$0xff]  }
 0x6f3   : > { %7931 = vmatpush1.bf16.msra.mxu0 %v12176_v13  ;;  %v12256_v13 = vld [vmem:[%s15868_s29 + $0x4a4] ss:$8 sps:$4 sm:$0xff]  }
 0x6f4   : > { %7932 = vmatprep.subr.bf16.mxu0 %v12184_v6  ;;  %v12251_v6 = vld [vmem:[%s15868_s29 + $0x420] ss:$8 sps:$4 sm:$0xff]  }
 0x6f5   : > { %7789 = vmatpush1.bf16.msra.mxu1 %v12179_v38  ;;  %v12259_v38 = vld [vmem:[%s15868_s29 + $0x434] ss:$8 sps:$4 sm:$0xff]  }
 0x6f6   : > { %7790 = vmatprep.subr.bf16.mxu1 %v12187_v31  ;;  %v12254_v31 = vld [vmem:[%s15868_s29 + $0x4a0] ss:$8 sps:$4 sm:$0xff]  }
 0x6f7   : > { %7933 = vmatpush1.bf16.msra.mxu0 %v12182_v54  ;;  %v12262_v54 = vld [vmem:[%s15868_s29 + $0x4b4] ss:$8 sps:$4 sm:$0xff]  }
 0x6f8   : > { %7934 = vmatprep.subr.bf16.mxu0 %v12190_v42  ;;  %v12257_v42 = vld [vmem:[%s15868_s29 + $0x430] ss:$8 sps:$4 sm:$0xff]  }
 0x6f9   : > { %7791 = vmatpush1.bf16.msra.mxu1 %v12185_v16  ;;  %v12265_v16 = vld [vmem:[%s15868_s29 + $0x444] ss:$8 sps:$4 sm:$0xff]  }
 0x6fa   : > { %8065 = vmatprep.subr.bf16.mxu1 %v12193_v19  ;;  %v12260_v19 = vld [vmem:[%s15868_s29 + $0x4b0] ss:$8 sps:$4 sm:$0xff]  }
 0x6fb   : > { %7935 = vmatpush1.bf16.msra.mxu0 %v12188_v56  ;;  %v12268_v56 = vld [vmem:[%s15868_s29 + $0x4c4] ss:$8 sps:$4 sm:$0xff]  }
 0x6fc   : > { %7809 = vmatmul.mubr.bf16.vlgmr.msra.gmra.mrb[56].mxu1 %v7694_v24  ;;  %8210 = vmatprep.subr.bf16.mxu0 %v12196_v47  ;;  %v12263_v47 = vld [vmem:[%s15868_s29 + $0x440] ss:$8 sps:$4 sm:$0xff]  }
 0x6fd   : > { %8066 = vmatpush1.bf16.msra.mxu1 %v12191_v14  ;;  %8097 = vmatprep.mubr.bf16.mxu1 %v15866_v62  ;;  %v12271_v14 = vld [vmem:[%s15868_s29 + $0x454] ss:$8 sps:$4 sm:$0xff]   ;;  %v12266_v24 = vld [vmem:[%s15868_s29 + $0x4c0] ss:$8 sps:$4 sm:$0xff]  }
 0x6fe   : > { %7953 = vmatmul.mubr.bf16.vlgmr.msra.gmra.mrb[224].mxu0 %v7838_v48  ;;  %8067 = vmatprep.subr.bf16.mxu1 %v12199_v40  ;;  %v12274_v40 = vld [vmem:[%s15868_s29 + $0x4d4] ss:$8 sps:$4 sm:$0xff]   ;;  %v12277_v48 = vld [vmem:[%s15868_s29 + $0x464] ss:$8 sps:$4 sm:$0xff]  }
 0x6ff   : > { %8211 = vmatpush1.bf16.msra.mxu0 %v12194_v25  ;;  %8242 = vmatprep.mubr.bf16.mxu0 %v15866_v62  ;;  %v12269_v25 = vld [vmem:[%s15868_s29 + $0x450] ss:$8 sps:$4 sm:$0xff]  }
 0x700   : > { %8212 = vmatprep.subr.bf16.mxu0 %v12202_v57  ;;  %v12272_v57 = vld [vmem:[%s15868_s29 + $0x4d0] ss:$8 sps:$4 sm:$0xff]  }
 0x701   : > { %8068 = vmatpush1.bf16.msra.mxu1 %v12197_v52  ;;  %v12280_v52 = vld [vmem:[%s15868_s29 + $0x4e4] ss:$8 sps:$4 sm:$0xff]  }
 0x702   : > { %8069 = vmatprep.subr.bf16.mxu1 %v12205_v51  ;;  %v12275_v51 = vld [vmem:[%s15868_s29 + $0x460] ss:$8 sps:$4 sm:$0xff]  }
 0x703   : > { %8213 = vmatpush1.bf16.msra.mxu0 %v12200_v39  ;;  %v12283_v39 = vld [vmem:[%s15868_s29 + $0x474] ss:$8 sps:$4 sm:$0xff]  }
 0x704   : > { %8214 = vmatprep.subr.bf16.mxu0 %v12208_v21  ;;  %v12278_v21 = vld [vmem:[%s15868_s29 + $0x4e0] ss:$8 sps:$4 sm:$0xff]  }
 0x705   : > { %8070 = vmatpush1.bf16.msra.mxu1 %v12203_v33  ;;  %v12286_v33 = vld [vmem:[%s15868_s29 + $0x4f4] ss:$8 sps:$4 sm:$0xff]  }
 0x706   : > { %8071 = vmatprep.subr.bf16.mxu1 %v12211_v15  ;;  %v12281_v15 = vld [vmem:[%s15868_s29 + $0x470] ss:$8 sps:$4 sm:$0xff]  }
 0x707   : > { %8215 = vmatpush1.bf16.msra.mxu0 %v12206_v29  ;;  %v12289_v29 = vld [vmem:[%s15868_s29 + $0x504] ss:$8 sps:$4 sm:$0xff]  }
 0x708   : > { %8216 = vmatprep.subr.bf16.mxu0 %v12214_v27  ;;  %v12284_v27 = vld [vmem:[%s15868_s29 + $0x4f0] ss:$8 sps:$4 sm:$0xff]  }
 0x709   : > { %8072 = vmatpush1.bf16.msra.mxu1 %v12209_v41  ;;  %v12292_v41 = vld [vmem:[%s15868_s29 + $0x584] ss:$8 sps:$4 sm:$0xff]  }
 0x70a   : > { %8073 = vmatprep.subr.bf16.mxu1 %v12217_v50  ;;  %v12287_v50 = vld [vmem:[%s15868_s29 + $0x500] ss:$8 sps:$4 sm:$0xff]  }
 0x70b   : > { %8217 = vmatpush1.bf16.msra.mxu0 %v12212_v30  ;;  %v8278_v30 = vpack.c.b16 %v15013_v7, %v15013_v7  ;;  %v12293_v7 = vld [vmem:[%s15868_s29 + $0x510] ss:$8 sps:$4 sm:$0xff]  }
 0x70c   : > { %8218 = vmatprep.subr.bf16.mxu0 %v12220_v20  ;;  %v12295_v20 = vld [vmem:[%s15868_s29 + $0x514] ss:$8 sps:$4 sm:$0xff]  }
 0x70d   : > { %8074 = vmatpush1.bf16.msra.mxu1 %v12215_v61  ;;  %v12290_v61 = vld [vmem:[%s15868_s29 + $0x580] ss:$8 sps:$4 sm:$0xff]  }
 0x70e   : > { %8075 = vmatprep.subr.bf16.mxu1 %v12223_v8  ;;  %v8422_v8 = vpack.c.b16 %v15007_v18, %v15007_v18  ;;  %v12296_v18 = vld [vmem:[%s15868_s29 + $0x590] ss:$8 sps:$4 sm:$0xff]  }
 0x70f   : > { %8219 = vmatpush1.bf16.msra.mxu0 %v12218_v9  ;;  %v12298_v9 = vld [vmem:[%s15868_s29 + $0x594] ss:$8 sps:$4 sm:$0xff]  }
 0x710   : > { %8220 = vmatprep.subr.bf16.mxu0 %v12226_v55  ;;  %v12301_v55 = vld [vmem:[%s15868_s29 + $0x524] ss:$8 sps:$4 sm:$0xff]  }
 0x711   : > { %8076 = vmatpush1.bf16.msra.mxu1 %v12221_v3  ;;  %v12304_v3 = vld [vmem:[%s15868_s29 + $0x5a4] ss:$8 sps:$4 sm:$0xff]  }
 0x712   : > { %8077 = vmatprep.subr.bf16.mxu1 %v12229_v17  ;;  %v12299_v17 = vld [vmem:[%s15868_s29 + $0x520] ss:$8 sps:$4 sm:$0xff]  }
 0x713   : > { %8221 = vmatpush1.bf16.msra.mxu0 %v12224_v43  ;;  %v12307_v43 = vld [vmem:[%s15868_s29 + $0x534] ss:$8 sps:$4 sm:$0xff]  }
 0x714   : > { %8222 = vmatprep.subr.bf16.mxu0 %v12232_v2  ;;  %v12302_v2 = vld [vmem:[%s15868_s29 + $0x5a0] ss:$8 sps:$4 sm:$0xff]  }
 0x715   : > { %8078 = vmatpush1.bf16.msra.mxu1 %v12227_v59  ;;  %v12310_v59 = vld [vmem:[%s15868_s29 + $0x5b4] ss:$8 sps:$4 sm:$0xff]  }
 0x716   : > { %8079 = vmatprep.subr.bf16.mxu1 %v12235_v60  ;;  %v12305_v60 = vld [vmem:[%s15868_s29 + $0x530] ss:$8 sps:$4 sm:$0xff]  }
 0x717   : > { %8223 = vmatpush1.bf16.msra.mxu0 %v12230_v10  ;;  %v12313_v10 = vld [vmem:[%s15868_s29 + $0x544] ss:$8 sps:$4 sm:$0xff]  }
 0x718   : > { %8224 = vmatprep.subr.bf16.mxu0 %v12238_v11  ;;  %v12308_v11 = vld [vmem:[%s15868_s29 + $0x5b0] ss:$8 sps:$4 sm:$0xff]  }
 0x719   : > { %8080 = vmatpush1.bf16.msra.mxu1 %v12233_v0  ;;  %v12316_v0 = vld [vmem:[%s15868_s29 + $0x5c4] ss:$8 sps:$4 sm:$0xff]  }
 0x71a   : > { %8360 = vmatprep.subr.bf16.mxu1 %v12241_v28  ;;  %v12311_v28 = vld [vmem:[%s15868_s29 + $0x540] ss:$8 sps:$4 sm:$0xff]  }
 0x71b   : > { %8225 = vmatpush1.bf16.msra.mxu0 %v12236_v1  ;;  %v12319_v1 = vld [vmem:[%s15868_s29 + $0x554] ss:$8 sps:$4 sm:$0xff]  }
 0x71c   : > { %8098 = vmatmul.mubr.bf16.vlgmr.msra.gmra.mrb[60].mxu1 %v7983_v37  ;;  %8504 = vmatprep.subr.bf16.mxu0 %v12244_v46  ;;  %v12314_v46 = vld [vmem:[%s15868_s29 + $0x5c0] ss:$8 sps:$4 sm:$0xff]   ;;  %v12317_v37 = vld [vmem:[%s15868_s29 + $0x550] ss:$8 sps:$4 sm:$0xff]  }
 0x71d   : > { %8361 = vmatpush1.bf16.msra.mxu1 %v12239_v53  ;;  %8392 = vmatprep.mubr.bf16.mxu1 %v15866_v62  ;;  %v12322_v53 = vld [vmem:[%s15868_s29 + $0x5d4] ss:$8 sps:$4 sm:$0xff]  }
 0x71e   : > { %8243 = vmatmul.mubr.bf16.vlgmr.msra.gmra.mrb[228].mxu0 %v8128_v58  ;;  %8362 = vmatprep.subr.bf16.mxu1 %v12247_v23  ;;  %v12325_v23 = vld [vmem:[%s15868_s29 + $0x564] ss:$8 sps:$4 sm:$0xff]  }
 0x71f   : > { %8505 = vmatpush1.bf16.msra.mxu0 %v12242_v45  ;;  %8536 = vmatprep.mubr.bf16.mxu0 %v15866_v62  ;;  %v12320_v45 = vld [vmem:[%s15868_s29 + $0x5d0] ss:$8 sps:$4 sm:$0xff]   ;;  %v12328_v58 = vld [vmem:[%s15868_s29 + $0x5e4] ss:$8 sps:$4 sm:$0xff]  }
 0x720   : > { %8506 = vmatprep.subr.bf16.mxu0 %v12250_v63  ;;  %v12323_v63 = vld [vmem:[%s15868_s29 + $0x560] ss:$8 sps:$4 sm:$0xff]  }
 0x721   : > { %8363 = vmatpush1.bf16.msra.mxu1 %v12245_v49  ;;  %v12331_v49 = vld [vmem:[%s15868_s29 + $0x574] ss:$8 sps:$4 sm:$0xff]  }
 0x722   : > { %8364 = vmatprep.subr.bf16.mxu1 %v12253_v5  ;;  %v12326_v5 = vld [vmem:[%s15868_s29 + $0x5e0] ss:$8 sps:$4 sm:$0xff]  }
 0x723   : > { %8507 = vmatpush1.bf16.msra.mxu0 %v12248_v32  ;;  %v12334_v32 = vld [vmem:[%s15868_s29 + $0x5f4] ss:$8 sps:$4 sm:$0xff]  }
 0x724   : > { %8508 = vmatprep.subr.bf16.mxu0 %v12256_v13  ;;  %v12329_v13 = vld [vmem:[%s15868_s29 + $0x570] ss:$8 sps:$4 sm:$0xff]  }
 0x725   : > { %8365 = vmatpush1.bf16.msra.mxu1 %v12251_v6  ;;  %v12337_v6 = vld [vmem:[%s15868_s29 + $0x604] ss:$8 sps:$4 sm:$0xff]  }
 0x726   : > { %8366 = vmatprep.subr.bf16.mxu1 %v12259_v38  ;;  %v12332_v38 = vld [vmem:[%s15868_s29 + $0x5f0] ss:$8 sps:$4 sm:$0xff]  }
 0x727   : > { %8509 = vmatpush1.bf16.msra.mxu0 %v12254_v31  ;;  %v12340_v31 = vld [vmem:[%s15868_s29 + $0x684] ss:$8 sps:$4 sm:$0xff]  }
 0x728   : > { %8510 = vmatprep.subr.bf16.mxu0 %v12262_v54  ;;  %v12335_v54 = vld [vmem:[%s15868_s29 + $0x600] ss:$8 sps:$4 sm:$0xff]  }
 0x729   : > { %8367 = vmatpush1.bf16.msra.mxu1 %v12257_v42  ;;  %v8567_v42 = vpack.c.b16 %v15019_v12, %v15019_v12  ;;  %v12341_v12 = vld [vmem:[%s15868_s29 + $0x610] ss:$8 sps:$4 sm:$0xff]  }
 0x72a   : > { %8368 = vmatprep.subr.bf16.mxu1 %v12265_v16  ;;  %v12343_v16 = vld [vmem:[%s15868_s29 + $0x614] ss:$8 sps:$4 sm:$0xff]  }
 0x72b   : > { %8511 = vmatpush1.bf16.msra.mxu0 %v12260_v19  ;;  %v12338_v19 = vld [vmem:[%s15868_s29 + $0x680] ss:$8 sps:$4 sm:$0xff]  }
 0x72c   : > { %8512 = vmatprep.subr.bf16.mxu0 %v12268_v56  ;;  %v8712_v56 = vpack.c.b16 %v15025_v26, %v15025_v26  ;;  %v12344_v26 = vld [vmem:[%s15868_s29 + $0x690] ss:$8 sps:$4 sm:$0xff]  }
 0x72d   : > { %8369 = vmatpush1.bf16.msra.mxu1 %v12263_v47  ;;  %v12346_v47 = vld [vmem:[%s15868_s29 + $0x694] ss:$8 sps:$4 sm:$0xff]  }
 0x72e   : > { %8370 = vmatprep.subr.bf16.mxu1 %v12271_v14  ;;  %v12349_v14 = vld [vmem:[%s15868_s29 + $0x624] ss:$8 sps:$4 sm:$0xff]  }
 0x72f   : > { %8513 = vmatpush1.bf16.msra.mxu0 %v12266_v24  ;;  %v12352_v24 = vld [vmem:[%s15868_s29 + $0x6a4] ss:$8 sps:$4 sm:$0xff]  }
 0x730   : > { %8514 = vmatprep.subr.bf16.mxu0 %v12274_v40  ;;  %v12347_v40 = vld [vmem:[%s15868_s29 + $0x620] ss:$8 sps:$4 sm:$0xff]  }
 0x731   : > { %8371 = vmatpush1.bf16.msra.mxu1 %v12269_v25  ;;  %v12355_v25 = vld [vmem:[%s15868_s29 + $0x634] ss:$8 sps:$4 sm:$0xff]  }
 0x732   : > { %8372 = vmatprep.subr.bf16.mxu1 %v12277_v48  ;;  %v12350_v48 = vld [vmem:[%s15868_s29 + $0x6a0] ss:$8 sps:$4 sm:$0xff]  }
 0x733   : > { %8515 = vmatpush1.bf16.msra.mxu0 %v12272_v57  ;;  %v12358_v57 = vld [vmem:[%s15868_s29 + $0x6b4] ss:$8 sps:$4 sm:$0xff]  }
 0x734   : > { %8516 = vmatprep.subr.bf16.mxu0 %v12280_v52  ;;  %v12353_v52 = vld [vmem:[%s15868_s29 + $0x630] ss:$8 sps:$4 sm:$0xff]  }
 0x735   : > { %8373 = vmatpush1.bf16.msra.mxu1 %v12275_v51  ;;  %v12361_v51 = vld [vmem:[%s15868_s29 + $0x644] ss:$8 sps:$4 sm:$0xff]  }
 0x736   : > { %8374 = vmatprep.subr.bf16.mxu1 %v12283_v39  ;;  %v12356_v39 = vld [vmem:[%s15868_s29 + $0x6b0] ss:$8 sps:$4 sm:$0xff]  }
 0x737   : > { %8517 = vmatpush1.bf16.msra.mxu0 %v12278_v21  ;;  %v12364_v21 = vld [vmem:[%s15868_s29 + $0x6c4] ss:$8 sps:$4 sm:$0xff]  }
 0x738   : > { %8518 = vmatprep.subr.bf16.mxu0 %v12286_v33  ;;  %v12359_v33 = vld [vmem:[%s15868_s29 + $0x640] ss:$8 sps:$4 sm:$0xff]  }
 0x739   : > { %8375 = vmatpush1.bf16.msra.mxu1 %v12281_v15  ;;  %v12367_v15 = vld [vmem:[%s15868_s29 + $0x654] ss:$8 sps:$4 sm:$0xff]  }
 0x73a   : > { %8649 = vmatprep.subr.bf16.mxu1 %v12289_v29  ;;  %v12362_v29 = vld [vmem:[%s15868_s29 + $0x6c0] ss:$8 sps:$4 sm:$0xff]  }
 0x73b   : > { %8519 = vmatpush1.bf16.msra.mxu0 %v12284_v27  ;;  %v12370_v27 = vld [vmem:[%s15868_s29 + $0x6d4] ss:$8 sps:$4 sm:$0xff]  }
 0x73c   : > { %8393 = vmatmul.mubr.bf16.vlgmr.msra.gmra.mrb[64].mxu1 %v8278_v30  ;;  %8794 = vmatprep.subr.bf16.mxu0 %v12292_v41  ;;  %v12365_v41 = vld [vmem:[%s15868_s29 + $0x650] ss:$8 sps:$4 sm:$0xff]  }
 0x73d   : > { %8650 = vmatpush1.bf16.msra.mxu1 %v12287_v50  ;;  %8681 = vmatprep.mubr.bf16.mxu1 %v15866_v62  ;;  %v12373_v50 = vld [vmem:[%s15868_s29 + $0x664] ss:$8 sps:$4 sm:$0xff]   ;;  %v12368_v30 = vld [vmem:[%s15868_s29 + $0x6d0] ss:$8 sps:$4 sm:$0xff]  }
 0x73e   : > { %8537 = vmatmul.mubr.bf16.vlgmr.msra.gmra.mrb[232].mxu0 %v8422_v8  ;;  %8651 = vmatprep.subr.bf16.mxu1 %v12295_v20  ;;  %v12376_v20 = vld [vmem:[%s15868_s29 + $0x6e4] ss:$8 sps:$4 sm:$0xff]   ;;  %v12379_v8 = vld [vmem:[%s15868_s29 + $0x674] ss:$8 sps:$4 sm:$0xff]  }
 0x73f   : > { %8795 = vmatpush1.bf16.msra.mxu0 %v12290_v61  ;;  %8826 = vmatprep.mubr.bf16.mxu0 %v15866_v62  ;;  %v12371_v61 = vld [vmem:[%s15868_s29 + $0x660] ss:$8 sps:$4 sm:$0xff]  }
 0x740   : > { %8796 = vmatprep.subr.bf16.mxu0 %v12298_v9  ;;  %v12374_v9 = vld [vmem:[%s15868_s29 + $0x6e0] ss:$8 sps:$4 sm:$0xff]  }
 0x741   : > { %8652 = vmatpush1.bf16.msra.mxu1 %v12293_v7  ;;  %v12382_v7 = vld [vmem:[%s15868_s29 + $0x6f4] ss:$8 sps:$4 sm:$0xff]  }
 0x742   : > { %8653 = vmatprep.subr.bf16.mxu1 %v12301_v55  ;;  %v12377_v55 = vld [vmem:[%s15868_s29 + $0x670] ss:$8 sps:$4 sm:$0xff]  }
 0x743   : > { %8797 = vmatpush1.bf16.msra.mxu0 %v12296_v18  ;;  %v12385_v18 = vld [vmem:[%s15868_s29 + $0x704] ss:$8 sps:$4 sm:$0xff]  }
 0x744   : > { %8798 = vmatprep.subr.bf16.mxu0 %v12304_v3  ;;  %v12380_v3 = vld [vmem:[%s15868_s29 + $0x6f0] ss:$8 sps:$4 sm:$0xff]  }
 0x745   : > { %8654 = vmatpush1.bf16.msra.mxu1 %v12299_v17  ;;  %v12388_v17 = vld [vmem:[%s15868_s29 + $0x784] ss:$8 sps:$4 sm:$0xff]  }
 0x746   : > { %8655 = vmatprep.subr.bf16.mxu1 %v12307_v43  ;;  %v12383_v43 = vld [vmem:[%s15868_s29 + $0x700] ss:$8 sps:$4 sm:$0xff]  }
 0x747   : > { %8799 = vmatpush1.bf16.msra.mxu0 %v12302_v2  ;;  %v8862_v2 = vpack.c.b16 %v15049_v35, %v15049_v35  ;;  %v12389_v35 = vld [vmem:[%s15868_s29 + $0x710] ss:$8 sps:$4 sm:$0xff]  }
 0x748   : > { %8800 = vmatprep.subr.bf16.mxu0 %v12310_v59  ;;  %v12391_v59 = vld [vmem:[%s15868_s29 + $0x714] ss:$8 sps:$4 sm:$0xff]  }
 0x749   : > { %8656 = vmatpush1.bf16.msra.mxu1 %v12305_v60  ;;  %v12386_v60 = vld [vmem:[%s15868_s29 + $0x780] ss:$8 sps:$4 sm:$0xff]  }
 0x74a   : > { %8657 = vmatprep.subr.bf16.mxu1 %v12313_v10  ;;  %v9006_v10 = vpack.c.b16 %v15043_v34, %v15043_v34  ;;  %v12392_v34 = vld [vmem:[%s15868_s29 + $0x790] ss:$8 sps:$4 sm:$0xff]  }
 0x74b   : > { %8801 = vmatpush1.bf16.msra.mxu0 %v12308_v11  ;;  %v12394_v11 = vld [vmem:[%s15868_s29 + $0x794] ss:$8 sps:$4 sm:$0xff]  }
 0x74c   : > { %8802 = vmatprep.subr.bf16.mxu0 %v12316_v0  ;;  %v12397_v0 = vld [vmem:[%s15868_s29 + $0x724] ss:$8 sps:$4 sm:$0xff]  }
 0x74d   : > { %8658 = vmatpush1.bf16.msra.mxu1 %v12311_v28  ;;  %v12400_v28 = vld [vmem:[%s15868_s29 + $0x7a4] ss:$8 sps:$4 sm:$0xff]  }
 0x74e   : > { %8659 = vmatprep.subr.bf16.mxu1 %v12319_v1  ;;  %v12395_v1 = vld [vmem:[%s15868_s29 + $0x720] ss:$8 sps:$4 sm:$0xff]  }
 0x74f   : > { %8803 = vmatpush1.bf16.msra.mxu0 %v12314_v46  ;;  %v12403_v46 = vld [vmem:[%s15868_s29 + $0x734] ss:$8 sps:$4 sm:$0xff]  }
 0x750   : > { %8804 = vmatprep.subr.bf16.mxu0 %v12322_v53  ;;  %v12406_v53 = vld [vmem:[%s15868_s29 + $0x7b4] ss:$8 sps:$4 sm:$0xff]  }
 0x751   : > { %8660 = vmatpush1.bf16.msra.mxu1 %v12317_v37  ;;  %v12401_v37 = vld [vmem:[%s15868_s29 + $0x730] ss:$8 sps:$4 sm:$0xff]  }
 0x752   : > { %8661 = vmatprep.subr.bf16.mxu1 %v12325_v23  ;;  %v12409_v23 = vld [vmem:[%s15868_s29 + $0x744] ss:$8 sps:$4 sm:$0xff]  }
 0x753   : > { %8805 = vmatpush1.bf16.msra.mxu0 %v12320_v45  ;;  %v12404_v45 = vld [vmem:[%s15868_s29 + $0x7b0] ss:$8 sps:$4 sm:$0xff]  }
 0x754   : > { %8806 = vmatprep.subr.bf16.mxu0 %v12328_v58  ;;  %v12412_v58 = vld [vmem:[%s15868_s29 + $0x7c4] ss:$8 sps:$4 sm:$0xff]  }
 0x755   : > { %8662 = vmatpush1.bf16.msra.mxu1 %v12323_v63  ;;  %v12407_v63 = vld [vmem:[%s15868_s29 + $0x740] ss:$8 sps:$4 sm:$0xff]  }
 0x756   : > { %8663 = vmatprep.subr.bf16.mxu1 %v12331_v49  ;;  %v12415_v49 = vld [vmem:[%s15868_s29 + $0x754] ss:$8 sps:$4 sm:$0xff]  }
 0x757   : > { %8807 = vmatpush1.bf16.msra.mxu0 %v12326_v5  ;;  %v12410_v5 = vld [vmem:[%s15868_s29 + $0x7c0] ss:$8 sps:$4 sm:$0xff]  }
 0x758   : > { %8808 = vmatprep.subr.bf16.mxu0 %v12334_v32  ;;  %v12418_v32 = vld [vmem:[%s15868_s29 + $0x7d4] ss:$8 sps:$4 sm:$0xff]  }
 0x759   : > { %8664 = vmatpush1.bf16.msra.mxu1 %v12329_v13  ;;  %v12413_v13 = vld [vmem:[%s15868_s29 + $0x750] ss:$8 sps:$4 sm:$0xff]  }
 0x75a   : > { %8944 = vmatprep.subr.bf16.mxu1 %v12337_v6  ;;  %v12421_v6 = vld [vmem:[%s15868_s29 + $0x764] ss:$8 sps:$4 sm:$0xff]  }
 0x75b   : > { %8809 = vmatpush1.bf16.msra.mxu0 %v12332_v38 }
 0x75c   : > { %8682 = vmatmul.mubr.bf16.vlgmr.msra.gmra.mrb[68].mxu1 %v8567_v42  ;;  %9088 = vmatprep.subr.bf16.mxu0 %v12340_v31  ;;  %v12416_v31 = vld [vmem:[%s15868_s29 + $0x7d0] ss:$8 sps:$4 sm:$0xff]   ;;  %v12424_v42 = vld [vmem:[%s15868_s29 + $0x7e4] ss:$8 sps:$4 sm:$0xff]  }
 0x75d   : > { %8945 = vmatpush1.bf16.msra.mxu1 %v12335_v54  ;;  %8976 = vmatprep.mubr.bf16.mxu1 %v15866_v62 }
 0x75e   : > { %8827 = vmatmul.mubr.bf16.vlgmr.msra.gmra.mrb[236].mxu0 %v8712_v56  ;;  %8946 = vmatprep.subr.bf16.mxu1 %v12343_v16  ;;  %v12419_v56 = vld [vmem:[%s15868_s29 + $0x760] ss:$8 sps:$4 sm:$0xff]  }
 0x75f   : > { %9089 = vmatpush1.bf16.msra.mxu0 %v12338_v19  ;;  %9120 = vmatprep.mubr.bf16.mxu0 %v15866_v62 }
 0x760   : > { %9090 = vmatprep.subr.bf16.mxu0 %v12346_v47 }
 0x761   : > { %8947 = vmatpush1.bf16.msra.mxu1 %v12341_v12 }
 0x762   : > { %8948 = vmatprep.subr.bf16.mxu1 %v12349_v14 }
 0x763   : > { %9091 = vmatpush1.bf16.msra.mxu0 %v12344_v26  ;;  %v12427_v26 = vld [vmem:[%s15868_s29 + $0x774] ss:$8 sps:$4 sm:$0xff]  }
 0x764   : > { %9092 = vmatprep.subr.bf16.mxu0 %v12352_v24 }
 0x765   : > { %8949 = vmatpush1.bf16.msra.mxu1 %v12347_v40 }
 0x766   : > { %8950 = vmatprep.subr.bf16.mxu1 %v12355_v25  ;;  %v12422_v25 = vld [vmem:[%s15868_s29 + $0x7e0] ss:$8 sps:$4 sm:$0xff]  }
 0x767   : > { %9093 = vmatpush1.bf16.msra.mxu0 %v12350_v48 }
 0x768   : > { %9094 = vmatprep.subr.bf16.mxu0 %v12358_v57  ;;  %v12430_v57 = vld [vmem:[%s15868_s29 + $0x7f4] ss:$8 sps:$4 sm:$0xff]  }
 0x769   : > { %8951 = vmatpush1.bf16.msra.mxu1 %v12353_v52  ;;  %v12425_v52 = vld [vmem:[%s15868_s29 + $0x770] ss:$8 sps:$4 sm:$0xff]  }
 0x76a   : > { %8952 = vmatprep.subr.bf16.mxu1 %v12361_v51  ;;  %v12428_v51 = vld [vmem:[%s15868_s29 + $0x7f0] ss:$8 sps:$4 sm:$0xff]  }
 0x76b   : > { %9095 = vmatpush1.bf16.msra.mxu0 %v12356_v39  ;;  %v9151_v39 = vpack.c.b16 %v15052_v4, %v15052_v4 }
 0x76c   : > { %9096 = vmatprep.subr.bf16.mxu0 %v12364_v21  ;;  %v9296_v21 = vpack.c.b16 %v15058_v44, %v15058_v44 }
 0x76d   : > { %8953 = vmatpush1.bf16.msra.mxu1 %v12359_v33 }
 0x76e   : > { %8954 = vmatprep.subr.bf16.mxu1 %v12367_v15 }
 0x76f   : > { %9097 = vmatpush1.bf16.msra.mxu0 %v12362_v29 }
 0x770   : > { %9098 = vmatprep.subr.bf16.mxu0 %v12370_v27 }
 0x771   : > { %8955 = vmatpush1.bf16.msra.mxu1 %v12365_v41 }
 0x772   : > { %8956 = vmatprep.subr.bf16.mxu1 %v12373_v50 }
 0x773   : > { %9099 = vmatpush1.bf16.msra.mxu0 %v12368_v30 }
 0x774   : > { %9100 = vmatprep.subr.bf16.mxu0 %v12376_v20 }
 0x775   : > { %8957 = vmatpush1.bf16.msra.mxu1 %v12371_v61 }
 0x776   : > { %8958 = vmatprep.subr.bf16.mxu1 %v12379_v8 }
 0x777   : > { %9101 = vmatpush1.bf16.msra.mxu0 %v12374_v9 }
 0x778   : > { %9102 = vmatprep.subr.bf16.mxu0 %v12382_v7 }
 0x779   : > { %8959 = vmatpush1.bf16.msra.mxu1 %v12377_v55 }
 0x77a   : > { %9233 = vmatprep.subr.bf16.mxu1 %v12385_v18 }
 0x77b   : > { %9103 = vmatpush1.bf16.msra.mxu0 %v12380_v3 }
 0x77c   : > { %8977 = vmatmul.mubr.bf16.vlgmr.msra.gmra.mrb[72].mxu1 %v8862_v2  ;;  %9378 = vmatprep.subr.bf16.mxu0 %v12388_v17 }
 0x77d   : > { %9234 = vmatpush1.bf16.msra.mxu1 %v12383_v43  ;;  %9265 = vmatprep.mubr.bf16.mxu1 %v15866_v62 }
 0x77e   : > { %9121 = vmatmul.mubr.bf16.vlgmr.msra.gmra.mrb[240].mxu0 %v9006_v10  ;;  %9235 = vmatprep.subr.bf16.mxu1 %v12391_v59 }
 0x77f   : > { %9379 = vmatpush1.bf16.msra.mxu0 %v12386_v60  ;;  %9410 = vmatprep.mubr.bf16.mxu0 %v15866_v62  ;;  %v12398_v62 = vld [vmem:[%s15868_s29 + $0x7a0] ss:$8 sps:$4 sm:$0xff]  }
 0x780   : > { %9380 = vmatprep.subr.bf16.mxu0 %v12394_v11 }
 0x781   : > { %9236 = vmatpush1.bf16.msra.mxu1 %v12389_v35  ;;  %v12431_v35 = vld [vmem:[%s15869_s14 + $0x40] sm:$0xff]  }
 0x782   : > { %9237 = vmatprep.subr.bf16.mxu1 %v12397_v0  ;;  %v12432_v0 = vld [vmem:[%s15869_s14] sm:$0xff]  }
 0x783   : > { %9381 = vmatpush1.bf16.msra.mxu0 %v12392_v34  ;;  %v12433_v34 = vld [vmem:[%s15869_s14 + $0x48] sm:$0xff]  }
 0x784   : > { %9382 = vmatprep.subr.bf16.mxu0 %v12400_v28  ;;  %v12434_v28 = vld [vmem:[%s15869_s14 + $0x8] sm:$0xff]  }
 0x785   : > { %9238 = vmatpush1.bf16.msra.mxu1 %v12395_v1  ;;  %v12435_v1 = vld [vmem:[%s15869_s14 + $0x50] sm:$0xff]  }
 0x786   : > { %9239 = vmatprep.subr.bf16.mxu1 %v12403_v46  ;;  %v12436_v46 = vld [vmem:[%s15869_s14 + $0x10] sm:$0xff]  }
 0x787   : > { %9383 = vmatpush1.bf16.msra.mxu0 %v12398_v62 }
 0x788   : > { %9384 = vmatprep.subr.bf16.mxu0 %v12406_v53 }
 0x789   : > { %9240 = vmatpush1.bf16.msra.mxu1 %v12401_v37 }
 0x78a   : > { %9241 = vmatprep.subr.bf16.mxu1 %v12409_v23 }
 0x78b   : > { %9385 = vmatpush1.bf16.msra.mxu0 %v12404_v45 }
 0x78c   : > { %9386 = vmatprep.subr.bf16.mxu0 %v12412_v58 }
 0x78d   : > { %9242 = vmatpush1.bf16.msra.mxu1 %v12407_v63 }
 0x78e   : > { %9243 = vmatprep.subr.bf16.mxu1 %v12415_v49 }
 0x78f   : > { %9387 = vmatpush1.bf16.msra.mxu0 %v12410_v5  ;;  %v7247_v38 = vpop.f32.mrb[48].mxu1 }
 0x790   : > { %v7249_v54 = vpop.f32.mrb[49].mxu1  ;;  %9388 = vmatprep.subr.bf16.mxu0 %v12418_v32 }
 0x791   : > { %9244 = vmatpush1.bf16.msra.mxu1 %v12413_v13  ;;  %v7251_v16 = vpop.f32.mrb[50].mxu1  ;;  %v7372_v19 = vpop.f32.mrb[216].mxu0 }
 0x792   : > { %v7373_v47 = vadd.f32 %v7372_v19, %v7247_v38  ;;  %v7252_v12 = vpop.f32.mrb[51].mxu1  ;;  %v7374_v14 = vpop.f32.mrb[217].mxu0  ;;  %9245 = vmatprep.subr.bf16.mxu1 %v12421_v6  ;;  %v12437_v38 = vld [vmem:[%s15869_s14 + $0x58] sm:$0xff]   ;;  %v12441_v16 = vld [vmem:[%s15869_s14 + $0x68] sm:$0xff]  }
 0x793   : > { %v7375_v24 = vadd.f32 %v7374_v14, %v7249_v54  ;;  %9389 = vmatpush1.bf16.msra.mxu0 %v12416_v31  ;;  %v7376_v40 = vpop.f32.mrb[218].mxu0  ;;  %v12438_v31 = vld [vmem:[%s15869_s14 + $0x18] sm:$0xff]   ;;  %v12439_v54 = vld [vmem:[%s15869_s14 + $0x60] sm:$0xff]   ;;  %v12442_v19 = vld [vmem:[%s15869_s14 + $0x28] sm:$0xff]  }
 0x794   : > { %v7377_v48 = vpop.f32.mrb[219].mxu0  ;;  %9390 = vmatprep.subr.bf16.mxu0 %v12424_v42  ;;  %v12440_v42 = vld [vmem:[%s15869_s14 + $0x20] sm:$0xff]   ;;  %v12445_v12 = vld [vmem:[%s15869_s14 + $0x78] sm:$0xff]  }
 0x795   : > { %9246 = vmatpush1.bf16.msra.mxu1 %v12419_v56  ;;  %v12443_v56 = vld [vmem:[%s15869_s14 + $0x70] sm:$0xff]   ;;  %v12446_v40 = vld [vmem:[%s15869_s14 + $0x38] sm:$0xff]  }
 0x796   : > { %9247 = vmatprep.subr.bf16.mxu1 %v12427_v26 }
 0x797   : > { %9391 = vmatpush1.bf16.msra.mxu0 %v12422_v25 }
 0x798   : > { %9392 = vmatprep.subr.bf16.mxu0 %v12430_v57 }
 0x799   : > { %9248 = vmatpush1.bf16.msra.mxu1 %v12425_v52 }
 0x79a   : > { %11259 = vmatprep.subr.bf16.mxu1 %v12431_v35 }
 0x79b   : > { %9393 = vmatpush1.bf16.msra.mxu0 %v12428_v51 }
 0x79c   : > { %9266 = vmatmul.mubr.bf16.vlgmr.msra.gmra.mrb[76].mxu1 %v9151_v39 }
 0x79d   : > { %11260 = vmatpush3.bf16.msra.mxu1 %v12432_v0 }
 0x79e   : > { %9411 = vmatmul.mubr.bf16.vlgmr.msra.gmra.mrb[244].mxu0 %v9296_v21  ;;  %11261 = vmatprep.subr.bf16.mxu1 %v12433_v34  ;;  %v9421_v34 = vld [vmem:[#allocation16] sm:$0x3] }
 0x7a1   : > { %11262 = vmatpush3.bf16.msra.mxu1 %v12434_v28 }
 0x7a2   : > { %11263 = vmatprep.subr.bf16.mxu1 %v12435_v1 }
 0x7a5   : > { %11264 = vmatpush3.bf16.msra.mxu1 %v12436_v46 }
 0x7a6   : > { %11265 = vmatprep.subr.bf16.mxu1 %v12437_v38 }
 0x7a9   : > { %11266 = vmatpush3.bf16.msra.mxu1 %v12438_v31 }
 0x7aa   : > { %11267 = vmatprep.subr.bf16.mxu1 %v12439_v54 }
 0x7ad   : > { %11268 = vmatpush3.bf16.msra.mxu1 %v12440_v42 }
 0x7ae   : > { %11269 = vmatprep.subr.bf16.mxu1 %v12441_v16 }
 0x7af   : > { %v7515_v33 = vpop.f32.mrb[52].mxu1 }
 0x7b0   : > { %v7522_v15 = vadd.f32 %v7515_v33, %v7373_v47  ;;  %v7517_v29 = vpop.f32.mrb[53].mxu1  ;;  %v12444_v47 = vld [vmem:[%s15869_s14 + $0x30] sm:$0xff]  }
 0x7b1   : > { %v7523_v27 = vadd.f32 %v7517_v29, %v7375_v24  ;;  %v7519_v41 = vpop.f32.mrb[54].mxu1  ;;  %v7660_v50 = vpop.f32.mrb[220].mxu0  ;;  %11270 = vmatpush3.bf16.msra.mxu1 %v12442_v19  ;;  %v12863_v19 = vmov 0.0  }
 0x7b2   : > { %v7667_v30 = vadd.f32 %v7660_v50, %v7522_v15  ;;  %v7520_v20 = vpop.f32.mrb[55].mxu1  ;;  %v7662_v61 = vpop.f32.mrb[221].mxu0  ;;  %11271 = vmatprep.subr.bf16.mxu1 %v12443_v56  ;;  %11382 = vmatprep.subr.bf16.mxu0 %v12863_v19  ;;  %v12449_v56 = vld [vmem:[#allocation19 + $0x10] sm:$0xff]  }
 0x7b3   : > { %v7668_v8 = vadd.f32 %v7662_v61, %v7523_v27  ;;  %v7664_v9 = vpop.f32.mrb[222].mxu0  ;;  %11390 = vmatprep.mubr.msk.bf16.mxu0 %vm12864_vm1, %v12863_v19 }
 0x7b4   : > { %v7665_v7 = vpop.f32.mrb[223].mxu0 }
 0x7b5   : > { %11272 = vmatpush3.bf16.msra.mxu1 %v12444_v47  ;;  %v12450_v47 = vld [vmem:[#allocation19 + $0x18] sm:$0xff]  }
 0x7b6   : > { %11273 = vmatprep.subr.bf16.mxu1 %v12445_v12 }
 0x7b9   : > { %11274 = vmatpush3.bf16.msra.mxu1 %v12446_v40 }
 0x7cf   : > { %v7810_v55 = vpop.f32.mrb[56].mxu1 }
 0x7d0   : > { %v7817_v4 = vadd.f32 %v7810_v55, %v7667_v30  ;;  %v7812_v18 = vpop.f32.mrb[57].mxu1 }
 0x7d1   : > { %v7818_v3 = vadd.f32 %v7812_v18, %v7668_v8  ;;  %v7814_v17 = vpop.f32.mrb[58].mxu1  ;;  %v7954_v43 = vpop.f32.mrb[224].mxu0 }
 0x7d2   : > { %v7961_v44 = vadd.f32 %v7954_v43, %v7817_v4  ;;  %v7815_v2 = vpop.f32.mrb[59].mxu1  ;;  %v7956_v59 = vpop.f32.mrb[225].mxu0 }
 0x7d3   : > { %v7962_v60 = vadd.f32 %v7956_v59, %v7818_v3  ;;  %v7958_v10 = vpop.f32.mrb[226].mxu0 }
 0x7d4   : > { %v7959_v11 = vpop.f32.mrb[227].mxu0 }
 0x7ef   : > { %v8099_v62 = vpop.f32.mrb[60].mxu1 }
 0x7f0   : > { %v8106_v53 = vadd.f32 %v8099_v62, %v7961_v44  ;;  %v8101_v37 = vpop.f32.mrb[61].mxu1  ;;  %v9426_v62 = vrot.slane %v9421_v34, %v14102_v36  ;;  %v12447_v36 = vld [vmem:[#allocation19] sm:$0xff]  }
 0x7f1   : > { %v8107_v23 = vadd.f32 %v8101_v37, %v7962_v60  ;;  %v8103_v45 = vpop.f32.mrb[62].mxu1  ;;  %v8244_v58 = vpop.f32.mrb[228].mxu0  ;;  %11383 = vmatpush3.bf16.msra.mxu0 %v12447_v36 }
 0x7f2   : > { %v8251_v63 = vadd.f32 %v8244_v58, %v8106_v53  ;;  %v8104_v49 = vpop.f32.mrb[63].mxu1  ;;  %v8246_v5 = vpop.f32.mrb[229].mxu0  ;;  %v9430_v45 = vrot.slane %v9421_v34, %v14105_v22  ;;  %v12448_v22 = vld [vmem:[#allocation19 + $0x8] sm:$0xff]   ;;  %11384 = vmatprep.subr.bf16.mxu0 %v12863_v19 }
 0x7f3   : > { %v8252_v32 = vadd.f32 %v8246_v5, %v8107_v23  ;;  %v8248_v13 = vpop.f32.mrb[230].mxu0 }
 0x7f4   : > { %v8249_v6 = vpop.f32.mrb[231].mxu0 }
 0x7f5   : > { %11385 = vmatpush3.bf16.msra.mxu0 %v12448_v22 }
 0x7f6   : > { %11386 = vmatprep.subr.bf16.mxu0 %v12863_v19 }
 0x7f9   : > { %11387 = vmatpush3.bf16.msra.mxu0 %v12449_v56 }
 0x7fa   : > { %11388 = vmatprep.subr.bf16.mxu0 %v12863_v19 }
 0x7fd   : > { %11389 = vmatpush3.bf16.msra.mxu0 %v12450_v47 }
 0x80f   : > { %v8394_v14 = vpop.f32.mrb[64].mxu1 }
 0x810   : > { %v8401_v26 = vadd.f32 %v8394_v14, %v8251_v63  ;;  %v8396_v24 = vpop.f32.mrb[65].mxu1  ;;  %v10824_v14 = vld [vmem:[#allocation17] ss:$0 sm:$0xff] }
 0x811   : > { %v8402_v25 = vadd.f32 %v8396_v24, %v8252_v32  ;;  %v8398_v48 = vpop.f32.mrb[66].mxu1  ;;  %v8538_v57 = vpop.f32.mrb[232].mxu0 }
 0x812   : > { %v8545_v52 = vadd.f32 %v8538_v57, %v8401_v26  ;;  %v8399_v51 = vpop.f32.mrb[67].mxu1  ;;  %v8540_v39 = vpop.f32.mrb[233].mxu0 }
 0x813   : > { %v8546_v21 = vadd.f32 %v8540_v39, %v8402_v25  ;;  %v8542_v33 = vpop.f32.mrb[234].mxu0  ;;  %v10841_v51 = vld [vmem:[#allocation20] ss:$0 sm:$0xff] }
 0x814   : > { %v8543_v15 = vpop.f32.mrb[235].mxu0 }
 0x82f   : > { %v8683_v29 = vpop.f32.mrb[68].mxu1 }
 0x830   : > { %v8690_v27 = vadd.f32 %v8683_v29, %v8545_v52  ;;  %v8685_v41 = vpop.f32.mrb[69].mxu1 }
 0x831   : > { %v8691_v50 = vadd.f32 %v8685_v41, %v8546_v21  ;;  %v8687_v30 = vpop.f32.mrb[70].mxu1  ;;  %v8828_v20 = vpop.f32.mrb[236].mxu0 }
 0x832   : > { %v8835_v61 = vadd.f32 %v8828_v20, %v8690_v27  ;;  %v8688_v8 = vpop.f32.mrb[71].mxu1  ;;  %v8830_v9 = vpop.f32.mrb[237].mxu0 }
 0x833   : > { %v8836_v7 = vadd.f32 %v8830_v9, %v8691_v50  ;;  %v8832_v55 = vpop.f32.mrb[238].mxu0 }
 0x834   : > { %v8833_v4 = vpop.f32.mrb[239].mxu0 }
 0x84f   : > { %v8978_v18 = vpop.f32.mrb[72].mxu1 }
 0x850   : > { %v8985_v3 = vadd.f32 %v8978_v18, %v8835_v61  ;;  %v8980_v17 = vpop.f32.mrb[73].mxu1 }
 0x851   : > { %v8986_v43 = vadd.f32 %v8980_v17, %v8836_v7  ;;  %v8982_v44 = vpop.f32.mrb[74].mxu1  ;;  %v9122_v2 = vpop.f32.mrb[240].mxu0 }
 0x852   : > { %v9129_v59 = vadd.f32 %v9122_v2, %v8985_v3  ;;  %v8983_v60 = vpop.f32.mrb[75].mxu1  ;;  %v9124_v10 = vpop.f32.mrb[241].mxu0 }
 0x853   : > { %v9130_v11 = vadd.f32 %v9124_v10, %v8986_v43  ;;  %v9126_v35 = vpop.f32.mrb[242].mxu0 }
 0x854   : > { %v9127_v0 = vpop.f32.mrb[243].mxu0 }
 0x86f   : > { %v9267_v28 = vpop.f32.mrb[76].mxu1 }
 0x870   : > { %v9274_v1 = vadd.f32 %v9267_v28, %v9129_v59  ;;  %v9269_v46 = vpop.f32.mrb[77].mxu1 }
 0x871   : > { %v9275_v53 = vadd.f32 %v9269_v46, %v9130_v11  ;;  %v9271_v37 = vpop.f32.mrb[78].mxu1  ;;  %v9412_v23 = vpop.f32.mrb[244].mxu0 }
 0x872   : > { %v9419_v58 = vadd.f32 %v9412_v23, %v9274_v1  ;;  %v9272_v63 = vpop.f32.mrb[79].mxu1  ;;  %v9414_v49 = vpop.f32.mrb[245].mxu0 }
 0x873   : > { %v9420_v5 = vadd.f32 %v9414_v49, %v9275_v53  ;;  %v9416_v32 = vpop.f32.mrb[246].mxu0 }
 0x874   : > { %v9433_v13 = vadd.f32 %v9426_v62, %v9419_v58  ;;  %v9417_v6 = vpop.f32.mrb[247].mxu0 }
 0x875   : > { %v9434_v38 = vadd.f32 %v9430_v45, %v9420_v5 }
 0x876   : > { %12451 = vtanh.f32 %v9433_v13 }
 0x877   : > { %12453 = vtanh.f32 %v9434_v38 }
 0x880   : > { %v12452_v31 = vpop.eup %12451 }
 0x881   : > { %v12454_v54 = vpop.eup %12453  ;;  %v9437_v16 = vpack.c.bf16 %v12452_v31, %v12452_v31 }
 0x882   : > { %v9438_v42 = vpack.c.bf16 %v12454_v54, %v12454_v54 }
 0x884   : > { %9606 = vmatprep.mubr.bf16.mxu1 %v9438_v42 }
 0x885   : > { %9607 = vmatmul.mubr.bf16.vlgmr.msra.gmra.mrb[80].mxu1 %v9437_v16 }
 0x958   : > { %v11275_v12 = vpop.f32.mrb[80].mxu1 }
 0x959   : > { %v11276_v26 = vpop.f32.mrb[81].mxu1 }
 0x95a   : > { %v11277_v24 = vadd.f32 %v11276_v26, %v11275_v12  ;;  %v11278_v40 = vpop.f32.mrb[82].mxu1 }
 0x95b   : > { %v11279_v25 = vpop.f32.mrb[83].mxu1 }
 0x95c   : > { %v9609_v48 = vadd.f32 %v11277_v24, %v10824_v14 }
 0x95e   : > { %12455 = vtanh.f32 %v9609_v48 }
 0x968   : > { %v12456_v57 = vpop.eup %12455 }
 0x969   : > { %v9615_v52 = vpack.c.bf16 %v12456_v57, %v12456_v57 }
 0x96b   : > { %11391 = vmatmul.mubr.msk.bf16.vlgmr.msra.gmra.mrb[248].mxu0 %vm1038_vm0, %v9615_v52 }
 0xa3e   : > { %v9692_v39 = vpop.f32.mrb[248].mxu0 }
 0xa3f   : > { %v9693_v21 = vadd.f32 %v10841_v51, %v9692_v39  ;;  %v11392_v33 = vpop.f32.mrb[249].mxu0 }
 0xa40   : > { %v9695_v15 = vpop.f32.mrb[250].mxu0 }
 0xa41   : > { %9698 = vst [vmem:[%s696_s9] sm:$0x3] %v9693_v21  ;;  %v11393_v29 = vpop.f32.mrb[251].mxu0 }
 0xa42 PF: > { %s15871_s28 = sld [smem:[#allocation32_spill]]  ;;  %s15872_s18 = sld [smem:[#allocation29_spill]] }
 0xa43   : > { %s15873_s27 = sld [smem:[#allocation33_spill]]  ;;  %s15874_s25 = smov %s12838_s26 }
 0xa48   : > { %p34_p10 = scmp.ge.s32.totalorder %s15871_s28, 5   ;;  %s15875_s26 = smov %s15872_s18 }
 0xa4a   :  { %36 = sbr.rel (!%p34_p10) target bundleno = 20 (0x14), region = 206 }
 0xa51   :  { %9718 = vsyncpa [#allocation7], 1 }
 0xa52   :  { %9720 = vsyncpa [#allocation7 + $0x1], 1 }
 0xa53   :  { %9721 = vsyncpa [#allocation9], 1 }
 0xa54   :  { %9723 = vsyncpa [#allocation9 + $0x1], 1 }
 0xa55   :  { %9724 = vsyncpa [#allocation12], 1 }
 0xa56   :  { %9726 = vsyncpa [#allocation12 + $0x1], 1 }
 0xa57   :  { %9727 = vsyncpa [#allocation15], 1 }
 0xa58   :  { %9729 = vsyncpa [#allocation15 + $0x1], 1 }
 0xa59   :  { %9730 = vsyncpa [#allocation18], 1 }
 0xa5a   :  { %9731 = vsyncpa [#allocation21], 1 }

</bundles_post_ra>
